<compile_context>
chip_gen: v6e
topology: v6e:2x2x1
jax: 0.10.0
libtpu: 0.0.40
codegen_flags: <defaults>
</compile_context>

<pallas_src>
import functools

import jax
import jax.numpy as jnp
from jax.experimental import pallas as pl
from jax.experimental.pallas import tpu as pltpu


def _tvmn3d_kernel(lut_ref, wr_ref, wg_ref, wb_ref, out_ref, *,
                   dim, d2pad, inv_count, lam_s, lam_m):
    """Per-block slab: lut_ref (BR, D2PAD) = (block_channels*dim, padded G*R lanes)."""
    L = lut_ref[...]                                   # (BR, D2PAD) f32
    br = L.shape[0]

    # ---- R axis: neighbour at +1 along the fused (G,R) lane axis. --------------
    # jnp.roll semantics: roll(L, d2pad-1)[:, k] == L[:, (k+1) % d2pad].
    # wr is 0 at r==dim-1 (wrap) and at the padded lanes, 2 at boundary diffs, 1 else.
    dr = L - pltpu.roll(L, shift=d2pad - 1, axis=1)
    drw = dr * wr_ref[...]                             # fold weight once
    tv = jnp.sum(dr * drw, keepdims=True)              # == sum(dr^2 * wr)      (1,1)
    mrw = jnp.maximum(drw, 0.0)
    mn = jnp.sum(mrw * mrw, keepdims=True)             # == sum(relu(dr*wr)^2)  (1,1)

    # ---- G axis: neighbour at +dim along the fused lane axis. ------------------
    dg = L - pltpu.roll(L, shift=d2pad - dim, axis=1)
    dgw = dg * wg_ref[...]
    tv = tv + jnp.sum(dg * dgw, keepdims=True)
    mgw = jnp.maximum(dgw, 0.0)
    mn = mn + jnp.sum(mgw * mgw, keepdims=True)

    # ---- B axis: neighbour at +1 along the sublane (row) axis. -----------------
    # wb (per-row, broadcast along lanes): 0 at the last row of each channel
    # (cross-channel pair), 2 at boundary diff rows {0, dim-2}, 1 elsewhere.
    db = L[: br - 1, :] - L[1:, :]
    dbw = db * wb_ref[: br - 1, :]
    tv = tv + jnp.sum(db * dbw, keepdims=True)
    mbw = jnp.maximum(dbw, 0.0)
    mn = mn + jnp.sum(mbw * mbw, keepdims=True)

    # ---- Accumulate into the resident (1,1) output across the batch grid. ------
    @pl.when(pl.program_id(0) == 0)
    def _init():
        out_ref[...] = jnp.zeros_like(out_ref)

    out_ref[...] += (lam_s * tv + lam_m * mn) * inv_count


def _tvmn1d_kernel(lut_ref, out_ref, *, dim, inv_count, lam_s, lam_m):
    lut = lut_ref[...]                                 # (C, last)
    d = lut[:, :-1] - lut[:, 1:]                       # (C, last-1)
    d2 = d * d
    # mean(d^2 with cols {0, dim-2} doubled) == (sum(d^2) + sum of those cols) / count.
    tv = (jnp.sum(d2, keepdims=True)
          + jnp.sum(d2[:, 0:1], keepdims=True)
          + jnp.sum(d2[:, dim - 2:dim - 1], keepdims=True))
    mn = jnp.sum(jnp.maximum(d, 0.0), keepdims=True)   # NOT squared (matches reference)
    out_ref[...] = lam_s * (tv * inv_count) + lam_m * (mn * inv_count)


class TVMN:
    """JAX/Pallas port of the PyTorch TVMN module."""

    def __init__(self, dim=33, lambda_smooth=1e-4, lambda_mn=10.0):
        self.dim = int(dim)
        self.lambda_smooth = float(lambda_smooth)
        self.lambda_mn = float(lambda_mn)
        dim = self.dim

        D2 = dim * dim
        self._d2 = D2
        self._d2pad = ((D2 + 127) // 128) * 128        # 1089 -> 1152 for dim=33

        # Tiny per-lane weight rows for the fused (G,R) axis; zeros double as wrap /
        # padding masks, 2.0 marks boundary diffs.  (relu(d*w)^2 is exactly the
        # reference's monotonicity term, so only one weight row per axis is needed.)
        k = jnp.arange(self._d2pad)
        r = k % dim
        g = k // dim
        valid = k < D2
        wr = jnp.where(valid & (r != dim - 1),
                       jnp.where((r == 0) | (r == dim - 2), 2.0, 1.0), 0.0)
        wg = jnp.where(valid & (g != dim - 1),
                       jnp.where((g == 0) | (g == dim - 2), 2.0, 1.0), 0.0)
        self._w_r_row = wr.astype(jnp.float32).reshape(1, self._d2pad)
        self._w_g_row = wg.astype(jnp.float32).reshape(1, self._d2pad)

        # Per-channel B-axis row weight (tiled per call to (n*dim, 1)).
        b = jnp.arange(dim)
        wb = jnp.where(b == dim - 1, 0.0,
                       jnp.where((b == 0) | (b == dim - 2), 2.0, 1.0))
        self._w_b_col = wb.astype(jnp.float32).reshape(dim, 1)

        # Full boundary-weight tensors: host-side reference check only (NOT kernel inputs).
        wrf = jnp.ones((dim, dim, dim - 1), jnp.float32)
        wrf = wrf.at[..., jnp.array([0, dim - 2])].multiply(2.0)
        wgf = jnp.ones((dim, dim - 1, dim), jnp.float32)
        wgf = wgf.at[..., jnp.array([0, dim - 2]), :].multiply(2.0)
        wbf = jnp.ones((dim - 1, dim, dim), jnp.float32)
        wbf = wbf.at[jnp.array([0, dim - 2]), :, :].multiply(2.0)
        self.weight_r, self.weight_g, self.weight_b = wrf, wgf, wbf

    def __call__(self, LUT):
        LUT = jnp.asarray(LUT, jnp.float32)
        if LUT.ndim > 3:
            return self._forward_3d(LUT)
        return self._forward_1d(LUT)

    # ------------------------------------------------------------------ 3D branch
    def _forward_3d(self, LUT):
        dim, D2, D2PAD = self.dim, self._d2, self._d2pad
        lut = LUT.reshape(-1, dim, D2)                 # fuse (G,R) -> lanes (free, row-major)
        n = lut.shape[0]

        bc = n if n <= 8 else 8                        # channels per grid step
        n_pad = ((n + bc - 1) // bc) * bc              # zero channels contribute nothing
        lut = jnp.pad(lut, ((0, n_pad - n), (0, 0), (0, D2PAD - D2)))
        rows = n_pad * dim
        lut2d = lut.reshape(rows, D2PAD)               # (rows, 1152) lane-aligned slab
        wb = jnp.tile(self._w_b_col, (n_pad, 1))       # (rows, 1) per-row B-axis weight
        br = bc * dim                                  # rows per grid step (channel aligned)
        grid = (n_pad // bc,)
        inv_count = 1.0 / float(n * dim * dim * (dim - 1))

        kernel = functools.partial(
            _tvmn3d_kernel, dim=dim, d2pad=D2PAD, inv_count=inv_count,
            lam_s=self.lambda_smooth, lam_m=self.lambda_mn)

        bytes_accessed = int(lut2d.size * 4 + 2 * D2PAD * 4 + rows * 4 + 4)
        flops = int(22 * rows * D2PAD)

        out = pl.pallas_call(
            kernel,
            out_shape=jax.ShapeDtypeStruct((1, 1), jnp.float32),
            grid_spec=pltpu.PrefetchScalarGridSpec(
                num_scalar_prefetch=0,
                grid=grid,
                in_specs=[
                    pl.BlockSpec((br, D2PAD), lambda i: (i, 0)),   # LUT slab block
                    pl.BlockSpec((1, D2PAD), lambda i: (0, 0)),    # R weight row
                    pl.BlockSpec((1, D2PAD), lambda i: (0, 0)),    # G weight row
                    pl.BlockSpec((br, 1), lambda i: (i, 0)),       # B row weights
                ],
                out_specs=pl.BlockSpec((1, 1), lambda i: (0, 0)),  # resident accumulator
            ),
            compiler_params=pltpu.CompilerParams(
                dimension_semantics=("arbitrary",),     # accumulator output -> arbitrary
                vmem_limit_bytes=48 * 1024 * 1024,      # > default scoped, < v7x physical
            ),
            cost_estimate=pl.CostEstimate(
                flops=flops, transcendentals=0, bytes_accessed=bytes_accessed),
        )(lut2d, self._w_r_row, self._w_g_row, wb)
        return out[0, 0]

    # ------------------------------------------------------------------ 1D branch
    def _forward_1d(self, LUT):
        # Mirrors the reference: boundary columns hardcoded to {0, dim-2}; a LUT whose
        # last dim != self.dim would be just as "wrong" as the PyTorch module.
        lut2 = LUT.reshape(-1, LUT.shape[-1])
        n, last = lut2.shape
        inv_count = 1.0 / float(n * (last - 1))
        kernel = functools.partial(
            _tvmn1d_kernel, dim=self.dim, inv_count=inv_count,
            lam_s=self.lambda_smooth, lam_m=self.lambda_mn)
        out = pl.pallas_call(
            kernel,
            out_shape=jax.ShapeDtypeStruct((1, 1), jnp.float32),
            in_specs=[pl.BlockSpec(memory_space=pltpu.MemorySpace.VMEM)],
            out_specs=pl.BlockSpec(memory_space=pltpu.MemorySpace.VMEM),
        )(lut2)
        return out[0, 0]


def _reference(mod: TVMN, LUT):
    """Pure-JAX transcription of the PyTorch forward, for correctness checks."""
    LUT = jnp.asarray(LUT, jnp.float32)
    dim = mod.dim
    if LUT.ndim > 3:
        wr = mod.weight_r[None]
        wg = mod.weight_g[None]
        wb = mod.weight_b[None]
        dif_r = LUT[..., :-1] - LUT[..., 1:]
        dif_g = LUT[..., :-1, :] - LUT[..., 1:, :]
        dif_b = LUT[..., :-1, :, :] - LUT[..., 1:, :, :]
        t0 = (jnp.mean(dif_r ** 2 * wr) + jnp.mean(dif_g ** 2 * wg)
              + jnp.mean(dif_b ** 2 * wb))
        t1 = (jnp.mean(jax.nn.relu(dif_r * wr) ** 2)
              + jnp.mean(jax.nn.relu(dif_g * wg) ** 2)
              + jnp.mean(jax.nn.relu(dif_b * wb) ** 2))
        t2 = 0.0
    else:
        dif = LUT[..., :-1] - LUT[..., 1:]
        t1 = jnp.mean(jax.nn.relu(dif))
        dif = dif ** 2
        dif = dif.at[..., jnp.array([0, dim - 2])].multiply(2.0)
        t0 = jnp.mean(dif)
        t2 = 0.0
    return mod.lambda_smooth * (t0 + 10 * t2) + mod.lambda_mn * t1


if __name__ == "__main__":
    dim = 33
    mod = TVMN(dim=dim, lambda_smooth=1e-4, lambda_mn=10.0)

    key = jax.random.PRNGKey(0)
    k1, k2, k3 = jax.random.split(key, 3)

    # 3D-LUT branch, typical shape: (channels=3, dim, dim, dim) -> single grid step.
    lut3d = jax.random.uniform(k1, (3, dim, dim, dim), dtype=jnp.float32)
    out3d = jax.block_until_ready(mod(lut3d))
    ref3d = jax.block_until_ready(_reference(mod, lut3d))
    assert abs(float(out3d) - float(ref3d)) <= 1e-4 * max(1.0, abs(float(ref3d))), (
        float(out3d), float(ref3d))

    # Batched 3D-LUT branch (n=10 channels -> 8-channel blocks, 2-step accumulator grid).
    lut3d_b = jax.random.uniform(k3, (2, 5, dim, dim, dim), dtype=jnp.float32)
    out3d_b = jax.block_until_ready(mod(lut3d_b))
    ref3d_b = jax.block_until_ready(_reference(mod, lut3d_b))
    assert abs(float(out3d_b) - float(ref3d_b)) <= 1e-4 * max(1.0, abs(float(ref3d_b))), (
        float(out3d_b), float(ref3d_b))

    # 1D-LUT branch: (channels=3, dim).
    lut1d = jax.random.uniform(k2, (3, dim), dtype=jnp.float32)
    out1d = jax.block_until_ready(mod(lut1d))
    ref1d = jax.block_until_ready(_reference(mod, lut1d))
    assert abs(float(out1d) - float(ref1d)) <= 1e-4 * max(1.0, abs(float(ref1d))), (
        float(out1d), float(ref1d))

    print("KERNEL_OK")
</pallas_src>

<mosaic_0001>
module attributes {stable_mosaic.version = 11 : i64} {
  func.func @_tvmn3d_kernel(%arg0: i32, %arg1: memref<99x1152xf32, #tpu.memory_space<vmem>>, %arg2: memref<1x1152xf32, #tpu.memory_space<vmem>>, %arg3: memref<1x1152xf32, #tpu.memory_space<vmem>>, %arg4: memref<99x1xf32, #tpu.memory_space<vmem>>, %arg5: memref<1x1xf32, #tpu.memory_space<vmem>>) attributes {dimension_semantics = [#tpu.dimension_semantics<arbitrary>], iteration_bounds = array<i64: 1>, scalar_prefetch = 0 : i64, scratch_operands = 0 : i64, tpu.core_type = #tpu.core_type<tc>, window_params = [{transform_indices = @transform_0, window_bounds = array<i64: 99, 1152>}, {pipeline_mode = #tpu.pipeline_mode<synchronous>, transform_indices = @transform_1, window_bounds = array<i64: 1, 1152>}, {pipeline_mode = #tpu.pipeline_mode<synchronous>, transform_indices = @transform_2, window_bounds = array<i64: 1, 1152>}, {transform_indices = @transform_3, window_bounds = array<i64: 99, 1>}, {pipeline_mode = #tpu.pipeline_mode<synchronous>, transform_indices = @transform_4, window_bounds = array<i64: 1, 1>}]} {
    %c0 = arith.constant 0 : index
    %c0_0 = arith.constant 0 : index
    %0 = vector.load %arg1[%c0, %c0_0] : memref<99x1152xf32, #tpu.memory_space<vmem>>, vector<99x1152xf32>
    %c1151_i32 = arith.constant 1151 : i32
    %1 = tpu.dynamic_rotate %0 by %c1151_i32 dim 1 : vector<99x1152xf32>, i32 -> vector<99x1152xf32>
    %2 = arith.subf %0, %1 : vector<99x1152xf32>
    %c0_1 = arith.constant 0 : index
    %c0_2 = arith.constant 0 : index
    %3 = vector.load %arg2[%c0_1, %c0_2] : memref<1x1152xf32, #tpu.memory_space<vmem>>, vector<1x1152xf32>
    %4 = vector.broadcast %3 : vector<1x1152xf32> to vector<99x1152xf32>
    %5 = arith.mulf %2, %4 : vector<99x1152xf32>
    %6 = arith.mulf %2, %5 : vector<99x1152xf32>
    %7 = vector.shape_cast %6 : vector<99x1152xf32> to vector<1x99x1152xf32>
    %cst = arith.constant dense<0.000000e+00> : vector<1xf32>
    %8 = vector.multi_reduction <add>, %7, %cst [1, 2] : vector<1x99x1152xf32> to vector<1xf32>
    %9 = vector.shape_cast %8 : vector<1xf32> to vector<1x1x1xf32>
    %10 = vector.extract %9[0, 0, 0] : f32 from vector<1x1x1xf32>
    %11 = vector.broadcast %10 : f32 to vector<1x1xf32>
    %cst_3 = arith.constant 0.000000e+00 : f32
    %12 = vector.broadcast %cst_3 : f32 to vector<99x1152xf32>
    %13 = arith.maximumf %5, %12 : vector<99x1152xf32>
    %14 = arith.mulf %13, %13 : vector<99x1152xf32>
    %15 = vector.shape_cast %14 : vector<99x1152xf32> to vector<1x99x1152xf32>
    %cst_4 = arith.constant dense<0.000000e+00> : vector<1xf32>
    %16 = vector.multi_reduction <add>, %15, %cst_4 [1, 2] : vector<1x99x1152xf32> to vector<1xf32>
    %17 = vector.shape_cast %16 : vector<1xf32> to vector<1x1x1xf32>
    %18 = vector.extract %17[0, 0, 0] : f32 from vector<1x1x1xf32>
    %19 = vector.broadcast %18 : f32 to vector<1x1xf32>
    %c1119_i32 = arith.constant 1119 : i32
    %20 = tpu.dynamic_rotate %0 by %c1119_i32 dim 1 : vector<99x1152xf32>, i32 -> vector<99x1152xf32>
    %21 = arith.subf %0, %20 : vector<99x1152xf32>
    %c0_5 = arith.constant 0 : index
    %c0_6 = arith.constant 0 : index
    %22 = vector.load %arg3[%c0_5, %c0_6] : memref<1x1152xf32, #tpu.memory_space<vmem>>, vector<1x1152xf32>
    %23 = vector.broadcast %22 : vector<1x1152xf32> to vector<99x1152xf32>
    %24 = arith.mulf %21, %23 : vector<99x1152xf32>
    %25 = arith.mulf %21, %24 : vector<99x1152xf32>
    %26 = vector.shape_cast %25 : vector<99x1152xf32> to vector<1x99x1152xf32>
    %cst_7 = arith.constant dense<0.000000e+00> : vector<1xf32>
    %27 = vector.multi_reduction <add>, %26, %cst_7 [1, 2] : vector<1x99x1152xf32> to vector<1xf32>
    %28 = vector.shape_cast %27 : vector<1xf32> to vector<1x1x1xf32>
    %29 = vector.extract %28[0, 0, 0] : f32 from vector<1x1x1xf32>
    %30 = vector.broadcast %29 : f32 to vector<1x1xf32>
    %31 = arith.addf %11, %30 : vector<1x1xf32>
    %cst_8 = arith.constant 0.000000e+00 : f32
    %32 = vector.broadcast %cst_8 : f32 to vector<99x1152xf32>
    %33 = arith.maximumf %24, %32 : vector<99x1152xf32>
    %34 = arith.mulf %33, %33 : vector<99x1152xf32>
    %35 = vector.shape_cast %34 : vector<99x1152xf32> to vector<1x99x1152xf32>
    %cst_9 = arith.constant dense<0.000000e+00> : vector<1xf32>
    %36 = vector.multi_reduction <add>, %35, %cst_9 [1, 2] : vector<1x99x1152xf32> to vector<1xf32>
    %37 = vector.shape_cast %36 : vector<1xf32> to vector<1x1x1xf32>
    %38 = vector.extract %37[0, 0, 0] : f32 from vector<1x1x1xf32>
    %39 = vector.broadcast %38 : f32 to vector<1x1xf32>
    %40 = arith.addf %19, %39 : vector<1x1xf32>
    %41 = vector.extract_strided_slice %0 {offsets = [0, 0], sizes = [98, 1152], strides = [1, 1]} : vector<99x1152xf32> to vector<98x1152xf32>
    %42 = vector.extract_strided_slice %0 {offsets = [1, 0], sizes = [98, 1152], strides = [1, 1]} : vector<99x1152xf32> to vector<98x1152xf32>
    %43 = arith.subf %41, %42 : vector<98x1152xf32>
    %c0_10 = arith.constant 0 : index
    %c0_11 = arith.constant 0 : index
    %44 = vector.load %arg4[%c0_10, %c0_11] : memref<99x1xf32, #tpu.memory_space<vmem>>, vector<98x1xf32>
    %45 = vector.broadcast %44 : vector<98x1xf32> to vector<98x1152xf32>
    %46 = arith.mulf %43, %45 : vector<98x1152xf32>
    %47 = arith.mulf %43, %46 : vector<98x1152xf32>
    %48 = vector.shape_cast %47 : vector<98x1152xf32> to vector<1x98x1152xf32>
    %cst_12 = arith.constant dense<0.000000e+00> : vector<1xf32>
    %49 = vector.multi_reduction <add>, %48, %cst_12 [1, 2] : vector<1x98x1152xf32> to vector<1xf32>
    %50 = vector.shape_cast %49 : vector<1xf32> to vector<1x1x1xf32>
    %51 = vector.extract %50[0, 0, 0] : f32 from vector<1x1x1xf32>
    %52 = vector.broadcast %51 : f32 to vector<1x1xf32>
    %53 = arith.addf %31, %52 : vector<1x1xf32>
    %cst_13 = arith.constant 0.000000e+00 : f32
    %54 = vector.broadcast %cst_13 : f32 to vector<98x1152xf32>
    %55 = arith.maximumf %46, %54 : vector<98x1152xf32>
    %56 = arith.mulf %55, %55 : vector<98x1152xf32>
    %57 = vector.shape_cast %56 : vector<98x1152xf32> to vector<1x98x1152xf32>
    %cst_14 = arith.constant dense<0.000000e+00> : vector<1xf32>
    %58 = vector.multi_reduction <add>, %57, %cst_14 [1, 2] : vector<1x98x1152xf32> to vector<1xf32>
    %59 = vector.shape_cast %58 : vector<1xf32> to vector<1x1x1xf32>
    %60 = vector.extract %59[0, 0, 0] : f32 from vector<1x1x1xf32>
    %61 = vector.broadcast %60 : f32 to vector<1x1xf32>
    %62 = arith.addf %40, %61 : vector<1x1xf32>
    %c0_i32 = arith.constant 0 : i32
    %63 = arith.cmpi eq, %arg0, %c0_i32 : i32
    %64 = arith.extui %63 : i1 to i32
    %c0_i32_15 = arith.constant 0 : i32
    %65 = arith.cmpi ne, %64, %c0_i32_15 : i32
    scf.if %65 {
      %cst_23 = arith.constant 0.000000e+00 : f32
      %76 = vector.broadcast %cst_23 : f32 to vector<1x1xf32>
      %c0_24 = arith.constant 0 : index
      %c0_25 = arith.constant 0 : index
      %77 = vector.load %arg5[%c0_24, %c0_25] : memref<1x1xf32, #tpu.memory_space<vmem>>, vector<1x1xf32>
      tpu.vector_store %arg5[%c0_24, %c0_25], %76 {strides = array<i32>} : memref<1x1xf32, #tpu.memory_space<vmem>>, vector<1x1xf32>,
    } else {
    }
    %c0_16 = arith.constant 0 : index
    %c0_17 = arith.constant 0 : index
    %66 = vector.load %arg5[%c0_16, %c0_17] : memref<1x1xf32, #tpu.memory_space<vmem>>, vector<1x1xf32>
    %cst_18 = arith.constant 9.99999974E-5 : f32
    %67 = vector.broadcast %cst_18 : f32 to vector<1x1xf32>
    %68 = arith.mulf %67, %53 : vector<1x1xf32>
    %cst_19 = arith.constant 1.000000e+01 : f32
    %69 = vector.broadcast %cst_19 : f32 to vector<1x1xf32>
    %70 = arith.mulf %69, %62 : vector<1x1xf32>
    %71 = arith.addf %68, %70 : vector<1x1xf32>
    %cst_20 = arith.constant 9.565350e-06 : f32
    %72 = vector.broadcast %cst_20 : f32 to vector<1x1xf32>
    %73 = arith.mulf %71, %72 : vector<1x1xf32>
    %74 = arith.addf %66, %73 : vector<1x1xf32>
    %c0_21 = arith.constant 0 : index
    %c0_22 = arith.constant 0 : index
    %75 = vector.load %arg5[%c0_21, %c0_22] : memref<1x1xf32, #tpu.memory_space<vmem>>, vector<1x1xf32>
    tpu.vector_store %arg5[%c0_21, %c0_22], %74 {strides = array<i32>} : memref<1x1xf32, #tpu.memory_space<vmem>>, vector<1x1xf32>,
    return
  }
  func.func @transform_0(%arg0: i32) -> (i32, i32) {
    %c0_i32 = arith.constant 0 : i32
    %c0_i32_0 = arith.constant 0 : i32
    return %arg0, %c0_i32 : i32, i32
  }
  func.func @transform_1(%arg0: i32) -> (i32, i32) {
    %c0_i32 = arith.constant 0 : i32
    %c0_i32_0 = arith.constant 0 : i32
    %c0_i32_1 = arith.constant 0 : i32
    return %c0_i32, %c0_i32_0 : i32, i32
  }
  func.func @transform_2(%arg0: i32) -> (i32, i32) {
    %c0_i32 = arith.constant 0 : i32
    %c0_i32_0 = arith.constant 0 : i32
    %c0_i32_1 = arith.constant 0 : i32
    return %c0_i32, %c0_i32_0 : i32, i32
  }
  func.func @transform_3(%arg0: i32) -> (i32, i32) {
    %c0_i32 = arith.constant 0 : i32
    %c0_i32_0 = arith.constant 0 : i32
    return %arg0, %c0_i32 : i32, i32
  }
  func.func @transform_4(%arg0: i32) -> (i32, i32) {
    %c0_i32 = arith.constant 0 : i32
    %c0_i32_0 = arith.constant 0 : i32
    %c0_i32_1 = arith.constant 0 : i32
    return %c0_i32, %c0_i32_0 : i32, i32
  }
}

</mosaic_0001>

<bundles_post_ra>
// kernel: tpu_custom_call.1
= control target key start
LH: loop header
LB: loop body
LE: loop exit
PB: predicated region body
PF: predicated region fallthrough
CT: control target
= control target key end

     0   :  { %9 = vsyncpa [#allocation3], 0  ;;  %s8862_s0 = inlined_call_operand.hbm [shape: f32[99,1152], index: 0, kind: input, shape index: {}]   ;;  %s8863_s1 = inlined_call_operand.vmem [shape: f32[1,1152], index: 1, kind: input, shape index: {}]   ;;  %s8864_s2 = inlined_call_operand.vmem [shape: f32[1,1152], index: 2, kind: input, shape index: {}]   ;;  %s8865_s3 = inlined_call_operand.vmem [shape: f32[99,1], index: 3, kind: input, shape index: {}]   ;;  %s8866_s4 = inlined_call_operand.hbm [shape: f32[1,1], index: 4, kind: output, shape index: {}]  }
   0x1   :  { %10 = vsyncpa [#allocation4], 0  ;;  %s4394_s15 = smov [#allocation2]  }
   0x2   :  { %s16_s16 = sshll.u32 %s4394_s15, 4  ;;  %s17_s16 = int_to_ptr.vmem [resolvable:$true] %s16_s16 }
   0x3   :  { %s4358_s17 = scalar_lea.vmem %s17_s16, 14976  ;;  %p4363_p1 = scmp.lt.s32.totalorder %s17_s16, %s17_s16 }
   0x4   :  { %p4359_p0 = scmp.ne.s32.totalorder %s17_s16, %s4358_s17  ;;  %p4364_p2 = scmp.lt.s32.totalorder %s4358_s17, %s4358_s17 }
   0x6   :  { %p4365_p3 = por %p4364_p2, %p4363_p1 }
   0x8   :  { %p4366_p4 = pnand %p4365_p3, %p4359_p0 }
   0xa   :  { %4369 = shalt.err (!%p4366_p4)
}
   0xb   :  { %s4395_s18 = smov 1152   ;;  %s4396_s19 = smov 72  }
   0xc   :  { %22 = dma.hbm_to_vmem [thread:$0]  %s8862_s0, 14976, %s17_s16, [#allocation3], %s4395_s18, %s4395_s18, %s4396_s19  }
   0xd   :  { %4390 = dma.done.wait [#allocation3], 14976  }
   0xe   :  { %4391 = vsyncadd [#allocation3], 4294952320  ;;  %v4430_v0 = vld [vmem:[#allocation2 + $0x90] sm:$0xff]  ;;  %v4432_v1 = vld [vmem:[#allocation2] sm:$0xff]  ;;  %s4397_s22 = smov 127   ;;  %v4398_v32 = vmov 0  }
   0xf   :  { %9138 = vst [vmem:[#allocation8_spill] sm:$0xff] %v4430_v0  ;;  %153 = vrot.lane.b32.xlu1 %v4430_v0, %s4397_s22  ;;  %149 = vrot.lane.b32.xlu0 %v4432_v1, %s4397_s22  ;;  %v4438_v2 = vld [vmem:[#allocation2 + $0xd8] sm:$0xff]  ;;  %v4440_v3 = vld [vmem:[#allocation2 + $0x48] sm:$0xff]  ;;  %v4448_v5 = vld [vmem:[#allocation2 + $0x120] sm:$0xff]  ;;  %v2811_v56 = vrot.slane %v4430_v0, 1  ;;  %v2784_v59 = vrot.slane %v4432_v1, 1 }
  0x10   :  { %9139 = vst [vmem:[#allocation9_spill] sm:$0xff] %v4438_v2  ;;  %9140 = vst [vmem:[#allocation10_spill] sm:$0xff] %v4440_v3  ;;  %v4446_v4 = vld [vmem:[#allocation2 + $0x168] sm:$0xff]  ;;  %v4454_v6 = vld [vmem:[#allocation2 + $0x1f8] sm:$0xff]  ;;  %4113 = vset.pattern.permute.xlu1 %v4398_v32  ;;  %4114 = vset.pattern.permute.xlu0 %v4398_v32  ;;  %v2829_v55 = vrot.slane %v4438_v2, 1  ;;  %vm2783_vm0 = vcmask 1046528  }
  0x11   :  { %9141 = vst [vmem:[#allocation11_spill] sm:$0xff] %v4446_v4  ;;  %v4456_v7 = vld [vmem:[#allocation2 + $0x1b0] sm:$0xff]  ;;  %v4462_v8 = vld [vmem:[#allocation2 + $0x288] sm:$0xff]  ;;  %v4464_v9 = vld [vmem:[#allocation2 + $0x240] sm:$0xff]  ;;  %v2785_v60 = vrot.slane %v4440_v3, 1  ;;  %v2865_v62 = vrot.slane %v4446_v4, 1 }
  0x12   :  { %9142 = vst [vmem:[#allocation12_spill] sm:$0xff] %v4456_v7  ;;  %9143 = vst [vmem:[#allocation13_spill] sm:$0xff] %v4464_v9  ;;  %v4470_v10 = vld [vmem:[#allocation2 + $0x318] sm:$0xff]  ;;  %v4472_v11 = vld [vmem:[#allocation2 + $0x2d0] sm:$0xff]  ;;  %v2830_v61 = vsel %vm2783_vm0, %v2811_v56, %v2829_v55  ;;  %v2847_v63 = vrot.slane %v4448_v5, 1  ;;  %s4399_s0 = smov 95  }
  0x13   :  { %155 = vrot.lane.b32.xlu1 %v4438_v2, %s4397_s22  ;;  %151 = vrot.lane.b32.xlu0 %v4440_v3, %s4397_s22  ;;  %v4478_v12 = vld [vmem:[#allocation2 + $0x8] sm:$0xff]  ;;  %v4480_v13 = vld [vmem:[#allocation2 + $0x360] sm:$0x7]  ;;  %v4486_v14 = vld [vmem:[#allocation2 + $0x98] sm:$0xff]  ;;  %v2812_v32 = vsel %vm2783_vm0, %v2785_v60, %v2811_v56  ;;  %vm1010_vm2 = vcmask 1042432   ;;  %vm3662_vm4 = vcmask 1041408  }
  0x14   :  { %v4488_v15 = vld [vmem:[#allocation2 + $0x50] sm:$0xff]  ;;  %v4494_v16 = vld [vmem:[#allocation2 + $0x128] sm:$0xff]  ;;  %v4496_v17 = vld [vmem:[#allocation2 + $0xe0] sm:$0xff]  ;;  %v2848_v56 = vsel %vm2783_vm0, %v2829_v55, %v2847_v63  ;;  %vm4066_vm5 = vcmask 0   ;;  %s4401_s19 = smov [#allocation5]  }
  0x15   :  { %9144 = vst [vmem:[#allocation14_spill] sm:$0xff] %v4488_v15  ;;  %v4502_v18 = vld [vmem:[#allocation2 + $0x1b8] sm:$0xff]  ;;  %v4504_v19 = vld [vmem:[#allocation2 + $0x170] sm:$0xff]  ;;  %v4510_v20 = vld [vmem:[#allocation2 + $0x248] sm:$0xff]  ;;  %s4082_s20 = sshll.u32 %s4401_s19, 4  ;;  %s4083_s20 = int_to_ptr.vmem [resolvable:$true] %s4082_s20 }
  0x16   :  { %v4512_v21 = vld [vmem:[#allocation2 + $0x200] sm:$0xff]  ;;  %v4518_v22 = vld [vmem:[#allocation2 + $0x2d8] sm:$0xff]  ;;  %v4520_v23 = vld [vmem:[#allocation2 + $0x290] sm:$0xff]  ;;  %s4370_s21 = scalar_lea.vmem %s4083_s20, 16  ;;  %s4374_s23 = scalar_lea.vmem %s4083_s20, 32 }
  0x17   :  { %159 = vrot.lane.b32.xlu1 %v4446_v4, %s4397_s22  ;;  %157 = vrot.lane.b32.xlu0 %v4448_v5, %s4397_s22  ;;  %v4526_v24 = vld [vmem:[#allocation2 + $0x368] sm:$0x7]  ;;  %v4528_v25 = vld [vmem:[#allocation2 + $0x320] sm:$0xff]  ;;  %v4534_v26 = vld [vmem:[#allocation2 + $0x58] sm:$0xff]  ;;  %p4371_p5 = scmp.ne.s32.totalorder %s4083_s20, %s4370_s21  ;;  %p4375_p6 = scmp.lt.s32.totalorder %s4083_s20, %s4083_s20 }
  0x18   :  { %9145 = vst [vmem:[#allocation15_spill] sm:$0xff] %v4534_v26  ;;  %v4536_v27 = vld [vmem:[#allocation2 + $0x10] sm:$0xff]  ;;  %v4542_v28 = vld [vmem:[#allocation2 + $0xe8] sm:$0xff]  ;;  %v4544_v29 = vld [vmem:[#allocation2 + $0xa0] sm:$0xff]  ;;  %p4376_p7 = scmp.lt.s32.totalorder %s4374_s23, %s4370_s21 }
  0x19   :  { %v4550_v30 = vld [vmem:[#allocation2 + $0x178] sm:$0xff]  ;;  %v4552_v31 = vld [vmem:[#allocation2 + $0x130] sm:$0xff]  ;;  %v4558_v33 = vld [vmem:[#allocation2 + $0x208] sm:$0xff] }
  0x1a   :  { %v4560_v34 = vld [vmem:[#allocation2 + $0x1c0] sm:$0xff]  ;;  %v4566_v35 = vld [vmem:[#allocation2 + $0x298] sm:$0xff]  ;;  %v4568_v36 = vld [vmem:[#allocation2 + $0x250] sm:$0xff]  ;;  %p4377_p8 = por %p4376_p7, %p4375_p6 }
  0x1b   :  { %163 = vrot.lane.b32.xlu1 %v4454_v6, %s4397_s22  ;;  %161 = vrot.lane.b32.xlu0 %v4456_v7, %s4397_s22  ;;  %v4574_v37 = vld [vmem:[#allocation2 + $0x328] sm:$0xff]  ;;  %v4576_v38 = vld [vmem:[#allocation2 + $0x2e0] sm:$0xff]  ;;  %v4582_v39 = vld [vmem:[#allocation2 + $0x18] sm:$0xff] }
  0x1c   :  { %v4584_v40 = vld [vmem:[#allocation2 + $0x370] sm:$0x7]  ;;  %v4590_v41 = vld [vmem:[#allocation2 + $0xa8] sm:$0xff]  ;;  %v4592_v42 = vld [vmem:[#allocation2 + $0x60] sm:$0xff]  ;;  %p4378_p9 = pnand %p4377_p8, %p4371_p5 }
  0x1d   :  { %9146 = vst [vmem:[#allocation16_spill] sm:$0xff] %v4584_v40  ;;  %9147 = vst [vmem:[#allocation17_spill] sm:$0xff] %v4592_v42  ;;  %v4598_v43 = vld [vmem:[#allocation2 + $0x138] sm:$0xff]  ;;  %v4600_v44 = vld [vmem:[#allocation2 + $0xf0] sm:$0xff] }
  0x1e   :  { %9148 = vst [vmem:[#allocation18_spill] sm:$0xff] %v4598_v43  ;;  %v4606_v45 = vld [vmem:[#allocation2 + $0x1c8] sm:$0xff]  ;;  %v4608_v46 = vld [vmem:[#allocation2 + $0x180] sm:$0xff]  ;;  %v4614_v47 = vld [vmem:[#allocation2 + $0x258] sm:$0xff] }
  0x1f   :  { %167 = vrot.lane.b32.xlu1 %v4462_v8, %s4397_s22  ;;  %165 = vrot.lane.b32.xlu0 %v4464_v9, %s4397_s22  ;;  %9149 = vst [vmem:[#allocation19_spill] sm:$0xff] %v4606_v45  ;;  %9150 = vst [vmem:[#allocation20_spill] sm:$0xff] %v4608_v46  ;;  %v4616_v48 = vld [vmem:[#allocation2 + $0x210] sm:$0xff]  ;;  %v4622_v49 = vld [vmem:[#allocation2 + $0x2e8] sm:$0xff] }
  0x20   :  { %9151 = vst [vmem:[#allocation21_spill] sm:$0xff] %v4614_v47  ;;  %9152 = vst [vmem:[#allocation22_spill] sm:$0xff] %v4616_v48  ;;  %v4624_v50 = vld [vmem:[#allocation2 + $0x2a0] sm:$0xff]  ;;  %v4630_v51 = vld [vmem:[#allocation2 + $0x378] sm:$0x7] }
  0x21   :  { %9153 = vst [vmem:[#allocation23_spill] sm:$0xff] %v4622_v49  ;;  %9154 = vst [vmem:[#allocation24_spill] sm:$0xff] %v4624_v50  ;;  %v4632_v52 = vld [vmem:[#allocation2 + $0x330] sm:$0xff]  ;;  %v4638_v53 = vld [vmem:[#allocation2 + $0x68] sm:$0xff] }
  0x22   :  { %9155 = vst [vmem:[#allocation25_spill] sm:$0xff] %v4630_v51  ;;  %9156 = vst [vmem:[#allocation26_spill] sm:$0xff] %v4632_v52  ;;  %v4640_v54 = vld [vmem:[#allocation2 + $0x20] sm:$0xff]  ;;  %v4648_v57 = vld [vmem:[#allocation2 + $0xf8] sm:$0xff] }
  0x23   :  { %171 = vrot.lane.b32.xlu1 %v4470_v10, %s4397_s22  ;;  %169 = vrot.lane.b32.xlu0 %v4472_v11, %s4397_s22  ;;  %9157 = vst [vmem:[#allocation27_spill] sm:$0xff] %v4638_v53  ;;  %9158 = vst [vmem:[#allocation28_spill] sm:$0xff] %v4640_v54  ;;  %v4650_v58 = vld [vmem:[#allocation2 + $0xb0] sm:$0xff] }
  0x24   :  { %9159 = vst [vmem:[#allocation29_spill] sm:$0xff] %v4648_v57  ;;  %9160 = vst [vmem:[#allocation30_spill] sm:$0xff] %v4650_v58  ;;  %v4690_v55 = vld [vmem:[#allocation2 + $0x1d0] sm:$0xff] }
  0x27   :  { %175 = vrot.lane.b32.xlu1 %v4478_v12, %s4397_s22  ;;  %173 = vrot.lane.b32.xlu0 %v4480_v13, %s4397_s22 }
  0x2b   :  { %179 = vrot.lane.b32.xlu1 %v4486_v14, %s4397_s22  ;;  %177 = vrot.lane.b32.xlu0 %v4488_v15, %s4397_s22 }
  0x2f   :  { %183 = vrot.lane.b32.xlu1 %v4494_v16, %s4397_s22  ;;  %181 = vrot.lane.b32.xlu0 %v4496_v17, %s4397_s22 }
  0x33   :  { %187 = vrot.lane.b32.xlu1 %v4502_v18, %s4397_s22  ;;  %185 = vrot.lane.b32.xlu0 %v4504_v19, %s4397_s22 }
  0x37   :  { %191 = vrot.lane.b32.xlu1 %v4510_v20, %s4397_s22  ;;  %189 = vrot.lane.b32.xlu0 %v4512_v21, %s4397_s22 }
  0x3b   :  { %195 = vrot.lane.b32.xlu1 %v4518_v22, %s4397_s22  ;;  %193 = vrot.lane.b32.xlu0 %v4520_v23, %s4397_s22 }
  0x3f   :  { %199 = vrot.lane.b32.xlu1 %v4526_v24, %s4397_s22  ;;  %197 = vrot.lane.b32.xlu0 %v4528_v25, %s4397_s22 }
  0x43   :  { %203 = vrot.lane.b32.xlu1 %v4534_v26, %s4397_s22  ;;  %201 = vrot.lane.b32.xlu0 %v4536_v27, %s4397_s22 }
  0x47   :  { %207 = vrot.lane.b32.xlu1 %v4542_v28, %s4397_s22  ;;  %205 = vrot.lane.b32.xlu0 %v4544_v29, %s4397_s22 }
  0x4b   :  { %211 = vrot.lane.b32.xlu1 %v4550_v30, %s4397_s22  ;;  %209 = vrot.lane.b32.xlu0 %v4552_v31, %s4397_s22 }
  0x4f   :  { %215 = vrot.lane.b32.xlu1 %v4558_v33, %s4397_s22  ;;  %213 = vrot.lane.b32.xlu0 %v4560_v34, %s4397_s22 }
  0x53   :  { %219 = vrot.lane.b32.xlu1 %v4566_v35, %s4397_s22  ;;  %217 = vrot.lane.b32.xlu0 %v4568_v36, %s4397_s22 }
  0x57   :  { %223 = vrot.lane.b32.xlu1 %v4574_v37, %s4397_s22  ;;  %221 = vrot.lane.b32.xlu0 %v4576_v38, %s4397_s22 }
  0x5b   :  { %227 = vrot.lane.b32.xlu1 %v4582_v39, %s4397_s22  ;;  %225 = vrot.lane.b32.xlu0 %v4584_v40, %s4397_s22 }
  0x5f   :  { %231 = vrot.lane.b32.xlu1 %v4590_v41, %s4397_s22  ;;  %229 = vrot.lane.b32.xlu0 %v4592_v42, %s4397_s22 }
  0x63   :  { %235 = vrot.lane.b32.xlu1 %v4598_v43, %s4397_s22  ;;  %233 = vrot.lane.b32.xlu0 %v4600_v44, %s4397_s22 }
  0x67   :  { %239 = vrot.lane.b32.xlu1 %v4606_v45, %s4397_s22  ;;  %237 = vrot.lane.b32.xlu0 %v4608_v46, %s4397_s22  ;;  %v2955_v46 = vrot.slane %v4472_v11, 1 }
  0x6b   :  { %243 = vrot.lane.b32.xlu1 %v4614_v47, %s4397_s22  ;;  %241 = vrot.lane.b32.xlu0 %v4616_v48, %s4397_s22  ;;  %v4671_v48 = vsub.f32 %v4430_v0, %v2830_v61  ;;  %v2866_v47 = vsel %vm2783_vm0, %v2847_v63, %v2865_v62  ;;  %v2788_v0 = vrot.slane %v4488_v15, 1 }
  0x6d   :  { %9163 = vst [vmem:[#allocation33_spill] sm:$0xff] %v4671_v48 }
  0x6f   :  { %247 = vrot.lane.b32.xlu1 %v4622_v49, %s4397_s22  ;;  %245 = vrot.lane.b32.xlu0 %v4624_v50, %s4397_s22  ;;  %v4667_v50 = vld [vmem:[#allocation2 + $0x140] sm:$0xff]  ;;  %v2937_v49 = vrot.slane %v4462_v8, 1 }
  0x70   :  { %9162 = vst [vmem:[#allocation32_spill] sm:$0xff] %v4667_v50 }
  0x73   :  { %251 = vrot.lane.b32.xlu1 %v4630_v51, %s4397_s22  ;;  %249 = vrot.lane.b32.xlu0 %v4632_v52, %s4397_s22  ;;  %v2919_v51 = vrot.slane %v4464_v9, 1  ;;  %v4665_v52 = vld [vmem:[#allocation2 + $0x188] sm:$0xff] }
  0x74   :  { %9161 = vst [vmem:[#allocation31_spill] sm:$0xff] %v4665_v52 }
  0x75   :  { %v2938_v63 = vsel %vm2783_vm0, %v2919_v51, %v2937_v49 }
  0x77   :  { %255 = vrot.lane.b32.xlu1 %v4638_v53, %s4397_s22  ;;  %253 = vrot.lane.b32.xlu0 %v4640_v54, %s4397_s22  ;;  %v2901_v54 = vrot.slane %v4454_v6, 1  ;;  %v2883_v53 = vrot.slane %v4456_v7, 1 }
  0x79   :  { %v2884_v61 = vsel %vm2783_vm0, %v2865_v62, %v2883_v53  ;;  %v2902_v48 = vsel %vm2783_vm0, %v2883_v53, %v2901_v54 }
  0x7a   :  { %v4711_v45 = vsub.f32 %v4446_v4, %v2884_v61  ;;  %v4714_v43 = vsub.f32 %v4456_v7, %v2902_v48  ;;  %v2831_v61 = vrot.slane %v4496_v17, 1  ;;  %v4729_v48 = vld [vmem:[#allocation2 + $0x2a8] sm:$0xff] }
  0x7b   :  { %259 = vrot.lane.b32.xlu1 %v4648_v57, %s4397_s22  ;;  %257 = vrot.lane.b32.xlu0 %v4650_v58, %s4397_s22  ;;  %v2786_v57 = vsel %vm2783_vm0, %v2784_v59, %v2785_v60  ;;  %v4675_v58 = vsub.f32 %v4440_v3, %v2812_v32  ;;  %v2920_v59 = vsel %vm2783_vm0, %v2901_v54, %v2919_v51  ;;  %v2973_v60 = vrot.slane %v4470_v10, 1  ;;  %v4688_v32 = vld [vmem:[#allocation2 + $0x218] sm:$0xff] }
  0x7c   :  { %v2991_v3 = vrot.slane %v4480_v13, 1  ;;  %v4701_v53 = vsub.f32 %v4432_v1, %v2786_v57  ;;  %v4704_v54 = vsub.f32 %v4438_v2, %v2848_v56  ;;  %v2813_v51 = vrot.slane %v4486_v14, 1  ;;  %9170 = vst [vmem:[#allocation40_spill] sm:$0xff] %v4711_v45  ;;  %9171 = vst [vmem:[#allocation41_spill] sm:$0xff] %v4714_v43  ;;  %v4731_v43 = vld [vmem:[#allocation2 + $0x260] sm:$0xff] }
  0x7d   :  { %9164 = vst [vmem:[#allocation34_spill] sm:$0xff] %v4675_v58  ;;  %v2787_v58 = vrot.slane %v4478_v12, 1  ;;  %v4722_v57 = vsub.f32 %v4454_v6, %v2920_v59  ;;  %v2974_v56 = vsel %vm2783_vm0, %v2955_v46, %v2973_v60  ;;  %v2867_v6 = vrot.slane %v4504_v19, 1 }
  0x7e   :  { %9167 = vst [vmem:[#allocation37_spill] sm:$0xff] %v4701_v53  ;;  %9168 = vst [vmem:[#allocation38_spill] sm:$0xff] %v4704_v54  ;;  %v2903_v54 = vrot.slane %v4512_v21, 1  ;;  %v2957_v53 = vrot.slane %v4518_v22, 1  ;;  %v2909_v2 = vrot.slane %v4688_v32, 1 }
  0x7f   :  { %263 = vrot.lane.b32.xlu1 %v4665_v52, %s4397_s22  ;;  %261 = vrot.lane.b32.xlu0 %v4667_v50, %s4397_s22  ;;  %v4707_v52 = vsub.f32 %v4448_v5, %v2866_v47  ;;  %9172 = vst [vmem:[#allocation42_spill] sm:$0xff] %v4722_v57  ;;  %v4725_v47 = vsub.f32 %v4464_v9, %v2938_v63  ;;  %v2885_v57 = vrot.slane %v4502_v18, 1  ;;  %v2939_v9 = vrot.slane %v4520_v23, 1 }
  0x80   :  { %v2789_v45 = vsel %vm2783_vm0, %v2787_v58, %v2788_v0  ;;  %v2921_v58 = vrot.slane %v4510_v20, 1 }
  0x81   :  { %v4696_v50 = vpop.permute.xlu1 %153  ;;  %v4698_v62 = vpop.permute.xlu0 %149  ;;  %9169 = vst [vmem:[#allocation39_spill] sm:$0xff] %v4707_v52  ;;  %9173 = vst [vmem:[#allocation43_spill] sm:$0xff] %v4725_v47  ;;  %v2849_v52 = vrot.slane %v4494_v16, 1  ;;  %v2814_v47 = vsel %vm2783_vm0, %v2788_v0, %v2813_v51 }
  0x82   :  { %9165 = vst [vmem:[#allocation35_spill] sm:$0xff] %v4696_v50  ;;  %9166 = vst [vmem:[#allocation36_spill] sm:$0xff] %v4698_v62  ;;  %v2956_v50 = vsel %vm2783_vm0, %v2937_v49, %v2955_v46  ;;  %v2992_v49 = vsel %vm2783_vm0, %v2973_v60, %v2991_v3  ;;  %v4748_v60 = vsub.f32 %v4472_v11, %v2974_v56  ;;  %v4767_v56 = vld [vmem:[#allocation2 + $0x338] sm:$0xff] }
  0x83   :  { %267 = vrot.lane.b32.xlu1 %v4688_v32, %s4397_s22  ;;  %265 = vrot.lane.b32.xlu0 %v4690_v55, %s4397_s22  ;;  %v4742_v46 = vsub.f32 %v4462_v8, %v2956_v50  ;;  %v4758_v0 = vsub.f32 %v4470_v10, %v2992_v49  ;;  %v4761_v8 = vsub.f32 %v4480_v13, %v2991_v3  ;;  %v2993_v49 = vrot.slane %v4526_v24, 1 }
  0x84   :  { %9177 = vst [vmem:[#allocation47_spill] sm:$0xff] %v4748_v60  ;;  %v4764_v11 = vsub.f32 %v4478_v12, %v2789_v45  ;;  %v2832_v50 = vsel %vm2783_vm0, %v2813_v51, %v2831_v61  ;;  %v4769_v60 = vld [vmem:[#allocation2 + $0x2f0] sm:$0xff]  ;;  %v2850_v4 = vsel %vm2783_vm0, %v2831_v61, %v2849_v52  ;;  %v2868_v10 = vsel %vm2783_vm0, %v2849_v52, %v2867_v6 }
  0x85   :  { %v4737_v59 = vpop.permute.xlu1 %155  ;;  %v4739_v63 = vpop.permute.xlu0 %151  ;;  %9176 = vst [vmem:[#allocation46_spill] sm:$0xff] %v4742_v46  ;;  %9178 = vst [vmem:[#allocation48_spill] sm:$0xff] %v4758_v0  ;;  %v4772_v46 = vsub.f32 %v4488_v15, %v2814_v47  ;;  %v2886_v45 = vsel %vm2783_vm0, %v2867_v6, %v2885_v57  ;;  %v2904_v51 = vsel %vm2783_vm0, %v2885_v57, %v2903_v54  ;;  %v2791_v0 = vrot.slane %v4534_v26, 1 }
  0x86   :  { %9174 = vst [vmem:[#allocation44_spill] sm:$0xff] %v4737_v59  ;;  %9175 = vst [vmem:[#allocation45_spill] sm:$0xff] %v4739_v63  ;;  %v2922_v47 = vsel %vm2783_vm0, %v2903_v54, %v2921_v58  ;;  %v2940_v61 = vsel %vm2783_vm0, %v2921_v58, %v2939_v9  ;;  %v2958_v52 = vsel %vm2783_vm0, %v2939_v9, %v2957_v53  ;;  %v2815_v58 = vrot.slane %v4544_v29, 1  ;;  %v4803_v9 = vld [vmem:[#allocation2 + $0x28] sm:$0xff] }
  0x87   :  { %271 = vrot.lane.b32.xlu1 %v4729_v48, %s4397_s22  ;;  %269 = vrot.lane.b32.xlu0 %v4731_v43, %s4397_s22  ;;  %9179 = vst [vmem:[#allocation49_spill] sm:$0xff] %v4761_v8  ;;  %9180 = vst [vmem:[#allocation50_spill] sm:$0xff] %v4764_v11  ;;  %v2975_v8 = vrot.slane %v4528_v25, 1  ;;  %v4794_v57 = vsub.f32 %v4486_v14, %v2832_v50  ;;  %v4797_v6 = vsub.f32 %v4496_v17, %v2850_v4  ;;  %v4805_v11 = vld [vmem:[#allocation2 + $0x380] sm:$0x7] }
  0x88   :  { %9181 = vst [vmem:[#allocation51_spill] sm:$0xff] %v4772_v46  ;;  %v2790_v46 = vrot.slane %v4536_v27, 1  ;;  %v4800_v54 = vsub.f32 %v4494_v16, %v2868_v10  ;;  %9187 = vst [vmem:[#allocation57_spill] sm:$0xff] %v4805_v11  ;;  %v4808_v15 = vsub.f32 %v4504_v19, %v2886_v45  ;;  %v4811_v7 = vsub.f32 %v4502_v18, %v2904_v51 }
  0x89   :  { %v4777_v3 = vpop.permute.xlu1 %159  ;;  %v4779_v13 = vpop.permute.xlu0 %157  ;;  %9184 = vst [vmem:[#allocation54_spill] sm:$0xff] %v4794_v57  ;;  %9185 = vst [vmem:[#allocation55_spill] sm:$0xff] %v4797_v6  ;;  %v2833_v14 = vrot.slane %v4542_v28, 1  ;;  %v2851_v4 = vrot.slane %v4552_v31, 1  ;;  %v4820_v50 = vsub.f32 %v4512_v21, %v2922_v47  ;;  %v4823_v10 = vsub.f32 %v4510_v20, %v2940_v61  ;;  %v4842_v47 = vld [vmem:[#allocation2 + $0xb8] sm:$0xff] }
  0x8a   :  { %9182 = vst [vmem:[#allocation52_spill] sm:$0xff] %v4777_v3  ;;  %9183 = vst [vmem:[#allocation53_spill] sm:$0xff] %v4779_v13  ;;  %v4826_v19 = vsub.f32 %v4520_v23, %v2958_v52  ;;  %v4829_v18 = vsub.f32 %v4526_v24, %v2993_v49  ;;  %v2976_v45 = vsel %vm2783_vm0, %v2957_v53, %v2975_v8  ;;  %v2869_v21 = vrot.slane %v4550_v30, 1  ;;  %v4844_v53 = vld [vmem:[#allocation2 + $0x70] sm:$0xff] }
  0x8b   :  { %275 = vrot.lane.b32.xlu1 %v4767_v56, %s4397_s22  ;;  %273 = vrot.lane.b32.xlu0 %v4769_v60, %s4397_s22  ;;  %9186 = vst [vmem:[#allocation56_spill] sm:$0xff] %v4800_v54  ;;  %9188 = vst [vmem:[#allocation58_spill] sm:$0xff] %v4808_v15  ;;  %v2994_v51 = vsel %vm2783_vm0, %v2975_v8, %v2993_v49  ;;  %v2816_v20 = vsel %vm2783_vm0, %v2791_v0, %v2815_v58  ;;  %v2905_v23 = vrot.slane %v4558_v33, 1  ;;  %v4884_v15 = vld [vmem:[#allocation2 + $0x100] sm:$0xff] }
  0x8c   :  { %9189 = vst [vmem:[#allocation59_spill] sm:$0xff] %v4811_v7  ;;  %9192 = vst [vmem:[#allocation62_spill] sm:$0xff] %v4820_v50  ;;  %v2792_v7 = vsel %vm2783_vm0, %v2790_v46, %v2791_v0  ;;  %v2887_v24 = vrot.slane %v4560_v34, 1  ;;  %v2834_v46 = vsel %vm2783_vm0, %v2815_v58, %v2833_v14  ;;  %v2852_v8 = vsel %vm2783_vm0, %v2833_v14, %v2851_v4 }
  0x8d   :  { %v4815_v17 = vpop.permute.xlu1 %163  ;;  %v4817_v16 = vpop.permute.xlu0 %161  ;;  %9193 = vst [vmem:[#allocation63_spill] sm:$0xff] %v4823_v10  ;;  %9194 = vst [vmem:[#allocation64_spill] sm:$0xff] %v4826_v19  ;;  %v2941_v49 = vrot.slane %v4566_v35, 1  ;;  %v2923_v61 = vrot.slane %v4568_v36, 1  ;;  %v4858_v19 = vsub.f32 %v4528_v25, %v2994_v51  ;;  %v2977_v10 = vrot.slane %v4574_v37, 1  ;;  %v4882_v51 = vld [vmem:[#allocation2 + $0x148] sm:$0xff] }
  0x8e   :  { %9190 = vst [vmem:[#allocation60_spill] sm:$0xff] %v4815_v17  ;;  %9191 = vst [vmem:[#allocation61_spill] sm:$0xff] %v4817_v16  ;;  %v2959_v58 = vrot.slane %v4576_v38, 1  ;;  %v4863_v14 = vsub.f32 %v4536_v27, %v2792_v7  ;;  %v2793_v50 = vrot.slane %v4582_v39, 1  ;;  %v2794_v54 = vrot.slane %v4592_v42, 1  ;;  %v9232_v17 = vld [vmem:[#allocation29_spill] sm:$0xff] }
  0x8f   :  { %9195 = vst [vmem:[#allocation65_spill] sm:$0xff] %v4829_v18  ;;  %279 = vrot.lane.b32.xlu1 %v4803_v9, %s4397_s22  ;;  %277 = vrot.lane.b32.xlu0 %v4805_v11, %s4397_s22  ;;  %9196 = vst [vmem:[#allocation66_spill] sm:$0xff] %v4842_v47  ;;  %v4855_v18 = vsub.f32 %v4518_v22, %v2976_v45  ;;  %v4873_v22 = vsub.f32 %v4534_v26, %v2816_v20  ;;  %v2927_v16 = vrot.slane %v4731_v43, 1 }
  0x90   :  { %9200 = vst [vmem:[#allocation70_spill] sm:$0xff] %v4858_v19  ;;  %9201 = vst [vmem:[#allocation71_spill] sm:$0xff] %v4863_v14  ;;  %v4876_v25 = vsub.f32 %v4544_v29, %v2834_v46  ;;  %v2870_v7 = vsel %vm2783_vm0, %v2851_v4, %v2869_v21  ;;  %v4880_v45 = vsub.f32 %v4542_v28, %v2852_v8  ;;  %v2817_v46 = vrot.slane %v4590_v41, 1  ;;  %v9228_v14 = vld [vmem:[#allocation27_spill] sm:$0xff] }
  0x91   :  { %v4850_v52 = vpop.permute.xlu1 %167  ;;  %v4852_v0 = vpop.permute.xlu0 %165  ;;  %9199 = vst [vmem:[#allocation69_spill] sm:$0xff] %v4855_v18  ;;  %9202 = vst [vmem:[#allocation72_spill] sm:$0xff] %v4873_v22  ;;  %v2888_v19 = vsel %vm2783_vm0, %v2869_v21, %v2887_v24  ;;  %v2906_v18 = vsel %vm2783_vm0, %v2887_v24, %v2905_v23  ;;  %v2924_v6 = vsel %vm2783_vm0, %v2905_v23, %v2923_v61  ;;  %v2835_v8 = vrot.slane %v4600_v44, 1 }
  0x92   :  { %9197 = vst [vmem:[#allocation67_spill] sm:$0xff] %v4850_v52  ;;  %9198 = vst [vmem:[#allocation68_spill] sm:$0xff] %v4852_v0  ;;  %v2942_v20 = vsel %vm2783_vm0, %v2923_v61, %v2941_v49  ;;  %v2960_v4 = vsel %vm2783_vm0, %v2941_v49, %v2959_v58  ;;  %v2978_v28 = vsel %vm2783_vm0, %v2959_v58, %v2977_v10  ;;  %v9208_v24 = vrot.slane %v4584_v40, 1  ;;  %v9212_v58 = vld [vmem:[#allocation19_spill] sm:$0xff]  ;;  %v9213_v40 = vld [vmem:[#allocation20_spill] sm:$0xff] }
  0x93   :  { %283 = vrot.lane.b32.xlu1 %v4842_v47, %s4397_s22  ;;  %281 = vrot.lane.b32.xlu0 %v4844_v53, %s4397_s22  ;;  %9203 = vst [vmem:[#allocation73_spill] sm:$0xff] %v4876_v25  ;;  %9204 = vst [vmem:[#allocation74_spill] sm:$0xff] %v4880_v45  ;;  %v4899_v21 = vsub.f32 %v4552_v31, %v2870_v7  ;;  %v2795_v61 = vsel %vm2783_vm0, %v2793_v50, %v2794_v54  ;;  %v9209_v45 = vld [vmem:[#allocation18_spill] sm:$0xff]  ;;  %v2889_v7 = vrot.slane %v9212_v58, 1  ;;  %v4920_v50 = vld [vmem:[#allocation2 + $0x190] sm:$0xff] }
  0x94   :  { %v2996_v23 = vsel %vm2783_vm0, %v2977_v10, %v9208_v24  ;;  %v2853_v25 = vrot.slane %v9209_v45, 1  ;;  %v4911_v49 = vsub.f32 %v4550_v30, %v2888_v19  ;;  %v4914_v31 = vsub.f32 %v4560_v34, %v2906_v18  ;;  %v4918_v24 = vld [vmem:[#allocation2 + $0x1d8] sm:$0xff] }
  0x95   :  { %v4890_v57 = vpop.permute.xlu1 %171  ;;  %v4892_v29 = vpop.permute.xlu0 %169  ;;  %9207 = vst [vmem:[#allocation77_spill] sm:$0xff] %v4899_v21  ;;  %v2871_v10 = vrot.slane %v9213_v40, 1  ;;  %v4923_v21 = vsub.f32 %v4558_v33, %v2924_v6  ;;  %v4926_v22 = vsub.f32 %v4568_v36, %v2942_v20  ;;  %v4929_v30 = vsub.f32 %v4566_v35, %v2960_v4  ;;  %v9221_v6 = vld [vmem:[#allocation21_spill] sm:$0xff] }
  0x96   :  { %9205 = vst [vmem:[#allocation75_spill] sm:$0xff] %v4890_v57  ;;  %9206 = vst [vmem:[#allocation76_spill] sm:$0xff] %v4892_v29  ;;  %v4932_v34 = vsub.f32 %v4576_v38, %v2978_v28  ;;  %v4943_v33 = vsub.f32 %v4582_v39, %v2795_v61  ;;  %v2836_v36 = vsel %vm2783_vm0, %v2817_v46, %v2835_v8  ;;  %v2925_v20 = vrot.slane %v9221_v6, 1  ;;  %v9222_v38 = vld [vmem:[#allocation22_spill] sm:$0xff]  ;;  %v9223_v28 = vld [vmem:[#allocation23_spill] sm:$0xff] }
  0x97   :  { %287 = vrot.lane.b32.xlu1 %v4882_v51, %s4397_s22  ;;  %285 = vrot.lane.b32.xlu0 %v4884_v15, %s4397_s22  ;;  %9210 = vst [vmem:[#allocation18_spill] sm:$0xff] %v4911_v49  ;;  %9211 = vst [vmem:[#allocation78_spill] sm:$0xff] %v4914_v31  ;;  %v4939_v31 = vsub.f32 %v4574_v37, %v2996_v23  ;;  %v2818_v49 = vsel %vm2783_vm0, %v2794_v54, %v2817_v46  ;;  %v2907_v4 = vrot.slane %v9222_v38, 1  ;;  %v9224_v23 = vld [vmem:[#allocation24_spill] sm:$0xff]  ;;  %v9225_v61 = vld [vmem:[#allocation26_spill] sm:$0xff] }
  0x98   :  { %9214 = vst [vmem:[#allocation19_spill] sm:$0xff] %v4923_v21  ;;  %9215 = vst [vmem:[#allocation20_spill] sm:$0xff] %v4926_v22  ;;  %v2854_v35 = vsel %vm2783_vm0, %v2835_v8, %v2853_v25  ;;  %v2872_v37 = vsel %vm2783_vm0, %v2853_v25, %v2871_v10  ;;  %v2890_v54 = vsel %vm2783_vm0, %v2871_v10, %v2889_v7  ;;  %v2943_v46 = vrot.slane %v9224_v23, 1  ;;  %v9227_v21 = vld [vmem:[#allocation25_spill] sm:$0xff]  ;;  %v9229_v57 = vld [vmem:[#allocation28_spill] sm:$0xff] }
  0x99   :  { %9216 = vst [vmem:[#allocation79_spill] sm:$0xff] %v4929_v30  ;;  %9217 = vst [vmem:[#allocation80_spill] sm:$0xff] %v4932_v34  ;;  %v4934_v19 = vpop.permute.xlu1 %175  ;;  %v4936_v18 = vpop.permute.xlu0 %173  ;;  %v2961_v34 = vrot.slane %v9223_v28, 1  ;;  %v2979_v8 = vrot.slane %v9225_v61, 1  ;;  %v4960_v30 = vld [vmem:[#allocation2 + $0x220] sm:$0xff]  ;;  %v4963_v22 = vsub.f32 %v4592_v42, %v2818_v49  ;;  %v2797_v26 = vrot.slane %v9228_v14, 1 }
  0x9a   :  { %9218 = vst [vmem:[#allocation81_spill] sm:$0xff] %v4936_v18  ;;  %9219 = vst [vmem:[#allocation82_spill] sm:$0xff] %v4939_v31  ;;  %v4958_v31 = vld [vmem:[#allocation2 + $0x268] sm:$0xff]  ;;  %v2796_v18 = vrot.slane %v9229_v57, 1  ;;  %v4973_v52 = vsub.f32 %v4590_v41, %v2836_v36  ;;  %v4976_v29 = vsub.f32 %v4600_v44, %v2854_v35  ;;  %v2837_v0 = vrot.slane %v9232_v17, 1  ;;  %v9233_v49 = vld [vmem:[#allocation30_spill] sm:$0xff] }
  0x9b   :  { %9220 = vst [vmem:[#allocation83_spill] sm:$0xff] %v4943_v33  ;;  %291 = vrot.lane.b32.xlu1 %v4918_v24, %s4397_s22  ;;  %289 = vrot.lane.b32.xlu0 %v4920_v50, %s4397_s22  ;;  %9226 = vst [vmem:[#allocation21_spill] sm:$0xff] %v4963_v22  ;;  %v2819_v22 = vrot.slane %v9233_v49, 1  ;;  %v4981_v33 = vsub.f32 %v9209_v45, %v2872_v37  ;;  %v4984_v42 = vsub.f32 %v9213_v40, %v2890_v54  ;;  %v4995_v35 = vld [vmem:[#allocation2 + $0x2f8] sm:$0xff]  ;;  %v4997_v40 = vld [vmem:[#allocation2 + $0x2b0] sm:$0xff] }
  0x9c   :  { %9230 = vst [vmem:[#allocation22_spill] sm:$0xff] %v4973_v52  ;;  %9231 = vst [vmem:[#allocation23_spill] sm:$0xff] %v4976_v29  ;;  %v2908_v3 = vsel %vm2783_vm0, %v2889_v7, %v2907_v4  ;;  %v2926_v41 = vsel %vm2783_vm0, %v2907_v4, %v2925_v20  ;;  %v2944_v44 = vsel %vm2783_vm0, %v2925_v20, %v2943_v46  ;;  %v9236_v7 = vrot.slane %v9227_v21, 1  ;;  %v9238_v29 = vld [vmem:[#allocation32_spill] sm:$0xff] }
  0x9d   :  { %v4968_v25 = vpop.permute.xlu1 %179  ;;  %v4970_v10 = vpop.permute.xlu0 %177  ;;  %9234 = vst [vmem:[#allocation24_spill] sm:$0xff] %v4981_v33  ;;  %9235 = vst [vmem:[#allocation26_spill] sm:$0xff] %v4984_v42  ;;  %v2962_v36 = vsel %vm2783_vm0, %v2943_v46, %v2961_v34  ;;  %v2980_v45 = vsel %vm2783_vm0, %v2961_v34, %v2979_v8  ;;  %v2798_v54 = vsel %vm2783_vm0, %v2796_v18, %v2797_v26  ;;  %v9237_v42 = vld [vmem:[#allocation31_spill] sm:$0xff]  ;;  %v2855_v4 = vrot.slane %v9238_v29, 1 }
  0x9e   :  { %v2998_v37 = vsel %vm2783_vm0, %v2979_v8, %v9236_v7  ;;  %v2873_v33 = vrot.slane %v9237_v42, 1  ;;  %v2820_v34 = vsel %vm2783_vm0, %v2797_v26, %v2819_v22  ;;  %v2838_v46 = vsel %vm2783_vm0, %v2819_v22, %v2837_v0 }
  0x9f   :  { %295 = vrot.lane.b32.xlu1 %v4958_v31, %s4397_s22  ;;  %293 = vrot.lane.b32.xlu0 %v4960_v30, %s4397_s22  ;;  %v2891_v21 = vrot.slane %v4690_v55, 1  ;;  %v5014_v8 = vsub.f32 %v9212_v58, %v2908_v3  ;;  %v5017_v18 = vsub.f32 %v9222_v38, %v2926_v41  ;;  %v2945_v7 = vrot.slane %v4729_v48, 1  ;;  %v145_v38 = vld [vmem:[#allocation2 + $0x388] sm:$0x7]  ;;  %v5037_v41 = vld [vmem:[#allocation2 + $0x340] sm:$0xff] }
  0xa0   :  { %v5026_v26 = vsub.f32 %v9221_v6, %v2944_v44  ;;  %v5029_v22 = vsub.f32 %v9224_v23, %v2962_v36  ;;  %v5032_v3 = vsub.f32 %v9223_v28, %v2980_v45  ;;  %v5035_v58 = vsub.f32 %v9225_v61, %v2998_v37  ;;  %9245 = vst [vmem:[#allocation84_spill] sm:$0xff] %v5037_v41 }
  0xa1   :  { %v5005_v52 = vpop.permute.xlu1 %183  ;;  %v5007_v20 = vpop.permute.xlu0 %181  ;;  %9239 = vst [vmem:[#allocation27_spill] sm:$0xff] %v5014_v8  ;;  %9240 = vst [vmem:[#allocation28_spill] sm:$0xff] %v5017_v18  ;;  %v5040_v18 = vsub.f32 %v9229_v57, %v2798_v54  ;;  %v5043_v8 = vsub.f32 %v9228_v14, %v2820_v34  ;;  %v5046_v6 = vsub.f32 %v9233_v49, %v2838_v46  ;;  %v383_v37 = vlaneseq }
  0xa2   :  { %9241 = vst [vmem:[#allocation29_spill] sm:$0xff] %v5026_v26  ;;  %9242 = vst [vmem:[#allocation30_spill] sm:$0xff] %v5029_v22  ;;  %v2856_v23 = vsel %vm2783_vm0, %v2837_v0, %v2855_v4  ;;  %v2874_v61 = vsel %vm2783_vm0, %v2855_v4, %v2873_v33  ;;  %v2892_v36 = vsel %vm2783_vm0, %v2873_v33, %v2891_v21  ;;  %v2981_v49 = vrot.slane %v4767_v56, 1 }
  0xa3   :  { %299 = vrot.lane.b32.xlu1 %v4995_v35, %s4397_s22  ;;  %297 = vrot.lane.b32.xlu0 %v4997_v40, %s4397_s22  ;;  %9243 = vst [vmem:[#allocation31_spill] sm:$0xff] %v5032_v3  ;;  %9244 = vst [vmem:[#allocation32_spill] sm:$0xff] %v5035_v58  ;;  %v2910_v45 = vsel %vm2783_vm0, %v2891_v21, %v2909_v2  ;;  %v2928_v54 = vsel %vm2783_vm0, %v2909_v2, %v2927_v16  ;;  %v2963_v46 = vrot.slane %v4769_v60, 1 }
  0xa4   :  { %9246 = vst [vmem:[#allocation85_spill] sm:$0xff] %v5040_v18  ;;  %9247 = vst [vmem:[#allocation86_spill] sm:$0xff] %v5043_v8  ;;  %v2946_v34 = vsel %vm2783_vm0, %v2927_v16, %v2945_v7  ;;  %v2799_v0 = vrot.slane %v4803_v9, 1  ;;  %v2821_v21 = vrot.slane %v4842_v47, 1  ;;  %v2800_v4 = vrot.slane %v4844_v53, 1 }
  0xa5   :  { %9248 = vst [vmem:[#allocation87_spill] sm:$0xff] %v5046_v6  ;;  %v5049_v44 = vpop.permute.xlu1 %187  ;;  %v5051_v28 = vpop.permute.xlu0 %185  ;;  %v5068_v2 = vsub.f32 %v9232_v17, %v2856_v23  ;;  %v5071_v16 = vsub.f32 %v9238_v29, %v2874_v61  ;;  %v5074_v58 = vsub.f32 %v9237_v42, %v2892_v36  ;;  %v5082_v33 = vsub.f32 %v4690_v55, %v2910_v45  ;;  %v5263_v6 = vld [vmem:[#allocation2 + $0x108] sm:$0xff] }
  0xa6   :  { %v5085_v26 = vsub.f32 %v4688_v32, %v2928_v54  ;;  %v2857_v17 = vrot.slane %v4882_v51, 1  ;;  %v5088_v23 = vshrl.u32 %v383_v37, 7  ;;  %v5091_v29 = vsub.f32 %v4731_v43, %v2946_v34  ;;  %v3243_v54 = vld [vmem:[%s8865_s3] sm:$0xff] }
  0xa7   :  { %303 = vrot.lane.b32.xlu1 %v145_v38, %s4397_s22  ;;  %301 = vrot.lane.b32.xlu0 %v5037_v41, %s4397_s22  ;;  %9249 = vst [vmem:[#allocation88_spill] sm:$0xff] %v5068_v2  ;;  %9250 = vst [vmem:[#allocation89_spill] sm:$0xff] %v5071_v16  ;;  %v2839_v38 = vrot.slane %v4884_v15, 1  ;;  %v2964_v42 = vsel %vm2783_vm0, %v2945_v7, %v2963_v46  ;;  %v2982_v61 = vsel %vm2783_vm0, %v2963_v46, %v2981_v49  ;;  %v5255_v2 = vld [vmem:[#allocation2 + $0xd0] sm:$0xff] }
  0xa8   :  { %9251 = vst [vmem:[#allocation90_spill] sm:$0xff] %v5074_v58  ;;  %9252 = vst [vmem:[#allocation91_spill] sm:$0xff] %v5082_v33  ;;  %v2875_v36 = vrot.slane %v4920_v50, 1  ;;  %v9255_v32 = vrot.slane %v4805_v11, 1  ;;  %v2801_v43 = vsel %vm2783_vm0, %v2799_v0, %v2800_v4  ;;  %v2822_v45 = vsel %vm2783_vm0, %v2800_v4, %v2821_v21  ;;  %v5133_v33 = vld [vmem:[%s8863_s1] sm:$0xff] }
  0xa9   :  { %v5077_v3 = vpop.permute.xlu1 %191  ;;  %v5079_v22 = vpop.permute.xlu0 %189  ;;  %9253 = vst [vmem:[#allocation92_spill] sm:$0xff] %v5085_v26  ;;  %9254 = vst [vmem:[#allocation93_spill] sm:$0xff] %v5091_v29  ;;  %v2893_v7 = vrot.slane %v4918_v24, 1  ;;  %v2840_v34 = vsel %vm2783_vm0, %v2821_v21, %v2839_v38  ;;  %v2929_v46 = vrot.slane %v4958_v31, 1  ;;  %v2911_v11 = vrot.slane %v4960_v30, 1 }
  0xaa   :  { %v3000_v55 = vsel %vm2783_vm0, %v2981_v49, %v9255_v32  ;;  %v5119_v0 = vsub.f32 %v4729_v48, %v2964_v42  ;;  %v2858_v4 = vsel %vm2783_vm0, %v2839_v38, %v2857_v17  ;;  %v8973_v32 = vsub.s32 0, %v5088_v23  ;;  %9280 = vst [vmem:[#allocation114_spill] sm:$0xff] %v5255_v2 }
  0xab   :  { %1434 = vrot.lane.b32.xlu1 %v4478_v12, %s4399_s0  ;;  %1408 = vrot.lane.b32.xlu0 %v4432_v1, %s4399_s0  ;;  %v5110_v12 = vand.u32 127, %v383_v37  ;;  %v2947_v26 = vrot.slane %v4997_v40, 1  ;;  %v5125_v37 = vsub.f32 %v4769_v60, %v2982_v61  ;;  %v5128_v21 = vsub.f32 %v4767_v56, %v3000_v55 }
  0xac   :  { %9257 = vst [vmem:[#allocation95_spill] sm:$0xff] %v5119_v0  ;;  %v2876_v48 = vsel %vm2783_vm0, %v2857_v17, %v2875_v36  ;;  %v2965_v42 = vrot.slane %v4995_v35, 1  ;;  %v5140_v38 = vsub.f32 %v4803_v9, %v2801_v43  ;;  %v5143_v60 = vsub.f32 %v4844_v53, %v2822_v45 }
  0xad   :  { %v5114_v29 = vpop.permute.xlu1 %195  ;;  %v5116_v49 = vpop.permute.xlu0 %193  ;;  %9258 = vst [vmem:[#allocation96_spill] sm:$0xff] %v5125_v37  ;;  %9259 = vst [vmem:[#allocation97_spill] sm:$0xff] %v5128_v21  ;;  %v5146_v56 = vsub.f32 %v4842_v47, %v2840_v34  ;;  %v2894_v61 = vsel %vm2783_vm0, %v2875_v36, %v2893_v7  ;;  %v5150_v55 = vsub.f32 %v4884_v15, %v2858_v4  ;;  %vm385_vm1 = vcmp.lt.s32.totalorder %v5110_v12, 127  ;;  %v38_v4 = vld [vmem:[#allocation2 + $0x30] sm:$0xff] }
  0xae   :  { %9256 = vst [vmem:[#allocation94_spill] sm:$0xff] %v5114_v29  ;;  %9260 = vst [vmem:[#allocation98_spill] sm:$0xff] %v5140_v38  ;;  %v2912_v17 = vsel %vm2783_vm0, %v2893_v7, %v2911_v11  ;;  %v5162_v45 = vrot.slane %v5133_v33, %v8973_v32  ;;  %v5165_v36 = vsub.f32 %v4882_v51, %v2876_v48  ;;  %v5169_v7 = vld [vmem:[#allocation2 + $0x78] sm:$0xff]  ;;  %v2802_v51 = vrot.slane %v38_v4, 1  ;;  %v5182_v32 = vld [vmem:[#allocation2 + $0x80] sm:$0xff] }
  0xaf   :  { %3258 = vperm.xlu1 %4113, %v3243_v54   ;;  %1460 = vrot.lane.b32.xlu0 %v4536_v27, %s4399_s0  ;;  %9261 = vst [vmem:[#allocation99_spill] sm:$0xff] %v5143_v60  ;;  %9262 = vst [vmem:[#allocation100_spill] sm:$0xff] %v5146_v56  ;;  %v2930_v27 = vsel %vm2783_vm0, %v2911_v11, %v2929_v46  ;;  %v2948_v15 = vsel %vm2783_vm0, %v2929_v46, %v2947_v26  ;;  %v5179_v48 = vld [vmem:[#allocation2 + $0x38] sm:$0xff]  ;;  %v2803_v46 = vrot.slane %v5169_v7, 1  ;;  %v9305_v47 = vld [vmem:[#allocation12_spill] sm:$0xff] }
  0xb0   :  { %9263 = vst [vmem:[#allocation101_spill] sm:$0xff] %v5150_v55  ;;  %9265 = vst [vmem:[#allocation103_spill] sm:$0xff] %v5165_v36  ;;  %v5172_v11 = vsub.f32 %v4920_v50, %v2894_v61  ;;  %v2966_v21 = vsel %vm2783_vm0, %v2947_v26, %v2965_v42  ;;  %v5185_v34 = vsub.f32 %v4918_v24, %v2912_v17  ;;  %v2805_v26 = vrot.slane %v5179_v48, 1 }
  0xb1   :  { %v5155_v54 = vpop.permute.xlu1 %199  ;;  %v5157_v43 = vpop.permute.xlu0 %197  ;;  %v5188_v50 = vsub.f32 %v4960_v30, %v2930_v27  ;;  %v5197_v61 = vsub.f32 %v4958_v31, %v2948_v15  ;;  %v5204_v30 = vld [vmem:[#allocation2 + $0x40] sm:$0xff]  ;;  %v5207_v27 = vld [vmem:[#allocation2 + $0x88] sm:$0xff]  ;;  %v478_v17 = vsel %vm385_vm1, %v4739_v63, %v4970_v10  ;;  %v9277_v16 = vsub.s32 1, %v5088_v23  ;;  %v5265_v63 = vld [vmem:[#allocation2 + $0x110] sm:$0xff] }
  0xb2   :  { %9264 = vst [vmem:[#allocation102_spill] sm:$0xff] %v5155_v54  ;;  %9266 = vst [vmem:[#allocation104_spill] sm:$0xff] %v5172_v11  ;;  %v2808_v15 = vrot.slane %v5204_v30, 1  ;;  %v2809_v37 = vrot.slane %v5207_v27, 1  ;;  %v2827_v56 = vrot.slane %v5255_v2, 1  ;;  %v9294_v38 = vrot.slane %v5265_v63, 1 }
  0xb3   :  { %1512 = vrot.lane.b32.xlu1 %v9229_v57, %s4399_s0  ;;  %1486 = vrot.lane.b32.xlu0 %v4582_v39, %s4399_s0  ;;  %9267 = vst [vmem:[#allocation105_spill] sm:$0xff] %v5185_v34  ;;  %9268 = vst [vmem:[#allocation106_spill] sm:$0xff] %v5188_v50  ;;  %v2806_v57 = vrot.slane %v5182_v32, 1  ;;  %v477_v39 = vsel %vm385_vm1, %v4698_v62, %v4934_v19  ;;  %v5210_v50 = vsub.f32 %v4997_v40, %v2966_v21  ;;  %v5229_v21 = vld [vmem:[#allocation2 + $0xc0] sm:$0xff] }
  0xb4   :  { %9269 = vst [vmem:[#allocation107_spill] sm:$0xff] %v5197_v61  ;;  %v9272_v34 = vrot.slane %v5037_v41, 1  ;;  %v9273_v61 = vld [vmem:[#allocation35_spill] sm:$0xff]  ;;  %v2804_v40 = vsel %vm2783_vm0, %v2802_v51, %v2803_v46  ;;  %9274 = vst [vmem:[#allocation110_spill] sm:$0xff] %v5229_v21  ;;  %vm1642_vm3 = vcmp.lt.s32.totalorder %v5110_v12, 95 }
  0xb5   :  { %v5200_v0 = vpop.permute.xlu1 %203  ;;  %v5202_v24 = vpop.permute.xlu0 %201  ;;  %9271 = vst [vmem:[#allocation109_spill] sm:$0xff] %v5210_v50  ;;  %v479_v11 = vsel %vm385_vm1, %v9273_v61, %v4968_v25  ;;  %v2807_v41 = vsel %vm2783_vm0, %v2805_v26, %v2806_v57  ;;  %v2823_v50 = vrot.slane %v5229_v21, 1 }
  0xb6   :  { %9270 = vst [vmem:[#allocation108_spill] sm:$0xff] %v5200_v0  ;;  %v2984_v31 = vsel %vm2783_vm0, %v2965_v42, %v9272_v34  ;;  %v5231_v42 = vld [vmem:[#allocation2 + $0xc8] sm:$0xff]  ;;  %v503_v34 = vsub.f32 %v4432_v1, %v477_v39  ;;  %v9278_v1 = vsub.s32 2, %v5088_v23 }
  0xb7   :  { %305 = vrot.lane.b32.xlu1 %v38_v4, %s4397_s22  ;;  %1538 = vrot.lane.b32.xlu0 %v4803_v9, %s4399_s0  ;;  %9275 = vst [vmem:[#allocation111_spill] sm:$0xff] %v5231_v42  ;;  %v2825_v58 = vrot.slane %v5231_v42, 1  ;;  %v5238_v36 = vsub.f32 %v4995_v35, %v2984_v31  ;;  %v5243_v9 = vrot.slane %v5133_v33, %v9277_v16  ;;  %v9281_v35 = vld [vmem:[#allocation8_spill] sm:$0xff] }
  0xb8   :  { %v5252_v26 = vrot.slane %v5133_v33, %v9278_v1  ;;  %v521_v31 = vsub.f32 %v9281_v35, %v479_v11  ;;  %v2810_v16 = vsel %vm2783_vm0, %v2808_v15, %v2809_v37  ;;  %9283 = vst [vmem:[#allocation8_spill] sm:$0xff] %v5263_v6  ;;  %v5270_v1 = vsub.f32 %v38_v4, %v2804_v40  ;;  %v5277_v35 = vld [vmem:[#allocation2 + $0x118] sm:$0xff] }
  0xb9   :  { %9276 = vst [vmem:[#allocation112_spill] sm:$0xff] %v5238_v36  ;;  %v5245_v51 = vpop.permute.xlu1 %207  ;;  %v5247_v55 = vpop.permute.xlu0 %205  ;;  %v9282_v36 = vld [vmem:[#allocation10_spill] sm:$0xff]  ;;  %v5273_v11 = vsub.f32 %v5179_v48, %v2807_v41  ;;  %9287 = vst [vmem:[#allocation117_spill] sm:$0xff] %v5277_v35  ;;  %v669_v39 = vmul.f32 %v5162_v45, %v503_v34  ;;  %v2824_v60 = vsel %vm2783_vm0, %v2803_v46, %v2823_v50 }
  0xba   :  { %9279 = vst [vmem:[#allocation113_spill] sm:$0xff] %v5252_v26  ;;  %v5259_v61 = vsub.f32 %v9282_v36, %v478_v17  ;;  %9284 = vst [vmem:[#allocation10_spill] sm:$0xff] %v5265_v63  ;;  %v2826_v8 = vsel %vm2783_vm0, %v2806_v57, %v2825_v58  ;;  %v481_v41 = vsel %vm385_vm1, %v4779_v13, %v5005_v52  ;;  %v9289_v17 = vsub.s32 3, %v5088_v23  ;;  %v9318_v26 = vld [vmem:[#allocation67_spill] sm:$0xff] }
  0xbb   :  { %331 = vrot.lane.b32.xlu1 %v5179_v48, %s4397_s22  ;;  %1564 = vrot.lane.b32.xlu0 %v38_v4, %s4399_s0  ;;  %9285 = vst [vmem:[#allocation115_spill] sm:$0xff] %v5270_v1  ;;  %9286 = vst [vmem:[#allocation116_spill] sm:$0xff] %v5273_v11  ;;  %v5292_v15 = vsub.f32 %v5204_v30, %v2810_v16  ;;  %v687_v62 = vmul.f32 %v5162_v45, %v521_v31 }
  0xbc   :  { %v5297_v46 = vrot.slane %v5133_v33, %v9289_v17  ;;  %v678_v11 = vmul.f32 %v5162_v45, %v5259_v61  ;;  %v480_v13 = vsel %vm385_vm1, %v4737_v59, %v5007_v20  ;;  %v2828_v16 = vsel %vm2783_vm0, %v2809_v37, %v2827_v56 }
  0xbd   :  { %v5287_v4 = vpop.permute.xlu1 %211  ;;  %v5289_v40 = vpop.permute.xlu0 %209  ;;  %9288 = vst [vmem:[#allocation118_spill] sm:$0xff] %v5292_v15  ;;  %v5311_v17 = vsub.f32 %v5169_v7, %v2824_v60  ;;  %v5314_v57 = vsub.f32 %v5182_v32, %v2826_v8  ;;  %v9293_v15 = vrot.slane %v5263_v6, 1  ;;  %v2844_v18 = vsel %vm2783_vm0, %v2825_v58, %v9294_v38 }
  0xbe   :  { %9290 = vst [vmem:[#allocation119_spill] sm:$0xff] %v5297_v46  ;;  %v1039_v59 = vmax.f32 %v669_v39, 0.0  ;;  %v539_v37 = vsub.f32 %v4448_v5, %v481_v41  ;;  %v9295_v46 = vld [vmem:[#allocation61_spill] sm:$0xff]  ;;  %v9296_v8 = vrot.slane %v5277_v35, 1  ;;  %v5342_v41 = vsub.f32 %v5207_v27, %v2828_v16 }
  0xbf   :  { %357 = vrot.lane.b32.xlu1 %v5204_v30, %s4397_s22  ;;  %9291 = vst [vmem:[#allocation120_spill] sm:$0xff] %v5311_v17  ;;  %9292 = vst [vmem:[#allocation121_spill] sm:$0xff] %v5314_v57  ;;  %v2842_v1 = vsel %vm2783_vm0, %v2823_v50, %v9293_v15  ;;  %v483_v60 = vsel %vm385_vm1, %v9295_v46, %v5049_v44  ;;  %1590 = vrot.lane.b32.xlu0 %v5179_v48, %s4399_s0  ;;  %v9297_v50 = vld [vmem:[#allocation9_spill] sm:$0xff]  ;;  %v9298_v17 = vld [vmem:[#allocation52_spill] sm:$0xff]  ;;  %v9300_v48 = vsub.s32 4, %v5088_v23 }
  0xc0   :  { %v2846_v57 = vsel %vm2783_vm0, %v2827_v56, %v9296_v8  ;;  %v530_v15 = vsub.f32 %v9297_v50, %v480_v13  ;;  %v482_v58 = vsel %vm385_vm1, %v9298_v17, %v5051_v28  ;;  %9299 = vst [vmem:[#allocation9_spill] sm:$0xff] %v5342_v41  ;;  %v1057_v56 = vmax.f32 %v687_v62, 0.0  ;;  %v5358_v17 = vld [vmem:[%s8864_s2] sm:$0xff]  ;;  %v5360_v16 = vld [vmem:[#allocation2 + $0x150] sm:$0xff] }
  0xc1   :  { %v5337_v5 = vpop.permute.xlu1 %215  ;;  %v5339_v38 = vpop.permute.xlu0 %213  ;;  %v5347_v46 = vrot.slane %v5133_v33, %v9300_v48  ;;  %v1048_v8 = vmax.f32 %v678_v11, 0.0  ;;  %v5350_v13 = vsub.f32 %v5229_v21, %v2842_v1  ;;  %v5353_v50 = vsub.f32 %v5231_v42, %v2844_v18  ;;  %9304 = vst [vmem:[#allocation125_spill] sm:$0xff] %v5360_v16  ;;  %v9308_v21 = vld [vmem:[#allocation68_spill] sm:$0xff] }
  0xc2   :  { %v5362_v41 = vmul.f32 %v669_v39, %v503_v34  ;;  %v557_v48 = vsub.f32 %v9305_v47, %v483_v60  ;;  %v5368_v1 = vsub.f32 %v5255_v2, %v2846_v57  ;;  %v485_v34 = vsel %vm385_vm1, %v9308_v21, %v5077_v3  ;;  %v3244_v47 = vld [vmem:[%s8865_s3 + $0x8] sm:$0xff] }
  0xc3   :  { %9301 = vst [vmem:[#allocation122_spill] sm:$0xff] %v5347_v46  ;;  %9302 = vst [vmem:[#allocation123_spill] sm:$0xff] %v5350_v13  ;;  %1410 = vrot.lane.b32.xlu1 %v9282_v36, %s4399_s0  ;;  %v705_v13 = vmul.f32 %v5162_v45, %v539_v37  ;;  %v9307_v46 = vld [vmem:[#allocation11_spill] sm:$0xff]  ;;  %1616 = vrot.lane.b32.xlu0 %v5204_v30, %s4399_s0  ;;  %v5384_v36 = vmul.f32 %v687_v62, %v521_v31  ;;  %v9310_v39 = vld [vmem:[#allocation60_spill] sm:$0xff] }
  0xc4   :  { %9303 = vst [vmem:[#allocation124_spill] sm:$0xff] %v5353_v50  ;;  %9306 = vst [vmem:[#allocation12_spill] sm:$0xff] %v5368_v1  ;;  %v5371_v50 = vmul.f32 %v1039_v59, %v1039_v59  ;;  %v548_v42 = vsub.f32 %v9307_v46, %v482_v58  ;;  %v696_v59 = vmul.f32 %v5162_v45, %v530_v15  ;;  %v9311_v58 = vsub.s32 0, %v5088_v23  ;;  %v9316_v21 = vld [vmem:[#allocation76_spill] sm:$0xff] }
  0xc5   :  { %9309 = vst [vmem:[#allocation11_spill] sm:$0xff] %v5384_v36  ;;  %v484_v46 = vsel %vm385_vm1, %v9310_v39, %v5079_v22  ;;  %v5391_v57 = vpop.permute.xlu1 %219  ;;  %v5393_v60 = vpop.permute.xlu0 %217  ;;  %v5400_v18 = vmul.f32 %v1057_v56, %v1057_v56  ;;  %v5403_v62 = vmul.f32 %v678_v11, %v5259_v61  ;;  %v5405_v31 = vmul.f32 %v1048_v8, %v1048_v8  ;;  %v9317_v36 = vld [vmem:[#allocation13_spill] sm:$0xff] }
  0xc6   :  { %v5398_v30 = vrot.slane %v5358_v17, %v9311_v58  ;;  %v487_v39 = vsel %vm385_vm1, %v9316_v21, %v5114_v29  ;;  %v723_v1 = vmul.f32 %v5162_v45, %v557_v48  ;;  %v575_v2 = vsub.f32 %v9317_v36, %v485_v34  ;;  %v9322_v34 = vld [vmem:[#allocation14_spill] sm:$0xff] }
  0xc7   :  { %9313 = vst [vmem:[#allocation127_spill] sm:$0xff] %v5400_v18  ;;  %9314 = vst [vmem:[#allocation128_spill] sm:$0xff] %v5403_v62  ;;  %v486_v56 = vsel %vm385_vm1, %v9318_v26, %v5116_v49  ;;  %3263 = vperm.xlu1 %4113, %v3244_v47   ;;  %v9319_v61 = vrot.slane %v5360_v16, 1  ;;  %v9320_v11 = vrot.slane %v5263_v6, 1  ;;  %v5422_v58 = vmul.f32 %v705_v13, %v539_v37  ;;  %v4115_v18 = vld [vmem:[#allocation2 + $0x1f8] sm:$0xff] }
  0xc8   :  { %9312 = vst [vmem:[#allocation126_spill] sm:$0xff] %v5398_v30  ;;  %9315 = vst [vmem:[#allocation129_spill] sm:$0xff] %v5405_v31  ;;  %v714_v21 = vmul.f32 %v5162_v45, %v548_v42  ;;  %v566_v31 = vsub.f32 %v4115_v18, %v484_v46  ;;  %1436 = vrot.lane.b32.xlu0 %v9322_v34, %s4399_s0  ;;  %v9323_v36 = vsub.s32 1, %v5088_v23  ;;  %v1075_v47 = vmax.f32 %v705_v13, 0.0  ;;  %v4116_v30 = vld [vmem:[#allocation2 + $0x2d0] sm:$0xff]  ;;  %v4117_v34 = vld [vmem:[#allocation2 + $0x288] sm:$0xff] }
  0xc9   :  { %v2860_v8 = vsel %vm2783_vm0, %v9320_v11, %v9319_v61  ;;  %9321 = vst [vmem:[#allocation13_spill] sm:$0xff] %v5422_v58  ;;  %v1066_v62 = vmax.f32 %v696_v59, 0.0  ;;  %v593_v16 = vsub.f32 %v4116_v30, %v487_v39  ;;  %v9325_v61 = vld [vmem:[#allocation81_spill] sm:$0xff]  ;;  %v5436_v11 = vpop.permute.xlu1 %223  ;;  %v5438_v18 = vpop.permute.xlu0 %221  ;;  %v5440_v46 = vmul.f32 %v696_v59, %v530_v15 }
  0xca   :  { %v5430_v26 = vrot.slane %v5358_v17, %v9323_v36  ;;  %v489_v37 = vsel %vm385_vm1, %v9325_v61, %v5155_v54  ;;  %9326 = vst [vmem:[#allocation130_spill] sm:$0xff] %v5438_v18  ;;  %v584_v58 = vsub.f32 %v4117_v34, %v486_v56  ;;  %v5443_v36 = vsub.f32 %v5263_v6, %v2860_v8  ;;  %v5445_v13 = vld [vmem:[#allocation2 + $0x158] sm:$0xff]  ;;  %v9333_v6 = vld [vmem:[#allocation15_spill] sm:$0xff] }
  0xcb   :  { %9327 = vst [vmem:[#allocation131_spill] sm:$0xff] %v5440_v46  ;;  %v9329_v39 = vsub.s32 2, %v5088_v23  ;;  %v741_v61 = vmul.f32 %v5162_v45, %v575_v2  ;;  %v464_v15 = vsel %vm385_vm1, %v4934_v19, %v5202_v24  ;;  %v9331_v59 = vld [vmem:[#allocation17_spill] sm:$0xff]  ;;  %v1084_v8 = vmax.f32 %v714_v21, 0.0 }
  0xcc   :  { %9324 = vst [vmem:[#allocation14_spill] sm:$0xff] %v5430_v26  ;;  %9328 = vst [vmem:[#allocation132_spill] sm:$0xff] %v5443_v36  ;;  %v1093_v26 = vmax.f32 %v723_v1, 0.0  ;;  %1488 = vrot.lane.b32.xlu1 %v9331_v59, %s4399_s0  ;;  %v732_v34 = vmul.f32 %v5162_v45, %v566_v31  ;;  %v4118_v36 = vld [vmem:[#allocation2 + $0x360] sm:$0x7]  ;;  %1462 = vrot.lane.b32.xlu0 %v9333_v6, %s4399_s0  ;;  %v5467_v54 = vmul.f32 %v1075_v47, %v1075_v47  ;;  %v5485_v47 = vld [vmem:[#allocation2 + $0x8] sm:$0xff] }
  0xcd   :  { %v5450_v30 = vrot.slane %v5358_v17, %v9329_v39  ;;  %v611_v46 = vsub.f32 %v4118_v36, %v489_v37  ;;  %v9332_v39 = vld [vmem:[#allocation75_spill] sm:$0xff]  ;;  %v5469_v19 = vmul.f32 %v1066_v62, %v1066_v62  ;;  %v5471_v59 = vmul.f32 %v723_v1, %v557_v48  ;;  %v5474_v29 = vpop.permute.xlu1 %227  ;;  %v5476_v18 = vpop.permute.xlu0 %225  ;;  %9339 = vst [vmem:[#allocation137_spill] sm:$0xff] %v5485_v47 }
  0xce   :  { %9334 = vst [vmem:[#allocation17_spill] sm:$0xff] %v5467_v54  ;;  %v759_v56 = vmul.f32 %v5162_v45, %v593_v16  ;;  %9337 = vst [vmem:[#allocation135_spill] sm:$0xff] %v5476_v18  ;;  %v5478_v37 = vld [vmem:[#allocation2 + $0x160] sm:$0xff]  ;;  %v750_v36 = vmul.f32 %v5162_v45, %v584_v58  ;;  %v465_v6 = vsel %vm385_vm1, %v4970_v10, %v5200_v0  ;;  %v9342_v18 = vrot.slane %v5265_v63, 1 }
  0xcf   :  { %9330 = vst [vmem:[#allocation133_spill] sm:$0xff] %v5450_v30  ;;  %v488_v30 = vsel %vm385_vm1, %v9332_v39, %v5157_v43  ;;  %9335 = vst [vmem:[#allocation15_spill] sm:$0xff] %v5469_v19  ;;  %v504_v48 = vsub.f32 %v5485_v47, %v464_v15  ;;  %v5489_v62 = vmul.f32 %v714_v21, %v548_v42  ;;  %v1111_v39 = vmax.f32 %v741_v61, 0.0 }
  0xd0   :  { %9336 = vst [vmem:[#allocation134_spill] sm:$0xff] %v5471_v59  ;;  %9338 = vst [vmem:[#allocation136_spill] sm:$0xff] %v5478_v37  ;;  %v4120_v59 = vld [vmem:[#allocation2 + $0x318] sm:$0xff]  ;;  %1540 = vrot.lane.b32.xlu1 %v4844_v53, %s4399_s0  ;;  %v9341_v19 = vrot.slane %v5445_v13, 1  ;;  %v5498_v0 = vmul.f32 %v1093_v26, %v1093_v26  ;;  %v5500_v15 = vmul.f32 %v1084_v8, %v1084_v8  ;;  %v1102_v1 = vmax.f32 %v732_v34, 0.0 }
  0xd1   :  { %9340 = vst [vmem:[#allocation138_spill] sm:$0xff] %v5489_v62  ;;  %v602_v54 = vsub.f32 %v4120_v59, %v488_v30  ;;  %v777_v21 = vmul.f32 %v5162_v45, %v611_v46  ;;  %1514 = vrot.lane.b32.xlu0 %v9228_v14, %s4399_s0  ;;  %v5505_v42 = vmul.f32 %v741_v61, %v575_v2  ;;  %v1129_v53 = vmax.f32 %v759_v56, 0.0  ;;  %v4121_v59 = vld [vmem:[#allocation2 + $0x50] sm:$0xff]  ;;  %v5509_v47 = vpop.permute.xlu1 %231 }
  0xd2   :  { %v2862_v10 = vsel %vm2783_vm0, %v9342_v18, %v9341_v19  ;;  %9343 = vst [vmem:[#allocation139_spill] sm:$0xff] %v5498_v0  ;;  %9344 = vst [vmem:[#allocation140_spill] sm:$0xff] %v5500_v15  ;;  %v5507_v30 = vmul.f32 %v732_v34, %v566_v31  ;;  %v513_v62 = vsub.f32 %v4121_v59, %v465_v6  ;;  %v5511_v18 = vpop.permute.xlu0 %229  ;;  %v1120_v26 = vmax.f32 %v750_v36, 0.0 }
  0xd3   :  { %9345 = vst [vmem:[#allocation141_spill] sm:$0xff] %v5505_v42  ;;  %v670_v8 = vmul.f32 %v5243_v9, %v504_v48  ;;  %v5515_v19 = vsub.f32 %v5265_v63, %v2862_v10  ;;  %v9348_v0 = vrot.slane %v5478_v37, 1  ;;  %v9349_v14 = vrot.slane %v5277_v35, 1 }
  0xd4   :  { %9346 = vst [vmem:[#allocation142_spill] sm:$0xff] %v5507_v30  ;;  %v5522_v31 = vmul.f32 %v1111_v39, %v1111_v39  ;;  %v768_v61 = vmul.f32 %v5162_v45, %v602_v54  ;;  %v467_v34 = vsel %vm385_vm1, %v5007_v20, %v5245_v51  ;;  %1566 = vrot.lane.b32.xlu1 %v5169_v7, %s4399_s0 }
  0xd5   :  { %9347 = vst [vmem:[#allocation143_spill] sm:$0xff] %v5515_v19  ;;  %v2864_v2 = vsel %vm2783_vm0, %v9349_v14, %v9348_v0  ;;  %v5532_v10 = vmul.f32 %v1102_v1, %v1102_v1  ;;  %v5534_v59 = vmul.f32 %v759_v56, %v593_v16  ;;  %v5536_v42 = vmul.f32 %v750_v36, %v584_v58  ;;  %v5547_v14 = vpop.permute.xlu1 %235  ;;  %v5556_v36 = vld [vmem:[#allocation2 + $0xe0] sm:$0xff] }
  0xd6   :  { %9350 = vst [vmem:[#allocation144_spill] sm:$0xff] %v5522_v31  ;;  %v1147_v0 = vmax.f32 %v777_v21, 0.0  ;;  %307 = vrot.lane.b32.xlu0 %v5169_v7, %s4397_s22  ;;  %v5540_v45 = vmul.f32 %v1129_v53, %v1129_v53  ;;  %v679_v39 = vmul.f32 %v5243_v9, %v513_v62  ;;  %v466_v20 = vsel %vm385_vm1, %v4968_v25, %v5247_v55  ;;  %v5549_v1 = vpop.permute.xlu0 %233  ;;  %v5605_v31 = vld [vmem:[#allocation2 + $0x170] sm:$0xff]  ;;  %v9378_v15 = vld [vmem:[#allocation135_spill] sm:$0xff] }
  0xd7   :  { %9351 = vst [vmem:[#allocation145_spill] sm:$0xff] %v5532_v10  ;;  %9352 = vst [vmem:[#allocation146_spill] sm:$0xff] %v5534_v59  ;;  %v5552_v16 = vsub.f32 %v5277_v35, %v2864_v2  ;;  %v5554_v58 = vmul.f32 %v1120_v26, %v1120_v26  ;;  %v894_v56 = vmul.f32 %v777_v21, %v611_v46  ;;  %v1040_v7 = vmax.f32 %v670_v8, 0.0  ;;  %v4123_v2 = vld [vmem:[#allocation2 + $0x98] sm:$0xff] }
  0xd8   :  { %9353 = vst [vmem:[#allocation147_spill] sm:$0xff] %v5536_v42  ;;  %9354 = vst [vmem:[#allocation148_spill] sm:$0xff] %v5540_v45  ;;  %v531_v53 = vsub.f32 %v5556_v36, %v467_v34  ;;  %v5559_v6 = vmul.f32 %v768_v61, %v602_v54  ;;  %v1138_v45 = vmax.f32 %v768_v61, 0.0  ;;  %1592 = vrot.lane.b32.xlu1 %v5182_v32, %s4399_s0  ;;  %v9358_v25 = vsub.s32 5, %v5088_v23 }
  0xd9   :  { %9355 = vst [vmem:[#allocation149_spill] sm:$0xff] %v5552_v16  ;;  %9356 = vst [vmem:[#allocation150_spill] sm:$0xff] %v5554_v58  ;;  %v9360_v26 = vsub.s32 3, %v5088_v23  ;;  %v1264_v21 = vmul.f32 %v1147_v0, %v1147_v0  ;;  %v522_v58 = vsub.f32 %v4123_v2, %v466_v20  ;;  %v469_v54 = vsel %vm385_vm1, %v5051_v28, %v5287_v4  ;;  %v5588_v20 = vpop.permute.xlu1 %239 }
  0xda   :  { %9357 = vst [vmem:[#allocation151_spill] sm:$0xff] %v5559_v6  ;;  %v5566_v59 = vrot.slane %v5358_v17, %v9358_v25  ;;  %333 = vrot.lane.b32.xlu0 %v5182_v32, %s4397_s22  ;;  %v9362_v61 = vsub.s32 4, %v5088_v23  ;;  %v1049_v25 = vmax.f32 %v679_v39, 0.0  ;;  %v787_v6 = vmul.f32 %v670_v8, %v504_v48  ;;  %9367 = vst [vmem:[#allocation158_spill] sm:$0xff] %v5605_v31 }
  0xdb   :  { %v5571_v46 = vrot.slane %v5358_v17, %v9360_v26  ;;  %v468_v0 = vsel %vm385_vm1, %v5005_v52, %v5289_v40  ;;  %v5590_v26 = vpop.permute.xlu0 %237  ;;  %v5594_v32 = vsel %vm1010_vm2, %v894_v56, 0.0  ;;  %v1157_v42 = vmul.f32 %v1040_v7, %v1040_v7 }
  0xdc   :  { %9359 = vst [vmem:[#allocation152_spill] sm:$0xff] %v5566_v59  ;;  %v5582_v34 = vrot.slane %v5358_v17, %v9362_v61  ;;  %9364 = vst [vmem:[#allocation155_spill] sm:$0xff] %v5594_v32  ;;  %v697_v61 = vmul.f32 %v5243_v9, %v531_v53  ;;  %v471_v48 = vsel %vm385_vm1, %v5079_v22, %v5337_v5  ;;  %1618 = vrot.lane.b32.xlu1 %v5207_v27, %s4399_s0  ;;  %v5701_v59 = vld [vmem:[#allocation2 + $0x10] sm:$0xff] }
  0xdd   :  { %9361 = vst [vmem:[#allocation153_spill] sm:$0xff] %v5571_v46  ;;  %v5601_v8 = vmul.f32 %v1138_v45, %v1138_v45  ;;  %v5603_v52 = vmul.f32 %v679_v39, %v513_v62  ;;  %v549_v10 = vsub.f32 %v5605_v31, %v469_v54  ;;  %v470_v56 = vsel %vm385_vm1, %v5049_v44, %v5339_v38  ;;  %v5618_v45 = vld [vmem:[#allocation2 + $0x128] sm:$0xff]  ;;  %v4132_v46 = vld [vmem:[#allocation2 + $0xa0] sm:$0xff] }
  0xde   :  { %9363 = vst [vmem:[#allocation154_spill] sm:$0xff] %v5582_v34  ;;  %v5615_v7 = vsel %vm1010_vm2, %v1264_v21, 0.0  ;;  %v688_v22 = vmul.f32 %v5243_v9, %v522_v58  ;;  %9369 = vst [vmem:[#allocation160_spill] sm:$0xff] %v5618_v45  ;;  %v540_v62 = vsub.f32 %v5618_v45, %v468_v0  ;;  %v473_v39 = vsel %vm385_vm1, %v5116_v49, %v5391_v57  ;;  %v4126_v21 = vld [vmem:[#allocation2 + $0x200] sm:$0xff]  ;;  %v4135_v31 = vld [vmem:[#allocation2 + $0x368] sm:$0x7] }
  0xdf   :  { %9365 = vst [vmem:[#allocation156_spill] sm:$0xff] %v5601_v8  ;;  %9366 = vst [vmem:[#allocation157_spill] sm:$0xff] %v5603_v52  ;;  %359 = vrot.lane.b32.xlu0 %v5207_v27, %s4397_s22  ;;  %v5627_v44 = vmul.f32 %v1049_v25, %v1049_v25  ;;  %v5630_v54 = vadd.f32 %v787_v6, %v5362_v41  ;;  %v5632_v28 = vsub.f32 %v4126_v21, %v471_v48  ;;  %v5636_v32 = vpop.permute.xlu0 %241  ;;  %v4127_v41 = vld [vmem:[#allocation2 + $0x1b8] sm:$0xff]  ;;  %v4128_v21 = vld [vmem:[#allocation2 + $0x290] sm:$0xff] }
  0xe0   :  { %9368 = vst [vmem:[#allocation159_spill] sm:$0xff] %v5615_v7  ;;  %v5634_v7 = vpop.permute.xlu1 %243  ;;  %v9371_v0 = vsub.s32 6, %v5088_v23  ;;  %v5644_v49 = vadd.f32 %v1157_v42, %v5371_v50  ;;  %v5646_v27 = vmul.f32 %v697_v61, %v531_v53  ;;  %v1067_v25 = vmax.f32 %v697_v61, 0.0  ;;  %1438 = vrot.lane.b32.xlu1 %v4123_v2, %s4399_s0  ;;  %v9377_v50 = vld [vmem:[#allocation94_spill] sm:$0xff]  ;;  %v4130_v52 = vld [vmem:[#allocation2 + $0x248] sm:$0xff]  ;;  %9382 = vst [vmem:[#allocation135_spill] sm:$0xff] %v5701_v59 }
  0xe1   :  { %9370 = vst [vmem:[#allocation161_spill] sm:$0xff] %v5627_v44  ;;  %v5648_v6 = vsub.f32 %v4127_v41, %v470_v56  ;;  %v715_v48 = vmul.f32 %v5243_v9, %v549_v10  ;;  %v5651_v30 = vsub.f32 %v4128_v21, %v473_v39  ;;  %v1058_v42 = vmax.f32 %v688_v22, 0.0  ;;  %v4129_v56 = vld [vmem:[#allocation2 + $0x90] sm:$0xff]  ;;  %v9376_v21 = vld [vmem:[#allocation130_spill] sm:$0xff] }
  0xe2   :  { %v5641_v8 = vrot.slane %v5358_v17, %v9371_v0  ;;  %9373 = vst [vmem:[#allocation163_spill] sm:$0xff] %v5646_v27  ;;  %v472_v0 = vsel %vm385_vm1, %v5077_v3, %v5393_v60  ;;  %v706_v53 = vmul.f32 %v5243_v9, %v540_v62  ;;  %v451_v61 = vsel %vm385_vm1, %v5202_v24, %v5474_v29  ;;  %v3245_v27 = vld [vmem:[%s8865_s3 + $0x10] sm:$0xff] }
  0xe3   :  { %1412 = vrot.lane.b32.xlu0 %v4129_v56, %s4399_s0  ;;  %v9374_v39 = vsub.s32 5, %v5088_v23  ;;  %v733_v3 = vmul.f32 %v5243_v9, %v5632_v28  ;;  %v475_v2 = vsel %vm385_vm1, %v5157_v43, %v5436_v11  ;;  %v474_v24 = vsel %vm385_vm1, %v9377_v50, %v9376_v21  ;;  %v9379_v56 = vld [vmem:[#allocation102_spill] sm:$0xff]  ;;  %v5686_v19 = vpop.permute.xlu0 %245 }
  0xe4   :  { %9372 = vst [vmem:[#allocation162_spill] sm:$0xff] %v5641_v8  ;;  %v476_v16 = vsel %vm385_vm1, %v9379_v56, %v9378_v15  ;;  %v5691_v44 = vmul.f32 %v1067_v25, %v1067_v25  ;;  %v5693_v43 = vmul.f32 %v688_v22, %v522_v58  ;;  %v724_v50 = vmul.f32 %v5243_v9, %v5648_v6 }
  0xe5   :  { %v5668_v41 = vrot.slane %v5133_v33, %v9374_v39  ;;  %v5684_v39 = vpop.permute.xlu1 %247  ;;  %v1085_v8 = vmax.f32 %v715_v48, 0.0  ;;  %v751_v56 = vmul.f32 %v5243_v9, %v5651_v30  ;;  %v505_v34 = vsub.f32 %v5701_v59, %v451_v61  ;;  %1464 = vrot.lane.b32.xlu1 %v4132_v46, %s4399_s0 }
  0xe6   :  { %9380 = vst [vmem:[#allocation130_spill] sm:$0xff] %v5691_v44  ;;  %9381 = vst [vmem:[#allocation94_spill] sm:$0xff] %v5693_v43  ;;  %v9383_v58 = vsub.s32 7, %v5088_v23  ;;  %v1076_v25 = vmax.f32 %v706_v53, 0.0  ;;  %v4133_v44 = vld [vmem:[#allocation2 + $0x320] sm:$0xff]  ;;  %v612_v45 = vsub.f32 %v4135_v31, %v476_v16  ;;  %v5712_v35 = vmul.f32 %v1058_v42, %v1058_v42  ;;  %v9388_v16 = vld [vmem:[#allocation108_spill] sm:$0xff] }
  0xe7   :  { %9375 = vst [vmem:[#allocation164_spill] sm:$0xff] %v5668_v41  ;;  %v5697_v41 = vsub.f32 %v4130_v52, %v472_v0  ;;  %v603_v52 = vsub.f32 %v4133_v44, %v475_v2  ;;  %v4134_v0 = vld [vmem:[#allocation2 + $0x2d8] sm:$0xff]  ;;  %3268 = vperm.xlu0 %4114, %v3245_v27   ;;  %v5714_v61 = vmul.f32 %v715_v48, %v549_v10  ;;  %v1103_v63 = vmax.f32 %v733_v3, 0.0 }
  0xe8   :  { %v5708_v22 = vrot.slane %v5358_v17, %v9383_v58  ;;  %v5710_v43 = vsub.f32 %v4134_v0, %v474_v24  ;;  %9385 = vst [vmem:[#allocation165_spill] sm:$0xff] %v5712_v35  ;;  %v5716_v59 = vmul.f32 %v706_v53, %v540_v62  ;;  %v5720_v17 = vpop.permute.xlu0 %249  ;;  %v1094_v58 = vmax.f32 %v724_v50, 0.0  ;;  %v9390_v48 = vld [vmem:[#allocation113_spill] sm:$0xff]  ;;  %v5735_v53 = vld [vmem:[#allocation2 + $0xa8] sm:$0xff] }
  0xe9   :  { %9386 = vst [vmem:[#allocation166_spill] sm:$0xff] %v5714_v61  ;;  %v5718_v37 = vpop.permute.xlu1 %251  ;;  %v742_v44 = vmul.f32 %v5243_v9, %v5697_v41  ;;  %v453_v31 = vsel %vm385_vm1, %v5247_v55, %v5509_v47  ;;  %v452_v10 = vsel %vm385_vm1, %v9388_v16, %v5511_v18  ;;  %v5732_v62 = vmul.f32 %v1085_v8, %v1085_v8 }
  0xea   :  { %9384 = vst [vmem:[#allocation102_spill] sm:$0xff] %v5708_v22  ;;  %9387 = vst [vmem:[#allocation167_spill] sm:$0xff] %v5716_v59  ;;  %v1121_v27 = vmax.f32 %v751_v56, 0.0  ;;  %v671_v42 = vmul.f32 %v9390_v48, %v505_v34  ;;  %1490 = vrot.lane.b32.xlu1 %v5735_v53, %s4399_s0  ;;  %v9392_v2 = vsub.s32 6, %v5088_v23  ;;  %v5744_v55 = vmul.f32 %v1076_v25, %v1076_v25 }
  0xeb   :  { %9389 = vst [vmem:[#allocation108_spill] sm:$0xff] %v5732_v62  ;;  %9391 = vst [vmem:[#allocation113_spill] sm:$0xff] %v5735_v53  ;;  %v769_v0 = vmul.f32 %v5243_v9, %v603_v52  ;;  %v760_v8 = vmul.f32 %v5243_v9, %v5710_v43  ;;  %v778_v16 = vmul.f32 %v5243_v9, %v612_v45  ;;  %v5750_v62 = vld [vmem:[#allocation2 + $0xb0] sm:$0xff] }
  0xec   :  { %v5742_v24 = vrot.slane %v5133_v33, %v9392_v2  ;;  %9394 = vst [vmem:[#allocation169_spill] sm:$0xff] %v5744_v55  ;;  %9395 = vst [vmem:[#allocation170_spill] sm:$0xff] %v5750_v62  ;;  %1516 = vrot.lane.b32.xlu0 %v5750_v62, %s4399_s0  ;;  %v5755_v61 = vmul.f32 %v733_v3, %v5632_v28  ;;  %v5758_v2 = vmul.f32 %v724_v50, %v5648_v6  ;;  %v4138_v55 = vld [vmem:[#allocation2 + $0x58] sm:$0xff] }
  0xed   :  { %v523_v25 = vsub.f32 %v4132_v46, %v453_v31  ;;  %v514_v59 = vsub.f32 %v4138_v55, %v452_v10  ;;  %v5760_v35 = vpop.permute.xlu1 %255  ;;  %v5764_v22 = vmul.f32 %v1103_v63, %v1103_v63  ;;  %v5766_v9 = vmul.f32 %v1094_v58, %v1094_v58  ;;  %v9402_v6 = vld [vmem:[#allocation66_spill] sm:$0xff] }
  0xee   :  { %9393 = vst [vmem:[#allocation168_spill] sm:$0xff] %v5742_v24  ;;  %9396 = vst [vmem:[#allocation171_spill] sm:$0xff] %v5755_v61  ;;  %v5762_v24 = vpop.permute.xlu0 %253  ;;  %v5769_v53 = vmul.f32 %v751_v56, %v5651_v30  ;;  %v1112_v62 = vmax.f32 %v742_v44, 0.0  ;;  %v5771_v28 = vmul.f32 %v1121_v27, %v1121_v27  ;;  %v1041_v3 = vmax.f32 %v671_v42, 0.0  ;;  %1542 = vrot.lane.b32.xlu1 %v9402_v6, %s4399_s0  ;;  %v9405_v10 = vld [vmem:[#allocation110_spill] sm:$0xff]  ;;  %v5810_v61 = vld [vmem:[#allocation2 + $0xe8] sm:$0xff] }
  0xef   :  { %9397 = vst [vmem:[#allocation172_spill] sm:$0xff] %v5758_v2  ;;  %9398 = vst [vmem:[#allocation173_spill] sm:$0xff] %v5764_v22  ;;  %v455_v46 = vsel %vm385_vm1, %v5289_v40, %v5547_v14  ;;  %v9403_v63 = vsub.s32 7, %v5088_v23  ;;  %v1139_v58 = vmax.f32 %v769_v0, 0.0  ;;  %v1130_v30 = vmax.f32 %v760_v8, 0.0  ;;  %v4147_v2 = vld [vmem:[#allocation2 + $0xd8] sm:$0xff] }
  0xf0   :  { %9399 = vst [vmem:[#allocation174_spill] sm:$0xff] %v5766_v9  ;;  %9400 = vst [vmem:[#allocation175_spill] sm:$0xff] %v5769_v53  ;;  %v1148_v56 = vmax.f32 %v778_v16, 0.0  ;;  %v454_v31 = vsel %vm385_vm1, %v5245_v51, %v5549_v1  ;;  %309 = vrot.lane.b32.xlu0 %v9405_v10, %s4397_s22  ;;  %v788_v40 = vmul.f32 %v671_v42, %v505_v34  ;;  %v5805_v34 = vld [vmem:[#allocation2 + $0x130] sm:$0xff] }
  0xf1   :  { %9401 = vst [vmem:[#allocation176_spill] sm:$0xff] %v5771_v28  ;;  %v5782_v50 = vrot.slane %v5133_v33, %v9403_v63  ;;  %v689_v27 = vmul.f32 %v9390_v48, %v523_v25  ;;  %v680_v55 = vmul.f32 %v9390_v48, %v514_v59  ;;  %v457_v33 = vsel %vm385_vm1, %v5339_v38, %v5588_v20  ;;  %v5796_v23 = vpop.permute.xlu1 %259  ;;  %v4146_v9 = vld [vmem:[#allocation2 + $0x370] sm:$0x7] }
  0xf2   :  { %v5798_v6 = vpop.permute.xlu0 %257  ;;  %v5801_v63 = vmul.f32 %v742_v44, %v5697_v41  ;;  %v5803_v51 = vmul.f32 %v1112_v62, %v1112_v62  ;;  %v895_v28 = vmul.f32 %v778_v16, %v612_v45  ;;  %v541_v42 = vsub.f32 %v5805_v34, %v455_v46  ;;  %1568 = vrot.lane.b32.xlu1 %v9405_v10, %s4399_s0  ;;  %v5824_v62 = vld [vmem:[#allocation2 + $0x1c0] sm:$0xff]  ;;  %v5844_v10 = vld [vmem:[#allocation2 + $0x178] sm:$0xff] }
  0xf3   :  { %9404 = vst [vmem:[#allocation66_spill] sm:$0xff] %v5782_v50  ;;  %v5808_v53 = vmul.f32 %v769_v0, %v603_v52  ;;  %v1158_v22 = vmul.f32 %v1041_v3, %v1041_v3  ;;  %v532_v38 = vsub.f32 %v5810_v61, %v454_v31  ;;  %v456_v41 = vsel %vm385_vm1, %v5287_v4, %v5590_v26  ;;  %v9412_v16 = vld [vmem:[#allocation111_spill] sm:$0xff] }
  0xf4   :  { %9406 = vst [vmem:[#allocation110_spill] sm:$0xff] %v5801_v63  ;;  %9407 = vst [vmem:[#allocation177_spill] sm:$0xff] %v5803_v51  ;;  %v5819_v45 = vmul.f32 %v1139_v58, %v1139_v58  ;;  %v5822_v44 = vmul.f32 %v760_v8, %v5710_v43  ;;  %v1265_v52 = vmul.f32 %v1148_v56, %v1148_v56  ;;  %335 = vrot.lane.b32.xlu0 %v9412_v16, %s4397_s22  ;;  %v5905_v63 = vld [vmem:[#allocation2 + $0x1a0] sm:$0xff] }
  0xf5   :  { %9408 = vst [vmem:[#allocation178_spill] sm:$0xff] %v5808_v53  ;;  %9411 = vst [vmem:[#allocation181_spill] sm:$0xff] %v5824_v62  ;;  %v5827_v0 = vsub.f32 %v5824_v62, %v457_v33  ;;  %v5831_v3 = vmul.f32 %v1130_v30, %v1130_v30  ;;  %v5834_v4 = vadd.f32 %v5630_v54, %v788_v40  ;;  %v1059_v46 = vmax.f32 %v689_v27, 0.0  ;;  %v5836_v31 = vpop.permute.xlu1 %263  ;;  %v4144_v53 = vld [vmem:[#allocation2 + $0x208] sm:$0xff] }
  0xf6   :  { %9409 = vst [vmem:[#allocation179_spill] sm:$0xff] %v5819_v45  ;;  %9410 = vst [vmem:[#allocation180_spill] sm:$0xff] %v5822_v44  ;;  %v1050_v58 = vmax.f32 %v680_v55, 0.0  ;;  %v5838_v43 = vpop.permute.xlu0 %261  ;;  %v5841_v8 = vsel %vm1010_vm2, %v895_v28, 0.0  ;;  %v707_v56 = vmul.f32 %v9390_v48, %v541_v42  ;;  %v5847_v33 = vsub.f32 %v5844_v10, %v456_v41  ;;  %1594 = vrot.lane.b32.xlu1 %v9412_v16, %s4399_s0 }
  0xf7   :  { %9413 = vst [vmem:[#allocation111_spill] sm:$0xff] %v5831_v3  ;;  %9414 = vst [vmem:[#allocation182_spill] sm:$0xff] %v5841_v8  ;;  %v459_v54 = vsel %vm385_vm1, %v5393_v60, %v5634_v7  ;;  %v5854_v30 = vadd.f32 %v5644_v49, %v1158_v22  ;;  %v5856_v40 = vmul.f32 %v689_v27, %v523_v25  ;;  %v5866_v41 = vsel %vm1010_vm2, %v1265_v52, 0.0  ;;  %v9419_v22 = vld [vmem:[#allocation114_spill] sm:$0xff]  ;;  %v4143_v27 = vld [vmem:[#allocation2 + $0x250] sm:$0xff] }
  0xf8   :  { %9415 = vst [vmem:[#allocation183_spill] sm:$0xff] %v5844_v10  ;;  %v698_v28 = vmul.f32 %v9390_v48, %v532_v38  ;;  %v458_v8 = vsel %vm385_vm1, %v5337_v5, %v5636_v32  ;;  %9417 = vst [vmem:[#allocation185_spill] sm:$0xff] %v5866_v41  ;;  %v5868_v45 = vmul.f32 %v680_v55, %v514_v59  ;;  %361 = vrot.lane.b32.xlu0 %v9419_v22, %s4397_s22  ;;  %v4145_v3 = vld [vmem:[#allocation2 + $0x2e0] sm:$0xff] }
  0xf9   :  { %9416 = vst [vmem:[#allocation184_spill] sm:$0xff] %v5856_v40  ;;  %v725_v60 = vmul.f32 %v9390_v48, %v5827_v0  ;;  %v461_v49 = vsel %vm385_vm1, %v9376_v21, %v5684_v39  ;;  %v5878_v5 = vmul.f32 %v1059_v46, %v1059_v46  ;;  %v5880_v25 = vmul.f32 %v1050_v58, %v1050_v58  ;;  %v5886_v55 = vpop.permute.xlu1 %267  ;;  %v4165_v10 = vld [vmem:[#allocation2 + $0x120] sm:$0xff] }
  0xfa   :  { %9418 = vst [vmem:[#allocation186_spill] sm:$0xff] %v5868_v45  ;;  %v577_v52 = vsub.f32 %v4143_v27, %v459_v54  ;;  %v463_v59 = vsel %vm385_vm1, %v9378_v15, %v5718_v37  ;;  %v5888_v16 = vpop.permute.xlu0 %265  ;;  %v1077_v41 = vmax.f32 %v707_v56, 0.0  ;;  %v716_v21 = vmul.f32 %v9390_v48, %v5847_v33  ;;  %v5896_v54 = vld [vmem:[#allocation2 + $0x198] sm:$0xff]  ;;  %1620 = vrot.lane.b32.xlu1 %v9419_v22, %s4399_s0 }
  0xfb   :  { %9420 = vst [vmem:[#allocation114_spill] sm:$0xff] %v5878_v5  ;;  %9421 = vst [vmem:[#allocation187_spill] sm:$0xff] %v5880_v25  ;;  %v568_v46 = vsub.f32 %v4144_v53, %v458_v8  ;;  %v460_v58 = vsel %vm385_vm1, %v5391_v57, %v5686_v19  ;;  %v5898_v27 = vmul.f32 %v707_v56, %v541_v42  ;;  %v1068_v15 = vmax.f32 %v698_v28, 0.0  ;;  %v4148_v56 = vld [vmem:[#allocation2 + $0x298] sm:$0xff] }
  0xfc   :  { %v5900_v44 = vsub.f32 %v4145_v3, %v461_v49  ;;  %v5907_v53 = vmul.f32 %v698_v28, %v532_v38  ;;  %v1095_v8 = vmax.f32 %v725_v60, 0.0  ;;  %v613_v57 = vsub.f32 %v4146_v9, %v463_v59  ;;  %1414 = vrot.lane.b32.xlu0 %v4147_v2, %s4399_s0  ;;  %v3246_v2 = vld [vmem:[%s8865_s3 + $0x18] sm:$0xff] }
  0xfd   :  { %9422 = vst [vmem:[#allocation188_spill] sm:$0xff] %v5898_v27  ;;  %v743_v3 = vmul.f32 %v9390_v48, %v577_v52  ;;  %v586_v49 = vsub.f32 %v4148_v56, %v460_v58  ;;  %v462_v22 = vsel %vm385_vm1, %v5436_v11, %v5720_v17  ;;  %v438_v38 = vsel %vm385_vm1, %v5474_v29, %v5762_v24  ;;  %v5920_v9 = vpop.permute.xlu1 %271 }
  0xfe   :  { %9423 = vst [vmem:[#allocation189_spill] sm:$0xff] %v5907_v53  ;;  %v5922_v28 = vpop.permute.xlu0 %269  ;;  %v5927_v59 = vmul.f32 %v1077_v41, %v1077_v41  ;;  %v1086_v58 = vmax.f32 %v716_v21, 0.0  ;;  %v734_v56 = vmul.f32 %v9390_v48, %v568_v46  ;;  %v439_v11 = vsel %vm385_vm1, %v5511_v18, %v5760_v35  ;;  %1440 = vrot.lane.b32.xlu1 %v5556_v36, %s4399_s0  ;;  %v4149_v18 = vld [vmem:[#allocation2 + $0x328] sm:$0xff] }
  0xff   :  { %v5934_v42 = vmul.f32 %v1068_v15, %v1068_v15  ;;  %v5937_v29 = vmul.f32 %v725_v60, %v5827_v0  ;;  %v761_v51 = vmul.f32 %v9390_v48, %v5900_v44  ;;  %v9427_v41 = vrot.slane %v5896_v54, 1 }
 0x100   :  { %9424 = vst [vmem:[#allocation190_spill] sm:$0xff] %v5927_v59  ;;  %v9428_v59 = vld [vmem:[#allocation125_spill] sm:$0xff]  ;;  %v779_v5 = vmul.f32 %v9390_v48, %v613_v57  ;;  %v604_v15 = vsub.f32 %v4149_v18, %v462_v22  ;;  %3273 = vperm.xlu0 %4114, %v3246_v2   ;;  %v9431_v60 = vrot.slane %v5905_v63, 1  ;;  %v5957_v40 = vmul.f32 %v1095_v8, %v1095_v8 }
 0x101   :  { %9425 = vst [vmem:[#allocation191_spill] sm:$0xff] %v5934_v42  ;;  %9426 = vst [vmem:[#allocation192_spill] sm:$0xff] %v5937_v29  ;;  %v9429_v27 = vrot.slane %v9428_v59, 1  ;;  %v5949_v42 = vld [vmem:[#allocation2 + $0x18] sm:$0xff]  ;;  %v9432_v29 = vrot.slane %v5445_v13, 1  ;;  %v1113_v25 = vmax.f32 %v743_v3, 0.0  ;;  %v5960_v62 = vpop.permute.xlu1 %275  ;;  %v5967_v2 = vmul.f32 %v1086_v58, %v1086_v58 }
 0x102   :  { %9430 = vst [vmem:[#allocation125_spill] sm:$0xff] %v5949_v42  ;;  %v506_v0 = vsub.f32 %v5949_v42, %v438_v38  ;;  %9433 = vst [vmem:[#allocation193_spill] sm:$0xff] %v5957_v40  ;;  %v5962_v22 = vpop.permute.xlu0 %273  ;;  %v5965_v38 = vmul.f32 %v716_v21, %v5847_v33  ;;  %v1104_v18 = vmax.f32 %v734_v56, 0.0  ;;  %v5972_v8 = vmul.f32 %v743_v3, %v577_v52  ;;  %v9439_v58 = vld [vmem:[#allocation119_spill] sm:$0xff] }
 0x103   :  { %v2878_v53 = vsel %vm2783_vm0, %v9429_v27, %v9427_v41  ;;  %v2880_v36 = vsel %vm2783_vm0, %v9432_v29, %v9431_v60  ;;  %v752_v27 = vmul.f32 %v9390_v48, %v586_v49  ;;  %v4151_v41 = vld [vmem:[#allocation2 + $0x60] sm:$0xff]  ;;  %9435 = vst [vmem:[#allocation195_spill] sm:$0xff] %v5967_v2  ;;  %v5974_v29 = vmul.f32 %v734_v56, %v568_v46  ;;  %v4152_v46 = vld [vmem:[#allocation2 + $0xf0] sm:$0xff] }
 0x104   :  { %v515_v45 = vsub.f32 %v4151_v41, %v439_v11  ;;  %9434 = vst [vmem:[#allocation194_spill] sm:$0xff] %v5965_v38  ;;  %v5970_v50 = vsub.f32 %v9428_v59, %v2878_v53  ;;  %9437 = vst [vmem:[#allocation197_spill] sm:$0xff] %v5972_v8  ;;  %v1131_v60 = vmax.f32 %v761_v51, 0.0  ;;  %v441_v11 = vsel %vm385_vm1, %v5549_v1, %v5796_v23  ;;  %v9447_v2 = vld [vmem:[#allocation113_spill] sm:$0xff] }
 0x105   :  { %9438 = vst [vmem:[#allocation198_spill] sm:$0xff] %v5974_v29  ;;  %1466 = vrot.lane.b32.xlu1 %v5810_v61, %s4399_s0  ;;  %v1149_v33 = vmax.f32 %v779_v5, 0.0  ;;  %v770_v21 = vmul.f32 %v9390_v48, %v604_v15  ;;  %v672_v41 = vmul.f32 %v9439_v58, %v506_v0  ;;  %v440_v52 = vsel %vm385_vm1, %v5509_v47, %v5798_v6  ;;  %v5992_v56 = vpop.permute.xlu1 %279 }
 0x106   :  { %9436 = vst [vmem:[#allocation196_spill] sm:$0xff] %v5970_v50  ;;  %1492 = vrot.lane.b32.xlu0 %v4152_v46, %s4399_s0  ;;  %v5989_v53 = vmul.f32 %v1113_v25, %v1113_v25  ;;  %v1122_v3 = vmax.f32 %v752_v27, 0.0  ;;  %v681_v1 = vmul.f32 %v9439_v58, %v515_v45  ;;  %9441 = vst [vmem:[#allocation199_spill] sm:$0xff] %v5992_v56  ;;  %v5994_v61 = vpop.permute.xlu0 %277 }
 0x107   :  { %v5997_v48 = vsub.f32 %v5445_v13, %v2880_v36  ;;  %v5999_v8 = vmul.f32 %v1104_v18, %v1104_v18  ;;  %v6002_v29 = vmul.f32 %v761_v51, %v5900_v44  ;;  %v6004_v47 = vmul.f32 %v752_v27, %v586_v49  ;;  %v6013_v36 = vld [vmem:[#allocation2 + $0xf8] sm:$0xff]  ;;  %v6022_v27 = vld [vmem:[#allocation2 + $0x1a8] sm:$0xff] }
 0x108   :  { %9440 = vst [vmem:[#allocation119_spill] sm:$0xff] %v5989_v53  ;;  %v533_v40 = vsub.f32 %v4152_v46, %v441_v11  ;;  %v6006_v25 = vmul.f32 %v1131_v60, %v1131_v60  ;;  %v896_v53 = vmul.f32 %v779_v5, %v613_v57  ;;  %v524_v38 = vsub.f32 %v9447_v2, %v440_v52  ;;  %v4154_v57 = vld [vmem:[#allocation2 + $0x100] sm:$0xff] }
 0x109   :  { %9442 = vst [vmem:[#allocation200_spill] sm:$0xff] %v5997_v48  ;;  %9443 = vst [vmem:[#allocation201_spill] sm:$0xff] %v5999_v8  ;;  %v443_v50 = vsel %vm385_vm1, %v5590_v26, %v5836_v31  ;;  %1518 = vrot.lane.b32.xlu1 %v6013_v36, %s4399_s0  ;;  %v1266_v51 = vmul.f32 %v1149_v33, %v1149_v33  ;;  %v1140_v44 = vmax.f32 %v770_v21, 0.0  ;;  %v1042_v49 = vmax.f32 %v672_v41, 0.0  ;;  %v6028_v60 = vpop.permute.xlu1 %283  ;;  %v6034_v46 = vld [vmem:[#allocation2 + $0x180] sm:$0xff] }
 0x10a   :  { %9444 = vst [vmem:[#allocation202_spill] sm:$0xff] %v6002_v29  ;;  %9445 = vst [vmem:[#allocation203_spill] sm:$0xff] %v6004_v47  ;;  %v442_v5 = vsel %vm385_vm1, %v5547_v14, %v5838_v43  ;;  %1544 = vrot.lane.b32.xlu0 %v4154_v57, %s4399_s0  ;;  %v6024_v2 = vmul.f32 %v1122_v3, %v1122_v3  ;;  %v6026_v26 = vmul.f32 %v770_v21, %v604_v15  ;;  %v6030_v11 = vpop.permute.xlu0 %281 }
 0x10b   :  { %9446 = vst [vmem:[#allocation204_spill] sm:$0xff] %v6006_v25  ;;  %v1051_v18 = vmax.f32 %v681_v1, 0.0  ;;  %9450 = vst [vmem:[#allocation206_spill] sm:$0xff] %v6028_v60  ;;  %v699_v52 = vmul.f32 %v9439_v58, %v533_v40  ;;  %v551_v14 = vsub.f32 %v6034_v46, %v443_v50  ;;  %v445_v3 = vsel %vm385_vm1, %v5636_v32, %v5886_v55  ;;  %v9453_v25 = vld [vmem:[#allocation8_spill] sm:$0xff] }
 0x10c   :  { %9448 = vst [vmem:[#allocation113_spill] sm:$0xff] %v6024_v2  ;;  %9449 = vst [vmem:[#allocation205_spill] sm:$0xff] %v6026_v26  ;;  %v444_v15 = vsel %vm385_vm1, %v5588_v20, %v5888_v16  ;;  %v6046_v21 = vsel %vm1010_vm2, %v896_v53, 0.0  ;;  %v789_v57 = vmul.f32 %v672_v41, %v506_v0  ;;  %v690_v33 = vmul.f32 %v9439_v58, %v524_v38  ;;  %v6049_v26 = vld [vmem:[#allocation2 + $0x138] sm:$0xff]  ;;  %v6063_v0 = vld [vmem:[#allocation2 + $0x210] sm:$0xff] }
 0x10d   :  { %9451 = vst [vmem:[#allocation207_spill] sm:$0xff] %v6034_v46  ;;  %9452 = vst [vmem:[#allocation208_spill] sm:$0xff] %v6046_v21  ;;  %v542_v50 = vsub.f32 %v6049_v26, %v442_v5  ;;  %311 = vrot.lane.b32.xlu1 %v9453_v25, %s4397_s22  ;;  %v6055_v32 = vsel %vm1010_vm2, %v1266_v51, 0.0  ;;  %v6057_v29 = vmul.f32 %v1140_v44, %v1140_v44  ;;  %v6066_v53 = vld [vmem:[#allocation2 + $0x1c8] sm:$0xff]  ;;  %v6073_v44 = vpop.permute.xlu1 %287  ;;  %v1069_v21 = vmax.f32 %v699_v52, 0.0 }
 0x10e   :  { %9454 = vst [vmem:[#allocation8_spill] sm:$0xff] %v6055_v32  ;;  %v6059_v2 = vmul.f32 %v681_v1, %v515_v45  ;;  %v1159_v20 = vmul.f32 %v1042_v49, %v1042_v49  ;;  %1570 = vrot.lane.b32.xlu0 %v9453_v25, %s4399_s0  ;;  %9457 = vst [vmem:[#allocation211_spill] sm:$0xff] %v6063_v0  ;;  %v569_v41 = vsub.f32 %v6063_v0, %v445_v3  ;;  %v6075_v45 = vpop.permute.xlu0 %285  ;;  %v9462_v25 = vld [vmem:[#allocation136_spill] sm:$0xff] }
 0x10f   :  { %9455 = vst [vmem:[#allocation209_spill] sm:$0xff] %v6057_v29  ;;  %9458 = vst [vmem:[#allocation212_spill] sm:$0xff] %v6066_v53  ;;  %v560_v5 = vsub.f32 %v6066_v53, %v444_v15  ;;  %v447_v51 = vsel %vm385_vm1, %v5686_v19, %v5920_v9  ;;  %v9461_v1 = vrot.slane %v6022_v27, 1  ;;  %v9463_v49 = vrot.slane %v9462_v25, 1 }
 0x110   :  { %9456 = vst [vmem:[#allocation210_spill] sm:$0xff] %v6059_v2  ;;  %9459 = vst [vmem:[#allocation213_spill] sm:$0xff] %v6073_v44  ;;  %v6082_v3 = vmul.f32 %v1051_v18, %v1051_v18  ;;  %v717_v15 = vmul.f32 %v9439_v58, %v551_v14  ;;  %v446_v19 = vsel %vm385_vm1, %v5634_v7, %v5922_v28  ;;  %v1060_v47 = vmax.f32 %v690_v33, 0.0 }
 0x111   :  { %9460 = vst [vmem:[#allocation214_spill] sm:$0xff] %v6075_v45  ;;  %v2882_v32 = vsel %vm2783_vm0, %v9463_v49, %v9461_v1  ;;  %v6090_v29 = vadd.f32 %v5834_v4, %v789_v57  ;;  %v708_v8 = vmul.f32 %v9439_v58, %v542_v50  ;;  %v449_v18 = vsel %vm385_vm1, %v5720_v17, %v5960_v62  ;;  %v9465_v1 = vld [vmem:[#allocation10_spill] sm:$0xff] }
 0x112   :  { %9464 = vst [vmem:[#allocation136_spill] sm:$0xff] %v6082_v3  ;;  %337 = vrot.lane.b32.xlu1 %v9465_v1, %s4397_s22  ;;  %v6100_v49 = vadd.f32 %v5854_v30, %v1159_v20  ;;  %v6102_v48 = vmul.f32 %v699_v52, %v533_v40  ;;  %v6104_v7 = vmul.f32 %v690_v33, %v524_v38  ;;  %v4159_v4 = vld [vmem:[#allocation2 + $0x2a0] sm:$0xff]  ;;  %v4160_v17 = vld [vmem:[#allocation2 + $0x258] sm:$0xff]  ;;  %v6114_v40 = vpop.permute.xlu1 %291  ;;  %v6116_v38 = vpop.permute.xlu0 %289  ;;  %v1087_v52 = vmax.f32 %v717_v15, 0.0  ;;  %v4161_v20 = vld [vmem:[#allocation2 + $0x330] sm:$0xff] }
 0x113   :  { %v587_v57 = vsub.f32 %v4159_v4, %v447_v51  ;;  %1596 = vrot.lane.b32.xlu0 %v9465_v1, %s4399_s0  ;;  %v735_v0 = vmul.f32 %v9439_v58, %v569_v41  ;;  %v726_v3 = vmul.f32 %v9439_v58, %v560_v5  ;;  %v578_v2 = vsub.f32 %v4160_v17, %v446_v19  ;;  %v6125_v4 = vld [vmem:[#allocation2 + $0x1e0] sm:$0xff] }
 0x114   :  { %9466 = vst [vmem:[#allocation10_spill] sm:$0xff] %v6102_v48  ;;  %9467 = vst [vmem:[#allocation215_spill] sm:$0xff] %v6104_v7  ;;  %v425_v30 = vsel %vm385_vm1, %v5762_v24, %v5992_v56  ;;  %v6118_v33 = vmul.f32 %v1069_v21, %v1069_v21  ;;  %v6120_v51 = vsub.f32 %v4161_v20, %v449_v18  ;;  %v1078_v17 = vmax.f32 %v708_v8, 0.0  ;;  %v9473_v21 = vld [vmem:[#allocation117_spill] sm:$0xff]  ;;  %v6136_v18 = vld [vmem:[#allocation2 + $0x1e8] sm:$0xff] }
 0x115   :  { %9468 = vst [vmem:[#allocation216_spill] sm:$0xff] %v6114_v40  ;;  %9469 = vst [vmem:[#allocation217_spill] sm:$0xff] %v6116_v38  ;;  %v6123_v1 = vsub.f32 %v9462_v25, %v2882_v32  ;;  %v6127_v19 = vmul.f32 %v1060_v47, %v1060_v47  ;;  %v448_v24 = vsel %vm385_vm1, %v5684_v39, %v5962_v22  ;;  %v6139_v20 = vld [vmem:[#allocation2 + $0x20] sm:$0xff] }
 0x116   :  { %9470 = vst [vmem:[#allocation218_spill] sm:$0xff] %v6118_v33  ;;  %363 = vrot.lane.b32.xlu1 %v9473_v21, %s4397_s22  ;;  %v753_v32 = vmul.f32 %v9439_v58, %v587_v57  ;;  %9474 = vst [vmem:[#allocation117_spill] sm:$0xff] %v6139_v20  ;;  %v507_v47 = vsub.f32 %v6139_v20, %v425_v30  ;;  %v6149_v48 = vmul.f32 %v717_v15, %v551_v14  ;;  %v6152_v53 = vpop.permute.xlu1 %295  ;;  %v6154_v56 = vpop.permute.xlu0 %293 }
 0x117   :  { %9471 = vst [vmem:[#allocation219_spill] sm:$0xff] %v6123_v1  ;;  %9472 = vst [vmem:[#allocation220_spill] sm:$0xff] %v6127_v19  ;;  %v450_v1 = vsel %vm385_vm1, %v5718_v37, %v5994_v61  ;;  %1622 = vrot.lane.b32.xlu0 %v9473_v21, %s4399_s0  ;;  %v1105_v33 = vmax.f32 %v735_v0, 0.0  ;;  %v1096_v19 = vmax.f32 %v726_v3, 0.0  ;;  %v744_v7 = vmul.f32 %v9439_v58, %v578_v2  ;;  %v4163_v21 = vld [vmem:[#allocation2 + $0x2e8] sm:$0xff] }
 0x118   :  { %9475 = vst [vmem:[#allocation221_spill] sm:$0xff] %v6149_v48  ;;  %9476 = vst [vmem:[#allocation222_spill] sm:$0xff] %v6152_v53  ;;  %v6156_v30 = vmul.f32 %v1087_v52, %v1087_v52  ;;  %v6158_v42 = vmul.f32 %v708_v8, %v542_v50  ;;  %v771_v37 = vmul.f32 %v9439_v58, %v6120_v51  ;;  %v4164_v48 = vld [vmem:[#allocation2 + $0x378] sm:$0x7]  ;;  %v1123_v52 = vmax.f32 %v753_v32, 0.0  ;;  %v9484_v50 = vld [vmem:[#allocation160_spill] sm:$0xff] }
 0x119   :  { %9477 = vst [vmem:[#allocation223_spill] sm:$0xff] %v6154_v56  ;;  %v596_v20 = vsub.f32 %v4163_v21, %v448_v24  ;;  %v6162_v39 = vmul.f32 %v1078_v17, %v1078_v17  ;;  %v6164_v14 = vmul.f32 %v735_v0, %v569_v41  ;;  %v6166_v15 = vmul.f32 %v726_v3, %v560_v5  ;;  %v3247_v17 = vld [vmem:[%s8865_s3 + $0x20] sm:$0xff] }
 0x11a   :  { %9478 = vst [vmem:[#allocation224_spill] sm:$0xff] %v6156_v30  ;;  %9479 = vst [vmem:[#allocation225_spill] sm:$0xff] %v6158_v42  ;;  %v614_v46 = vsub.f32 %v4164_v48, %v450_v1  ;;  %1416 = vrot.lane.b32.xlu1 %v4165_v10, %s4399_s0  ;;  %v9483_v30 = vld [vmem:[#allocation122_spill] sm:$0xff]  ;;  %v9485_v0 = vrot.slane %v6125_v4, 1  ;;  %v9486_v41 = vrot.slane %v5896_v54, 1  ;;  %v9487_v48 = vrot.slane %v6136_v18, 1 }
 0x11b   :  { %9480 = vst [vmem:[#allocation226_spill] sm:$0xff] %v6162_v39  ;;  %9481 = vst [vmem:[#allocation227_spill] sm:$0xff] %v6164_v14  ;;  %v673_v8 = vmul.f32 %v9483_v30, %v507_v47  ;;  %1442 = vrot.lane.b32.xlu0 %v9484_v50, %s4399_s0  ;;  %v9488_v10 = vrot.slane %v5905_v63, 1  ;;  %v6185_v1 = vmul.f32 %v1105_v33, %v1105_v33  ;;  %v1114_v50 = vmax.f32 %v744_v7, 0.0  ;;  %v6191_v14 = vpop.permute.xlu1 %299  ;;  %v4178_v42 = vld [vmem:[#allocation2 + $0x338] sm:$0xff] }
 0x11c   :  { %9482 = vst [vmem:[#allocation228_spill] sm:$0xff] %v6166_v15  ;;  %v2896_v5 = vsel %vm2783_vm0, %v9486_v41, %v9485_v0  ;;  %v6187_v24 = vmul.f32 %v1096_v19, %v1096_v19  ;;  %v6189_v21 = vmul.f32 %v753_v32, %v587_v57  ;;  %9492 = vst [vmem:[#allocation230_spill] sm:$0xff] %v6191_v14  ;;  %v6193_v15 = vpop.permute.xlu0 %297  ;;  %v1141_v39 = vmax.f32 %v771_v37, 0.0 }
 0x11d   :  { %v2898_v3 = vsel %vm2783_vm0, %v9488_v10, %v9487_v48  ;;  %9489 = vst [vmem:[#allocation122_spill] sm:$0xff] %v6185_v1  ;;  %9493 = vst [vmem:[#allocation231_spill] sm:$0xff] %v6193_v15  ;;  %v762_v0 = vmul.f32 %v9439_v58, %v596_v20  ;;  %v427_v41 = vsel %vm385_vm1, %v5798_v6, %v6028_v60  ;;  %v6213_v10 = vld [vmem:[#allocation2 + $0x1f0] sm:$0xff]  ;;  %v1043_v6 = vmax.f32 %v673_v8, 0.0 }
 0x11e   :  { %9490 = vst [vmem:[#allocation160_spill] sm:$0xff] %v6187_v24  ;;  %9491 = vst [vmem:[#allocation229_spill] sm:$0xff] %v6189_v21  ;;  %v426_v33 = vsel %vm385_vm1, %v5760_v35, %v6030_v11  ;;  %v6204_v57 = vmul.f32 %v744_v7, %v578_v2  ;;  %v780_v19 = vmul.f32 %v9439_v58, %v614_v46  ;;  %3278 = vperm.xlu1 %4113, %v3247_v17   ;;  %v9499_v7 = vld [vmem:[#allocation170_spill] sm:$0xff] }
 0x11f   :  { %v6208_v32 = vsub.f32 %v5896_v54, %v2896_v5  ;;  %v6211_v48 = vsub.f32 %v5905_v63, %v2898_v3  ;;  %v6215_v21 = vmul.f32 %v1123_v52, %v1123_v52  ;;  %v429_v35 = vsel %vm385_vm1, %v5838_v43, %v6073_v44  ;;  %1468 = vrot.lane.b32.xlu0 %v5805_v34, %s4399_s0  ;;  %v6227_v5 = vld [vmem:[#allocation2 + $0x68] sm:$0xff]  ;;  %v4167_v58 = vld [vmem:[#allocation2 + $0x140] sm:$0xff] }
 0x120   :  { %9494 = vst [vmem:[#allocation232_spill] sm:$0xff] %v6204_v57  ;;  %v6224_v2 = vmul.f32 %v1114_v50, %v1114_v50  ;;  %v525_v17 = vsub.f32 %v9499_v7, %v427_v41  ;;  %v516_v52 = vsub.f32 %v6227_v5, %v426_v33  ;;  %v428_v3 = vsel %vm385_vm1, %v5796_v23, %v6075_v45 }
 0x121   :  { %9495 = vst [vmem:[#allocation233_spill] sm:$0xff] %v6208_v32  ;;  %9496 = vst [vmem:[#allocation234_spill] sm:$0xff] %v6211_v48  ;;  %v6238_v34 = vmul.f32 %v771_v37, %v6120_v51  ;;  %v6240_v43 = vmul.f32 %v1141_v39, %v1141_v39  ;;  %v1132_v50 = vmax.f32 %v762_v0, 0.0  ;;  %v790_v41 = vmul.f32 %v673_v8, %v507_v47  ;;  %v6252_v51 = vpop.permute.xlu1 %303 }
 0x122   :  { %9497 = vst [vmem:[#allocation235_spill] sm:$0xff] %v6215_v21  ;;  %9498 = vst [vmem:[#allocation236_spill] sm:$0xff] %v6224_v2  ;;  %v6234_v21 = vpop.permute.xlu0 %301  ;;  %v1150_v7 = vmax.f32 %v780_v19, 0.0  ;;  %v6242_v2 = vsub.f32 %v4167_v58, %v429_v35  ;;  %v431_v23 = vsel %vm385_vm1, %v5888_v16, %v6114_v40  ;;  %v430_v33 = vsel %vm385_vm1, %v5836_v31, %v6116_v38  ;;  %v4174_v38 = vld [vmem:[#allocation2 + $0x2a8] sm:$0xff] }
 0x123   :  { %9500 = vst [vmem:[#allocation170_spill] sm:$0xff] %v6234_v21  ;;  %9501 = vst [vmem:[#allocation237_spill] sm:$0xff] %v6238_v34  ;;  %1494 = vrot.lane.b32.xlu1 %v6049_v26, %s4399_s0  ;;  %v1160_v47 = vmul.f32 %v1043_v6, %v1043_v6  ;;  %v897_v39 = vmul.f32 %v780_v19, %v614_v46  ;;  %v534_v37 = vsub.f32 %v6013_v36, %v428_v3  ;;  %v6275_v19 = vld [vmem:[#allocation2 + $0x1d0] sm:$0xff] }
 0x124   :  { %9502 = vst [vmem:[#allocation238_spill] sm:$0xff] %v6240_v43  ;;  %9503 = vst [vmem:[#allocation239_spill] sm:$0xff] %v6252_v51  ;;  %1520 = vrot.lane.b32.xlu0 %v4167_v58, %s4399_s0  ;;  %v9504_v8 = vrot.slane %v6213_v10, 1  ;;  %v9505_v16 = vrot.slane %v6022_v27, 1  ;;  %v6263_v43 = vmul.f32 %v762_v0, %v596_v20  ;;  %v691_v31 = vmul.f32 %v9483_v30, %v525_v17  ;;  %v6278_v58 = vld [vmem:[#allocation2 + $0x188] sm:$0xff] }
 0x125   :  { %v682_v34 = vmul.f32 %v9483_v30, %v516_v52  ;;  %v433_v26 = vsel %vm385_vm1, %v5922_v28, %v6152_v53  ;;  %v6273_v46 = vmul.f32 %v1132_v50, %v1132_v50  ;;  %v561_v6 = vsub.f32 %v6275_v19, %v431_v23 }
 0x126   :  { %v2900_v35 = vsel %vm2783_vm0, %v9505_v16, %v9504_v8  ;;  %9506 = vst [vmem:[#allocation240_spill] sm:$0xff] %v6263_v43  ;;  %v6271_v36 = vpop.permute.xlu0 %1408  ;;  %v6281_v20 = vsub.f32 %v6278_v58, %v430_v33  ;;  %v432_v0 = vsel %vm385_vm1, %v5886_v55, %v6154_v56  ;;  %v6288_v28 = vadd.f32 %v6090_v29, %v790_v41  ;;  %v4170_v8 = vld [vmem:[#allocation2 + $0x148] sm:$0xff]  ;;  %v6303_v29 = vld [vmem:[#allocation2 + $0x260] sm:$0xff] }
 0x127   :  { %9507 = vst [vmem:[#allocation241_spill] sm:$0xff] %v6273_v46  ;;  %v1267_v3 = vmul.f32 %v1150_v7, %v1150_v7  ;;  %v709_v50 = vmul.f32 %v9483_v30, %v6242_v2  ;;  %1546 = vrot.lane.b32.xlu1 %v4170_v8, %s4399_s0  ;;  %v6294_v23 = vsub.f32 %v6022_v27, %v2900_v35  ;;  %v6300_v16 = vsel %vm1010_vm2, %v897_v39, 0.0  ;;  %v6310_v46 = vld [vmem:[#allocation2 + $0x218] sm:$0xff] }
 0x128   :  { %v6297_v33 = vadd.f32 %v6100_v49, %v1160_v47  ;;  %9509 = vst [vmem:[#allocation243_spill] sm:$0xff] %v6300_v16  ;;  %v700_v55 = vmul.f32 %v9483_v30, %v534_v37  ;;  %9510 = vst [vmem:[#allocation244_spill] sm:$0xff] %v6303_v29  ;;  %v579_v41 = vsub.f32 %v6303_v29, %v433_v26  ;;  %313 = vrot.lane.b32.xlu0 %v9428_v59, %s4397_s22  ;;  %v1435_v47 = vpop.permute.xlu1 %1434 }
 0x129   :  { %9508 = vst [vmem:[#allocation242_spill] sm:$0xff] %v6294_v23  ;;  %v6308_v7 = vmul.f32 %v691_v31, %v525_v17  ;;  %v1061_v8 = vmax.f32 %v691_v31, 0.0  ;;  %v1052_v35 = vmax.f32 %v682_v34, 0.0  ;;  %v570_v49 = vsub.f32 %v6310_v46, %v432_v0 }
 0x12a   :  { %v1461_v39 = vpop.permute.xlu0 %1460  ;;  %v727_v16 = vmul.f32 %v9483_v30, %v561_v6  ;;  %v718_v43 = vmul.f32 %v9483_v30, %v6281_v20  ;;  %v435_v26 = vsel %vm385_vm1, %v5962_v22, %v6191_v14  ;;  %v6323_v31 = vsel %vm1010_vm2, %v1267_v3, 0.0  ;;  %v9513_v3 = vld [vmem:[#allocation137_spill] sm:$0xff] }
 0x12b   :  { %9511 = vst [vmem:[#allocation245_spill] sm:$0xff] %v6308_v7  ;;  %v1721_v17 = vsel %vm1642_vm3, %v1435_v47, %v1461_v39  ;;  %9512 = vst [vmem:[#allocation246_spill] sm:$0xff] %v6323_v31  ;;  %v6325_v53 = vmul.f32 %v682_v34, %v516_v52  ;;  %v1079_v0 = vmax.f32 %v709_v50, 0.0  ;;  %v434_v57 = vsel %vm385_vm1, %v5920_v9, %v6193_v15  ;;  %v4173_v15 = vld [vmem:[#allocation2 + $0x2f0] sm:$0xff] }
 0x12c   :  { %1572 = vrot.lane.b32.xlu1 %v9428_v59, %s4399_s0  ;;  %v1070_v1 = vmax.f32 %v700_v55, 0.0  ;;  %v745_v22 = vmul.f32 %v9483_v30, %v579_v41  ;;  %v1734_v14 = vsel %vm1642_vm3, %v6271_v36, %v1435_v47  ;;  %v1761_v31 = vsub.f32 %v9513_v3, %v1721_v17  ;;  %339 = vrot.lane.b32.xlu0 %v5445_v13, %s4397_s22  ;;  %v4175_v3 = vld [vmem:[#allocation2] sm:$0xff] }
 0x12d   :  { %v6340_v52 = vmul.f32 %v1061_v8, %v1061_v8  ;;  %v6342_v34 = vmul.f32 %v1052_v35, %v1052_v35  ;;  %v736_v9 = vmul.f32 %v9483_v30, %v570_v49  ;;  %v597_v59 = vsub.f32 %v4173_v15, %v435_v26 }
 0x12e   :  { %v6345_v56 = vpop.permute.xlu0 %1486  ;;  %v1097_v40 = vmax.f32 %v727_v16, 0.0  ;;  %v1088_v24 = vmax.f32 %v718_v43, 0.0  ;;  %v588_v23 = vsub.f32 %v4174_v38, %v434_v57  ;;  %v6351_v17 = vmul.f32 %v709_v50, %v6242_v2  ;;  %v9520_v57 = vld [vmem:[#allocation14_spill] sm:$0xff] }
 0x12f   :  { %9514 = vst [vmem:[#allocation137_spill] sm:$0xff] %v6340_v52  ;;  %v1708_v47 = vsel %vm1642_vm3, %v1461_v39, %v6345_v56  ;;  %v6353_v8 = vmul.f32 %v1079_v0, %v1079_v0  ;;  %v6355_v35 = vmul.f32 %v700_v55, %v534_v37  ;;  %v1760_v48 = vsub.f32 %v4175_v3, %v1734_v14  ;;  %v9521_v37 = vld [vmem:[#allocation135_spill] sm:$0xff]  ;;  %v6382_v0 = vpop.permute.xlu1 %3258 }
 0x130   :  { %9515 = vst [vmem:[#allocation247_spill] sm:$0xff] %v6351_v17  ;;  %1598 = vrot.lane.b32.xlu1 %v5445_v13, %s4399_s0  ;;  %v6359_v15 = vmul.f32 %v1070_v1, %v1070_v1  ;;  %v6361_v26 = vmul.f32 %v727_v16, %v561_v6  ;;  %v1115_v38 = vmax.f32 %v745_v22, 0.0  ;;  %v1927_v32 = vmul.f32 %v9520_v57, %v1761_v31 }
 0x131   :  { %9516 = vst [vmem:[#allocation248_spill] sm:$0xff] %v6353_v8  ;;  %9517 = vst [vmem:[#allocation249_spill] sm:$0xff] %v6355_v35  ;;  %365 = vrot.lane.b32.xlu0 %v9462_v25, %s4397_s22  ;;  %v1106_v2 = vmax.f32 %v736_v9, 0.0  ;;  %v763_v50 = vmul.f32 %v9483_v30, %v597_v59  ;;  %v437_v14 = vsel %vm385_vm1, %v5994_v61, %v6252_v51  ;;  %v9527_v61 = vld [vmem:[#allocation126_spill] sm:$0xff] }
 0x132   :  { %9518 = vst [vmem:[#allocation250_spill] sm:$0xff] %v6359_v15  ;;  %9519 = vst [vmem:[#allocation251_spill] sm:$0xff] %v6361_v26  ;;  %v1762_v13 = vsub.f32 %v9521_v37, %v1708_v47  ;;  %v6372_v1 = vpop.permute.xlu0 %1538  ;;  %v6374_v6 = vmul.f32 %v1097_v40, %v1097_v40  ;;  %v6377_v16 = vmul.f32 %v718_v43, %v6281_v20  ;;  %v9528_v47 = vld [vmem:[#allocation37_spill] sm:$0xff]  ;;  %v2297_v20 = vmax.f32 %v1927_v32, 0.0  ;;  %v9536_v8 = vld [vmem:[#allocation158_spill] sm:$0xff] }
 0x133   :  { %v6379_v55 = vmul.f32 %v1088_v24, %v1088_v24  ;;  %v754_v39 = vmul.f32 %v9483_v30, %v588_v23  ;;  %v6384_v3 = vmul.f32 %v745_v22, %v579_v41  ;;  %v6386_v26 = vmul.f32 %v736_v9, %v570_v49  ;;  %v4176_v24 = vld [vmem:[#allocation2 + $0x380] sm:$0x7]  ;;  %v4177_v41 = vld [vmem:[#allocation2 + $0x168] sm:$0xff] }
 0x134   :  { %9522 = vst [vmem:[#allocation14_spill] sm:$0xff] %v6374_v6  ;;  %9523 = vst [vmem:[#allocation135_spill] sm:$0xff] %v6377_v16  ;;  %v1926_v51 = vmul.f32 %v9527_v61, %v1760_v48  ;;  %v3321_v37 = vmul.f32 %v6382_v0, %v9528_v47  ;;  %1624 = vrot.lane.b32.xlu1 %v9462_v25, %s4399_s0  ;;  %v6393_v40 = vmul.f32 %v1115_v38, %v1115_v38  ;;  %v9530_v6 = vld [vmem:[#allocation50_spill] sm:$0xff]  ;;  %v9532_v25 = vld [vmem:[#allocation133_spill] sm:$0xff] }
 0x135   :  { %9524 = vst [vmem:[#allocation252_spill] sm:$0xff] %v6379_v55  ;;  %9525 = vst [vmem:[#allocation253_spill] sm:$0xff] %v6384_v3  ;;  %v615_v43 = vsub.f32 %v4176_v24, %v437_v14  ;;  %v3322_v55 = vmul.f32 %v6382_v0, %v9530_v6  ;;  %1418 = vrot.lane.b32.xlu0 %v4177_v41, %s4399_s0  ;;  %v6398_v49 = vmul.f32 %v1106_v2, %v1106_v2  ;;  %v3248_v14 = vld [vmem:[%s8865_s3 + $0x28] sm:$0xff] }
 0x136   :  { %9526 = vst [vmem:[#allocation254_spill] sm:$0xff] %v6386_v26  ;;  %9529 = vst [vmem:[#allocation126_spill] sm:$0xff] %v6393_v40  ;;  %v1133_v22 = vmax.f32 %v763_v50, 0.0  ;;  %v436_v9 = vsel %vm385_vm1, %v5960_v62, %v6234_v21  ;;  %v1928_v38 = vmul.f32 %v9532_v25, %v1762_v13  ;;  %v1124_v24 = vmax.f32 %v754_v39, 0.0  ;;  %v9533_v40 = vld [vmem:[#allocation71_spill] sm:$0xff]  ;;  %v1565_v44 = vpop.permute.xlu0 %1564 }
 0x137   :  { %9531 = vst [vmem:[#allocation37_spill] sm:$0xff] %v6398_v49  ;;  %v3323_v3 = vmul.f32 %v6382_v0, %v9533_v40  ;;  %v3438_v41 = vmul.f32 %v3321_v37, %v9528_v47  ;;  %v3439_v2 = vmul.f32 %v3322_v55, %v9530_v6  ;;  %v1513_v49 = vpop.permute.xlu1 %1512  ;;  %v6412_v26 = vmul.f32 %v763_v50, %v597_v59 }
 0x138   :  { %v6414_v16 = vmul.f32 %v754_v39, %v588_v23  ;;  %v2296_v62 = vmax.f32 %v1926_v51, 0.0  ;;  %v2044_v21 = vmul.f32 %v1927_v32, %v1761_v31  ;;  %1444 = vrot.lane.b32.xlu1 %v9536_v8, %s4399_s0  ;;  %v6419_v17 = vmul.f32 %v9483_v30, %v615_v43  ;;  %v9540_v31 = vld [vmem:[#allocation83_spill] sm:$0xff] }
 0x139   :  { %9534 = vst [vmem:[#allocation50_spill] sm:$0xff] %v6412_v26  ;;  %v6421_v15 = vsub.f32 %v4178_v42, %v436_v9  ;;  %v2043_v47 = vmul.f32 %v1926_v51, %v1760_v48  ;;  %v2414_v45 = vmul.f32 %v2297_v20, %v2297_v20  ;;  %3283 = vperm.xlu0 %4114, %v3248_v14   ;;  %v3692_v50 = vmax.f32 %v3321_v37, 0.0  ;;  %v9541_v48 = vld [vmem:[#allocation183_spill] sm:$0xff]  ;;  %v9545_v14 = vld [vmem:[#allocation85_spill] sm:$0xff] }
 0x13a   :  { %9535 = vst [vmem:[#allocation133_spill] sm:$0xff] %v6414_v16  ;;  %9537 = vst [vmem:[#allocation71_spill] sm:$0xff] %v6419_v17  ;;  %v2045_v6 = vmul.f32 %v1928_v38, %v1762_v13  ;;  %v3555_v59 = vadd.f32 %v3439_v2, %v3438_v41  ;;  %v3693_v23 = vmax.f32 %v3322_v55, 0.0  ;;  %v6423_v39 = vmul.f32 %v1133_v22, %v1133_v22  ;;  %v1591_v41 = vpop.permute.xlu0 %1590 }
 0x13b   :  { %v6425_v32 = vmul.f32 %v1124_v24, %v1124_v24  ;;  %v3324_v8 = vmul.f32 %v6382_v0, %v9540_v31  ;;  %v3440_v26 = vmul.f32 %v3323_v3, %v9533_v40  ;;  %v2413_v16 = vmul.f32 %v2296_v62, %v2296_v62  ;;  %v6439_v20 = vpop.permute.xlu1 %305  ;;  %v9544_v40 = vld [vmem:[#allocation207_spill] sm:$0xff] }
 0x13c   :  { %9538 = vst [vmem:[#allocation158_spill] sm:$0xff] %v6423_v39  ;;  %v2160_v35 = vadd.f32 %v2044_v21, %v2043_v47  ;;  %v3694_v42 = vmax.f32 %v3323_v3, 0.0  ;;  %v3809_v9 = vmul.f32 %v3692_v50, %v3692_v50  ;;  %1470 = vrot.lane.b32.xlu1 %v9541_v48, %s4399_s0  ;;  %v6433_v51 = vmul.f32 %v6419_v17, %v615_v43  ;;  %v4194_v17 = vld [vmem:[#allocation2 + $0x60] sm:$0xff] }
 0x13d   :  { %9539 = vst [vmem:[#allocation255_spill] sm:$0xff] %v6425_v32  ;;  %v6437_v13 = vmul.f32 %v9483_v30, %v6421_v15  ;;  %v3556_v55 = vadd.f32 %v3555_v59, %v3440_v26  ;;  %v3810_v37 = vmul.f32 %v3693_v23, %v3693_v23  ;;  %1496 = vrot.lane.b32.xlu0 %v9544_v40, %s4399_s0  ;;  %v2298_v22 = vmax.f32 %v1928_v38, 0.0  ;;  %v9548_v23 = vld [vmem:[#allocation199_spill] sm:$0xff] }
 0x13e   :  { %9542 = vst [vmem:[#allocation83_spill] sm:$0xff] %v6433_v51  ;;  %v2530_v21 = vadd.f32 %v2414_v45, %v2413_v16  ;;  %v2161_v3 = vadd.f32 %v2160_v35, %v2045_v6  ;;  %v3325_v24 = vmul.f32 %v6382_v0, %v9545_v14  ;;  %v3441_v43 = vmul.f32 %v3324_v8, %v9540_v31  ;;  %v9546_v35 = vld [vmem:[#allocation117_spill] sm:$0xff]  ;;  %v1617_v39 = vpop.permute.xlu0 %1616 }
 0x13f   :  { %9543 = vst [vmem:[#allocation183_spill] sm:$0xff] %v6437_v13  ;;  %v3926_v2 = vadd.f32 %v3810_v37, %v3809_v9  ;;  %v1669_v30 = vsel %vm1642_vm3, %v6372_v1, %v1565_v44  ;;  %v1682_v26 = vsel %vm1642_vm3, %v1513_v49, %v6372_v1  ;;  %v3695_v62 = vmax.f32 %v3324_v8, 0.0  ;;  %v9547_v6 = vld [vmem:[#allocation125_spill] sm:$0xff] }
 0x140   :  { %v3811_v47 = vmul.f32 %v3694_v42, %v3694_v42  ;;  %v1695_v45 = vsel %vm1642_vm3, %v6345_v56, %v1513_v49  ;;  %v1764_v16 = vsub.f32 %v9546_v35, %v1682_v26  ;;  %1522 = vrot.lane.b32.xlu1 %v6278_v58, %s4399_s0  ;;  %v3557_v38 = vadd.f32 %v3556_v55, %v3441_v43  ;;  %v4179_v31 = vld [vmem:[#allocation2 + $0x190] sm:$0xff]  ;;  %v9549_v49 = vld [vmem:[#allocation98_spill] sm:$0xff]  ;;  %v4180_v58 = vld [vmem:[#allocation2 + $0x28] sm:$0xff] }
 0x141   :  { %v1763_v59 = vsub.f32 %v9547_v6, %v1695_v45  ;;  %v1656_v50 = vsel %vm1642_vm3, %v1565_v44, %v1591_v41  ;;  %v412_v1 = vsel %vm385_vm1, %v9548_v23, %v6439_v20  ;;  %1548 = vrot.lane.b32.xlu0 %v4179_v31, %s4399_s0  ;;  %v2415_v56 = vmul.f32 %v2298_v22, %v2298_v22  ;;  %v9550_v55 = vld [vmem:[#allocation153_spill] sm:$0xff]  ;;  %v9551_v44 = vld [vmem:[#allocation154_spill] sm:$0xff]  ;;  %v332_v45 = vpop.permute.xlu1 %331  ;;  %v9552_v35 = vld [vmem:[#allocation115_spill] sm:$0xff] }
 0x142   :  { %v3326_v8 = vmul.f32 %v6382_v0, %v9549_v49  ;;  %v3927_v42 = vadd.f32 %v3926_v2, %v3811_v47  ;;  %v1765_v9 = vsub.f32 %v4180_v58, %v1669_v30  ;;  %v3442_v48 = vmul.f32 %v3325_v24, %v9545_v14  ;;  %v4181_v43 = vld [vmem:[#allocation2 + $0x30] sm:$0xff] }
 0x143   :  { %v1929_v37 = vmul.f32 %v9550_v55, %v1763_v59  ;;  %v1930_v40 = vmul.f32 %v9551_v44, %v1764_v16  ;;  %v1766_v26 = vsub.f32 %v4181_v43, %v1656_v50  ;;  %v6473_v6 = vmul.f32 %v6382_v0, %v9552_v35  ;;  %v9553_v22 = vld [vmem:[#allocation116_spill] sm:$0xff]  ;;  %v9554_v50 = vld [vmem:[#allocation118_spill] sm:$0xff] }
 0x144   :  { %v6477_v23 = vmul.f32 %v6382_v0, %v9553_v22  ;;  %v3812_v2 = vmul.f32 %v3695_v62, %v3695_v62  ;;  %v508_v47 = vsub.f32 %v4180_v58, %v412_v1  ;;  %315 = vrot.lane.b32.xlu1 %v5896_v54, %s4397_s22  ;;  %v3558_v14 = vadd.f32 %v3557_v38, %v3442_v48  ;;  %v9555_v62 = vld [vmem:[#allocation152_spill] sm:$0xff]  ;;  %v9556_v38 = vld [vmem:[#allocation162_spill] sm:$0xff] }
 0x145   :  { %v3696_v30 = vmax.f32 %v3325_v24, 0.0  ;;  %v2046_v31 = vmul.f32 %v1929_v37, %v1763_v59  ;;  %v2299_v51 = vmax.f32 %v1929_v37, 0.0  ;;  %1574 = vrot.lane.b32.xlu0 %v5896_v54, %s4399_s0  ;;  %v6485_v32 = vmul.f32 %v6382_v0, %v9554_v50  ;;  %v9557_v54 = vld [vmem:[#allocation164_spill] sm:$0xff] }
 0x146   :  { %v3443_v60 = vmul.f32 %v3326_v8, %v9549_v49  ;;  %v3928_v52 = vadd.f32 %v3927_v42, %v3812_v2  ;;  %v1931_v1 = vmul.f32 %v9555_v62, %v1765_v9  ;;  %v2300_v7 = vmax.f32 %v1930_v40, 0.0  ;;  %v358_v2 = vpop.permute.xlu1 %357  ;;  %v4187_v62 = vld [vmem:[#allocation2 + $0x50] sm:$0xff] }
 0x147   :  { %v2162_v58 = vadd.f32 %v2161_v3, %v2046_v31  ;;  %v2416_v29 = vmul.f32 %v2299_v51, %v2299_v51  ;;  %v1932_v24 = vmul.f32 %v9556_v38, %v1766_v26  ;;  %v2531_v59 = vadd.f32 %v2530_v21, %v2415_v56 }
 0x148   :  { %v3444_v48 = vmul.f32 %v6473_v6, %v9552_v35  ;;  %v2047_v37 = vmul.f32 %v1930_v40, %v1764_v16  ;;  %v674_v44 = vmul.f32 %v9557_v54, %v508_v47  ;;  %341 = vrot.lane.b32.xlu1 %v5905_v63, %s4397_s22  ;;  %v3559_v0 = vadd.f32 %v3558_v14, %v3443_v60 }
 0x149   :  { %v3697_v49 = vmax.f32 %v3326_v8, 0.0  ;;  %v3813_v42 = vmul.f32 %v3696_v30, %v3696_v30  ;;  %v1643_v3 = vsel %vm1642_vm3, %v1591_v41, %v1617_v39  ;;  %1600 = vrot.lane.b32.xlu0 %v5905_v63, %s4399_s0  ;;  %v6501_v51 = vmul.f32 %v6477_v23, %v9553_v22  ;;  %v1437_v8 = vpop.permute.xlu0 %1436  ;;  %v4182_v30 = vld [vmem:[#allocation2 + $0x38] sm:$0xff] }
 0x14a   :  { %v2301_v21 = vmax.f32 %v1931_v1, 0.0  ;;  %v2163_v16 = vadd.f32 %v2162_v58, %v2047_v37  ;;  %v2532_v56 = vadd.f32 %v2531_v59, %v2416_v29  ;;  %v2048_v35 = vmul.f32 %v1931_v1, %v1765_v9  ;;  %v9558_v59 = vld [vmem:[#allocation36_spill] sm:$0xff] }
 0x14b   :  { %v3929_v40 = vadd.f32 %v3928_v52, %v3813_v42  ;;  %v2417_v31 = vmul.f32 %v2300_v7, %v2300_v7  ;;  %v2302_v60 = vmax.f32 %v1932_v24, 0.0  ;;  %v791_v14 = vmul.f32 %v674_v44, %v508_v47  ;;  %v9560_v42 = vld [vmem:[#allocation102_spill] sm:$0xff] }
 0x14c   :  { %v1767_v38 = vsub.f32 %v4182_v30, %v1643_v3  ;;  %v399_v41 = vsel %vm385_vm1, %v6439_v20, %v332_v45  ;;  %v386_v63 = vsel %vm385_vm1, %v332_v45, %v358_v2  ;;  %367 = vrot.lane.b32.xlu1 %v6022_v27, %s4397_s22  ;;  %v6510_v22 = vadd.f32 %v3559_v0, %v3444_v48  ;;  %v6523_v0 = vpop.permute.xlu1 %1410 }
 0x14d   :  { %v3814_v7 = vmul.f32 %v3697_v49, %v3697_v49  ;;  %v1044_v52 = vmax.f32 %v674_v44, 0.0  ;;  %1626 = vrot.lane.b32.xlu0 %v6022_v27, %s4399_s0  ;;  %v2418_v9 = vmul.f32 %v2301_v21, %v2301_v21  ;;  %v2164_v47 = vadd.f32 %v2163_v16, %v2048_v35  ;;  %9559 = vst [vmem:[#allocation207_spill] sm:$0xff] %v6523_v0  ;;  %v4183_v21 = vld [vmem:[#allocation2 + $0x1b0] sm:$0xff]  ;;  %v4184_v16 = vld [vmem:[#allocation2 + $0x40] sm:$0xff] }
 0x14e   :  { %v2533_v1 = vadd.f32 %v2532_v56, %v2417_v31  ;;  %v509_v58 = vsub.f32 %v4181_v43, %v399_v41  ;;  %v1747_v45 = vsel %vm1642_vm3, %v1617_v39, %v6271_v36  ;;  %v490_v48 = vsel %vm385_vm1, %v358_v2, %v9558_v59  ;;  %v6530_v43 = vld [vmem:[%s8863_s1 + $0x8] ss:$0 sm:$0xff]  ;;  %v9561_v39 = vld [vmem:[#allocation168_spill] sm:$0xff] }
 0x14f   :  { %v6515_v20 = vadd.f32 %v3929_v40, %v3814_v7  ;;  %v510_v37 = vsub.f32 %v4182_v30, %v386_v63  ;;  %v2049_v44 = vmul.f32 %v1932_v24, %v1766_v26  ;;  %v2419_v49 = vmul.f32 %v2302_v60, %v2302_v60  ;;  %v9562_v40 = vld [vmem:[#allocation66_spill] sm:$0xff]  ;;  %v6535_v24 = vpop.permute.xlu0 %1462  ;;  %v3249_v35 = vld [vmem:[%s8865_s3 + $0x30] sm:$0xff]  ;;  %v6547_v41 = vld [vmem:[%s8864_s2 + $0x8] ss:$0 sm:$0xff] }
 0x150   :  { %v907_v27 = vadd.f32 %v6288_v28, %v791_v14  ;;  %v1933_v3 = vmul.f32 %v9560_v42, %v1767_v38  ;;  %1420 = vrot.lane.b32.xlu1 %v4183_v21, %s4399_s0  ;;  %v1161_v36 = vmul.f32 %v1044_v52, %v1044_v52  ;;  %v675_v2 = vmul.f32 %v9561_v39, %v509_v58  ;;  %v4185_v28 = vld [vmem:[#allocation2 + $0x1b8] sm:$0xff] }
 0x151   :  { %v511_v56 = vsub.f32 %v4184_v16, %v490_v48  ;;  %v676_v26 = vmul.f32 %v9562_v40, %v510_v37  ;;  %1446 = vrot.lane.b32.xlu0 %v4185_v28, %s4399_s0  ;;  %v2534_v31 = vadd.f32 %v2533_v1, %v2418_v9  ;;  %v2165_v60 = vadd.f32 %v2164_v47, %v2049_v44  ;;  %v4186_v47 = vld [vmem:[#allocation2 + $0x48] sm:$0xff] }
 0x152   :  { %v1768_v14 = vsub.f32 %v4184_v16, %v1747_v45  ;;  %v1735_v30 = vsel %vm1642_vm3, %v6523_v0, %v1437_v8  ;;  %v792_v63 = vmul.f32 %v675_v2, %v509_v58  ;;  %v1045_v7 = vmax.f32 %v675_v2, 0.0  ;;  %v9563_v58 = vld [vmem:[#allocation181_spill] sm:$0xff] }
 0x153   :  { %v677_v52 = vmul.f32 %v6530_v43, %v511_v56  ;;  %v793_v59 = vmul.f32 %v676_v26, %v510_v37  ;;  %v2303_v48 = vmax.f32 %v1933_v3, 0.0  ;;  %v1046_v21 = vmax.f32 %v676_v26, 0.0 }
 0x154   :  { %v1722_v9 = vsel %vm1642_vm3, %v1437_v8, %v6535_v24  ;;  %v1769_v1 = vsub.f32 %v4186_v47, %v1735_v30  ;;  %3288 = vperm.xlu1 %4113, %v3249_v35   ;;  %v1277_v45 = vadd.f32 %v6297_v33, %v1161_v36  ;;  %v908_v44 = vadd.f32 %v907_v27, %v792_v63  ;;  %v6558_v35 = vpop.permute.xlu1 %3263  ;;  %v9566_v47 = vld [vmem:[#allocation34_spill] sm:$0xff] }
 0x155   :  { %v1162_v16 = vmul.f32 %v1045_v7, %v1045_v7  ;;  %v1047_v28 = vmax.f32 %v677_v52, 0.0  ;;  %1472 = vrot.lane.b32.xlu0 %v9563_v58, %s4399_s0  ;;  %v1934_v2 = vmul.f32 %v6547_v41, %v1768_v14  ;;  %v2050_v37 = vmul.f32 %v1933_v3, %v1767_v38  ;;  %v9564_v7 = vld [vmem:[#allocation212_spill] sm:$0xff]  ;;  %v9569_v58 = vld [vmem:[#allocation129_spill] sm:$0xff] }
 0x156   :  { %v1163_v29 = vmul.f32 %v1046_v21, %v1046_v21  ;;  %v1935_v26 = vmul.f32 %v9527_v61, %v1769_v1  ;;  %v794_v0 = vmul.f32 %v677_v52, %v511_v56  ;;  %v909_v8 = vadd.f32 %v908_v44, %v793_v59 }
 0x157   :  { %v1278_v42 = vadd.f32 %v1277_v45, %v1162_v16  ;;  %v1770_v30 = vsub.f32 %v4187_v62, %v1722_v9  ;;  %v3699_v33 = vmax.f32 %v6477_v23, 0.0  ;;  %v3700_v27 = vmax.f32 %v6485_v32, 0.0  ;;  %v9567_v45 = vld [vmem:[#allocation128_spill] sm:$0xff]  ;;  %v4188_v16 = vld [vmem:[#allocation2 + $0x1d8] sm:$0xff] }
 0x158   :  { %v2535_v36 = vadd.f32 %v2534_v31, %v2419_v49  ;;  %v2420_v63 = vmul.f32 %v2303_v48, %v2303_v48  ;;  %1498 = vrot.lane.b32.xlu1 %v9564_v7, %s4399_s0  ;;  %v9565_v38 = vmax.f32 %v6473_v6, 0.0  ;;  %v910_v21 = vadd.f32 %v909_v8, %v794_v0  ;;  %v6571_v31 = vpop.permute.xlu0 %1514 }
 0x159   :  { %v1164_v56 = vmul.f32 %v1047_v28, %v1047_v28  ;;  %v1279_v52 = vadd.f32 %v1278_v42, %v1163_v29  ;;  %1524 = vrot.lane.b32.xlu0 %v6275_v19, %s4399_s0  ;;  %v3561_v23 = vadd.f32 %v6510_v22, %v6501_v51  ;;  %v2166_v62 = vadd.f32 %v2165_v60, %v2050_v37  ;;  %v6586_v28 = vpop.permute.xlu1 %1488 }
 0x15a   :  { %v3815_v3 = vmul.f32 %v9565_v38, %v9565_v38  ;;  %v2304_v59 = vmax.f32 %v1934_v2, 0.0  ;;  %v2305_v49 = vmax.f32 %v1935_v26, 0.0  ;;  %v1936_v6 = vmul.f32 %v9520_v57, %v1770_v30  ;;  %v9570_v38 = vld [vmem:[#allocation157_spill] sm:$0xff] }
 0x15b   :  { %v1280_v9 = vadd.f32 %v1279_v52, %v1164_v56  ;;  %v3330_v0 = vmul.f32 %v6558_v35, %v9566_v47  ;;  %v2051_v29 = vmul.f32 %v1934_v2, %v1768_v14  ;;  %v2536_v42 = vadd.f32 %v2535_v36, %v2420_v63  ;;  %v9572_v52 = vld [vmem:[#allocation72_spill] sm:$0xff] }
 0x15c   :  { %v3931_v48 = vadd.f32 %v6515_v20, %v3815_v3  ;;  %v911_v19 = vadd.f32 %v910_v21, %v9567_v45  ;;  %v2052_v44 = vmul.f32 %v1935_v26, %v1769_v1  ;;  %1550 = vrot.lane.b32.xlu1 %v4188_v16, %s4399_s0  ;;  %v6582_v22 = vmul.f32 %v6437_v13, %v6421_v15  ;;  %v9571_v21 = vld [vmem:[#allocation51_spill] sm:$0xff]  ;;  %v4209_v13 = vld [vmem:[#allocation2 + $0xb0] sm:$0xff] }
 0x15d   :  { %v3446_v20 = vmul.f32 %v6485_v32, %v9554_v50  ;;  %v3816_v60 = vmul.f32 %v3699_v33, %v3699_v33  ;;  %317 = vrot.lane.b32.xlu0 %v6125_v4, %s4397_s22  ;;  %v2167_v14 = vadd.f32 %v2166_v62, %v2051_v29  ;;  %v2421_v1 = vmul.f32 %v2304_v59, %v2304_v59  ;;  %v308_v33 = vpop.permute.xlu0 %307 }
 0x15e   :  { %9568 = vst [vmem:[#allocation85_spill] sm:$0xff] %v6582_v22  ;;  %v1281_v2 = vadd.f32 %v1280_v9, %v9569_v58  ;;  %v2422_v37 = vmul.f32 %v2305_v49, %v2305_v49  ;;  %v3817_v26 = vmul.f32 %v3700_v27, %v3700_v27  ;;  %v2306_v36 = vmax.f32 %v1936_v6, 0.0 }
 0x15f   :  { %v3932_v8 = vadd.f32 %v3931_v48, %v3816_v60  ;;  %v3447_v15 = vmul.f32 %v3330_v0, %v9566_v47  ;;  %v3562_v63 = vadd.f32 %v3561_v23, %v3446_v20  ;;  %v2537_v7 = vadd.f32 %v2536_v42, %v2421_v1  ;;  %v9573_v23 = vld [vmem:[#allocation161_spill] sm:$0xff]  ;;  %v9575_v47 = vld [vmem:[#allocation86_spill] sm:$0xff]  ;;  %v9576_v42 = vld [vmem:[#allocation99_spill] sm:$0xff] }
 0x160   :  { %v912_v32 = vadd.f32 %v911_v19, %v9570_v38  ;;  %v2168_v50 = vadd.f32 %v2167_v14, %v2052_v44  ;;  %1576 = vrot.lane.b32.xlu1 %v6125_v4, %s4399_s0  ;;  %v2053_v3 = vmul.f32 %v1936_v6, %v1770_v30  ;;  %v3331_v56 = vmul.f32 %v6558_v35, %v9571_v21  ;;  %v9574_v48 = vld [vmem:[#allocation21_spill] sm:$0xff]  ;;  %v6616_v19 = vpop.permute.xlu1 %1540  ;;  %v9577_v44 = vld [vmem:[#allocation186_spill] sm:$0xff]  ;;  %v9578_v60 = vld [vmem:[#allocation120_spill] sm:$0xff] }
 0x161   :  { %v6599_v27 = vmul.f32 %v6558_v35, %v9572_v52  ;;  %v3701_v62 = vmax.f32 %v3330_v0, 0.0  ;;  %343 = vrot.lane.b32.xlu0 %v6136_v18, %s4397_s22  ;;  %v1282_v59 = vadd.f32 %v1281_v2, %v9573_v23  ;;  %v2538_v49 = vadd.f32 %v2537_v7, %v2422_v37  ;;  %v9579_v1 = vld [vmem:[#allocation121_spill] sm:$0xff] }
 0x162   :  { %v6606_v9 = vmul.f32 %v6558_v35, %v9574_v48  ;;  %v6610_v30 = vmul.f32 %v6558_v35, %v9575_v47  ;;  %v3933_v6 = vadd.f32 %v3932_v8, %v3817_v26  ;;  %v2423_v29 = vmul.f32 %v2306_v36, %v2306_v36  ;;  %v9580_v2 = vld [vmem:[#allocation9_spill] sm:$0xff] }
 0x163   :  { %v6614_v45 = vmul.f32 %v6558_v35, %v9576_v42  ;;  %v3563_v0 = vadd.f32 %v3562_v63, %v3447_v15  ;;  %v913_v16 = vadd.f32 %v912_v32, %v9577_v44  ;;  %v6619_v20 = vadd.f32 %v2168_v50, %v2053_v3  ;;  %v9581_v15 = vld [vmem:[#allocation187_spill] sm:$0xff]  ;;  %v334_v32 = vpop.permute.xlu0 %333  ;;  %v4191_v44 = vld [vmem:[#allocation2 + $0x1f8] sm:$0xff] }
 0x164   :  { %v6623_v14 = vmul.f32 %v6558_v35, %v9578_v60  ;;  %v6627_v58 = vmul.f32 %v6558_v35, %v9579_v1  ;;  %1602 = vrot.lane.b32.xlu1 %v6136_v18, %s4399_s0  ;;  %v6633_v37 = vmul.f32 %v6558_v35, %v9580_v2  ;;  %v3448_v26 = vmul.f32 %v3331_v56, %v9571_v21 }
 0x165   :  { %v3449_v8 = vmul.f32 %v6599_v27, %v9572_v52  ;;  %v3818_v36 = vmul.f32 %v3701_v62, %v3701_v62  ;;  %369 = vrot.lane.b32.xlu0 %v6213_v10, %s4397_s22  ;;  %v1283_v63 = vadd.f32 %v1282_v59, %v9581_v15  ;;  %v6641_v7 = vadd.f32 %v2538_v49, %v2423_v29  ;;  %v9582_v62 = vld [vmem:[#allocation210_spill] sm:$0xff] }
 0x166   :  { %v3450_v38 = vmul.f32 %v6606_v9, %v9574_v48  ;;  %v6647_v35 = vmul.f32 %v6610_v30, %v9575_v47  ;;  %v3564_v50 = vadd.f32 %v3563_v0, %v3448_v26  ;;  %v3702_v3 = vmax.f32 %v3331_v56, 0.0  ;;  %v6665_v56 = vld [vmem:[#allocation2 + $0x70] sm:$0xff]  ;;  %v4190_v47 = vld [vmem:[#allocation2 + $0x58] sm:$0xff]  ;;  %v6676_v0 = vpop.permute.xlu1 %1566 }
 0x167   :  { %v413_v21 = vsel %vm385_vm1, %v6030_v11, %v308_v33  ;;  %v1709_v52 = vsel %vm1642_vm3, %v6535_v24, %v6586_v28  ;;  %v914_v23 = vadd.f32 %v913_v16, %v9582_v62  ;;  %v6659_v59 = vmul.f32 %v6614_v45, %v9576_v42  ;;  %v9583_v16 = vld [vmem:[#allocation136_spill] sm:$0xff] }
 0x168   :  { %v6663_v49 = vmul.f32 %v6623_v14, %v9578_v60  ;;  %v517_v48 = vsub.f32 %v6665_v56, %v413_v21  ;;  %1628 = vrot.lane.b32.xlu1 %v6213_v10, %s4399_s0  ;;  %v6672_v11 = vmul.f32 %v6627_v58, %v9579_v1  ;;  %v3934_v24 = vadd.f32 %v3933_v6, %v3818_v36  ;;  %v3250_v6 = vld [vmem:[%s8865_s3 + $0x38] sm:$0xff] }
 0x169   :  { %v1771_v29 = vsub.f32 %v4190_v47, %v1709_v52  ;;  %v400_v42 = vsel %vm385_vm1, %v308_v33, %v334_v32  ;;  %1422 = vrot.lane.b32.xlu0 %v4191_v44, %s4399_s0  ;;  %v1284_v60 = vadd.f32 %v1283_v63, %v9583_v16  ;;  %v3703_v26 = vmax.f32 %v6599_v27, 0.0  ;;  %v6690_v52 = vld [vmem:[#allocation2 + $0x78] sm:$0xff]  ;;  %v360_v44 = vpop.permute.xlu0 %359  ;;  %v4193_v16 = vld [vmem:[#allocation2 + $0x200] sm:$0xff] }
 0x16a   :  { %v3704_v15 = vmax.f32 %v6606_v9, 0.0  ;;  %v683_v1 = vmul.f32 %v9557_v54, %v517_v48  ;;  %v6688_v33 = vmul.f32 %v6633_v37, %v9580_v2  ;;  %v3565_v36 = vadd.f32 %v3564_v50, %v3449_v8  ;;  %v1593_v2 = vpop.permute.xlu1 %1592 }
 0x16b   :  { %v3819_v21 = vmul.f32 %v3702_v3, %v3702_v3  ;;  %v518_v63 = vsub.f32 %v6690_v52, %v400_v42  ;;  %v915_v27 = vadd.f32 %v914_v23, %v6325_v53  ;;  %v3705_v9 = vmax.f32 %v6610_v30, 0.0 }
 0x16c   :  { %v1053_v47 = vmax.f32 %v683_v1, 0.0  ;;  %1448 = vrot.lane.b32.xlu1 %v4193_v16, %s4399_s0  ;;  %v1696_v8 = vsel %vm1642_vm3, %v6586_v28, %v6571_v31  ;;  %v1937_v50 = vmul.f32 %v9532_v25, %v1771_v29  ;;  %v1285_v53 = vadd.f32 %v1284_v60, %v6342_v34 }
 0x16d   :  { %v3935_v51 = vadd.f32 %v3934_v24, %v3819_v21  ;;  %3293 = vperm.xlu0 %4114, %v3250_v6   ;;  %v3820_v30 = vmul.f32 %v3703_v26, %v3703_v26  ;;  %v3821_v3 = vmul.f32 %v3704_v15, %v3704_v15  ;;  %v800_v23 = vmul.f32 %v683_v1, %v517_v48  ;;  %v9584_v24 = vld [vmem:[#allocation45_spill] sm:$0xff]  ;;  %v9585_v15 = vld [vmem:[#allocation211_spill] sm:$0xff] }
 0x16e   :  { %v3566_v42 = vadd.f32 %v3565_v36, %v3450_v38  ;;  %v684_v62 = vmul.f32 %v9561_v39, %v518_v63  ;;  %v387_v16 = vsel %vm385_vm1, %v334_v32, %v360_v44  ;;  %v491_v21 = vsel %vm385_vm1, %v360_v44, %v9584_v24  ;;  %v4195_v38 = vld [vmem:[#allocation2 + $0x208] sm:$0xff] }
 0x16f   :  { %v916_v28 = vadd.f32 %v915_v27, %v800_v23  ;;  %v1170_v22 = vmul.f32 %v1053_v47, %v1053_v47  ;;  %v1772_v6 = vsub.f32 %v4194_v17, %v1696_v8  ;;  %v1683_v34 = vsel %vm1642_vm3, %v6571_v31, %v6616_v19  ;;  %v4196_v27 = vld [vmem:[#allocation2 + $0x80] sm:$0xff]  ;;  %v4197_v17 = vld [vmem:[#allocation2 + $0x88] sm:$0xff] }
 0x170   :  { %1474 = vrot.lane.b32.xlu1 %v4195_v38, %s4399_s0  ;;  %v3936_v48 = vadd.f32 %v3935_v51, %v3820_v30  ;;  %v2054_v60 = vmul.f32 %v1937_v50, %v1771_v29  ;;  %v801_v32 = vmul.f32 %v684_v62, %v518_v63  ;;  %v1054_v26 = vmax.f32 %v684_v62, 0.0  ;;  %v6733_v30 = vld [vmem:[#allocation2 + $0x228] sm:$0xff] }
 0x171   :  { %1500 = vrot.lane.b32.xlu0 %v9585_v15, %s4399_s0  ;;  %v1286_v1 = vadd.f32 %v1285_v53, %v1170_v22  ;;  %v2307_v36 = vmax.f32 %v1937_v50, 0.0  ;;  %v519_v47 = vsub.f32 %v4196_v27, %v387_v16  ;;  %v520_v44 = vsub.f32 %v4197_v17, %v491_v21  ;;  %v4198_v53 = vld [vmem:[#allocation2 + $0x220] sm:$0xff]  ;;  %v9587_v15 = vld [vmem:[#allocation152_spill] sm:$0xff] }
 0x172   :  { %v3567_v8 = vadd.f32 %v3566_v42, %v6647_v35  ;;  %v3822_v23 = vmul.f32 %v3705_v9, %v3705_v9  ;;  %v1171_v31 = vmul.f32 %v1054_v26, %v1054_v26  ;;  %v1773_v24 = vsub.f32 %v6227_v5, %v1683_v34  ;;  %v1619_v9 = vpop.permute.xlu1 %1618 }
 0x173   :  { %v1938_v51 = vmul.f32 %v9550_v55, %v1772_v6  ;;  %v917_v29 = vadd.f32 %v916_v28, %v801_v32  ;;  %v685_v63 = vmul.f32 %v9562_v40, %v519_v47  ;;  %v686_v62 = vmul.f32 %v6530_v43, %v520_v44 }
 0x174   :  { %1526 = vrot.lane.b32.xlu1 %v6310_v46, %s4399_s0  ;;  %v3937_v22 = vadd.f32 %v3936_v48, %v3821_v3  ;;  %v2170_v50 = vadd.f32 %v6619_v20, %v2054_v60  ;;  %v1670_v35 = vsel %vm1642_vm3, %v6616_v19, %v6676_v0  ;;  %v1657_v5 = vsel %vm1642_vm3, %v6676_v0, %v1593_v2  ;;  %v9586_v20 = vld [vmem:[#allocation154_spill] sm:$0xff] }
 0x175   :  { %1552 = vrot.lane.b32.xlu0 %v4198_v53, %s4399_s0  ;;  %v2424_v42 = vmul.f32 %v2307_v36, %v2307_v36  ;;  %v1287_v46 = vadd.f32 %v1286_v1, %v1171_v31  ;;  %v802_v3 = vmul.f32 %v685_v63, %v519_v47  ;;  %v1055_v16 = vmax.f32 %v685_v63, 0.0  ;;  %v9588_v63 = vld [vmem:[#allocation162_spill] sm:$0xff] }
 0x176   :  { %v1939_v21 = vmul.f32 %v9586_v20, %v1773_v24  ;;  %v1056_v28 = vmax.f32 %v686_v62, 0.0  ;;  %v1774_v34 = vsub.f32 %v6665_v56, %v1670_v35  ;;  %v1775_v19 = vsub.f32 %v6690_v52, %v1657_v5  ;;  %v6746_v56 = vld [vmem:[#allocation2 + $0x230] sm:$0xff]  ;;  %v9589_v35 = vld [vmem:[#allocation207_spill] sm:$0xff] }
 0x177   :  { %v803_v38 = vmul.f32 %v686_v62, %v520_v44  ;;  %v918_v48 = vadd.f32 %v917_v29, %v802_v3  ;;  %v1172_v0 = vmul.f32 %v1055_v16, %v1055_v16  ;;  %v1644_v60 = vsel %vm1642_vm3, %v1593_v2, %v1619_v9  ;;  %v9591_v16 = vld [vmem:[#allocation102_spill] sm:$0xff] }
 0x178   :  { %319 = vrot.lane.b32.xlu1 %v6733_v30, %s4397_s22  ;;  %v3568_v32 = vadd.f32 %v3567_v8, %v6659_v59  ;;  %v2308_v26 = vmax.f32 %v1938_v51, 0.0  ;;  %v1940_v1 = vmul.f32 %v9587_v15, %v1774_v34  ;;  %v1776_v36 = vsub.f32 %v4196_v27, %v1644_v60  ;;  %v1439_v8 = vpop.permute.xlu1 %1438 }
 0x179   :  { %1578 = vrot.lane.b32.xlu0 %v6733_v30, %s4399_s0  ;;  %v2055_v52 = vmul.f32 %v1938_v51, %v1772_v6  ;;  %v919_v47 = vadd.f32 %v918_v48, %v803_v38  ;;  %v1173_v44 = vmul.f32 %v1056_v28, %v1056_v28  ;;  %v1288_v31 = vadd.f32 %v1287_v46, %v1172_v0  ;;  %v6758_v46 = vpop.permute.xlu0 %1412  ;;  %v9593_v48 = vld [vmem:[#allocation127_spill] sm:$0xff] }
 0x17a   :  { %v2540_v2 = vadd.f32 %v6641_v7, %v2424_v42  ;;  %v2309_v29 = vmax.f32 %v1939_v21, 0.0  ;;  %v1941_v62 = vmul.f32 %v9588_v63, %v1775_v19  ;;  %v1748_v59 = vsel %vm1642_vm3, %v1619_v9, %v9589_v35  ;;  %v4199_v35 = vld [vmem:[#allocation2 + $0x90] sm:$0xff] }
 0x17b   :  { %v3938_v27 = vadd.f32 %v3937_v22, %v3822_v23  ;;  %v2171_v5 = vadd.f32 %v2170_v50, %v2055_v52  ;;  %v2056_v53 = vmul.f32 %v1939_v21, %v1773_v24  ;;  %v1289_v3 = vadd.f32 %v1288_v31, %v1173_v44  ;;  %v6763_v23 = vld [vmem:[#allocation2 + $0x238] sm:$0xff]  ;;  %v9592_v24 = vld [vmem:[#allocation11_spill] sm:$0xff] }
 0x17c   :  { %345 = vrot.lane.b32.xlu1 %v6746_v56, %s4397_s22  ;;  %v9590_v6 = vmax.f32 %v6614_v45, 0.0  ;;  %v2425_v7 = vmul.f32 %v2308_v26, %v2308_v26  ;;  %v2310_v42 = vmax.f32 %v1940_v1, 0.0  ;;  %v1942_v28 = vmul.f32 %v9591_v16, %v1776_v36 }
 0x17d   :  { %1604 = vrot.lane.b32.xlu0 %v6746_v56, %s4399_s0  ;;  %v920_v22 = vadd.f32 %v919_v47, %v9592_v24  ;;  %v2057_v50 = vmul.f32 %v1940_v1, %v1774_v34  ;;  %v1777_v9 = vsub.f32 %v4197_v17, %v1748_v59  ;;  %v1736_v45 = vsel %vm1642_vm3, %v6758_v46, %v1439_v8  ;;  %v6778_v59 = vpop.permute.xlu0 %3268  ;;  %v9597_v24 = vld [vmem:[#allocation33_spill] sm:$0xff] }
 0x17e   :  { %v3823_v51 = vmul.f32 %v9590_v6, %v9590_v6  ;;  %v2541_v21 = vadd.f32 %v2540_v2, %v2425_v7  ;;  %v2426_v38 = vmul.f32 %v2309_v29, %v2309_v29  ;;  %v1290_v0 = vadd.f32 %v1289_v3, %v9593_v48  ;;  %v6776_v29 = vpop.permute.xlu1 %1464  ;;  %v4200_v48 = vld [vmem:[#allocation2 + $0x240] sm:$0xff] }
 0x17f   :  { %v2311_v60 = vmax.f32 %v1941_v62, 0.0  ;;  %v3569_v26 = vadd.f32 %v3568_v32, %v6663_v49  ;;  %v2172_v44 = vadd.f32 %v2171_v5, %v2056_v53  ;;  %v2058_v31 = vmul.f32 %v1941_v62, %v1775_v19  ;;  %v9595_v49 = vld [vmem:[#allocation94_spill] sm:$0xff]  ;;  %v9596_v53 = vld [vmem:[#allocation165_spill] sm:$0xff] }
 0x180   :  { %v3939_v52 = vadd.f32 %v3938_v27, %v3823_v51  ;;  %371 = vrot.lane.b32.xlu1 %v6763_v23, %s4397_s22  ;;  %v9594_v34 = vmax.f32 %v6623_v14, 0.0  ;;  %v2427_v1 = vmul.f32 %v2310_v42, %v2310_v42  ;;  %v2312_v47 = vmax.f32 %v1942_v28, 0.0 }
 0x181   :  { %v1778_v2 = vsub.f32 %v4199_v35, %v1736_v45  ;;  %1630 = vrot.lane.b32.xlu0 %v6763_v23, %s4399_s0  ;;  %v921_v19 = vadd.f32 %v920_v22, %v9595_v49  ;;  %v2173_v32 = vadd.f32 %v2172_v44, %v2057_v50  ;;  %v1943_v62 = vmul.f32 %v6547_v41, %v1777_v9  ;;  %v9599_v44 = vld [vmem:[#allocation114_spill] sm:$0xff] }
 0x182   :  { %v3824_v17 = vmul.f32 %v9594_v34, %v9594_v34  ;;  %v2059_v27 = vmul.f32 %v1942_v28, %v1776_v36  ;;  %v3708_v14 = vmax.f32 %v6627_v58, 0.0  ;;  %v2542_v5 = vadd.f32 %v2541_v21, %v2426_v38  ;;  %v4201_v28 = vld [vmem:[#allocation2 + $0x248] sm:$0xff] }
 0x183   :  { %v1291_v3 = vadd.f32 %v1290_v0, %v9596_v53  ;;  %v2428_v6 = vmul.f32 %v2311_v60, %v2311_v60  ;;  %v3570_v51 = vadd.f32 %v3569_v26, %v6672_v11  ;;  %v2174_v42 = vadd.f32 %v2173_v32, %v2058_v31  ;;  %v3251_v11 = vld [vmem:[%s8865_s3 + $0x40] sm:$0xff]  ;;  %v9598_v38 = vld [vmem:[#allocation184_spill] sm:$0xff]  ;;  %v4202_v32 = vld [vmem:[#allocation2 + $0x98] sm:$0xff] }
 0x184   :  { %v3940_v7 = vadd.f32 %v3939_v52, %v3824_v17  ;;  %v3339_v45 = vmul.f32 %v6778_v59, %v9597_v24  ;;  %1424 = vrot.lane.b32.xlu1 %v4200_v48, %s4399_s0  ;;  %v2543_v22 = vadd.f32 %v2542_v5, %v2427_v1  ;;  %v2429_v50 = vmul.f32 %v2312_v47, %v2312_v47  ;;  %v9600_v17 = vld [vmem:[#allocation54_spill] sm:$0xff]  ;;  %v1491_v1 = vpop.permute.xlu1 %1490  ;;  %v1517_v47 = vpop.permute.xlu0 %1516 }
 0x185   :  { %v1944_v36 = vmul.f32 %v9527_v61, %v1778_v2  ;;  %v1723_v58 = vsel %vm1642_vm3, %v1439_v8, %v6776_v29  ;;  %1450 = vrot.lane.b32.xlu0 %v4201_v28, %s4399_s0  ;;  %v3709_v21 = vmax.f32 %v6633_v37, 0.0  ;;  %v922_v0 = vadd.f32 %v921_v19, %v9598_v38  ;;  %v9604_v38 = vld [vmem:[#allocation22_spill] sm:$0xff] }
 0x186   :  { %v2175_v60 = vadd.f32 %v2174_v42, %v2059_v27  ;;  %v2313_v26 = vmax.f32 %v1943_v62, 0.0  ;;  %v3825_v52 = vmul.f32 %v3708_v14, %v3708_v14  ;;  %v1292_v31 = vadd.f32 %v1291_v3, %v9599_v44  ;;  %v9601_v14 = vld [vmem:[#allocation73_spill] sm:$0xff]  ;;  %v9602_v42 = vld [vmem:[#allocation215_spill] sm:$0xff] }
 0x187   :  { %v2544_v34 = vadd.f32 %v2543_v22, %v2428_v6  ;;  %v3340_v8 = vmul.f32 %v6778_v59, %v9600_v17  ;;  %v3571_v35 = vadd.f32 %v3570_v51, %v6688_v33  ;;  %v2060_v49 = vmul.f32 %v1943_v62, %v1777_v9  ;;  %v4203_v6 = vld [vmem:[#allocation2 + $0x250] sm:$0xff]  ;;  %v4204_v44 = vld [vmem:[#allocation2 + $0x258] sm:$0xff] }
 0x188   :  { %v1779_v5 = vsub.f32 %v4202_v32, %v1723_v58  ;;  %v3456_v37 = vmul.f32 %v3339_v45, %v9597_v24  ;;  %3298 = vperm.xlu1 %4113, %v3251_v11   ;;  %v3941_v19 = vadd.f32 %v3940_v7, %v3825_v52  ;;  %v2314_v53 = vmax.f32 %v1944_v36, 0.0  ;;  %v9603_v62 = vld [vmem:[#allocation220_spill] sm:$0xff] }
 0x189   :  { %v2545_v27 = vadd.f32 %v2544_v34, %v2429_v50  ;;  %v6807_v3 = vmul.f32 %v6778_v59, %v9601_v14  ;;  %1476 = vrot.lane.b32.xlu0 %v4203_v6, %s4399_s0  ;;  %v923_v48 = vadd.f32 %v922_v0, %v9602_v42  ;;  %v2176_v22 = vadd.f32 %v2175_v60, %v2060_v49  ;;  %v9606_v34 = vld [vmem:[#allocation245_spill] sm:$0xff] }
 0x18a   :  { %v2430_v33 = vmul.f32 %v2313_v26, %v2313_v26  ;;  %v2061_v9 = vmul.f32 %v1944_v36, %v1778_v2  ;;  %v1293_v51 = vadd.f32 %v1292_v31, %v9603_v62  ;;  %v3457_v24 = vmul.f32 %v3340_v8, %v9600_v17  ;;  %v6822_v26 = vpop.permute.xlu1 %1542  ;;  %v6829_v32 = vld [vmem:[#allocation2 + $0x270] sm:$0xff] }
 0x18b   :  { %v3572_v58 = vadd.f32 %v3571_v35, %v3456_v37  ;;  %v3710_v7 = vmax.f32 %v3339_v45, 0.0  ;;  %v3826_v28 = vmul.f32 %v3709_v21, %v3709_v21  ;;  %v1945_v11 = vmul.f32 %v9520_v57, %v1779_v5  ;;  %v310_v45 = vpop.permute.xlu0 %309  ;;  %v9605_v21 = vld [vmem:[#allocation244_spill] sm:$0xff]  ;;  %9607 = vst [vmem:[#allocation117_spill] sm:$0xff] %v6829_v32  ;;  %v9608_v37 = vld [vmem:[#allocation137_spill] sm:$0xff] }
 0x18c   :  { %v6817_v52 = vmul.f32 %v6778_v59, %v9604_v38  ;;  %1502 = vrot.lane.b32.xlu1 %v4204_v44, %s4399_s0  ;;  %v2546_v0 = vadd.f32 %v2545_v27, %v2430_v33  ;;  %v2431_v2 = vmul.f32 %v2314_v53, %v2314_v53  ;;  %v3458_v36 = vmul.f32 %v6807_v3, %v9601_v14  ;;  %v9609_v14 = vld [vmem:[#allocation87_spill] sm:$0xff]  ;;  %v9610_v62 = vld [vmem:[#allocation100_spill] sm:$0xff] }
 0x18d   :  { %v3573_v60 = vadd.f32 %v3572_v58, %v3457_v24  ;;  %1528 = vrot.lane.b32.xlu0 %v9605_v21, %s4399_s0  ;;  %v3942_v31 = vadd.f32 %v3941_v19, %v3826_v28  ;;  %v6827_v17 = vadd.f32 %v923_v48, %v9606_v34  ;;  %v3711_v35 = vmax.f32 %v3340_v8, 0.0  ;;  %v4205_v24 = vld [vmem:[#allocation2 + $0x268] sm:$0xff]  ;;  %v9615_v21 = vld [vmem:[#allocation206_spill] sm:$0xff] }
 0x18e   :  { %v3827_v49 = vmul.f32 %v3710_v7, %v3710_v7  ;;  %v6832_v27 = vadd.f32 %v1293_v51, %v9608_v37  ;;  %v2177_v53 = vadd.f32 %v2176_v22, %v2061_v9  ;;  %v6836_v6 = vmul.f32 %v6778_v59, %v9609_v14  ;;  %v9611_v22 = vld [vmem:[#allocation123_spill] sm:$0xff] }
 0x18f   :  { %v3574_v42 = vadd.f32 %v3573_v60, %v3458_v36  ;;  %v2062_v33 = vmul.f32 %v1945_v11, %v1779_v5  ;;  %v6840_v19 = vmul.f32 %v6778_v59, %v9610_v62  ;;  %v3459_v8 = vmul.f32 %v6817_v52, %v9604_v38  ;;  %v9614_v36 = vld [vmem:[#allocation12_spill] sm:$0xff]  ;;  %v4206_v37 = vld [vmem:[#allocation2 + $0xa0] sm:$0xff] }
 0x190   :  { %v3943_v48 = vadd.f32 %v3942_v31, %v3827_v49  ;;  %1554 = vrot.lane.b32.xlu1 %v4205_v24, %s4399_s0  ;;  %v2547_v51 = vadd.f32 %v2546_v0, %v2431_v2  ;;  %v2315_v58 = vmax.f32 %v1945_v11, 0.0  ;;  %v6847_v9 = vmul.f32 %v6778_v59, %v9611_v22  ;;  %v6857_v0 = vld [vmem:[#allocation2 + $0x278] sm:$0xff]  ;;  %v9613_v11 = vld [vmem:[#allocation124_spill] sm:$0xff]  ;;  %v1569_v31 = vpop.permute.xlu1 %1568 }
 0x191   :  { %v1710_v5 = vsel %vm1642_vm3, %v6776_v29, %v1491_v1  ;;  %321 = vrot.lane.b32.xlu0 %v6829_v32, %s4397_s22  ;;  %v3575_v7 = vadd.f32 %v3574_v42, %v3459_v8  ;;  %v3712_v28 = vmax.f32 %v6807_v3, 0.0  ;;  %v3828_v38 = vmul.f32 %v3711_v35, %v3711_v35  ;;  %9612 = vst [vmem:[#allocation125_spill] sm:$0xff] %v6857_v0  ;;  %v4207_v8 = vld [vmem:[#allocation2 + $0xa8] sm:$0xff] }
 0x192   :  { %v1697_v44 = vsel %vm1642_vm3, %v1491_v1, %v1517_v47  ;;  %v6861_v2 = vmul.f32 %v6778_v59, %v9613_v11  ;;  %v6865_v60 = vmul.f32 %v6778_v59, %v9614_v36  ;;  %v1684_v29 = vsel %vm1642_vm3, %v1517_v47, %v6822_v26  ;;  %v6873_v1 = vpop.permute.xlu0 %335 }
 0x193   :  { %v414_v3 = vsel %vm385_vm1, %v9615_v21, %v310_v45  ;;  %v6875_v34 = vadd.f32 %v2177_v53, %v2062_v33  ;;  %v3460_v35 = vmul.f32 %v6836_v6, %v9609_v14  ;;  %v3944_v49 = vadd.f32 %v3943_v48, %v3828_v38  ;;  %v4208_v21 = vld [vmem:[#allocation2 + $0xb8] sm:$0xff] }
 0x194   :  { %v1780_v59 = vsub.f32 %v4206_v37, %v1710_v5  ;;  %1580 = vrot.lane.b32.xlu1 %v6829_v32, %s4399_s0  ;;  %v2432_v42 = vmul.f32 %v2315_v58, %v2315_v58  ;;  %v3713_v47 = vmax.f32 %v6817_v52, 0.0  ;;  %v1781_v24 = vsub.f32 %v4207_v8, %v1697_v44  ;;  %v6887_v5 = vld [vmem:[#allocation2 + $0x280] sm:$0xff]  ;;  %v4211_v37 = vld [vmem:[#allocation2 + $0x288] sm:$0xff] }
 0x195   :  { %v526_v50 = vsub.f32 %v4208_v21, %v414_v3  ;;  %347 = vrot.lane.b32.xlu0 %v6857_v0, %s4397_s22  ;;  %v3576_v53 = vadd.f32 %v3575_v7, %v3460_v35  ;;  %v3829_v33 = vmul.f32 %v3712_v28, %v3712_v28  ;;  %v1782_v14 = vsub.f32 %v4209_v13, %v1684_v29  ;;  %v4210_v29 = vld [vmem:[#allocation2 + $0xc0] sm:$0xff] }
 0x196   :  { %v401_v48 = vsel %vm385_vm1, %v310_v45, %v6873_v1  ;;  %9616 = vst [vmem:[#allocation199_spill] sm:$0xff] %v6887_v5  ;;  %v3461_v52 = vmul.f32 %v6840_v19, %v9610_v62  ;;  %v3462_v58 = vmul.f32 %v6847_v9, %v9611_v22  ;;  %v6895_v38 = vmul.f32 %v6861_v2, %v9613_v11 }
 0x197   :  { %v3714_v7 = vmax.f32 %v6836_v6, 0.0  ;;  %v3715_v13 = vmax.f32 %v6840_v19, 0.0  ;;  %v3945_v28 = vadd.f32 %v3944_v49, %v3829_v33  ;;  %v1946_v44 = vmul.f32 %v9532_v25, %v1780_v59  ;;  %v1595_v6 = vpop.permute.xlu1 %1594 }
 0x198   :  { %v692_v45 = vmul.f32 %v9557_v54, %v526_v50  ;;  %1606 = vrot.lane.b32.xlu1 %v6857_v0, %s4399_s0  ;;  %v2548_v62 = vadd.f32 %v2547_v51, %v2432_v42  ;;  %v6905_v22 = vmul.f32 %v6865_v60, %v9614_v36  ;;  %v1947_v11 = vmul.f32 %v9550_v55, %v1781_v24 }
 0x199   :  { %v527_v3 = vsub.f32 %v4210_v29, %v401_v48  ;;  %373 = vrot.lane.b32.xlu0 %v6887_v5, %s4397_s22  ;;  %v3577_v19 = vadd.f32 %v3576_v53, %v3461_v52  ;;  %v3830_v35 = vmul.f32 %v3713_v47, %v3713_v47  ;;  %v1948_v49 = vmul.f32 %v9586_v20, %v1782_v14  ;;  %v362_v53 = vpop.permute.xlu0 %361 }
 0x19a   :  { %v1671_v51 = vsel %vm1642_vm3, %v6822_v26, %v1569_v31  ;;  %v3831_v8 = vmul.f32 %v3714_v7, %v3714_v7  ;;  %v6917_v33 = vmul.f32 %v3715_v13, %v3715_v13  ;;  %v2316_v0 = vmax.f32 %v1946_v44, 0.0 }
 0x19b   :  { %v3946_v48 = vadd.f32 %v3945_v28, %v3830_v35  ;;  %v1062_v32 = vmax.f32 %v692_v45, 0.0  ;;  %v2063_v47 = vmul.f32 %v1946_v44, %v1780_v59  ;;  %v2064_v52 = vmul.f32 %v1947_v11, %v1781_v24  ;;  %v3252_v59 = vld [vmem:[%s8865_s3 + $0x48] sm:$0xff] }
 0x19c   :  { %1632 = vrot.lane.b32.xlu1 %v6887_v5, %s4399_s0  ;;  %v6921_v20 = vsub.f32 %v4208_v21, %v1671_v51  ;;  %v693_v26 = vmul.f32 %v9561_v39, %v527_v3  ;;  %v6925_v42 = vadd.f32 %v3577_v19, %v3462_v58  ;;  %v2317_v7 = vmax.f32 %v1947_v11, 0.0  ;;  %v1621_v51 = vpop.permute.xlu1 %1620 }
 0x19d   :  { %1426 = vrot.lane.b32.xlu0 %v4211_v37, %s4399_s0  ;;  %v6927_v13 = vmul.f32 %v1948_v49, %v1782_v14  ;;  %v1658_v28 = vsel %vm1642_vm3, %v1569_v31, %v1595_v6  ;;  %v2318_v24 = vmax.f32 %v1948_v49, 0.0  ;;  %v809_v21 = vmul.f32 %v692_v45, %v526_v50  ;;  %v9617_v14 = vld [vmem:[#allocation35_spill] sm:$0xff]  ;;  %v4212_v31 = vld [vmem:[#allocation2 + $0x290] sm:$0xff] }
 0x19e   :  { %v1063_v44 = vmax.f32 %v693_v26, 0.0  ;;  %v388_v35 = vsel %vm385_vm1, %v6873_v1, %v362_v53  ;;  %v3947_v58 = vadd.f32 %v3946_v48, %v3831_v8  ;;  %v2433_v19 = vmul.f32 %v2316_v0, %v2316_v0  ;;  %v4213_v49 = vld [vmem:[#allocation2 + $0xc8] sm:$0xff]  ;;  %v4214_v45 = vld [vmem:[#allocation2 + $0xd0] sm:$0xff] }
 0x19f   :  { %v1179_v11 = vmul.f32 %v1062_v32, %v1062_v32  ;;  %v492_v37 = vsel %vm385_vm1, %v362_v53, %v9617_v14  ;;  %v810_v36 = vmul.f32 %v693_v26, %v527_v3  ;;  %v1784_v5 = vsub.f32 %v4210_v29, %v1658_v28 }
 0x1a0   :  { %1452 = vrot.lane.b32.xlu1 %v4212_v31, %s4399_s0  ;;  %v528_v50 = vsub.f32 %v4213_v49, %v388_v35  ;;  %v529_v39 = vsub.f32 %v4214_v45, %v492_v37  ;;  %v2179_v1 = vadd.f32 %v6875_v34, %v2063_v47  ;;  %v1949_v0 = vmul.f32 %v9587_v15, %v6921_v20  ;;  %v4215_v34 = vld [vmem:[#allocation2 + $0x298] sm:$0xff] }
 0x1a1   :  { %3303 = vperm.xlu0 %4114, %v3252_v59   ;;  %v1180_v32 = vmul.f32 %v1063_v44, %v1063_v44  ;;  %v1645_v8 = vsel %vm1642_vm3, %v1595_v6, %v1621_v51  ;;  %v2434_v48 = vmul.f32 %v2317_v7, %v2317_v7  ;;  %v925_v53 = vadd.f32 %v6827_v17, %v809_v21  ;;  %v6952_v7 = vpop.permute.xlu0 %1414  ;;  %v6954_v17 = vpop.permute.xlu1 %1440  ;;  %v4216_v21 = vld [vmem:[#allocation2 + $0x2a0] sm:$0xff] }
 0x1a2   :  { %v694_v3 = vmul.f32 %v9562_v40, %v528_v50  ;;  %v695_v29 = vmul.f32 %v6530_v43, %v529_v39  ;;  %v2549_v26 = vadd.f32 %v2548_v62, %v2433_v19  ;;  %v2435_v28 = vmul.f32 %v2318_v24, %v2318_v24 }
 0x1a3   :  { %v1295_v59 = vadd.f32 %v6832_v27, %v1179_v11  ;;  %v1785_v35 = vsub.f32 %v4213_v49, %v1645_v8  ;;  %v926_v47 = vadd.f32 %v925_v53, %v810_v36  ;;  %v1950_v44 = vmul.f32 %v9588_v63, %v1784_v5 }
 0x1a4   :  { %1478 = vrot.lane.b32.xlu1 %v4215_v34, %s4399_s0  ;;  %v811_v14 = vmul.f32 %v694_v3, %v528_v50  ;;  %v1064_v6 = vmax.f32 %v694_v3, 0.0  ;;  %v2319_v43 = vmax.f32 %v1949_v0, 0.0  ;;  %v1065_v24 = vmax.f32 %v695_v29, 0.0 }
 0x1a5   :  { %1504 = vrot.lane.b32.xlu0 %v4216_v21, %s4399_s0  ;;  %v1296_v62 = vadd.f32 %v1295_v59, %v1180_v32  ;;  %v1749_v27 = vsel %vm1642_vm3, %v1621_v51, %v6758_v46  ;;  %v812_v19 = vmul.f32 %v695_v29, %v529_v39  ;;  %v1951_v37 = vmul.f32 %v9591_v16, %v1785_v35  ;;  %v4217_v32 = vld [vmem:[#allocation2 + $0x2a8] sm:$0xff]  ;;  %v4218_v51 = vld [vmem:[#allocation2 + $0x2b0] sm:$0xff]  ;;  %v6968_v29 = vld [vmem:[#allocation2 + $0x2b8] sm:$0xff] }
 0x1a6   :  { %v927_v36 = vadd.f32 %v926_v47, %v811_v14  ;;  %v1181_v11 = vmul.f32 %v1064_v6, %v1064_v6  ;;  %v3948_v31 = vadd.f32 %v3947_v58, %v6917_v33  ;;  %v2180_v49 = vadd.f32 %v2179_v1, %v2064_v52  ;;  %v4219_v47 = vld [vmem:[#allocation2 + $0xd8] sm:$0xff]  ;;  %v6979_v6 = vpop.permute.xlu0 %3273 }
 0x1a7   :  { %v2550_v50 = vadd.f32 %v2549_v26, %v2434_v48  ;;  %v1737_v8 = vsel %vm1642_vm3, %v6952_v7, %v6954_v17  ;;  %v2320_v53 = vmax.f32 %v1950_v44, 0.0  ;;  %v1786_v39 = vsub.f32 %v4214_v45, %v1749_v27 }
 0x1a8   :  { %1530 = vrot.lane.b32.xlu1 %v4217_v32, %s4399_s0  ;;  %v928_v3 = vadd.f32 %v927_v36, %v812_v19  ;;  %v1297_v46 = vadd.f32 %v1296_v62, %v1181_v11  ;;  %v9618_v33 = vmax.f32 %v6847_v9, 0.0  ;;  %v9619_v58 = vmax.f32 %v6861_v2, 0.0  ;;  %v9620_v62 = vld [vmem:[#allocation131_spill] sm:$0xff] }
 0x1a9   :  { %1556 = vrot.lane.b32.xlu0 %v4218_v51, %s4399_s0  ;;  %v2066_v48 = vmul.f32 %v1949_v0, %v6921_v20  ;;  %v1182_v26 = vmul.f32 %v1065_v24, %v1065_v24  ;;  %v3579_v59 = vadd.f32 %v6925_v42, %v6895_v38  ;;  %v2436_v45 = vmul.f32 %v2319_v43, %v2319_v43  ;;  %v6988_v42 = vld [vmem:[#allocation2 + $0x2c0] sm:$0xff] }
 0x1aa   :  { %v3833_v52 = vmul.f32 %v9618_v33, %v9618_v33  ;;  %v3834_v1 = vmul.f32 %v9619_v58, %v9619_v58  ;;  %v2321_v34 = vmax.f32 %v1951_v37, 0.0  ;;  %v1787_v14 = vsub.f32 %v4219_v47, %v1737_v8  ;;  %v9623_v8 = vld [vmem:[#allocation163_spill] sm:$0xff] }
 0x1ab   :  { %v2181_v9 = vadd.f32 %v2180_v49, %v6927_v13  ;;  %v2067_v21 = vmul.f32 %v1950_v44, %v1784_v5  ;;  %v929_v27 = vadd.f32 %v928_v3, %v9620_v62  ;;  %v1298_v2 = vadd.f32 %v1297_v46, %v1182_v26  ;;  %v9621_v44 = vld [vmem:[#allocation38_spill] sm:$0xff]  ;;  %v6997_v49 = vpop.permute.xlu1 %1466  ;;  %v9625_v46 = vld [vmem:[#allocation55_spill] sm:$0xff] }
 0x1ac   :  { %323 = vrot.lane.b32.xlu1 %v6968_v29, %s4397_s22  ;;  %v3949_v20 = vadd.f32 %v3948_v31, %v3833_v52  ;;  %v2551_v0 = vadd.f32 %v2550_v50, %v2435_v28  ;;  %v2437_v24 = vmul.f32 %v2320_v53, %v2320_v53  ;;  %v1952_v38 = vmul.f32 %v6547_v41, %v1786_v39  ;;  %v9624_v53 = vld [vmem:[#allocation15_spill] sm:$0xff] }
 0x1ad   :  { %1582 = vrot.lane.b32.xlu0 %v6968_v29, %s4399_s0  ;;  %v2182_v43 = vadd.f32 %v2181_v9, %v2066_v48  ;;  %v9091_v13 = vrot.slane %v6733_v30, 1  ;;  %v2068_v5 = vmul.f32 %v1951_v37, %v1785_v35  ;;  %v3348_v19 = vmul.f32 %v6979_v6, %v9621_v44  ;;  %v121_v52 = vld [vmem:[#allocation2 + $0x2c8] sm:$0xff] }
 0x1ae   :  { %v9622_v36 = vmax.f32 %v6865_v60, 0.0  ;;  %v2552_v28 = vadd.f32 %v2551_v0, %v2436_v45  ;;  %v2438_v31 = vmul.f32 %v2321_v34, %v2321_v34  ;;  %v1953_v41 = vmul.f32 %v9527_v61, %v1787_v14  ;;  %v9627_v45 = vld [vmem:[#allocation74_spill] sm:$0xff] }
 0x1af   :  { %v2183_v50 = vadd.f32 %v2182_v43, %v2067_v21  ;;  %v930_v32 = vadd.f32 %v929_v27, %v9623_v8  ;;  %v1299_v3 = vadd.f32 %v1298_v2, %v9624_v53  ;;  %v7003_v35 = vmul.f32 %v6979_v6, %v9625_v46  ;;  %v9628_v21 = vld [vmem:[#allocation189_spill] sm:$0xff]  ;;  %v9629_v27 = vld [vmem:[#allocation130_spill] sm:$0xff]  ;;  %v9630_v43 = vld [vmem:[#allocation23_spill] sm:$0xff] }
 0x1b0   :  { %v3835_v11 = vmul.f32 %v9622_v36, %v9622_v36  ;;  %349 = vrot.lane.b32.xlu1 %v6988_v42, %s4397_s22  ;;  %v3580_v60 = vadd.f32 %v3579_v59, %v6905_v22  ;;  %v3950_v37 = vadd.f32 %v3949_v20, %v3834_v1  ;;  %v2553_v51 = vadd.f32 %v2552_v28, %v2437_v24  ;;  %v4220_v8 = vld [vmem:[#allocation2 + $0x1e0] sm:$0xff] }
 0x1b1   :  { %v2322_v33 = vmax.f32 %v1952_v38, 0.0  ;;  %1608 = vrot.lane.b32.xlu0 %v6988_v42, %s4399_s0  ;;  %v9626_v58 = vrot.slane %v6125_v4, 1  ;;  %v2184_v26 = vadd.f32 %v2183_v50, %v2068_v5  ;;  %v7017_v34 = vmul.f32 %v6979_v6, %v9627_v45 }
 0x1b2   :  { %v3465_v22 = vmul.f32 %v3348_v19, %v9621_v44  ;;  %v2069_v1 = vmul.f32 %v1952_v38, %v1786_v39  ;;  %v2554_v59 = vadd.f32 %v2553_v51, %v2438_v31  ;;  %v9090_v47 = vrot.slane %v6746_v56, 1  ;;  %v1493_v38 = vpop.permute.xlu0 %1492  ;;  %v7030_v44 = vpop.permute.xlu1 %1518 }
 0x1b3   :  { %v2914_v48 = vsel %vm2783_vm0, %v9626_v58, %v9091_v13  ;;  %v2323_v9 = vmax.f32 %v1953_v41, 0.0  ;;  %v931_v62 = vadd.f32 %v930_v32, %v9628_v21  ;;  %v1300_v2 = vadd.f32 %v1299_v3, %v9629_v27  ;;  %v9639_v27 = vld [vmem:[#allocation143_spill] sm:$0xff] }
 0x1b4   :  { %v3466_v4 = vmul.f32 %v7003_v35, %v9625_v46  ;;  %v3581_v20 = vadd.f32 %v3580_v60, %v3465_v22  ;;  %375 = vrot.lane.b32.xlu1 %v121_v52, %s4397_s22  ;;  %v3951_v0 = vadd.f32 %v3950_v37, %v3835_v11  ;;  %v2439_v24 = vmul.f32 %v2322_v33, %v2322_v33  ;;  %v9633_v46 = vld [vmem:[#allocation10_spill] sm:$0xff]  ;;  %v9634_v37 = vld [vmem:[#allocation191_spill] sm:$0xff]  ;;  %v4221_v33 = vld [vmem:[#allocation2 + $0x2d0] sm:$0xff] }
 0x1b5   :  { %v7028_v5 = vmul.f32 %v6979_v6, %v9630_v43  ;;  %v3719_v39 = vmax.f32 %v3348_v19, 0.0  ;;  %1634 = vrot.lane.b32.xlu0 %v121_v52, %s4399_s0  ;;  %v2185_v36 = vadd.f32 %v2184_v26, %v2069_v1  ;;  %v2070_v28 = vmul.f32 %v1953_v41, %v1787_v14  ;;  %v9635_v52 = vld [vmem:[#allocation88_spill] sm:$0xff]  ;;  %v4222_v1 = vld [vmem:[#allocation2 + $0x2d8] sm:$0xff] }
 0x1b6   :  { %v3467_v31 = vmul.f32 %v7017_v34, %v9627_v45  ;;  %v3582_v50 = vadd.f32 %v3581_v20, %v3466_v4  ;;  %v7035_v32 = vsub.f32 %v4220_v8, %v2914_v48  ;;  %v2555_v11 = vadd.f32 %v2554_v59, %v2439_v24  ;;  %v9636_v48 = vld [vmem:[#allocation101_spill] sm:$0xff] }
 0x1b7   :  { %v9632_v53 = vrot.slane %v6136_v18, 1  ;;  %v2440_v3 = vmul.f32 %v2323_v9, %v2323_v9  ;;  %v932_v60 = vadd.f32 %v931_v62, %v9633_v46  ;;  %v1301_v51 = vadd.f32 %v1300_v2, %v9634_v37  ;;  %v9637_v18 = vld [vmem:[#allocation132_spill] sm:$0xff]  ;;  %v9640_v24 = vld [vmem:[#allocation149_spill] sm:$0xff]  ;;  %v4225_v37 = vld [vmem:[#allocation2 + $0x2e0] sm:$0xff] }
 0x1b8   :  { %9631 = vst [vmem:[#allocation98_spill] sm:$0xff] %v7035_v32  ;;  %v3583_v14 = vadd.f32 %v3582_v50, %v3467_v31  ;;  %v3836_v41 = vmul.f32 %v3719_v39, %v3719_v39  ;;  %1428 = vrot.lane.b32.xlu1 %v4221_v33, %s4399_s0  ;;  %v7047_v58 = vmul.f32 %v6979_v6, %v9635_v52  ;;  %v3253_v59 = vld [vmem:[%s8865_s3 + $0x50] sm:$0xff]  ;;  %v4223_v9 = vld [vmem:[#allocation2 + $0x1e8] sm:$0xff]  ;;  %v3720_v4 = vmax.f32 %v7003_v35, 0.0 }
 0x1b9   :  { %v2916_v19 = vsel %vm2783_vm0, %v9632_v53, %v9090_v47  ;;  %v7051_v26 = vmul.f32 %v6979_v6, %v9636_v48  ;;  %v7055_v45 = vmul.f32 %v6979_v6, %v9637_v18  ;;  %v3468_v22 = vmul.f32 %v7028_v5, %v9630_v43  ;;  %1454 = vrot.lane.b32.xlu0 %v4222_v1, %s4399_s0  ;;  %v9641_v50 = vld [vmem:[#allocation249_spill] sm:$0xff]  ;;  %v9642_v53 = vld [vmem:[#allocation218_spill] sm:$0xff] }
 0x1ba   :  { %v7063_v21 = vsub.f32 %v4223_v9, %v2916_v19  ;;  %v7065_v62 = vadd.f32 %v2185_v36, %v2070_v28  ;;  %v7069_v2 = vmul.f32 %v6979_v6, %v9639_v27  ;;  %v7072_v20 = vadd.f32 %v2555_v11, %v2440_v3  ;;  %v7082_v36 = vpop.permute.xlu0 %1544  ;;  %v312_v28 = vpop.permute.xlu1 %311  ;;  %v4224_v19 = vld [vmem:[#allocation2 + $0xe0] sm:$0xff] }
 0x1bb   :  { %v7076_v43 = vmul.f32 %v6979_v6, %v9640_v24  ;;  %v3584_v39 = vadd.f32 %v3583_v14, %v3468_v22  ;;  %v1724_v31 = vsel %vm1642_vm3, %v6954_v17, %v6997_v49  ;;  %v7085_v8 = vadd.f32 %v932_v60, %v9641_v50  ;;  %v7122_v50 = vld [vmem:[#allocation2 + $0x100] sm:$0xff] }
 0x1bc   :  { %9638 = vst [vmem:[#allocation115_spill] sm:$0xff] %v7063_v21  ;;  %v1302_v35 = vadd.f32 %v1301_v51, %v9642_v53  ;;  %v3952_v11 = vadd.f32 %v3951_v0, %v3836_v41  ;;  %v1788_v3 = vsub.f32 %v4224_v19, %v1724_v31  ;;  %3308 = vperm.xlu1 %4113, %v3253_v59   ;;  %v3721_v51 = vmax.f32 %v7017_v34, 0.0  ;;  %v9643_v41 = vld [vmem:[#allocation214_spill] sm:$0xff]  ;;  %v4226_v59 = vld [vmem:[#allocation2 + $0xe8] sm:$0xff]  ;;  %v4229_v53 = vld [vmem:[#allocation2 + $0x2f0] sm:$0xff] }
 0x1bd   :  { %v3469_v6 = vmul.f32 %v7047_v58, %v9635_v52  ;;  %v3470_v46 = vmul.f32 %v7051_v26, %v9636_v48  ;;  %v3471_v17 = vmul.f32 %v7055_v45, %v9637_v18  ;;  %v1711_v60 = vsel %vm1642_vm3, %v6997_v49, %v1493_v38  ;;  %1480 = vrot.lane.b32.xlu0 %v4225_v37, %s4399_s0 }
 0x1be   :  { %v7100_v0 = vmul.f32 %v7069_v2, %v9639_v27  ;;  %v3837_v14 = vmul.f32 %v3720_v4, %v3720_v4  ;;  %v415_v33 = vsel %vm385_vm1, %v9643_v41, %v312_v28  ;;  %v7108_v52 = vmul.f32 %v7076_v43, %v9640_v24  ;;  %v4227_v27 = vld [vmem:[#allocation2 + $0x2e8] sm:$0xff]  ;;  %v9644_v4 = vld [vmem:[#allocation250_spill] sm:$0xff] }
 0x1bf   :  { %v3585_v48 = vadd.f32 %v3584_v39, %v3469_v6  ;;  %v1954_v49 = vmul.f32 %v9520_v57, %v1788_v3  ;;  %v1698_v18 = vsel %vm1642_vm3, %v1493_v38, %v7030_v44  ;;  %v3722_v22 = vmax.f32 %v7028_v5, 0.0  ;;  %v1571_v5 = vpop.permute.xlu0 %1570  ;;  %v4230_v6 = vld [vmem:[#allocation2 + $0xf0] sm:$0xff] }
 0x1c0   :  { %v3953_v1 = vadd.f32 %v3952_v11, %v3837_v14  ;;  %v9089_v34 = vrot.slane %v6763_v23, 1  ;;  %v1789_v9 = vsub.f32 %v4226_v59, %v1711_v60  ;;  %1506 = vrot.lane.b32.xlu1 %v4227_v27, %s4399_s0  ;;  %v7118_v24 = vadd.f32 %v1302_v35, %v9644_v4  ;;  %v338_v35 = vpop.permute.xlu1 %337  ;;  %v4231_v4 = vld [vmem:[#allocation2 + $0x2f8] sm:$0xff] }
 0x1c1   :  { %v3723_v39 = vmax.f32 %v7047_v58, 0.0  ;;  %v3724_v31 = vmax.f32 %v7051_v26, 0.0  ;;  %v535_v38 = vsub.f32 %v7122_v50, %v415_v33  ;;  %1532 = vrot.lane.b32.xlu0 %v4229_v53, %s4399_s0  ;;  %v3725_v11 = vmax.f32 %v7055_v45, 0.0  ;;  %v128_v26 = vld [vmem:[#allocation2 + $0x300] sm:$0xff] }
 0x1c2   :  { %v3838_v19 = vmul.f32 %v3721_v51, %v3721_v51  ;;  %v1790_v60 = vsub.f32 %v4230_v6, %v1698_v18  ;;  %v1685_v58 = vsel %vm1642_vm3, %v7030_v44, %v7082_v36  ;;  %v3586_v37 = vadd.f32 %v3585_v48, %v3470_v46  ;;  %v4232_v46 = vld [vmem:[#allocation2 + $0xf8] sm:$0xff] }
 0x1c3   :  { %v3726_v14 = vmax.f32 %v7069_v2, 0.0  ;;  %v3727_v41 = vmax.f32 %v7076_v43, 0.0  ;;  %v2324_v33 = vmax.f32 %v1954_v49, 0.0  ;;  %v3839_v59 = vmul.f32 %v3722_v22, %v3722_v22 }
 0x1c4   :  { %v3954_v27 = vadd.f32 %v3953_v1, %v3838_v19  ;;  %v9645_v45 = vrot.slane %v6213_v10, 1  ;;  %v1955_v18 = vmul.f32 %v9532_v25, %v1789_v9  ;;  %1558 = vrot.lane.b32.xlu1 %v4231_v4, %s4399_s0  ;;  %v2071_v44 = vmul.f32 %v1954_v49, %v1788_v3  ;;  %v129_v19 = vld [vmem:[#allocation2 + $0x308] sm:$0xff]  ;;  %v1597_v4 = vpop.permute.xlu0 %1596 }
 0x1c5   :  { %v1791_v48 = vsub.f32 %v4232_v46, %v1685_v58  ;;  %v701_v2 = vmul.f32 %v9557_v54, %v535_v38  ;;  %v402_v43 = vsel %vm385_vm1, %v312_v28, %v338_v35  ;;  %325 = vrot.lane.b32.xlu0 %v128_v26, %s4397_s22  ;;  %v3840_v22 = vmul.f32 %v3723_v39, %v3723_v39  ;;  %v4233_v49 = vld [vmem:[#allocation2 + $0x108] sm:$0xff] }
 0x1c6   :  { %v2918_v51 = vsel %vm2783_vm0, %v9645_v45, %v9089_v34  ;;  %v7144_v1 = vmul.f32 %v3724_v31, %v3724_v31  ;;  %v7146_v10 = vmul.f32 %v3725_v11, %v3725_v11  ;;  %v1956_v53 = vmul.f32 %v9550_v55, %v1790_v60  ;;  %v4234_v34 = vld [vmem:[#allocation2 + $0x1f0] sm:$0xff]  ;;  %v9647_v11 = vld [vmem:[#allocation154_spill] sm:$0xff] }
 0x1c7   :  { %v3587_v6 = vadd.f32 %v3586_v37, %v3471_v17  ;;  %v7149_v45 = vmul.f32 %v3726_v14, %v3726_v14  ;;  %v2441_v3 = vmul.f32 %v2324_v33, %v2324_v33  ;;  %v536_v58 = vsub.f32 %v4233_v49, %v402_v43  ;;  %v9648_v37 = vld [vmem:[#allocation168_spill] sm:$0xff]  ;;  %v364_v33 = vpop.permute.xlu1 %363 }
 0x1c8   :  { %v7151_v46 = vmul.f32 %v3727_v41, %v3727_v41  ;;  %v3955_v28 = vadd.f32 %v3954_v27, %v3839_v59  ;;  %v7153_v47 = vsub.f32 %v4234_v34, %v2918_v51  ;;  %v2325_v39 = vmax.f32 %v1955_v18, 0.0  ;;  %1584 = vrot.lane.b32.xlu1 %v128_v26, %s4399_s0  ;;  %v7165_v27 = vld [vmem:[#allocation2 + $0x310] sm:$0xff] }
 0x1c9   :  { %v2187_v31 = vadd.f32 %v7065_v62, %v2071_v44  ;;  %v7158_v13 = vmul.f32 %v9647_v11, %v1791_v48  ;;  %v1071_v17 = vmax.f32 %v701_v2, 0.0  ;;  %v702_v14 = vmul.f32 %v9648_v37, %v536_v58  ;;  %351 = vrot.lane.b32.xlu0 %v129_v19, %s4397_s22  ;;  %9649 = vst [vmem:[#allocation118_spill] sm:$0xff] %v7165_v27 }
 0x1ca   :  { %9646 = vst [vmem:[#allocation116_spill] sm:$0xff] %v7153_v47  ;;  %v2072_v41 = vmul.f32 %v1955_v18, %v1789_v9  ;;  %v2073_v43 = vmul.f32 %v1956_v53, %v1790_v60  ;;  %v2326_v59 = vmax.f32 %v1956_v53, 0.0  ;;  %v1672_v34 = vsel %vm1642_vm3, %v7082_v36, %v1571_v5 }
 0x1cb   :  { %v7168_v62 = vadd.f32 %v3587_v6, %v7100_v0  ;;  %v2557_v26 = vadd.f32 %v7072_v20, %v2441_v3  ;;  %v818_v51 = vmul.f32 %v701_v2, %v535_v38  ;;  %v1072_v44 = vmax.f32 %v702_v14, 0.0  ;;  %v1623_v6 = vpop.permute.xlu0 %1622  ;;  %v9650_v2 = vld [vmem:[#allocation44_spill] sm:$0xff] }
 0x1cc   :  { %v3956_v47 = vadd.f32 %v3955_v28, %v3840_v22  ;;  %v2442_v21 = vmul.f32 %v2325_v39, %v2325_v39  ;;  %v1659_v9 = vsel %vm1642_vm3, %v1571_v5, %v1597_v4  ;;  %v389_v60 = vsel %vm385_vm1, %v338_v35, %v364_v33  ;;  %1610 = vrot.lane.b32.xlu1 %v129_v19, %s4399_s0  ;;  %v4235_v22 = vld [vmem:[#allocation2 + $0x110] sm:$0xff] }
 0x1cd   :  { %v2188_v36 = vadd.f32 %v2187_v31, %v2072_v41  ;;  %v1188_v18 = vmul.f32 %v1071_v17, %v1071_v17  ;;  %v1792_v53 = vsub.f32 %v7122_v50, %v1672_v34  ;;  %v819_v0 = vmul.f32 %v702_v14, %v536_v58  ;;  %377 = vrot.lane.b32.xlu0 %v7165_v27, %s4397_s22  ;;  %v4236_v58 = vld [vmem:[#allocation2 + $0x118] sm:$0xff] }
 0x1ce   :  { %v2443_v20 = vmul.f32 %v2326_v59, %v2326_v59  ;;  %v2074_v38 = vmul.f32 %v7158_v13, %v1791_v48  ;;  %v493_v5 = vsel %vm385_vm1, %v364_v33, %v9650_v2  ;;  %v537_v35 = vsub.f32 %v4235_v22, %v389_v60  ;;  %v4237_v41 = vld [vmem:[#allocation2 + $0x318] sm:$0xff]  ;;  %v4239_v2 = vld [vmem:[#allocation2 + $0x320] sm:$0xff] }
 0x1cf   :  { %v2558_v3 = vadd.f32 %v2557_v26, %v2442_v21  ;;  %v934_v19 = vadd.f32 %v7085_v8, %v818_v51  ;;  %v1189_v28 = vmul.f32 %v1072_v44, %v1072_v44  ;;  %v1793_v39 = vsub.f32 %v4233_v49, %v1659_v9  ;;  %v7199_v26 = vpop.permute.xlu1 %1416 }
 0x1d0   :  { %v2327_v50 = vmax.f32 %v7158_v13, 0.0  ;;  %v538_v31 = vsub.f32 %v4236_v58, %v493_v5  ;;  %v703_v17 = vmul.f32 %v9562_v40, %v537_v35  ;;  %v1646_v48 = vsel %vm1642_vm3, %v1597_v4, %v1623_v6  ;;  %1636 = vrot.lane.b32.xlu1 %v7165_v27, %s4399_s0  ;;  %v7196_v13 = vld [vmem:[%s8863_s1 + $0x8] ss:$0 sm:$0xff] }
 0x1d1   :  { %v2189_v14 = vadd.f32 %v2188_v36, %v2073_v43  ;;  %v1304_v33 = vadd.f32 %v7118_v24, %v1188_v18  ;;  %v1958_v21 = vmul.f32 %v9587_v15, %v1792_v53  ;;  %v935_v8 = vadd.f32 %v934_v19, %v819_v0  ;;  %1430 = vrot.lane.b32.xlu0 %v4237_v41, %s4399_s0  ;;  %v3254_v24 = vld [vmem:[%s8865_s3 + $0x58] sm:$0xff] }
 0x1d2   :  { %v704_v49 = vmul.f32 %v7196_v13, %v538_v31  ;;  %v820_v4 = vmul.f32 %v703_v17, %v537_v35  ;;  %v1073_v59 = vmax.f32 %v703_v17, 0.0  ;;  %v1794_v34 = vsub.f32 %v4235_v22, %v1646_v48  ;;  %v7210_v17 = vpop.permute.xlu0 %1442  ;;  %v9651_v48 = vld [vmem:[#allocation13_spill] sm:$0xff] }
 0x1d3   :  { %v3957_v43 = vadd.f32 %v3956_v47, %v7144_v1  ;;  %v2559_v51 = vadd.f32 %v2558_v3, %v2443_v20  ;;  %v1305_v44 = vadd.f32 %v1304_v33, %v1189_v28  ;;  %v1959_v9 = vmul.f32 %v9588_v63, %v1793_v39 }
 0x1d4   :  { %v821_v60 = vmul.f32 %v704_v49, %v538_v31  ;;  %v936_v36 = vadd.f32 %v935_v8, %v820_v4  ;;  %v1074_v18 = vmax.f32 %v704_v49, 0.0  ;;  %v1190_v0 = vmul.f32 %v1073_v59, %v1073_v59  ;;  %1456 = vrot.lane.b32.xlu1 %v4239_v2, %s4399_s0  ;;  %v4240_v8 = vld [vmem:[#allocation2 + $0x328] sm:$0xff]  ;;  %v4241_v49 = vld [vmem:[#allocation2 + $0x330] sm:$0xff] }
 0x1d5   :  { %v2190_v5 = vadd.f32 %v2189_v14, %v2074_v38  ;;  %v2075_v22 = vmul.f32 %v1958_v21, %v1792_v53  ;;  %v2328_v35 = vmax.f32 %v1958_v21, 0.0  ;;  %v1750_v19 = vsel %vm1642_vm3, %v1623_v6, %v6952_v7  ;;  %3313 = vperm.xlu0 %4114, %v3254_v24   ;;  %v7221_v6 = vpop.permute.xlu1 %3278  ;;  %v9654_v24 = vld [vmem:[#allocation17_spill] sm:$0xff] }
 0x1d6   :  { %v937_v47 = vadd.f32 %v936_v36, %v821_v60  ;;  %v1191_v1 = vmul.f32 %v1074_v18, %v1074_v18  ;;  %v1306_v20 = vadd.f32 %v1305_v44, %v1190_v0  ;;  %v1960_v3 = vmul.f32 %v9591_v16, %v1794_v34  ;;  %v9655_v36 = vld [vmem:[#allocation125_spill] sm:$0xff]  ;;  %v4242_v0 = vld [vmem:[#allocation2 + $0x120] sm:$0xff] }
 0x1d7   :  { %v3589_v28 = vadd.f32 %v7168_v62, %v7108_v52  ;;  %v3958_v31 = vadd.f32 %v3957_v43, %v7146_v10  ;;  %v2444_v38 = vmul.f32 %v2327_v50, %v2327_v50  ;;  %v2329_v53 = vmax.f32 %v1959_v9, 0.0  ;;  %v9652_v10 = vld [vmem:[#allocation117_spill] sm:$0xff] }
 0x1d8   :  { %v938_v14 = vadd.f32 %v937_v47, %v9651_v48  ;;  %v1307_v33 = vadd.f32 %v1306_v20, %v1191_v1  ;;  %v1795_v21 = vsub.f32 %v4236_v58, %v1750_v19  ;;  %v1738_v7 = vsel %vm1642_vm3, %v7199_v26, %v7210_v17  ;;  %1482 = vrot.lane.b32.xlu1 %v4240_v8, %s4399_s0  ;;  %v9653_v58 = vld [vmem:[#allocation167_spill] sm:$0xff]  ;;  %v4244_v20 = vld [vmem:[#allocation2 + $0x338] sm:$0xff]  ;;  %v1469_v8 = vpop.permute.xlu0 %1468 }
 0x1d9   :  { %v2560_v41 = vadd.f32 %v2559_v51, %v2444_v38  ;;  %v2191_v52 = vadd.f32 %v2190_v5, %v2075_v22  ;;  %v2445_v62 = vmul.f32 %v2328_v35, %v2328_v35  ;;  %v9096_v50 = vrot.slane %v9652_v10, 1  ;;  %1508 = vrot.lane.b32.xlu0 %v4241_v49, %s4399_s0  ;;  %v9656_v19 = vld [vmem:[#allocation39_spill] sm:$0xff]  ;;  %v9657_v5 = vld [vmem:[#allocation188_spill] sm:$0xff]  ;;  %v9658_v35 = vld [vmem:[#allocation169_spill] sm:$0xff] }
 0x1da   :  { %v2076_v4 = vmul.f32 %v1959_v9, %v1793_v39  ;;  %v939_v59 = vadd.f32 %v938_v14, %v9653_v58  ;;  %v1308_v43 = vadd.f32 %v1307_v33, %v9654_v24  ;;  %v2330_v44 = vmax.f32 %v1960_v3, 0.0  ;;  %v7236_v39 = vld [vmem:[%s8864_s2 + $0x8] ss:$0 sm:$0xff]  ;;  %v9660_v33 = vld [vmem:[#allocation56_spill] sm:$0xff]  ;;  %v4245_v58 = vld [vmem:[#allocation2 + $0x340] sm:$0xff] }
 0x1db   :  { %v2446_v60 = vmul.f32 %v2329_v53, %v2329_v53  ;;  %v9094_v18 = vrot.slane %v9655_v36, 1  ;;  %v1796_v2 = vsub.f32 %v4242_v0, %v1738_v7  ;;  %v3357_v51 = vmul.f32 %v7221_v6, %v9656_v19  ;;  %v137_v49 = vld [vmem:[#allocation2 + $0x348] sm:$0xff]  ;;  %v9662_v24 = vld [vmem:[#allocation190_spill] sm:$0xff] }
 0x1dc   :  { %v940_v22 = vadd.f32 %v939_v59, %v9657_v5  ;;  %v1309_v47 = vadd.f32 %v1308_v43, %v9658_v35  ;;  %v1961_v9 = vmul.f32 %v7236_v39, %v1795_v21  ;;  %v2077_v1 = vmul.f32 %v1960_v3, %v1794_v34  ;;  %1534 = vrot.lane.b32.xlu1 %v4244_v20, %s4399_s0  ;;  %v9661_v3 = vld [vmem:[#allocation225_spill] sm:$0xff]  ;;  %v1495_v5 = vpop.permute.xlu1 %1494  ;;  %v9664_v35 = vld [vmem:[#allocation226_spill] sm:$0xff] }
 0x1dd   :  { %v3959_v38 = vadd.f32 %v3958_v31, %v7149_v45  ;;  %v2561_v53 = vadd.f32 %v2560_v41, %v2445_v62  ;;  %v9659_v48 = vrot.slane %v6733_v30, 1  ;;  %v3358_v7 = vmul.f32 %v7221_v6, %v9660_v33  ;;  %1560 = vrot.lane.b32.xlu0 %v4245_v58, %s4399_s0  ;;  %v9663_v30 = vld [vmem:[#allocation77_spill] sm:$0xff] }
 0x1de   :  { %v2192_v34 = vadd.f32 %v2191_v52, %v2076_v4  ;;  %v941_v59 = vadd.f32 %v940_v22, %v9661_v3  ;;  %v1310_v45 = vadd.f32 %v1309_v47, %v9662_v24  ;;  %v2447_v31 = vmul.f32 %v2330_v44, %v2330_v44  ;;  %v9666_v44 = vld [vmem:[#allocation199_spill] sm:$0xff]  ;;  %v9667_v24 = vld [vmem:[#allocation24_spill] sm:$0xff] }
 0x1df   :  { %v2932_v14 = vsel %vm2783_vm0, %v9659_v48, %v9096_v50  ;;  %v2562_v41 = vadd.f32 %v2561_v53, %v2446_v60  ;;  %v1962_v62 = vmul.f32 %v9527_v61, %v1796_v2  ;;  %v7254_v43 = vmul.f32 %v7221_v6, %v9663_v30 }
 0x1e0   :  { %v3474_v0 = vmul.f32 %v3357_v51, %v9656_v19  ;;  %v1311_v20 = vadd.f32 %v1310_v45, %v9664_v35  ;;  %v2193_v48 = vadd.f32 %v2192_v34, %v2077_v1  ;;  %v2331_v58 = vmax.f32 %v1961_v9, 0.0  ;;  %327 = vrot.lane.b32.xlu1 %v137_v49, %s4397_s22  ;;  %v138_v19 = vld [vmem:[#allocation2 + $0x350] sm:$0xff] }
 0x1e1   :  { %v9665_v52 = vrot.slane %v6746_v56, 1  ;;  %v9095_v60 = vrot.slane %v9666_v44, 1  ;;  %v3475_v22 = vmul.f32 %v3358_v7, %v9660_v33  ;;  %v3728_v53 = vmax.f32 %v3357_v51, 0.0  ;;  %1586 = vrot.lane.b32.xlu0 %v137_v49, %s4399_s0  ;;  %v7274_v33 = vpop.permute.xlu0 %1520  ;;  %v4261_v44 = vld [vmem:[#allocation2 + $0x160] sm:$0xff] }
 0x1e2   :  { %v3590_v47 = vadd.f32 %v3589_v28, %v3474_v0  ;;  %v3960_v1 = vadd.f32 %v3959_v38, %v7151_v46  ;;  %v2078_v34 = vmul.f32 %v1961_v9, %v1795_v21  ;;  %v2563_v3 = vadd.f32 %v2562_v41, %v2447_v31  ;;  %v4246_v28 = vld [vmem:[#allocation2 + $0x228] sm:$0xff]  ;;  %v4247_v0 = vld [vmem:[#allocation2 + $0x230] sm:$0xff] }
 0x1e3   :  { %v2934_v4 = vsel %vm2783_vm0, %v9665_v52, %v9094_v18  ;;  %v7270_v56 = vmul.f32 %v7221_v6, %v9667_v24  ;;  %v2332_v45 = vmax.f32 %v1962_v62, 0.0  ;;  %v3476_v35 = vmul.f32 %v7254_v43, %v9663_v30  ;;  %v7288_v30 = vpop.permute.xlu1 %1546 }
 0x1e4   :  { %v3591_v52 = vadd.f32 %v3590_v47, %v3475_v22  ;;  %v3729_v18 = vmax.f32 %v3358_v7, 0.0  ;;  %v7276_v51 = vsub.f32 %v4246_v28, %v2932_v14  ;;  %v2448_v49 = vmul.f32 %v2331_v58, %v2331_v58  ;;  %353 = vrot.lane.b32.xlu1 %v138_v19, %s4397_s22  ;;  %v139_v14 = vld [vmem:[#allocation2 + $0x358] sm:$0xff] }
 0x1e5   :  { %v7278_v46 = vsub.f32 %v4247_v0, %v2934_v4  ;;  %v3845_v21 = vmul.f32 %v3728_v53, %v3728_v53  ;;  %v2194_v9 = vadd.f32 %v2193_v48, %v2078_v34  ;;  %v2079_v38 = vmul.f32 %v1962_v62, %v1796_v2  ;;  %1612 = vrot.lane.b32.xlu0 %v138_v19, %s4399_s0  ;;  %v9671_v4 = vld [vmem:[#allocation89_spill] sm:$0xff]  ;;  %v9672_v34 = vld [vmem:[#allocation103_spill] sm:$0xff] }
 0x1e6   :  { %9668 = vst [vmem:[#allocation36_spill] sm:$0xff] %v7276_v51  ;;  %v9670_v31 = vrot.slane %v6763_v23, 1  ;;  %v3592_v41 = vadd.f32 %v3591_v52, %v3476_v35  ;;  %v2564_v58 = vadd.f32 %v2563_v3, %v2448_v49  ;;  %v3361_v22 = vmul.f32 %v7221_v6, %v9671_v4  ;;  %v314_v49 = vpop.permute.xlu0 %313 }
 0x1e7   :  { %9669 = vst [vmem:[#allocation181_spill] sm:$0xff] %v7278_v46  ;;  %v3477_v2 = vmul.f32 %v7270_v56, %v9667_v24  ;;  %v3961_v62 = vadd.f32 %v3960_v1, %v3845_v21  ;;  %v2449_v48 = vmul.f32 %v2332_v45, %v2332_v45  ;;  %v3730_v23 = vmax.f32 %v7254_v43, 0.0  ;;  %v4248_v43 = vld [vmem:[#allocation2 + $0x128] sm:$0xff] }
 0x1e8   :  { %v7286_v7 = vsel %vm2783_vm0, %v9670_v31, %v9095_v60  ;;  %v3846_v47 = vmul.f32 %v3729_v18, %v3729_v18  ;;  %v1725_v53 = vsel %vm1642_vm3, %v7210_v17, %v1469_v8  ;;  %v3362_v35 = vmul.f32 %v7221_v6, %v9672_v34  ;;  %379 = vrot.lane.b32.xlu1 %v139_v14, %s4397_s22  ;;  %v9673_v45 = vld [vmem:[#allocation247_spill] sm:$0xff]  ;;  %v9674_v17 = vld [vmem:[#allocation248_spill] sm:$0xff] }
 0x1e9   :  { %v3593_v19 = vadd.f32 %v3592_v41, %v3477_v2  ;;  %v1712_v3 = vsel %vm1642_vm3, %v1469_v8, %v1495_v5  ;;  %v1699_v24 = vsel %vm1642_vm3, %v1495_v5, %v7274_v33  ;;  %v1797_v18 = vsub.f32 %v4248_v43, %v1725_v53  ;;  %1638 = vrot.lane.b32.xlu0 %v139_v14, %s4399_s0  ;;  %v9675_v8 = vld [vmem:[#allocation196_spill] sm:$0xff]  ;;  %v7322_v43 = vpop.permute.xlu1 %1572 }
 0x1ea   :  { %v3962_v1 = vadd.f32 %v3961_v62, %v3846_v47  ;;  %v7308_v52 = vadd.f32 %v941_v59, %v9673_v45  ;;  %v7311_v28 = vadd.f32 %v1311_v20, %v9674_v17  ;;  %v7314_v0 = vadd.f32 %v2194_v9, %v2079_v38  ;;  %v9676_v5 = vld [vmem:[#allocation200_spill] sm:$0xff]  ;;  %v4250_v20 = vld [vmem:[#allocation2 + $0x138] sm:$0xff]  ;;  %v9677_v9 = vld [vmem:[#allocation219_spill] sm:$0xff] }
 0x1eb   :  { %v3363_v21 = vmul.f32 %v7221_v6, %v9675_v8  ;;  %v3364_v31 = vmul.f32 %v7221_v6, %v9676_v5  ;;  %v3478_v41 = vmul.f32 %v3361_v22, %v9671_v4  ;;  %v3731_v2 = vmax.f32 %v7270_v56, 0.0  ;;  %v4249_v62 = vld [vmem:[#allocation2 + $0x130] sm:$0xff]  ;;  %v4251_v56 = vld [vmem:[#allocation2 + $0x360] sm:$0x7] }
 0x1ec   :  { %v3847_v59 = vmul.f32 %v3730_v23, %v3730_v23  ;;  %v1798_v47 = vsub.f32 %v4249_v62, %v1712_v3  ;;  %v1799_v53 = vsub.f32 %v4250_v20, %v1699_v24  ;;  %v7324_v14 = vadd.f32 %v2564_v58, %v2449_v48  ;;  %v9678_v17 = vld [vmem:[#allocation213_spill] sm:$0xff]  ;;  %1432 = vrot.lane.b32.xlu1 %v4251_v56, %s4399_s0  ;;  %v4252_v58 = vld [vmem:[#allocation2 + $0x368] sm:$0x7] }
 0x1ed   :  { %v7328_v38 = vmul.f32 %v7221_v6, %v9677_v9  ;;  %v3479_v45 = vmul.f32 %v3362_v35, %v9672_v34  ;;  %v416_v4 = vsel %vm385_vm1, %v9678_v17, %v314_v49  ;;  %v3594_v23 = vadd.f32 %v3593_v19, %v3478_v41  ;;  %1458 = vrot.lane.b32.xlu0 %v4252_v58, %s4399_s0  ;;  %v3255_v17 = vld [vmem:[%s8865_s3 + $0x60] sm:$0x3]  ;;  %v1599_v46 = vpop.permute.xlu1 %1598 }
 0x1ee   :  { %v3732_v3 = vmax.f32 %v3361_v22, 0.0  ;;  %v3963_v24 = vadd.f32 %v3962_v1, %v3847_v59  ;;  %v1963_v62 = vmul.f32 %v9520_v57, %v1797_v18  ;;  %v3480_v6 = vmul.f32 %v3363_v21, %v9675_v8  ;;  %v4253_v1 = vld [vmem:[#allocation2 + $0x148] sm:$0xff]  ;;  %v340_v59 = vpop.permute.xlu0 %339 }
 0x1ef   :  { %v7339_v48 = vmul.f32 %v3364_v31, %v9676_v5  ;;  %v3733_v34 = vmax.f32 %v3362_v35, 0.0  ;;  %v3734_v20 = vmax.f32 %v3363_v21, 0.0  ;;  %v3848_v56 = vmul.f32 %v3731_v2, %v3731_v2 }
 0x1f0   :  { %v1964_v22 = vmul.f32 %v9532_v25, %v1798_v47  ;;  %v1965_v19 = vmul.f32 %v9550_v55, %v1799_v53  ;;  %v544_v41 = vsub.f32 %v4253_v1, %v416_v4  ;;  %v7348_v8 = vmul.f32 %v7328_v38, %v9677_v9  ;;  %3318 = vperm.xlu1 %4113, %v3255_v17   ;;  %v4254_v4 = vld [vmem:[#allocation2 + $0x370] sm:$0x7]  ;;  %v4255_v17 = vld [vmem:[#allocation2 + $0x140] sm:$0xff] }
 0x1f1   :  { %v3735_v5 = vmax.f32 %v3364_v31, 0.0  ;;  %v1686_v21 = vsel %vm1642_vm3, %v7274_v33, %v7288_v30  ;;  %v3595_v2 = vadd.f32 %v3594_v23, %v3479_v45  ;;  %v3849_v58 = vmul.f32 %v3732_v3, %v3732_v3  ;;  %1484 = vrot.lane.b32.xlu0 %v4254_v4, %s4399_s0 }
 0x1f2   :  { %v3964_v60 = vadd.f32 %v3963_v24, %v3848_v56  ;;  %v2080_v50 = vmul.f32 %v1963_v62, %v1797_v18  ;;  %v3850_v51 = vmul.f32 %v3733_v34, %v3733_v34  ;;  %v2333_v9 = vmax.f32 %v1963_v62, 0.0  ;;  %v4256_v24 = vld [vmem:[#allocation2 + $0x150] sm:$0xff]  ;;  %v4257_v34 = vld [vmem:[#allocation2 + $0x378] sm:$0x7] }
 0x1f3   :  { %v710_v31 = vmul.f32 %v9557_v54, %v544_v41  ;;  %v403_v35 = vsel %vm385_vm1, %v314_v49, %v340_v59  ;;  %v7359_v32 = vmul.f32 %v3734_v20, %v3734_v20  ;;  %v2334_v27 = vmax.f32 %v1964_v22, 0.0 }
 0x1f4   :  { %v2335_v33 = vmax.f32 %v1965_v19, 0.0  ;;  %v1800_v45 = vsub.f32 %v4255_v17, %v1686_v21  ;;  %v7361_v23 = vmul.f32 %v3735_v5, %v3735_v5  ;;  %v2081_v18 = vmul.f32 %v1964_v22, %v1798_v47  ;;  %1510 = vrot.lane.b32.xlu1 %v4257_v34, %s4399_s0  ;;  %v366_v21 = vpop.permute.xlu0 %365  ;;  %v4258_v5 = vld [vmem:[#allocation2 + $0x380] sm:$0x7] }
 0x1f5   :  { %v1673_v3 = vsel %vm1642_vm3, %v7288_v30, %v7322_v43  ;;  %v545_v62 = vsub.f32 %v4256_v24, %v403_v35  ;;  %v7368_v49 = vadd.f32 %v3595_v2, %v3480_v6  ;;  %v3965_v20 = vadd.f32 %v3964_v60, %v3849_v58  ;;  %1536 = vrot.lane.b32.xlu0 %v4258_v5, %s4399_s0  ;;  %v1625_v2 = vpop.permute.xlu1 %1624 }
 0x1f6   :  { %v2196_v56 = vadd.f32 %v7314_v0, %v2080_v50  ;;  %v2082_v4 = vmul.f32 %v1965_v19, %v1799_v53  ;;  %v2450_v47 = vmul.f32 %v2333_v9, %v2333_v9  ;;  %v1080_v22 = vmax.f32 %v710_v31, 0.0  ;;  %v9679_v19 = vld [vmem:[#allocation53_spill] sm:$0xff]  ;;  %v4259_v9 = vld [vmem:[#allocation2 + $0x388] sm:$0x7] }
 0x1f7   :  { %v711_v17 = vmul.f32 %v9648_v37, %v545_v62  ;;  %v1660_v30 = vsel %vm1642_vm3, %v7322_v43, %v1599_v46  ;;  %v2451_v35 = vmul.f32 %v2334_v27, %v2334_v27  ;;  %v2452_v34 = vmul.f32 %v2335_v33, %v2335_v33  ;;  %v4260_v27 = vld [vmem:[#allocation2 + $0x158] sm:$0xff] }
 0x1f8   :  { %v1966_v6 = vmul.f32 %v9647_v11, %v1800_v45  ;;  %v827_v60 = vmul.f32 %v710_v31, %v544_v41  ;;  %v1801_v50 = vsub.f32 %v4253_v1, %v1673_v3  ;;  %v390_v53 = vsel %vm385_vm1, %v340_v59, %v366_v21  ;;  %1562 = vrot.lane.b32.xlu1 %v4259_v9, %s4399_s0 }
 0x1f9   :  { %v1081_v0 = vmax.f32 %v711_v17, 0.0  ;;  %v494_v58 = vsel %vm385_vm1, %v366_v21, %v9679_v19  ;;  %v828_v5 = vmul.f32 %v711_v17, %v545_v62  ;;  %v1802_v43 = vsub.f32 %v4256_v24, %v1660_v30  ;;  %v7397_v9 = vpop.permute.xlu1 %1444 }
 0x1fa   :  { %v546_v33 = vsub.f32 %v4260_v27, %v390_v53  ;;  %v547_v37 = vsub.f32 %v4261_v44, %v494_v58  ;;  %v3966_v41 = vadd.f32 %v3965_v20, %v3850_v51  ;;  %v2566_v1 = vadd.f32 %v7324_v14, %v2450_v47  ;;  %v7390_v53 = vpop.permute.xlu0 %1418 }
 0x1fb   :  { %v1197_v31 = vmul.f32 %v1080_v22, %v1080_v22  ;;  %v1647_v59 = vsel %vm1642_vm3, %v1599_v46, %v1625_v2  ;;  %v2197_v3 = vadd.f32 %v2196_v56, %v2081_v18  ;;  %v943_v11 = vadd.f32 %v7308_v52, %v827_v60 }
 0x1fc   :  { %v712_v21 = vmul.f32 %v9562_v40, %v546_v33  ;;  %v713_v19 = vmul.f32 %v7196_v13, %v547_v37  ;;  %v2336_v62 = vmax.f32 %v1966_v6, 0.0  ;;  %v1967_v24 = vmul.f32 %v9587_v15, %v1801_v50 }
 0x1fd   :  { %v1198_v17 = vmul.f32 %v1081_v0, %v1081_v0  ;;  %v1803_v30 = vsub.f32 %v4260_v27, %v1647_v59  ;;  %v2567_v51 = vadd.f32 %v2566_v1, %v2451_v35  ;;  %v944_v14 = vadd.f32 %v943_v11, %v828_v5 }
 0x1fe   :  { %v1968_v20 = vmul.f32 %v9588_v63, %v1802_v43  ;;  %v829_v47 = vmul.f32 %v712_v21, %v546_v33  ;;  %v2083_v46 = vmul.f32 %v1966_v6, %v1800_v45  ;;  %v1313_v18 = vadd.f32 %v7311_v28, %v1197_v31 }
 0x1ff   :  { %v1082_v52 = vmax.f32 %v712_v21, 0.0  ;;  %v1083_v56 = vmax.f32 %v713_v19, 0.0  ;;  %v2198_v22 = vadd.f32 %v2197_v3, %v2082_v4  ;;  %v830_v60 = vmul.f32 %v713_v19, %v547_v37 }
 0x200   :  { %v945_v58 = vadd.f32 %v944_v14, %v829_v47  ;;  %v1751_v0 = vsel %vm1642_vm3, %v1625_v2, %v7199_v26  ;;  %v2337_v27 = vmax.f32 %v1967_v24, 0.0  ;;  %v1314_v35 = vadd.f32 %v1313_v18, %v1198_v17  ;;  %v7404_v26 = vpop.permute.xlu0 %3283  ;;  %v9681_v14 = vld [vmem:[#allocation166_spill] sm:$0xff]  ;;  %v4262_v18 = vld [vmem:[#allocation2 + $0x168] sm:$0xff] }
 0x201   :  { %v1199_v11 = vmul.f32 %v1082_v52, %v1082_v52  ;;  %v1969_v5 = vmul.f32 %v9591_v16, %v1803_v30  ;;  %v2568_v33 = vadd.f32 %v2567_v51, %v2452_v34  ;;  %v2453_v45 = vmul.f32 %v2336_v62, %v2336_v62  ;;  %v9680_v34 = vld [vmem:[#allocation138_spill] sm:$0xff] }
 0x202   :  { %v2338_v6 = vmax.f32 %v1968_v20, 0.0  ;;  %v946_v28 = vadd.f32 %v945_v58, %v830_v60  ;;  %v1200_v1 = vmul.f32 %v1083_v56, %v1083_v56  ;;  %v1804_v4 = vsub.f32 %v4261_v44, %v1751_v0  ;;  %v9682_v56 = vld [vmem:[#allocation40_spill] sm:$0xff] }
 0x203   :  { %v1315_v31 = vadd.f32 %v1314_v35, %v1199_v11  ;;  %v1739_v37 = vsel %vm1642_vm3, %v7390_v53, %v7397_v9  ;;  %v3597_v2 = vadd.f32 %v7368_v49, %v7339_v48  ;;  %v3967_v59 = vadd.f32 %v3966_v41, %v7359_v32  ;;  %v9683_v49 = vld [vmem:[#allocation140_spill] sm:$0xff] }
 0x204   :  { %v2084_v3 = vmul.f32 %v1967_v24, %v1801_v50  ;;  %v947_v21 = vadd.f32 %v946_v28, %v9680_v34  ;;  %v2199_v19 = vadd.f32 %v2198_v22, %v2083_v46  ;;  %v2454_v62 = vmul.f32 %v2337_v27, %v2337_v27  ;;  %v146_v41 = vld [vmem:[#allocation2 + $0x390] sm:$0x7]  ;;  %v9685_v28 = vld [vmem:[#allocation58_spill] sm:$0xff] }
 0x205   :  { %v1316_v17 = vadd.f32 %v1315_v31, %v1200_v1  ;;  %v2339_v51 = vmax.f32 %v1969_v5, 0.0  ;;  %v2085_v44 = vmul.f32 %v1968_v20, %v1802_v43  ;;  %v1805_v52 = vsub.f32 %v4262_v18, %v1739_v37  ;;  %v1471_v20 = vpop.permute.xlu1 %1470  ;;  %329 = vrot.lane.b32.xlu0 %v146_v41, %s4397_s22  ;;  %1588 = vrot.lane.b32.xlu1 %v146_v41, %s4399_s0  ;;  %v9684_v35 = vld [vmem:[#allocation108_spill] sm:$0xff]  ;;  %v9691_v18 = vld [vmem:[#allocation18_spill] sm:$0xff] }
 0x206   :  { %v7411_v47 = vadd.f32 %v947_v21, %v9681_v14  ;;  %v3366_v60 = vmul.f32 %v7404_v26, %v9682_v56  ;;  %v2569_v58 = vadd.f32 %v2568_v33, %v2453_v45  ;;  %v2455_v48 = vmul.f32 %v2338_v6, %v2338_v6  ;;  %v4265_v41 = vld [vmem:[#allocation2 + $0x278] sm:$0xff] }
 0x207   :  { %v1317_v32 = vadd.f32 %v1316_v17, %v9683_v49  ;;  %v1970_v50 = vmul.f32 %v7236_v39, %v1804_v4  ;;  %v2200_v24 = vadd.f32 %v2199_v19, %v2084_v3  ;;  %v9106_v46 = vrot.slane %v6968_v29, 1  ;;  %v7433_v3 = vld [vmem:[#allocation2 + $0x238] sm:$0xff]  ;;  %v4264_v49 = vld [vmem:[#allocation2 + $0x270] sm:$0xff] }
 0x208   :  { %v2086_v22 = vmul.f32 %v1969_v5, %v1803_v30  ;;  %v9105_v43 = vrot.slane %v6988_v42, 1  ;;  %v3968_v0 = vadd.f32 %v3967_v59, %v7361_v23  ;;  %v2570_v27 = vadd.f32 %v2569_v58, %v2454_v62  ;;  %9687 = vst [vmem:[#allocation212_spill] sm:$0xff] %v7433_v3  ;;  %v1497_v58 = vpop.permute.xlu0 %1496 }
 0x209   :  { %v7423_v11 = vadd.f32 %v1317_v32, %v9684_v35  ;;  %v2456_v33 = vmul.f32 %v2339_v51, %v2339_v51  ;;  %v2201_v45 = vadd.f32 %v2200_v24, %v2085_v44  ;;  %v1971_v6 = vmul.f32 %v9527_v61, %v1805_v52 }
 0x20a   :  { %v3367_v30 = vmul.f32 %v7404_v26, %v9685_v28  ;;  %v3483_v5 = vmul.f32 %v3366_v60, %v9682_v56  ;;  %v3598_v1 = vadd.f32 %v3597_v2, %v7348_v8  ;;  %v9686_v31 = vmax.f32 %v7328_v38, 0.0 }
 0x20b   :  { %v2571_v23 = vadd.f32 %v2570_v27, %v2455_v48  ;;  %v2340_v59 = vmax.f32 %v1970_v50, 0.0  ;;  %v7437_v34 = vsub.f32 %v7433_v3, %v7286_v7  ;;  %v9689_v21 = vrot.slane %v9652_v10, 1  ;;  %v7452_v48 = vpop.permute.xlu1 %1522 }
 0x20c   :  { %v3853_v37 = vmul.f32 %v9686_v31, %v9686_v31  ;;  %v2202_v62 = vadd.f32 %v2201_v45, %v2086_v22  ;;  %v9690_v38 = vrot.slane %v9655_v36, 1  ;;  %v3599_v51 = vadd.f32 %v3598_v1, %v3483_v5  ;;  %v9695_v45 = vld [vmem:[#allocation90_spill] sm:$0xff]  ;;  %v9696_v5 = vld [vmem:[#allocation104_spill] sm:$0xff] }
 0x20d   :  { %9688 = vst [vmem:[#allocation34_spill] sm:$0xff] %v7437_v34  ;;  %v2950_v19 = vsel %vm2783_vm0, %v9689_v21, %v9106_v46  ;;  %v2572_v17 = vadd.f32 %v2571_v23, %v2456_v33  ;;  %v3737_v44 = vmax.f32 %v3366_v60, 0.0  ;;  %v2087_v14 = vmul.f32 %v1970_v50, %v1804_v4  ;;  %v9694_v60 = vld [vmem:[#allocation26_spill] sm:$0xff]  ;;  %v9697_v21 = vld [vmem:[#allocation233_spill] sm:$0xff] }
 0x20e   :  { %v2952_v8 = vsel %vm2783_vm0, %v9690_v38, %v9105_v43  ;;  %v3969_v2 = vadd.f32 %v3968_v0, %v3853_v37  ;;  %v2341_v7 = vmax.f32 %v1971_v6, 0.0  ;;  %v3368_v56 = vmul.f32 %v7404_v26, %v9691_v18  ;;  %v4266_v38 = vld [vmem:[#allocation2 + $0x170] sm:$0xff]  ;;  %v7522_v43 = vld [vmem:[#allocation2 + $0x2c8] sm:$0xff] }
 0x20f   :  { %v3484_v10 = vmul.f32 %v3367_v30, %v9685_v28  ;;  %v7454_v32 = vsub.f32 %v4264_v49, %v2950_v19  ;;  %v2457_v36 = vmul.f32 %v2340_v59, %v2340_v59  ;;  %v7456_v24 = vsub.f32 %v4265_v41, %v2952_v8  ;;  %v147_v49 = vld [vmem:[#allocation2 + $0x398] sm:$0x7] }
 0x210   :  { %v3854_v22 = vmul.f32 %v3737_v44, %v3737_v44  ;;  %v2203_v0 = vadd.f32 %v2202_v62, %v2087_v14  ;;  %v3369_v4 = vmul.f32 %v7404_v26, %v9694_v60  ;;  %v3738_v27 = vmax.f32 %v3367_v30, 0.0  ;;  %v9698_v30 = vld [vmem:[#allocation234_spill] sm:$0xff]  ;;  %v7478_v14 = vpop.permute.xlu0 %1548  ;;  %355 = vrot.lane.b32.xlu0 %v147_v49, %s4397_s22  ;;  %1614 = vrot.lane.b32.xlu1 %v147_v49, %s4399_s0  ;;  %v9702_v46 = vld [vmem:[#allocation221_spill] sm:$0xff] }
 0x211   :  { %9692 = vst [vmem:[#allocation128_spill] sm:$0xff] %v7454_v32  ;;  %9693 = vst [vmem:[#allocation129_spill] sm:$0xff] %v7456_v24  ;;  %v3600_v50 = vadd.f32 %v3599_v51, %v3484_v10  ;;  %v2573_v35 = vadd.f32 %v2572_v17, %v2457_v36  ;;  %v2088_v33 = vmul.f32 %v1971_v6, %v1805_v52  ;;  %v9699_v6 = vld [vmem:[#allocation242_spill] sm:$0xff]  ;;  %v3739_v51 = vmax.f32 %v3368_v56, 0.0 }
 0x212   :  { %v3370_v28 = vmul.f32 %v7404_v26, %v9695_v45  ;;  %v3371_v1 = vmul.f32 %v7404_v26, %v9696_v5  ;;  %v2458_v31 = vmul.f32 %v2341_v7, %v2341_v7  ;;  %v3485_v37 = vmul.f32 %v3368_v56, %v9691_v18 }
 0x213   :  { %v3970_v23 = vadd.f32 %v3969_v2, %v3854_v22  ;;  %v1726_v59 = vsel %vm1642_vm3, %v7397_v9, %v1471_v20  ;;  %v3372_v19 = vmul.f32 %v7404_v26, %v9697_v21  ;;  %v3373_v52 = vmul.f32 %v7404_v26, %v9698_v30  ;;  %v316_v9 = vpop.permute.xlu1 %315 }
 0x214   :  { %v7474_v62 = vmul.f32 %v7404_v26, %v9699_v6  ;;  %v1806_v8 = vsub.f32 %v4266_v38, %v1726_v59  ;;  %v3601_v17 = vadd.f32 %v3600_v50, %v3485_v37  ;;  %v3855_v44 = vmul.f32 %v3738_v27, %v3738_v27  ;;  %v4267_v50 = vld [vmem:[#allocation2 + $0x178] sm:$0xff]  ;;  %v148_v59 = vld [vmem:[#allocation2 + $0x3a0] sm:$0x7] }
 0x215   :  { %v1713_v2 = vsel %vm1642_vm3, %v1471_v20, %v1497_v58  ;;  %v2204_v7 = vadd.f32 %v2203_v0, %v2088_v33  ;;  %v3486_v18 = vmul.f32 %v3369_v4, %v9694_v60  ;;  %v3487_v10 = vmul.f32 %v3370_v28, %v9695_v45  ;;  %v9700_v27 = vld [vmem:[#allocation217_spill] sm:$0xff]  ;;  %381 = vrot.lane.b32.xlu0 %v148_v59, %s4397_s22 }
 0x216   :  { %v1700_v26 = vsel %vm1642_vm3, %v1497_v58, %v7452_v48  ;;  %v7485_v36 = vadd.f32 %v2573_v35, %v2458_v31  ;;  %v3488_v56 = vmul.f32 %v3371_v1, %v9696_v5  ;;  %v3740_v41 = vmax.f32 %v3369_v4, 0.0  ;;  %v4268_v31 = vld [vmem:[#allocation2 + $0x180] sm:$0xff]  ;;  %1640 = vrot.lane.b32.xlu1 %v148_v59, %s4399_s0 }
 0x217   :  { %v3971_v22 = vadd.f32 %v3970_v23, %v3855_v44  ;;  %v3741_v20 = vmax.f32 %v3370_v28, 0.0  ;;  %v1972_v0 = vmul.f32 %v9520_v57, %v1806_v8  ;;  %v1807_v60 = vsub.f32 %v4267_v50, %v1713_v2  ;;  %v1575_v2 = vpop.permute.xlu0 %1574  ;;  %v9703_v44 = vld [vmem:[#allocation195_spill] sm:$0xff] }
 0x218   :  { %v417_v33 = vsel %vm385_vm1, %v9700_v27, %v316_v9  ;;  %v3602_v58 = vadd.f32 %v3601_v17, %v3486_v18  ;;  %v3742_v35 = vmax.f32 %v3371_v1, 0.0  ;;  %v3856_v45 = vmul.f32 %v3739_v51, %v3739_v51  ;;  %v4269_v1 = vld [vmem:[#allocation2 + $0x190] sm:$0xff] }
 0x219   :  { %v1808_v5 = vsub.f32 %v4268_v31, %v1700_v26  ;;  %v7495_v4 = vmul.f32 %v3372_v19, %v9697_v21  ;;  %v7498_v28 = vmul.f32 %v3373_v52, %v9698_v30  ;;  %v7502_v37 = vmul.f32 %v7474_v62, %v9699_v6 }
 0x21a   :  { %v3743_v23 = vmax.f32 %v3372_v19, 0.0  ;;  %v3744_v38 = vmax.f32 %v3373_v52, 0.0  ;;  %v3972_v17 = vadd.f32 %v3971_v22, %v3856_v45  ;;  %v553_v51 = vsub.f32 %v4269_v1, %v417_v33  ;;  %v342_v19 = vpop.permute.xlu1 %341  ;;  %v9701_v33 = vld [vmem:[#allocation194_spill] sm:$0xff] }
 0x21b   :  { %v3857_v21 = vmul.f32 %v3740_v41, %v3740_v41  ;;  %v2342_v18 = vmax.f32 %v1972_v0, 0.0  ;;  %v1973_v30 = vmul.f32 %v9532_v25, %v1807_v60  ;;  %v1687_v6 = vsel %vm1642_vm3, %v7452_v48, %v7478_v14 }
 0x21c   :  { %v3603_v52 = vadd.f32 %v3602_v58, %v3487_v10  ;;  %v3858_v26 = vmul.f32 %v3741_v20, %v3741_v20  ;;  %v7512_v49 = vmul.f32 %v3742_v35, %v3742_v35  ;;  %v1974_v22 = vmul.f32 %v9550_v55, %v1808_v5  ;;  %v4271_v20 = vld [vmem:[#allocation2 + $0x188] sm:$0xff] }
 0x21d   :  { %v7515_v50 = vmul.f32 %v3743_v23, %v3743_v23  ;;  %v2089_v41 = vmul.f32 %v1972_v0, %v1806_v8  ;;  %v719_v27 = vmul.f32 %v9557_v54, %v553_v51  ;;  %v949_v45 = vadd.f32 %v7411_v47, %v9701_v33  ;;  %v9704_v33 = vld [vmem:[#allocation135_spill] sm:$0xff] }
 0x21e   :  { %v7520_v31 = vmul.f32 %v3744_v38, %v3744_v38  ;;  %v3973_v48 = vadd.f32 %v3972_v17, %v3857_v21  ;;  %v1809_v58 = vsub.f32 %v4271_v20, %v1687_v6  ;;  %v2459_v35 = vmul.f32 %v2342_v18, %v2342_v18  ;;  %v1601_v17 = vpop.permute.xlu0 %1600  ;;  %v9705_v6 = vld [vmem:[#allocation224_spill] sm:$0xff]  ;;  %v368_v20 = vpop.permute.xlu1 %367 }
 0x21f   :  { %v2343_v59 = vmax.f32 %v1973_v30, 0.0  ;;  %v950_v23 = vadd.f32 %v949_v45, %v9702_v46  ;;  %v1319_v8 = vadd.f32 %v7423_v11, %v9703_v44  ;;  %v7528_v0 = vadd.f32 %v3603_v52, %v3488_v56  ;;  %v4272_v56 = vld [vmem:[#allocation2 + $0x198] sm:$0xff]  ;;  %v9708_v45 = vld [vmem:[#allocation168_spill] sm:$0xff] }
 0x220   :  { %v2090_v24 = vmul.f32 %v1973_v30, %v1807_v60  ;;  %v2091_v47 = vmul.f32 %v1974_v22, %v1808_v5  ;;  %v404_v38 = vsel %vm385_vm1, %v316_v9, %v342_v19  ;;  %v2205_v21 = vadd.f32 %v2204_v7, %v2089_v41  ;;  %v9706_v9 = vld [vmem:[#allocation154_spill] sm:$0xff]  ;;  %v9707_v7 = vld [vmem:[#allocation252_spill] sm:$0xff] }
 0x221   :  { %v951_v10 = vadd.f32 %v950_v23, %v9704_v33  ;;  %v1089_v32 = vmax.f32 %v719_v27, 0.0  ;;  %v1320_v18 = vadd.f32 %v1319_v8, %v9705_v6  ;;  %v3974_v3 = vadd.f32 %v3973_v48, %v3858_v26  ;;  %v4273_v6 = vld [vmem:[#allocation2 + $0x1a0] sm:$0xff] }
 0x222   :  { %v2344_v46 = vmax.f32 %v1974_v22, 0.0  ;;  %v1674_v11 = vsel %vm1642_vm3, %v7478_v14, %v1575_v2  ;;  %v554_v60 = vsub.f32 %v4272_v56, %v404_v38  ;;  %v2575_v5 = vadd.f32 %v7485_v36, %v2459_v35  ;;  %v9709_v38 = vld [vmem:[#allocation52_spill] sm:$0xff] }
 0x223   :  { %v2460_v44 = vmul.f32 %v2343_v59, %v2343_v59  ;;  %v1975_v30 = vmul.f32 %v9706_v9, %v1809_v58  ;;  %v1321_v52 = vadd.f32 %v1320_v18, %v9707_v7  ;;  %v836_v41 = vmul.f32 %v719_v27, %v553_v51  ;;  %v1627_v27 = vpop.permute.xlu0 %1626 }
 0x224   :  { %v720_v23 = vmul.f32 %v9708_v45, %v554_v60  ;;  %v1661_v26 = vsel %vm1642_vm3, %v1575_v2, %v1601_v17  ;;  %v391_v22 = vsel %vm385_vm1, %v342_v19, %v368_v20  ;;  %v2206_v48 = vadd.f32 %v2205_v21, %v2090_v24  ;;  %v4274_v19 = vld [vmem:[#allocation2 + $0x1a8] sm:$0xff] }
 0x225   :  { %v1206_v14 = vmul.f32 %v1089_v32, %v1089_v32  ;;  %v1810_v8 = vsub.f32 %v4269_v1, %v1674_v11  ;;  %v495_v36 = vsel %vm385_vm1, %v368_v20, %v9709_v38  ;;  %v2461_v35 = vmul.f32 %v2344_v46, %v2344_v46 }
 0x226   :  { %v837_v59 = vmul.f32 %v720_v23, %v554_v60  ;;  %v1090_v33 = vmax.f32 %v720_v23, 0.0  ;;  %v555_v51 = vsub.f32 %v4273_v6, %v391_v22  ;;  %v2576_v18 = vadd.f32 %v2575_v5, %v2460_v44  ;;  %v7553_v44 = vpop.permute.xlu1 %1420 }
 0x227   :  { %v2092_v7 = vmul.f32 %v1975_v30, %v1809_v58  ;;  %v2345_v34 = vmax.f32 %v1975_v30, 0.0  ;;  %v1811_v2 = vsub.f32 %v4272_v56, %v1661_v26  ;;  %v952_v45 = vadd.f32 %v951_v10, %v836_v41 }
 0x228   :  { %v1207_v9 = vmul.f32 %v1090_v33, %v1090_v33  ;;  %v556_v24 = vsub.f32 %v4274_v19, %v495_v36  ;;  %v721_v32 = vmul.f32 %v9562_v40, %v555_v51  ;;  %v2207_v1 = vadd.f32 %v2206_v48, %v2091_v47  ;;  %v7559_v48 = vpop.permute.xlu0 %1446 }
 0x229   :  { %v1322_v21 = vadd.f32 %v1321_v52, %v1206_v14  ;;  %v1976_v20 = vmul.f32 %v9587_v15, %v1810_v8  ;;  %v1648_v46 = vsel %vm1642_vm3, %v1601_v17, %v1627_v27  ;;  %v953_v11 = vadd.f32 %v952_v45, %v837_v59 }
 0x22a   :  { %v722_v60 = vmul.f32 %v7196_v13, %v556_v24  ;;  %v838_v5 = vmul.f32 %v721_v32, %v555_v51  ;;  %v1091_v58 = vmax.f32 %v721_v32, 0.0  ;;  %v1977_v56 = vmul.f32 %v9588_v63, %v1811_v2  ;;  %v9712_v32 = vld [vmem:[#allocation199_spill] sm:$0xff] }
 0x22b   :  { %v1323_v10 = vadd.f32 %v1322_v21, %v1207_v9  ;;  %v1752_v47 = vsel %vm1642_vm3, %v1627_v27, %v7390_v53  ;;  %v1812_v30 = vsub.f32 %v4273_v6, %v1648_v46  ;;  %v2577_v17 = vadd.f32 %v2576_v18, %v2461_v35  ;;  %v9710_v27 = vld [vmem:[#allocation134_spill] sm:$0xff] }
 0x22c   :  { %v839_v52 = vmul.f32 %v722_v60, %v556_v24  ;;  %v954_v41 = vadd.f32 %v953_v11, %v838_v5  ;;  %v1092_v23 = vmax.f32 %v722_v60, 0.0  ;;  %v1208_v26 = vmul.f32 %v1091_v58, %v1091_v58  ;;  %v4275_v58 = vld [vmem:[#allocation2 + $0x1b0] sm:$0xff] }
 0x22d   :  { %v2208_v45 = vadd.f32 %v2207_v1, %v2092_v7  ;;  %v2093_v22 = vmul.f32 %v1976_v20, %v1810_v8  ;;  %v2346_v13 = vmax.f32 %v1976_v20, 0.0  ;;  %v1978_v36 = vmul.f32 %v9591_v16, %v1812_v30  ;;  %v7570_v7 = vpop.permute.xlu1 %3288  ;;  %v9715_v20 = vld [vmem:[#allocation139_spill] sm:$0xff] }
 0x22e   :  { %v955_v14 = vadd.f32 %v954_v41, %v839_v52  ;;  %v1209_v38 = vmul.f32 %v1092_v23, %v1092_v23  ;;  %v1324_v9 = vadd.f32 %v1323_v10, %v1208_v26  ;;  %v3605_v59 = vadd.f32 %v7528_v0, %v7495_v4  ;;  %v7584_v41 = vpop.permute.xlu0 %1472  ;;  %v9717_v26 = vld [vmem:[#allocation174_spill] sm:$0xff] }
 0x22f   :  { %v3975_v53 = vadd.f32 %v3974_v3, %v7512_v49  ;;  %v2462_v33 = vmul.f32 %v2345_v34, %v2345_v34  ;;  %v1813_v6 = vsub.f32 %v4274_v19, %v1752_v47  ;;  %v2347_v51 = vmax.f32 %v1977_v56, 0.0  ;;  %v9714_v19 = vld [vmem:[#allocation172_spill] sm:$0xff]  ;;  %v9716_v47 = vld [vmem:[#allocation41_spill] sm:$0xff] }
 0x230   :  { %v956_v35 = vadd.f32 %v955_v14, %v9710_v27  ;;  %v1325_v18 = vadd.f32 %v1324_v9, %v1209_v38  ;;  %v1740_v8 = vsel %vm1642_vm3, %v7553_v44, %v7559_v48  ;;  %v9711_v24 = vrot.slane %v7522_v43, 1  ;;  %v7597_v14 = vld [vmem:[#allocation2 + $0x308] sm:$0xff] }
 0x231   :  { %v9713_v1 = vrot.slane %v9712_v32, 1  ;;  %v2578_v3 = vadd.f32 %v2577_v17, %v2462_v33  ;;  %v2209_v34 = vadd.f32 %v2208_v45, %v2093_v22  ;;  %v2094_v49 = vmul.f32 %v1977_v56, %v1811_v2  ;;  %v7594_v22 = vld [vmem:[#allocation2 + $0x300] sm:$0xff]  ;;  %9719 = vst [vmem:[#allocation157_spill] sm:$0xff] %v7597_v14 }
 0x232   :  { %v2463_v0 = vmul.f32 %v2346_v13, %v2346_v13  ;;  %v7578_v21 = vadd.f32 %v956_v35, %v9714_v19  ;;  %v1326_v46 = vadd.f32 %v1325_v18, %v9715_v20  ;;  %v2348_v11 = vmax.f32 %v1978_v36, 0.0  ;;  %v7626_v19 = vpop.permute.xlu0 %1524 }
 0x233   :  { %v2954_v4 = vsel %vm2783_vm0, %v9713_v1, %v9711_v24  ;;  %v1979_v60 = vmul.f32 %v7236_v39, %v1813_v6  ;;  %v2095_v5 = vmul.f32 %v1978_v36, %v1812_v30  ;;  %v1814_v10 = vsub.f32 %v4275_v58, %v1740_v8  ;;  %v9721_v24 = vld [vmem:[#allocation78_spill] sm:$0xff]  ;;  %v1499_v1 = vpop.permute.xlu1 %1498 }
 0x234   :  { %v3375_v52 = vmul.f32 %v7570_v7, %v9716_v47  ;;  %v3606_v23 = vadd.f32 %v3605_v59, %v7498_v28  ;;  %v3976_v2 = vadd.f32 %v3975_v53, %v7515_v50  ;;  %v2464_v56 = vmul.f32 %v2347_v51, %v2347_v51  ;;  %v7600_v28 = vld [vmem:[#allocation2 + $0x280] sm:$0xff] }
 0x235   :  { %v7589_v17 = vadd.f32 %v1326_v46, %v9717_v26  ;;  %v9718_v45 = vmax.f32 %v7474_v62, 0.0  ;;  %v2210_v30 = vadd.f32 %v2209_v34, %v2094_v49  ;;  %v9113_v13 = vrot.slane %v7594_v22, 1  ;;  %v9720_v59 = vld [vmem:[#allocation59_spill] sm:$0xff] }
 0x236   :  { %v9112_v38 = vrot.slane %v7597_v14, 1  ;;  %v7603_v50 = vsub.f32 %v7600_v28, %v2954_v4  ;;  %v2579_v9 = vadd.f32 %v2578_v3, %v2463_v0  ;;  %v2465_v36 = vmul.f32 %v2348_v11, %v2348_v11  ;;  %v4288_v14 = vld [vmem:[#allocation2 + $0x1f0] sm:$0xff] }
 0x237   :  { %v3862_v39 = vmul.f32 %v9718_v45, %v9718_v45  ;;  %v3376_v62 = vmul.f32 %v7570_v7, %v9720_v59  ;;  %v2211_v53 = vadd.f32 %v2210_v30, %v2095_v5  ;;  %v2349_v33 = vmax.f32 %v1979_v60, 0.0  ;;  %v4279_v45 = vld [vmem:[#allocation2 + $0x2b8] sm:$0xff] }
 0x238   :  { %v1980_v51 = vmul.f32 %v9527_v61, %v1814_v10  ;;  %v3492_v27 = vmul.f32 %v3375_v52, %v9716_v47  ;;  %v3607_v35 = vadd.f32 %v3606_v23, %v7502_v37  ;;  %v3977_v18 = vadd.f32 %v3976_v2, %v7520_v31  ;;  %v9724_v31 = vld [vmem:[#allocation118_spill] sm:$0xff] }
 0x239   :  { %v2580_v8 = vadd.f32 %v2579_v9, %v2464_v56  ;;  %v7613_v32 = vmul.f32 %v7570_v7, %v9721_v24  ;;  %v9722_v4 = vrot.slane %v6968_v29, 1  ;;  %v2096_v34 = vmul.f32 %v1979_v60, %v1813_v6  ;;  %v9725_v6 = vld [vmem:[#allocation27_spill] sm:$0xff] }
 0x23a   :  { %v9723_v49 = vrot.slane %v6988_v42, 1  ;;  %v9111_v0 = vrot.slane %v9724_v31, 1  ;;  %v3493_v46 = vmul.f32 %v3376_v62, %v9720_v59  ;;  %v3608_v11 = vadd.f32 %v3607_v35, %v3492_v27  ;;  %v4280_v9 = vld [vmem:[#allocation2 + $0x2c0] sm:$0xff] }
 0x23b   :  { %v2968_v3 = vsel %vm2783_vm0, %v9722_v4, %v9113_v13  ;;  %v2581_v20 = vadd.f32 %v2580_v8, %v2465_v36  ;;  %v3746_v5 = vmax.f32 %v3375_v52, 0.0  ;;  %v2212_v58 = vadd.f32 %v2211_v53, %v2096_v34  ;;  %v9729_v53 = vld [vmem:[#allocation91_spill] sm:$0xff]  ;;  %v9730_v8 = vld [vmem:[#allocation105_spill] sm:$0xff]  ;;  %v9731_v34 = vld [vmem:[#allocation98_spill] sm:$0xff] }
 0x23c   :  { %v2970_v37 = vsel %vm2783_vm0, %v9723_v49, %v9112_v38  ;;  %v2466_v29 = vmul.f32 %v2349_v33, %v2349_v33  ;;  %v2097_v47 = vmul.f32 %v1980_v51, %v1814_v10  ;;  %v2350_v23 = vmax.f32 %v1980_v51, 0.0  ;;  %v9740_v38 = vld [vmem:[#allocation14_spill] sm:$0xff] }
 0x23d   :  { %v3378_v60 = vmul.f32 %v7570_v7, %v9725_v6  ;;  %v3494_v42 = vmul.f32 %v7613_v32, %v9721_v24  ;;  %v3609_v2 = vadd.f32 %v3608_v11, %v3493_v46  ;;  %v3863_v56 = vmul.f32 %v3746_v5, %v3746_v5  ;;  %v9733_v11 = vld [vmem:[#allocation116_spill] sm:$0xff] }
 0x23e   :  { %v3978_v26 = vadd.f32 %v3977_v18, %v3862_v39  ;;  %v7633_v30 = vsub.f32 %v4279_v45, %v2968_v3  ;;  %v7635_v36 = vsub.f32 %v4280_v9, %v2970_v37  ;;  %v9728_v10 = vrot.slane %v7522_v43, 1  ;;  %v7646_v39 = vpop.permute.xlu1 %1550  ;;  %v7656_v3 = vpop.permute.xlu0 %317  ;;  %v9732_v37 = vld [vmem:[#allocation115_spill] sm:$0xff]  ;;  %v9736_v9 = vld [vmem:[#allocation193_spill] sm:$0xff] }
 0x23f   :  { %v2582_v59 = vadd.f32 %v2581_v20, %v2466_v29  ;;  %v3379_v33 = vmul.f32 %v7570_v7, %v9729_v53  ;;  %v3610_v51 = vadd.f32 %v3609_v2, %v3494_v42  ;;  %v3747_v27 = vmax.f32 %v3376_v62, 0.0  ;;  %v9734_v29 = vld [vmem:[#allocation192_spill] sm:$0xff]  ;;  %v4281_v2 = vld [vmem:[#allocation2 + $0x1b8] sm:$0xff] }
 0x240   :  { %9726 = vst [vmem:[#allocation51_spill] sm:$0xff] %v7633_v30  ;;  %9727 = vst [vmem:[#allocation72_spill] sm:$0xff] %v7635_v36  ;;  %v7642_v52 = vsel %vm2783_vm0, %v9728_v10, %v9111_v0  ;;  %v7648_v35 = vadd.f32 %v2212_v58, %v2097_v47  ;;  %v2467_v18 = vmul.f32 %v2350_v23, %v2350_v23  ;;  %v3748_v58 = vmax.f32 %v7613_v32, 0.0  ;;  %v9735_v32 = vld [vmem:[#allocation228_spill] sm:$0xff] }
 0x241   :  { %v3380_v24 = vmul.f32 %v7570_v7, %v9730_v8  ;;  %v1727_v4 = vsel %vm1642_vm3, %v7559_v48, %v7584_v41  ;;  %v3381_v49 = vmul.f32 %v7570_v7, %v9731_v34  ;;  %v3382_v62 = vmul.f32 %v7570_v7, %v9732_v37 }
 0x242   :  { %v3495_v20 = vmul.f32 %v3378_v60, %v9725_v6  ;;  %v3979_v46 = vadd.f32 %v3978_v26, %v3863_v56  ;;  %v7665_v5 = vmul.f32 %v7570_v7, %v9733_v11  ;;  %v1714_v48 = vsel %vm1642_vm3, %v7584_v41, %v1499_v1 }
 0x243   :  { %v958_v47 = vadd.f32 %v7578_v21, %v9734_v29  ;;  %v3864_v42 = vmul.f32 %v3747_v27, %v3747_v27  ;;  %v1815_v45 = vsub.f32 %v4281_v2, %v1727_v4  ;;  %v1701_v6 = vsel %vm1642_vm3, %v1499_v1, %v7626_v19  ;;  %v4282_v27 = vld [vmem:[#allocation2 + $0x1c0] sm:$0xff]  ;;  %v7683_v4 = vpop.permute.xlu1 %1576 }
 0x244   :  { %v3611_v23 = vadd.f32 %v3610_v51, %v3495_v20  ;;  %v7676_v56 = vadd.f32 %v2582_v59, %v2467_v18  ;;  %v3496_v7 = vmul.f32 %v3379_v33, %v9729_v53  ;;  %v1328_v41 = vadd.f32 %v7589_v17, %v9736_v9  ;;  %v4283_v53 = vld [vmem:[#allocation2 + $0x1c8] sm:$0xff] }
 0x245   :  { %v959_v26 = vadd.f32 %v958_v47, %v9735_v32  ;;  %v3497_v10 = vmul.f32 %v3380_v24, %v9730_v8  ;;  %v3749_v21 = vmax.f32 %v3378_v60, 0.0  ;;  %v3980_v51 = vadd.f32 %v3979_v46, %v3864_v42  ;;  %v344_v47 = vpop.permute.xlu0 %343  ;;  %v9737_v42 = vld [vmem:[#allocation251_spill] sm:$0xff] }
 0x246   :  { %v1816_v20 = vsub.f32 %v4282_v27, %v1714_v48  ;;  %v3498_v29 = vmul.f32 %v3381_v49, %v9731_v34  ;;  %v7687_v1 = vmul.f32 %v3382_v62, %v9732_v37  ;;  %v3750_v59 = vmax.f32 %v3379_v33, 0.0 }
 0x247   :  { %v1817_v18 = vsub.f32 %v4283_v53, %v1701_v6  ;;  %v3612_v2 = vadd.f32 %v3611_v23, %v3496_v7  ;;  %v3751_v32 = vmax.f32 %v3380_v24, 0.0  ;;  %v3865_v17 = vmul.f32 %v3748_v58, %v3748_v58  ;;  %v9738_v58 = vld [vmem:[#allocation160_spill] sm:$0xff] }
 0x248   :  { %v1981_v8 = vmul.f32 %v9520_v57, %v1815_v45  ;;  %v3752_v60 = vmax.f32 %v3381_v49, 0.0  ;;  %v3753_v46 = vmax.f32 %v3382_v62, 0.0  ;;  %v960_v9 = vadd.f32 %v959_v26, %v9737_v42  ;;  %v9739_v49 = vld [vmem:[#allocation216_spill] sm:$0xff] }
 0x249   :  { %v3866_v27 = vmul.f32 %v3749_v21, %v3749_v21  ;;  %v3981_v34 = vadd.f32 %v3980_v51, %v3865_v17  ;;  %v1982_v37 = vmul.f32 %v9532_v25, %v1816_v20  ;;  %v1688_v33 = vsel %vm1642_vm3, %v7626_v19, %v7646_v39  ;;  %v4284_v51 = vld [vmem:[#allocation2 + $0x1d8] sm:$0xff]  ;;  %v1603_v17 = vpop.permute.xlu1 %1602  ;;  %v4285_v19 = vld [vmem:[#allocation2 + $0x1d0] sm:$0xff]  ;;  %v370_v48 = vpop.permute.xlu0 %369 }
 0x24a   :  { %v3867_v23 = vmul.f32 %v3750_v59, %v3750_v59  ;;  %v1983_v24 = vmul.f32 %v9550_v55, %v1817_v18  ;;  %v1329_v6 = vadd.f32 %v1328_v41, %v9738_v58  ;;  %v418_v62 = vsel %vm385_vm1, %v9739_v49, %v7656_v3 }
 0x24b   :  { %v3613_v7 = vadd.f32 %v3612_v2, %v3497_v10  ;;  %v3868_v26 = vmul.f32 %v3751_v32, %v3751_v32  ;;  %v2351_v21 = vmax.f32 %v1981_v8, 0.0  ;;  %v562_v53 = vsub.f32 %v4284_v51, %v418_v62 }
 0x24c   :  { %v7703_v42 = vmul.f32 %v3752_v60, %v3752_v60  ;;  %v2098_v0 = vmul.f32 %v1981_v8, %v1815_v45  ;;  %v1818_v59 = vsub.f32 %v4285_v19, %v1688_v33  ;;  %v1330_v13 = vadd.f32 %v1329_v6, %v9740_v38  ;;  %v9741_v33 = vld [vmem:[#allocation154_spill] sm:$0xff] }
 0x24d   :  { %v7706_v41 = vmul.f32 %v3753_v46, %v3753_v46  ;;  %v3982_v58 = vadd.f32 %v3981_v34, %v3866_v27  ;;  %v2352_v31 = vmax.f32 %v1982_v37, 0.0  ;;  %v728_v49 = vmul.f32 %v9557_v54, %v562_v53  ;;  %v4286_v34 = vld [vmem:[#allocation2 + $0x1e0] sm:$0xff] }
 0x24e   :  { %v2099_v10 = vmul.f32 %v1982_v37, %v1816_v20  ;;  %v2100_v2 = vmul.f32 %v1983_v24, %v1817_v18  ;;  %v2353_v32 = vmax.f32 %v1983_v24, 0.0  ;;  %v405_v60 = vsel %vm385_vm1, %v7656_v3, %v344_v47  ;;  %v9742_v20 = vld [vmem:[#allocation61_spill] sm:$0xff] }
 0x24f   :  { %v3614_v62 = vadd.f32 %v3613_v7, %v3498_v29  ;;  %v2468_v45 = vmul.f32 %v2351_v21, %v2351_v21  ;;  %v1098_v8 = vmax.f32 %v728_v49, 0.0  ;;  %v392_v38 = vsel %vm385_vm1, %v344_v47, %v370_v48  ;;  %v1629_v47 = vpop.permute.xlu1 %1628  ;;  %v4287_v21 = vld [vmem:[#allocation2 + $0x1e8] sm:$0xff] }
 0x250   :  { %v2214_v46 = vadd.f32 %v7648_v35, %v2098_v0  ;;  %v7716_v27 = vmul.f32 %v9741_v33, %v1818_v59  ;;  %v563_v6 = vsub.f32 %v4286_v34, %v405_v60  ;;  %v496_v18 = vsel %vm385_vm1, %v370_v48, %v9742_v20  ;;  %v9743_v0 = vld [vmem:[#allocation168_spill] sm:$0xff] }
 0x251   :  { %v3983_v37 = vadd.f32 %v3982_v58, %v3867_v23  ;;  %v2469_v24 = vmul.f32 %v2352_v31, %v2352_v31  ;;  %v845_v3 = vmul.f32 %v728_v49, %v562_v53  ;;  %v1675_v29 = vsel %vm1642_vm3, %v7646_v39, %v7683_v4 }
 0x252   :  { %v1215_v7 = vmul.f32 %v1098_v8, %v1098_v8  ;;  %v729_v35 = vmul.f32 %v9743_v0, %v563_v6  ;;  %v564_v19 = vsub.f32 %v4287_v21, %v392_v38  ;;  %v565_v60 = vsub.f32 %v4288_v14, %v496_v18  ;;  %v7735_v38 = vld [vmem:[%s8863_s1 + $0x8] ss:$0 sm:$0xff] }
 0x253   :  { %v2584_v36 = vadd.f32 %v7676_v56, %v2468_v45  ;;  %v2215_v30 = vadd.f32 %v2214_v46, %v2099_v10  ;;  %v2470_v48 = vmul.f32 %v2353_v32, %v2353_v32  ;;  %v1662_v31 = vsel %vm1642_vm3, %v7683_v4, %v1603_v17 }
 0x254   :  { %v2101_v23 = vmul.f32 %v7716_v27, %v1818_v59  ;;  %v1819_v53 = vsub.f32 %v4284_v51, %v1675_v29  ;;  %v846_v39 = vmul.f32 %v729_v35, %v563_v6  ;;  %v1099_v58 = vmax.f32 %v729_v35, 0.0  ;;  %v7739_v59 = vpop.permute.xlu0 %1422  ;;  %v7741_v6 = vpop.permute.xlu1 %1448 }
 0x255   :  { %v3984_v49 = vadd.f32 %v3983_v37, %v3868_v26  ;;  %v961_v8 = vadd.f32 %v960_v9, %v845_v3  ;;  %v730_v20 = vmul.f32 %v9562_v40, %v564_v19  ;;  %v731_v56 = vmul.f32 %v7735_v38, %v565_v60 }
 0x256   :  { %v2354_v10 = vmax.f32 %v7716_v27, 0.0  ;;  %v1331_v32 = vadd.f32 %v1330_v13, %v1215_v7  ;;  %v1216_v4 = vmul.f32 %v1099_v58, %v1099_v58  ;;  %v1820_v45 = vsub.f32 %v4286_v34, %v1662_v31 }
 0x257   :  { %v962_v51 = vadd.f32 %v961_v8, %v846_v39  ;;  %v847_v46 = vmul.f32 %v730_v20, %v564_v19  ;;  %v1100_v26 = vmax.f32 %v730_v20, 0.0  ;;  %v1101_v9 = vmax.f32 %v731_v56, 0.0 }
 0x258   :  { %v2585_v18 = vadd.f32 %v2584_v36, %v2469_v24  ;;  %v1985_v37 = vmul.f32 %v9587_v15, %v1819_v53  ;;  %v848_v3 = vmul.f32 %v731_v56, %v565_v60  ;;  %v1649_v29 = vsel %vm1642_vm3, %v1603_v17, %v1629_v47 }
 0x259   :  { %v1332_v35 = vadd.f32 %v1331_v32, %v1216_v4  ;;  %v963_v27 = vadd.f32 %v962_v51, %v847_v46  ;;  %v1217_v13 = vmul.f32 %v1100_v26, %v1100_v26  ;;  %v1753_v34 = vsel %vm1642_vm3, %v1629_v47, %v7553_v44  ;;  %v7756_v44 = vpop.permute.xlu0 %3293  ;;  %v4290_v32 = vld [vmem:[#allocation2 + $0x1f8] sm:$0xff] }
 0x25a   :  { %v2216_v7 = vadd.f32 %v2215_v30, %v2100_v2  ;;  %v1986_v19 = vmul.f32 %v9588_v63, %v1820_v45  ;;  %v1821_v31 = vsub.f32 %v4287_v21, %v1649_v29  ;;  %v1741_v36 = vsel %vm1642_vm3, %v7739_v59, %v7741_v6  ;;  %v9744_v30 = vld [vmem:[#allocation142_spill] sm:$0xff] }
 0x25b   :  { %v3615_v24 = vadd.f32 %v3614_v62, %v7687_v1  ;;  %v964_v60 = vadd.f32 %v963_v27, %v848_v3  ;;  %v1218_v17 = vmul.f32 %v1101_v9, %v1101_v9  ;;  %v1333_v39 = vadd.f32 %v1332_v35, %v1217_v13  ;;  %v9745_v9 = vld [vmem:[#allocation171_spill] sm:$0xff] }
 0x25c   :  { %v3985_v58 = vadd.f32 %v3984_v49, %v7703_v42  ;;  %v2102_v8 = vmul.f32 %v1985_v37, %v1819_v53  ;;  %v2355_v20 = vmax.f32 %v1985_v37, 0.0  ;;  %v1822_v56 = vsub.f32 %v4288_v14, %v1753_v34  ;;  %v9746_v42 = vld [vmem:[#allocation145_spill] sm:$0xff]  ;;  %v9747_v14 = vld [vmem:[#allocation42_spill] sm:$0xff]  ;;  %v1475_v34 = vpop.permute.xlu1 %1474 }
 0x25d   :  { %v965_v2 = vadd.f32 %v964_v60, %v9744_v30  ;;  %v1334_v47 = vadd.f32 %v1333_v39, %v1218_v17  ;;  %v1987_v21 = vmul.f32 %v9591_v16, %v1821_v31  ;;  %v1823_v4 = vsub.f32 %v4290_v32, %v1741_v36  ;;  %v9751_v60 = vld [vmem:[#allocation62_spill] sm:$0xff] }
 0x25e   :  { %v2586_v51 = vadd.f32 %v2585_v18, %v2470_v48  ;;  %v2217_v46 = vadd.f32 %v2216_v7, %v2101_v23  ;;  %v2471_v1 = vmul.f32 %v2354_v10, %v2354_v10  ;;  %v2103_v62 = vmul.f32 %v1986_v19, %v1820_v45  ;;  %v7770_v48 = vld [vmem:[%s8864_s2 + $0x8] ss:$0 sm:$0xff]  ;;  %v9748_v10 = vld [vmem:[#allocation173_spill] sm:$0xff] }
 0x25f   :  { %v2356_v26 = vmax.f32 %v1986_v19, 0.0  ;;  %v7761_v3 = vadd.f32 %v965_v2, %v9745_v9  ;;  %v1335_v53 = vadd.f32 %v1334_v47, %v9746_v42  ;;  %v3384_v49 = vmul.f32 %v7756_v44, %v9747_v14  ;;  %v1501_v47 = vpop.permute.xlu0 %1500  ;;  %v7794_v42 = vld [vmem:[#allocation2 + $0x348] sm:$0xff] }
 0x260   :  { %v3986_v37 = vadd.f32 %v3985_v58, %v7706_v41  ;;  %v2218_v29 = vadd.f32 %v2217_v46, %v2102_v8  ;;  %v2472_v35 = vmul.f32 %v2355_v20, %v2355_v20  ;;  %v1988_v23 = vmul.f32 %v7770_v48, %v1822_v56  ;;  %v9753_v46 = vld [vmem:[#allocation28_spill] sm:$0xff]  ;;  %9754 = vst [vmem:[#allocation21_spill] sm:$0xff] %v7794_v42 }
 0x261   :  { %v7774_v45 = vadd.f32 %v1335_v53, %v9748_v10  ;;  %v2104_v18 = vmul.f32 %v1987_v21, %v1821_v31  ;;  %v2357_v27 = vmax.f32 %v1987_v21, 0.0  ;;  %v1989_v13 = vmul.f32 %v9527_v61, %v1823_v4 }
 0x262   :  { %v7779_v41 = vsub.f32 %v7522_v43, %v7642_v52  ;;  %v3500_v7 = vmul.f32 %v7665_v5, %v9733_v11  ;;  %v9750_v19 = vmax.f32 %v7665_v5, 0.0  ;;  %v3385_v17 = vmul.f32 %v7756_v44, %v9751_v60  ;;  %v9752_v43 = vld [vmem:[#allocation19_spill] sm:$0xff] }
 0x263   :  { %v2587_v39 = vadd.f32 %v2586_v51, %v2471_v1  ;;  %v2219_v31 = vadd.f32 %v2218_v29, %v2103_v62  ;;  %v2473_v58 = vmul.f32 %v2356_v26, %v2356_v26  ;;  %v3501_v8 = vmul.f32 %v3384_v49, %v9747_v14 }
 0x264   :  { %9749 = vst [vmem:[#allocation161_spill] sm:$0xff] %v7779_v41  ;;  %v3871_v36 = vmul.f32 %v9750_v19, %v9750_v19  ;;  %v3616_v20 = vadd.f32 %v3615_v24, %v3500_v7  ;;  %v2358_v2 = vmax.f32 %v1988_v23, 0.0  ;;  %v3386_v52 = vmul.f32 %v7756_v44, %v9752_v43  ;;  %v9755_v19 = vld [vmem:[#allocation92_spill] sm:$0xff]  ;;  %v9762_v24 = vld [vmem:[#allocation201_spill] sm:$0xff] }
 0x265   :  { %v2588_v11 = vadd.f32 %v2587_v39, %v2472_v35  ;;  %v2220_v21 = vadd.f32 %v2219_v31, %v2104_v18  ;;  %v2474_v5 = vmul.f32 %v2357_v27, %v2357_v27  ;;  %v2359_v32 = vmax.f32 %v1989_v13, 0.0 }
 0x266   :  { %v3987_v30 = vadd.f32 %v3986_v37, %v3871_v36  ;;  %v3387_v9 = vmul.f32 %v7756_v44, %v9753_v46  ;;  %v3502_v51 = vmul.f32 %v3385_v17, %v9751_v60  ;;  %v3617_v1 = vadd.f32 %v3616_v20, %v3501_v8  ;;  %v1527_v37 = vpop.permute.xlu1 %1526  ;;  %v7801_v8 = vpop.permute.xlu0 %1552 }
 0x267   :  { %v3755_v62 = vmax.f32 %v3384_v49, 0.0  ;;  %v2589_v26 = vadd.f32 %v2588_v11, %v2473_v58  ;;  %v2105_v53 = vmul.f32 %v1988_v23, %v1822_v56  ;;  %v3756_v14 = vmax.f32 %v3385_v17, 0.0  ;;  %v9756_v56 = vld [vmem:[#allocation106_spill] sm:$0xff] }
 0x268   :  { %v2475_v29 = vmul.f32 %v2358_v2, %v2358_v2  ;;  %v2106_v35 = vmul.f32 %v1989_v13, %v1823_v4  ;;  %v3503_v10 = vmul.f32 %v3386_v52, %v9752_v43  ;;  %v3618_v18 = vadd.f32 %v3617_v1, %v3502_v51  ;;  %v9757_v4 = vld [vmem:[#allocation36_spill] sm:$0xff]  ;;  %v9758_v2 = vld [vmem:[#allocation181_spill] sm:$0xff] }
 0x269   :  { %v2221_v27 = vadd.f32 %v2220_v21, %v2105_v53  ;;  %v2476_v7 = vmul.f32 %v2359_v32, %v2359_v32  ;;  %v3388_v36 = vmul.f32 %v7756_v44, %v9755_v19  ;;  %v3872_v60 = vmul.f32 %v3755_v62, %v3755_v62 }
 0x26a   :  { %v2590_v49 = vadd.f32 %v2589_v26, %v2474_v5  ;;  %v3504_v39 = vmul.f32 %v3387_v9, %v9753_v46  ;;  %v3619_v31 = vadd.f32 %v3618_v18, %v3503_v10  ;;  %v3757_v58 = vmax.f32 %v3386_v52, 0.0  ;;  %v4293_v46 = vld [vmem:[#allocation2 + $0x200] sm:$0xff]  ;;  %v320_v1 = vpop.permute.xlu1 %319 }
 0x26b   :  { %v3389_v23 = vmul.f32 %v7756_v44, %v9756_v56  ;;  %v3390_v13 = vmul.f32 %v7756_v44, %v9757_v4  ;;  %v3873_v17 = vmul.f32 %v3756_v14, %v3756_v14  ;;  %v3988_v20 = vadd.f32 %v3987_v30, %v3872_v60  ;;  %v9759_v26 = vld [vmem:[#allocation34_spill] sm:$0xff]  ;;  %v4294_v60 = vld [vmem:[#allocation2 + $0x208] sm:$0xff] }
 0x26c   :  { %v7809_v43 = vmul.f32 %v7756_v44, %v9758_v2  ;;  %v3620_v11 = vadd.f32 %v3619_v31, %v3504_v39  ;;  %v1728_v21 = vsel %vm1642_vm3, %v7741_v6, %v1475_v34  ;;  %v1715_v52 = vsel %vm1642_vm3, %v1475_v34, %v1501_v47 }
 0x26d   :  { %v3505_v5 = vmul.f32 %v3388_v36, %v9755_v19  ;;  %v3989_v32 = vadd.f32 %v3988_v20, %v3873_v17  ;;  %v1824_v51 = vsub.f32 %v4293_v46, %v1728_v21  ;;  %v1702_v30 = vsel %vm1642_vm3, %v1501_v47, %v1527_v37  ;;  %v4295_v47 = vld [vmem:[#allocation2 + $0x210] sm:$0xff]  ;;  %v9760_v46 = vld [vmem:[#allocation223_spill] sm:$0xff] }
 0x26e   :  { %v2591_v62 = vadd.f32 %v2590_v49, %v2475_v29  ;;  %v7821_v53 = vmul.f32 %v7756_v44, %v9759_v26  ;;  %v3758_v14 = vmax.f32 %v3387_v9, 0.0  ;;  %v3874_v10 = vmul.f32 %v3757_v58, %v3757_v58  ;;  %v1579_v29 = vpop.permute.xlu0 %1578 }
 0x26f   :  { %v2222_v6 = vadd.f32 %v2221_v27, %v2106_v35  ;;  %v3621_v18 = vadd.f32 %v3620_v11, %v3505_v5  ;;  %v1990_v34 = vmul.f32 %v9520_v57, %v1824_v51  ;;  %v1825_v19 = vsub.f32 %v4294_v60, %v1715_v52  ;;  %v346_v5 = vpop.permute.xlu1 %345 }
 0x270   :  { %v3506_v39 = vmul.f32 %v3389_v23, %v9756_v56  ;;  %v3507_v31 = vmul.f32 %v3390_v13, %v9757_v4  ;;  %v3990_v17 = vadd.f32 %v3989_v32, %v3874_v10  ;;  %v1826_v20 = vsub.f32 %v4295_v47, %v1702_v30  ;;  %v9764_v32 = vld [vmem:[#allocation122_spill] sm:$0xff] }
 0x271   :  { %v3759_v49 = vmax.f32 %v3388_v36, 0.0  ;;  %v2107_v21 = vmul.f32 %v1990_v34, %v1824_v51  ;;  %v2360_v44 = vmax.f32 %v1990_v34, 0.0  ;;  %v419_v9 = vsel %vm385_vm1, %v9760_v46, %v320_v1 }
 0x272   :  { %v3760_v35 = vmax.f32 %v3389_v23, 0.0  ;;  %v3761_v27 = vmax.f32 %v3390_v13, 0.0  ;;  %v3875_v58 = vmul.f32 %v3758_v14, %v3758_v14  ;;  %v1689_v56 = vsel %vm1642_vm3, %v1527_v37, %v7801_v8  ;;  %v4296_v13 = vld [vmem:[#allocation2 + $0x220] sm:$0xff]  ;;  %v4297_v37 = vld [vmem:[#allocation2 + $0x218] sm:$0xff]  ;;  %v1605_v47 = vpop.permute.xlu0 %1604 }
 0x273   :  { %v2592_v11 = vadd.f32 %v2591_v62, %v2476_v7  ;;  %v7834_v4 = vmul.f32 %v7809_v43, %v9758_v2  ;;  %v3622_v52 = vadd.f32 %v3621_v18, %v3506_v39  ;;  %v1991_v36 = vmul.f32 %v9532_v25, %v1825_v19  ;;  %v9761_v18 = vld [vmem:[#allocation198_spill] sm:$0xff] }
 0x274   :  { %v3991_v51 = vadd.f32 %v3990_v17, %v3875_v58  ;;  %v1992_v23 = vmul.f32 %v9550_v55, %v1826_v20  ;;  %v571_v30 = vsub.f32 %v4296_v13, %v419_v9  ;;  %v3876_v14 = vmul.f32 %v3759_v49, %v3759_v49  ;;  %v9763_v9 = vld [vmem:[#allocation227_spill] sm:$0xff] }
 0x275   :  { %v2223_v10 = vadd.f32 %v2222_v6, %v2107_v21  ;;  %v2477_v34 = vmul.f32 %v2360_v44, %v2360_v44  ;;  %v1827_v7 = vsub.f32 %v4297_v37, %v1689_v56  ;;  %v3877_v62 = vmul.f32 %v3760_v35, %v3760_v35 }
 0x276   :  { %v7839_v60 = vmul.f32 %v3761_v27, %v3761_v27  ;;  %v737_v2 = vmul.f32 %v9557_v54, %v571_v30  ;;  %v967_v39 = vadd.f32 %v7761_v3, %v9761_v18  ;;  %v7844_v46 = vadd.f32 %v3622_v52, %v3507_v31  ;;  %v372_v3 = vpop.permute.xlu1 %371  ;;  %v9765_v18 = vld [vmem:[#allocation254_spill] sm:$0xff] }
 0x277   :  { %v2108_v17 = vmul.f32 %v1991_v36, %v1825_v19  ;;  %v2361_v58 = vmax.f32 %v1991_v36, 0.0  ;;  %v1337_v49 = vadd.f32 %v7774_v45, %v9762_v24  ;;  %v3992_v6 = vadd.f32 %v3991_v51, %v3876_v14  ;;  %v9766_v36 = vld [vmem:[#allocation37_spill] sm:$0xff]  ;;  %v4298_v14 = vld [vmem:[#allocation2 + $0x228] sm:$0xff] }
 0x278   :  { %v2109_v21 = vmul.f32 %v1992_v23, %v1826_v20  ;;  %v2362_v44 = vmax.f32 %v1992_v23, 0.0  ;;  %v968_v35 = vadd.f32 %v967_v39, %v9763_v9  ;;  %v2593_v27 = vadd.f32 %v2592_v11, %v2477_v34  ;;  %v1631_v39 = vpop.permute.xlu0 %1630  ;;  %v9767_v9 = vld [vmem:[#allocation60_spill] sm:$0xff] }
 0x279   :  { %v2224_v56 = vadd.f32 %v2223_v10, %v2108_v17  ;;  %v1993_v37 = vmul.f32 %v9741_v33, %v1827_v7  ;;  %v1338_v41 = vadd.f32 %v1337_v49, %v9764_v32  ;;  %v1107_v52 = vmax.f32 %v737_v2, 0.0 }
 0x27a   :  { %v969_v31 = vadd.f32 %v968_v35, %v9765_v18  ;;  %v1676_v19 = vsel %vm1642_vm3, %v7801_v8, %v1579_v29  ;;  %v406_v45 = vsel %vm385_vm1, %v320_v1, %v346_v5  ;;  %v2478_v24 = vmul.f32 %v2361_v58, %v2361_v58  ;;  %v9768_v58 = vld [vmem:[#allocation212_spill] sm:$0xff] }
 0x27b   :  { %v854_v20 = vmul.f32 %v737_v2, %v571_v30  ;;  %v1339_v11 = vadd.f32 %v1338_v41, %v9766_v36  ;;  %v1828_v51 = vsub.f32 %v4296_v13, %v1676_v19  ;;  %v2479_v23 = vmul.f32 %v2362_v44, %v2362_v44  ;;  %v4299_v13 = vld [vmem:[#allocation2 + $0x230] sm:$0xff]  ;;  %v7868_v19 = vpop.permute.xlu1 %1424 }
 0x27c   :  { %v572_v10 = vsub.f32 %v4298_v14, %v406_v45  ;;  %v1663_v32 = vsel %vm1642_vm3, %v1579_v29, %v1605_v47  ;;  %v393_v34 = vsel %vm385_vm1, %v346_v5, %v372_v3  ;;  %v3993_v17 = vadd.f32 %v3992_v6, %v3877_v62  ;;  %v7874_v36 = vpop.permute.xlu0 %1450 }
 0x27d   :  { %v2594_v8 = vadd.f32 %v2593_v27, %v2478_v24  ;;  %v2225_v49 = vadd.f32 %v2224_v56, %v2109_v21  ;;  %v497_v1 = vsel %vm385_vm1, %v372_v3, %v9767_v9  ;;  %v1224_v30 = vmul.f32 %v1107_v52, %v1107_v52 }
 0x27e   :  { %v738_v41 = vmul.f32 %v9743_v0, %v572_v10  ;;  %v573_v2 = vsub.f32 %v4299_v13, %v393_v34  ;;  %v574_v44 = vsub.f32 %v9768_v58, %v497_v1  ;;  %v2110_v35 = vmul.f32 %v1993_v37, %v1827_v7 }
 0x27f   :  { %v970_v29 = vadd.f32 %v969_v31, %v854_v20  ;;  %v1994_v18 = vmul.f32 %v9587_v15, %v1828_v51  ;;  %v1829_v5 = vsub.f32 %v4298_v14, %v1663_v32  ;;  %v2595_v56 = vadd.f32 %v2594_v8, %v2479_v23 }
 0x280   :  { %v855_v62 = vmul.f32 %v738_v41, %v572_v10  ;;  %v1108_v6 = vmax.f32 %v738_v41, 0.0  ;;  %v739_v21 = vmul.f32 %v9562_v40, %v573_v2  ;;  %v740_v27 = vmul.f32 %v7735_v38, %v574_v44 }
 0x281   :  { %v2226_v3 = vadd.f32 %v2225_v49, %v2110_v35  ;;  %v2363_v52 = vmax.f32 %v1993_v37, 0.0  ;;  %v1650_v45 = vsel %vm1642_vm3, %v1605_v47, %v1631_v39  ;;  %v1340_v24 = vadd.f32 %v1339_v11, %v1224_v30 }
 0x282   :  { %v971_v7 = vadd.f32 %v970_v29, %v855_v62  ;;  %v1225_v31 = vmul.f32 %v1108_v6, %v1108_v6  ;;  %v856_v20 = vmul.f32 %v739_v21, %v573_v2  ;;  %v2111_v14 = vmul.f32 %v1994_v18, %v1828_v51  ;;  %v7884_v51 = vpop.permute.xlu1 %3298  ;;  %v4300_v2 = vld [vmem:[#allocation2 + $0x238] sm:$0xff] }
 0x283   :  { %v1995_v10 = vmul.f32 %v9588_v63, %v1829_v5  ;;  %v1109_v32 = vmax.f32 %v739_v21, 0.0  ;;  %v1754_v34 = vsel %vm1642_vm3, %v1631_v39, %v7739_v59  ;;  %v857_v23 = vmul.f32 %v740_v27, %v574_v44  ;;  %v9769_v62 = vld [vmem:[#allocation141_spill] sm:$0xff]  ;;  %v4301_v21 = vld [vmem:[#allocation2 + $0x240] sm:$0xff] }
 0x284   :  { %v972_v8 = vadd.f32 %v971_v7, %v856_v20  ;;  %v1110_v37 = vmax.f32 %v740_v27, 0.0  ;;  %v1830_v49 = vsub.f32 %v4299_v13, %v1650_v45  ;;  %v2364_v9 = vmax.f32 %v1994_v18, 0.0  ;;  %v7889_v45 = vpop.permute.xlu0 %1476  ;;  %v9770_v20 = vld [vmem:[#allocation110_spill] sm:$0xff] }
 0x285   :  { %v1341_v47 = vadd.f32 %v1340_v24, %v1225_v31  ;;  %v1226_v11 = vmul.f32 %v1109_v32, %v1109_v32  ;;  %v1742_v1 = vsel %vm1642_vm3, %v7868_v19, %v7874_v36  ;;  %v2480_v30 = vmul.f32 %v2363_v52, %v2363_v52 }
 0x286   :  { %v973_v41 = vadd.f32 %v972_v8, %v857_v23  ;;  %v1831_v58 = vsub.f32 %v4300_v2, %v1754_v34  ;;  %v1996_v59 = vmul.f32 %v9591_v16, %v1830_v49  ;;  %v3994_v39 = vadd.f32 %v3993_v17, %v7839_v60  ;;  %v9771_v34 = vld [vmem:[#allocation43_spill] sm:$0xff]  ;;  %v1503_v8 = vpop.permute.xlu1 %1502 }
 0x287   :  { %v2365_v44 = vmax.f32 %v1995_v10, 0.0  ;;  %v1227_v13 = vmul.f32 %v1110_v37, %v1110_v37  ;;  %v1342_v35 = vadd.f32 %v1341_v47, %v1226_v11  ;;  %v2596_v29 = vadd.f32 %v2595_v56, %v2480_v30  ;;  %v9774_v30 = vld [vmem:[#allocation177_spill] sm:$0xff]  ;;  %v9775_v2 = vld [vmem:[#allocation63_spill] sm:$0xff] }
 0x288   :  { %v2112_v18 = vmul.f32 %v1995_v10, %v1829_v5  ;;  %v974_v6 = vadd.f32 %v973_v41, %v9769_v62  ;;  %v1832_v27 = vsub.f32 %v4301_v21, %v1742_v1  ;;  %v2227_v24 = vadd.f32 %v2226_v3, %v2111_v14  ;;  %v9772_v3 = vld [vmem:[#allocation144_spill] sm:$0xff] }
 0x289   :  { %v2481_v52 = vmul.f32 %v2364_v9, %v2364_v9  ;;  %v1343_v7 = vadd.f32 %v1342_v35, %v1227_v13  ;;  %v2366_v31 = vmax.f32 %v1996_v59, 0.0  ;;  %v1997_v60 = vmul.f32 %v7770_v48, %v1831_v58 }
 0x28a   :  { %v7892_v32 = vadd.f32 %v974_v6, %v9770_v20  ;;  %v2113_v17 = vmul.f32 %v1996_v59, %v1830_v49  ;;  %v3393_v56 = vmul.f32 %v7884_v51, %v9771_v34  ;;  %v3509_v5 = vmul.f32 %v7821_v53, %v9759_v26  ;;  %v9778_v6 = vld [vmem:[#allocation20_spill] sm:$0xff] }
 0x28b   :  { %v3624_v10 = vadd.f32 %v7844_v46, %v7834_v4  ;;  %v2482_v23 = vmul.f32 %v2365_v44, %v2365_v44  ;;  %v1344_v14 = vadd.f32 %v1343_v7, %v9772_v3  ;;  %v3763_v37 = vmax.f32 %v7821_v53, 0.0  ;;  %v1529_v53 = vpop.permute.xlu0 %1528  ;;  %v9779_v7 = vld [vmem:[#allocation29_spill] sm:$0xff]  ;;  %v7925_v3 = vpop.permute.xlu1 %1554 }
 0x28c   :  { %v9773_v9 = vmax.f32 %v7809_v43, 0.0  ;;  %v2228_v49 = vadd.f32 %v2227_v24, %v2112_v18  ;;  %v1998_v11 = vmul.f32 %v9527_v61, %v1832_v27  ;;  %v2597_v1 = vadd.f32 %v2596_v29, %v2481_v52 }
 0x28d   :  { %v1345_v41 = vadd.f32 %v1344_v14, %v9774_v30  ;;  %v2483_v26 = vmul.f32 %v2366_v31, %v2366_v31  ;;  %v3394_v4 = vmul.f32 %v7884_v51, %v9775_v2  ;;  %v2367_v44 = vmax.f32 %v1997_v60, 0.0 }
 0x28e   :  { %v3879_v47 = vmul.f32 %v9773_v9, %v9773_v9  ;;  %v2229_v59 = vadd.f32 %v2228_v49, %v2113_v17  ;;  %v3510_v13 = vmul.f32 %v3393_v56, %v9771_v34  ;;  %v9776_v43 = vrot.slane %v7794_v42, 1  ;;  %v9780_v9 = vld [vmem:[#allocation93_spill] sm:$0xff] }
 0x28f   :  { %v9777_v35 = vrot.slane %v7594_v22, 1  ;;  %v3625_v29 = vadd.f32 %v3624_v10, %v3509_v5  ;;  %v2598_v62 = vadd.f32 %v2597_v1, %v2482_v23  ;;  %v3395_v21 = vmul.f32 %v7884_v51, %v9778_v6  ;;  %v9781_v1 = vld [vmem:[#allocation107_spill] sm:$0xff] }
 0x290   :  { %v3995_v46 = vadd.f32 %v3994_v39, %v3879_v47  ;;  %v3880_v24 = vmul.f32 %v3763_v37, %v3763_v37  ;;  %v2114_v52 = vmul.f32 %v1997_v60, %v1831_v58  ;;  %v2368_v39 = vmax.f32 %v1998_v11, 0.0 }
 0x291   :  { %v7916_v18 = vsel %vm2783_vm0, %v9777_v35, %v9776_v43  ;;  %v7922_v31 = vmul.f32 %v7884_v51, %v9779_v7  ;;  %v2599_v20 = vadd.f32 %v2598_v62, %v2483_v26  ;;  %v3511_v17 = vmul.f32 %v3394_v4, %v9775_v2  ;;  %v9782_v26 = vld [vmem:[#allocation128_spill] sm:$0xff] }
 0x292   :  { %v3626_v34 = vadd.f32 %v3625_v29, %v3510_v13  ;;  %v3764_v22 = vmax.f32 %v3393_v56, 0.0  ;;  %v3996_v14 = vadd.f32 %v3995_v46, %v3880_v24  ;;  %v2230_v5 = vadd.f32 %v2229_v59, %v2114_v52  ;;  %v7934_v13 = vpop.permute.xlu0 %321  ;;  %v9783_v59 = vld [vmem:[#allocation129_spill] sm:$0xff]  ;;  %v4302_v24 = vld [vmem:[#allocation2 + $0x248] sm:$0xff] }
 0x293   :  { %v2484_v10 = vmul.f32 %v2367_v44, %v2367_v44  ;;  %v2115_v23 = vmul.f32 %v1998_v11, %v1832_v27  ;;  %v3397_v37 = vmul.f32 %v7884_v51, %v9780_v9  ;;  %v3512_v58 = vmul.f32 %v3395_v21, %v9778_v6 }
 0x294   :  { %v3627_v60 = vadd.f32 %v3626_v34, %v3511_v17  ;;  %v3765_v47 = vmax.f32 %v3394_v4, 0.0  ;;  %v2485_v49 = vmul.f32 %v2368_v39, %v2368_v39  ;;  %v3398_v30 = vmul.f32 %v7884_v51, %v9781_v1 }
 0x295   :  { %v3399_v56 = vmul.f32 %v7884_v51, %v9782_v26  ;;  %v3881_v2 = vmul.f32 %v3764_v22, %v3764_v22  ;;  %v2600_v46 = vadd.f32 %v2599_v20, %v2484_v10  ;;  %v3400_v27 = vmul.f32 %v7884_v51, %v9783_v59  ;;  %v7947_v20 = vpop.permute.xlu1 %1580  ;;  %v9784_v10 = vld [vmem:[#allocation197_spill] sm:$0xff] }
 0x296   :  { %v3513_v11 = vmul.f32 %v7922_v31, %v9779_v7  ;;  %v3628_v44 = vadd.f32 %v3627_v60, %v3512_v58  ;;  %v2231_v43 = vadd.f32 %v2230_v5, %v2115_v23  ;;  %v3766_v4 = vmax.f32 %v3395_v21, 0.0  ;;  %v9785_v60 = vld [vmem:[#allocation119_spill] sm:$0xff] }
 0x297   :  { %v3997_v35 = vadd.f32 %v3996_v14, %v3881_v2  ;;  %v1729_v29 = vsel %vm1642_vm3, %v7874_v36, %v7889_v45  ;;  %v3882_v6 = vmul.f32 %v3765_v47, %v3765_v47  ;;  %v1716_v39 = vsel %vm1642_vm3, %v7889_v45, %v1503_v8  ;;  %v4303_v14 = vld [vmem:[#allocation2 + $0x250] sm:$0xff]  ;;  %v348_v47 = vpop.permute.xlu0 %347 }
 0x298   :  { %v3629_v62 = vadd.f32 %v3628_v44, %v3513_v11  ;;  %v1833_v52 = vsub.f32 %v4302_v24, %v1729_v29  ;;  %v7951_v7 = vmul.f32 %v7884_v51, %v7603_v50  ;;  %v3514_v21 = vmul.f32 %v3397_v37, %v9780_v9 }
 0x299   :  { %v3767_v17 = vmax.f32 %v7922_v31, 0.0  ;;  %v1703_v36 = vsel %vm1642_vm3, %v1503_v8, %v1529_v53  ;;  %v3768_v34 = vmax.f32 %v3397_v37, 0.0  ;;  %v3998_v22 = vadd.f32 %v3997_v35, %v3882_v6  ;;  %v4304_v37 = vld [vmem:[#allocation2 + $0x258] sm:$0xff] }
 0x29a   :  { %v1834_v5 = vsub.f32 %v4303_v14, %v1716_v39  ;;  %v976_v45 = vadd.f32 %v7892_v32, %v9784_v10  ;;  %v3769_v23 = vmax.f32 %v3398_v30, 0.0  ;;  %v3770_v58 = vmax.f32 %v3399_v56, 0.0  ;;  %v9787_v14 = vld [vmem:[#allocation236_spill] sm:$0xff] }
 0x29b   :  { %v1690_v51 = vsel %vm1642_vm3, %v1529_v53, %v7925_v3  ;;  %v1346_v9 = vadd.f32 %v1345_v41, %v9785_v60  ;;  %v3630_v31 = vadd.f32 %v3629_v62, %v3514_v21  ;;  %v3883_v2 = vmul.f32 %v3766_v4, %v3766_v4  ;;  %v4305_v41 = vld [vmem:[#allocation2 + $0x260] sm:$0xff]  ;;  %v7970_v62 = vpop.permute.xlu1 %1606 }
 0x29c   :  { %v1999_v8 = vmul.f32 %v9520_v57, %v1833_v52  ;;  %v1835_v11 = vsub.f32 %v4304_v37, %v1703_v36  ;;  %v2601_v44 = vadd.f32 %v2600_v46, %v2485_v49  ;;  %v3515_v35 = vmul.f32 %v3398_v30, %v9781_v1  ;;  %v9790_v37 = vld [vmem:[#allocation126_spill] sm:$0xff] }
 0x29d   :  { %v3516_v32 = vmul.f32 %v3399_v56, %v9782_v26  ;;  %v3771_v29 = vmax.f32 %v3400_v27, 0.0  ;;  %v7967_v6 = vmul.f32 %v3400_v27, %v9783_v59  ;;  %v3999_v24 = vadd.f32 %v3998_v22, %v3883_v2  ;;  %v9786_v27 = vld [vmem:[#allocation232_spill] sm:$0xff] }
 0x29e   :  { %v2000_v53 = vmul.f32 %v9532_v25, %v1834_v5  ;;  %v1836_v39 = vsub.f32 %v4305_v41, %v1690_v51  ;;  %v3884_v21 = vmul.f32 %v3767_v17, %v3767_v17  ;;  %v3885_v36 = vmul.f32 %v3768_v34, %v3768_v34  ;;  %v374_v51 = vpop.permute.xlu0 %373  ;;  %v9788_v34 = vld [vmem:[#allocation222_spill] sm:$0xff] }
 0x29f   :  { %v3886_v49 = vmul.f32 %v3769_v23, %v3769_v23  ;;  %v3631_v46 = vadd.f32 %v3630_v31, %v3515_v35  ;;  %v7973_v1 = vmul.f32 %v3770_v58, %v3770_v58  ;;  %v2116_v30 = vmul.f32 %v1999_v8, %v1833_v52  ;;  %v9789_v58 = vld [vmem:[#allocation253_spill] sm:$0xff]  ;;  %v4306_v35 = vld [vmem:[#allocation2 + $0x268] sm:$0xff]  ;;  %v1633_v41 = vpop.permute.xlu1 %1632 }
 0x2a0   :  { %v2001_v26 = vmul.f32 %v9550_v55, %v1835_v11  ;;  %v7976_v56 = vmul.f32 %v3771_v29, %v3771_v29  ;;  %v2369_v59 = vmax.f32 %v1999_v8, 0.0  ;;  %v977_v22 = vadd.f32 %v976_v45, %v9786_v27 }
 0x2a1   :  { %v1347_v10 = vadd.f32 %v1346_v9, %v9787_v14  ;;  %v4000_v60 = vadd.f32 %v3999_v24, %v3884_v21  ;;  %v2117_v2 = vmul.f32 %v2000_v53, %v1834_v5  ;;  %v7981_v17 = vmul.f32 %v9741_v33, %v1836_v39 }
 0x2a2   :  { %v420_v52 = vsel %vm385_vm1, %v9788_v34, %v7934_v13  ;;  %v2370_v23 = vmax.f32 %v2000_v53, 0.0  ;;  %v978_v31 = vadd.f32 %v977_v22, %v9789_v58  ;;  %v7989_v29 = vadd.f32 %v3631_v46, %v3516_v32  ;;  %v4307_v22 = vld [vmem:[#allocation2 + $0x270] sm:$0xff] }
 0x2a3   :  { %v1348_v8 = vadd.f32 %v1347_v10, %v9790_v37  ;;  %v580_v45 = vsub.f32 %v4306_v35, %v420_v52  ;;  %v2232_v9 = vadd.f32 %v2231_v43, %v2116_v30  ;;  %v2118_v24 = vmul.f32 %v2001_v26, %v1835_v11  ;;  %v9791_v11 = vld [vmem:[#allocation68_spill] sm:$0xff] }
 0x2a4   :  { %v407_v5 = vsel %vm385_vm1, %v7934_v13, %v348_v47  ;;  %v2486_v21 = vmul.f32 %v2369_v59, %v2369_v59  ;;  %v1677_v53 = vsel %vm1642_vm3, %v7925_v3, %v7947_v20  ;;  %v4001_v10 = vadd.f32 %v4000_v60, %v3885_v36  ;;  %v8008_v3 = vpop.permute.xlu0 %1426 }
 0x2a5   :  { %v746_v27 = vmul.f32 %v9557_v54, %v580_v45  ;;  %v581_v14 = vsub.f32 %v4307_v22, %v407_v5  ;;  %v2371_v32 = vmax.f32 %v2001_v26, 0.0  ;;  %v394_v43 = vsel %vm385_vm1, %v348_v47, %v374_v51  ;;  %v4308_v26 = vld [vmem:[#allocation2 + $0x278] sm:$0xff] }
 0x2a6   :  { %v498_v13 = vsel %vm385_vm1, %v374_v51, %v9791_v11  ;;  %v2487_v46 = vmul.f32 %v2370_v23, %v2370_v23  ;;  %v1664_v34 = vsel %vm1642_vm3, %v7947_v20, %v7970_v62  ;;  %v1837_v52 = vsub.f32 %v4306_v35, %v1677_v53  ;;  %v8015_v11 = vpop.permute.xlu1 %1452 }
 0x2a7   :  { %v863_v30 = vmul.f32 %v746_v27, %v580_v45  ;;  %v1116_v59 = vmax.f32 %v746_v27, 0.0  ;;  %v747_v36 = vmul.f32 %v9743_v0, %v581_v14  ;;  %v582_v60 = vsub.f32 %v4308_v26, %v394_v43 }
 0x2a8   :  { %v583_v47 = vsub.f32 %v7600_v28, %v498_v13  ;;  %v2602_v58 = vadd.f32 %v2601_v44, %v2486_v21  ;;  %v2119_v51 = vmul.f32 %v7981_v17, %v1836_v39  ;;  %v2372_v23 = vmax.f32 %v7981_v17, 0.0 }
 0x2a9   :  { %v1233_v37 = vmul.f32 %v1116_v59, %v1116_v59  ;;  %v864_v45 = vmul.f32 %v747_v36, %v581_v14  ;;  %v1117_v5 = vmax.f32 %v747_v36, 0.0  ;;  %v1838_v27 = vsub.f32 %v4307_v22, %v1664_v34  ;;  %v8019_v59 = vpop.permute.xlu0 %3303 }
 0x2aa   :  { %v748_v20 = vmul.f32 %v9562_v40, %v582_v60  ;;  %v2233_v35 = vadd.f32 %v2232_v9, %v2117_v2  ;;  %v2488_v53 = vmul.f32 %v2371_v32, %v2371_v32  ;;  %v979_v4 = vadd.f32 %v978_v31, %v863_v30 }
 0x2ab   :  { %v749_v43 = vmul.f32 %v7735_v38, %v583_v47  ;;  %v4002_v42 = vadd.f32 %v4001_v10, %v3886_v49  ;;  %v1349_v28 = vadd.f32 %v1348_v8, %v1233_v37  ;;  %v2003_v44 = vmul.f32 %v9587_v15, %v1837_v52 }
 0x2ac   :  { %v1234_v39 = vmul.f32 %v1117_v5, %v1117_v5  ;;  %v2603_v21 = vadd.f32 %v2602_v58, %v2487_v46  ;;  %v980_v17 = vadd.f32 %v979_v4, %v864_v45  ;;  %v865_v13 = vmul.f32 %v748_v20, %v582_v60  ;;  %v8028_v46 = vpop.permute.xlu1 %1478  ;;  %v4309_v58 = vld [vmem:[#allocation2 + $0x280] sm:$0xff] }
 0x2ad   :  { %v1118_v14 = vmax.f32 %v748_v20, 0.0  ;;  %v2004_v34 = vmul.f32 %v9588_v63, %v1838_v27  ;;  %v866_v36 = vmul.f32 %v749_v43, %v583_v47  ;;  %v1119_v2 = vmax.f32 %v749_v43, 0.0 }
 0x2ae   :  { %v1350_v22 = vadd.f32 %v1349_v28, %v1234_v39  ;;  %v981_v9 = vadd.f32 %v980_v17, %v865_v13  ;;  %v1651_v38 = vsel %vm1642_vm3, %v7970_v62, %v1633_v41  ;;  %v1755_v49 = vsel %vm1642_vm3, %v1633_v41, %v7868_v19  ;;  %v9793_v17 = vld [vmem:[#allocation46_spill] sm:$0xff] }
 0x2af   :  { %v1235_v31 = vmul.f32 %v1118_v14, %v1118_v14  ;;  %v2234_v4 = vadd.f32 %v2233_v35, %v2118_v24  ;;  %v2489_v8 = vmul.f32 %v2372_v23, %v2372_v23  ;;  %v2373_v10 = vmax.f32 %v2003_v44, 0.0  ;;  %v8037_v35 = vpop.permute.xlu0 %1504 }
 0x2b0   :  { %v1839_v32 = vsub.f32 %v4308_v26, %v1651_v38  ;;  %v982_v30 = vadd.f32 %v981_v9, %v866_v36  ;;  %v1236_v60 = vmul.f32 %v1119_v2, %v1119_v2  ;;  %v1840_v37 = vsub.f32 %v4309_v58, %v1755_v49  ;;  %v9792_v26 = vld [vmem:[#allocation147_spill] sm:$0xff] }
 0x2b1   :  { %v1351_v47 = vadd.f32 %v1350_v22, %v1235_v31  ;;  %v4003_v45 = vadd.f32 %v4002_v42, %v7973_v1  ;;  %v2604_v5 = vadd.f32 %v2603_v21, %v2488_v53  ;;  %v1743_v19 = vsel %vm1642_vm3, %v8008_v3, %v8015_v11  ;;  %v9794_v1 = vld [vmem:[#allocation175_spill] sm:$0xff]  ;;  %v9795_v21 = vld [vmem:[#allocation150_spill] sm:$0xff]  ;;  %v9796_v31 = vld [vmem:[#allocation176_spill] sm:$0xff] }
 0x2b2   :  { %v2005_v62 = vmul.f32 %v9591_v16, %v1839_v32  ;;  %v2120_v24 = vmul.f32 %v2003_v44, %v1837_v52  ;;  %v2374_v41 = vmax.f32 %v2004_v34, 0.0  ;;  %v983_v23 = vadd.f32 %v982_v30, %v9792_v26  ;;  %v4310_v52 = vld [vmem:[#allocation2 + $0x288] sm:$0xff] }
 0x2b3   :  { %v1352_v20 = vadd.f32 %v1351_v47, %v1236_v60  ;;  %v2235_v43 = vadd.f32 %v2234_v4, %v2119_v51  ;;  %v2490_v28 = vmul.f32 %v2373_v10, %v2373_v10  ;;  %v2121_v39 = vmul.f32 %v2004_v34, %v1838_v27  ;;  %v8049_v27 = vpop.permute.xlu1 %1530  ;;  %v8063_v58 = vpop.permute.xlu0 %1556 }
 0x2b4   :  { %v3402_v42 = vmul.f32 %v8019_v59, %v9793_v17  ;;  %v8042_v53 = vadd.f32 %v983_v23, %v9794_v1  ;;  %v2006_v14 = vmul.f32 %v7770_v48, %v1840_v37  ;;  %v1841_v44 = vsub.f32 %v4310_v52, %v1743_v19  ;;  %v8070_v19 = vld [vmem:[#allocation2 + $0x358] sm:$0xff] }
 0x2b5   :  { %v1353_v13 = vadd.f32 %v1352_v20, %v9795_v21  ;;  %v3633_v22 = vadd.f32 %v7989_v29, %v7967_v6  ;;  %v4004_v36 = vadd.f32 %v4003_v45, %v7976_v56  ;;  %v2605_v51 = vadd.f32 %v2604_v5, %v2489_v8  ;;  %v9798_v29 = vld [vmem:[#allocation64_spill] sm:$0xff]  ;;  %v9800_v5 = vld [vmem:[#allocation79_spill] sm:$0xff]  ;;  %9801 = vst [vmem:[#allocation99_spill] sm:$0xff] %v8070_v19  ;;  %v9802_v20 = vld [vmem:[#allocation30_spill] sm:$0xff] }
 0x2b6   :  { %v2375_v2 = vmax.f32 %v2005_v62, 0.0  ;;  %v2236_v34 = vadd.f32 %v2235_v43, %v2120_v24  ;;  %v2491_v9 = vmul.f32 %v2374_v41, %v2374_v41  ;;  %v2122_v49 = vmul.f32 %v2005_v62, %v1839_v32  ;;  %v8065_v32 = vld [vmem:[#allocation2 + $0x350] sm:$0xff] }
 0x2b7   :  { %v8052_v38 = vadd.f32 %v1353_v13, %v9796_v31  ;;  %v3518_v48 = vmul.f32 %v7951_v7, %v7603_v50  ;;  %v9797_v4 = vmax.f32 %v7951_v7, 0.0  ;;  %v2606_v6 = vadd.f32 %v2605_v51, %v2490_v28  ;;  %9799 = vst [vmem:[#allocation86_spill] sm:$0xff] %v8065_v32  ;;  %v8078_v1 = vpop.permute.xlu1 %323 }
 0x2b8   :  { %v3403_v56 = vmul.f32 %v8019_v59, %v9798_v29  ;;  %v2237_v8 = vadd.f32 %v2236_v34, %v2121_v39  ;;  %v2376_v30 = vmax.f32 %v2006_v14, 0.0  ;;  %v2007_v60 = vmul.f32 %v9527_v61, %v1841_v44 }
 0x2b9   :  { %v3889_v10 = vmul.f32 %v9797_v4, %v9797_v4  ;;  %v3519_v47 = vmul.f32 %v3402_v42, %v9793_v17  ;;  %v3634_v45 = vadd.f32 %v3633_v22, %v3518_v48  ;;  %v2492_v7 = vmul.f32 %v2375_v2, %v2375_v2  ;;  %v9803_v22 = vld [vmem:[#allocation95_spill] sm:$0xff]  ;;  %v9804_v2 = vld [vmem:[#allocation109_spill] sm:$0xff] }
 0x2ba   :  { %v3404_v62 = vmul.f32 %v8019_v59, %v9800_v5  ;;  %v2607_v26 = vadd.f32 %v2606_v6, %v2491_v9  ;;  %v2238_v23 = vadd.f32 %v2237_v8, %v2122_v49  ;;  %v8075_v43 = vmul.f32 %v8019_v59, %v9802_v20  ;;  %v9806_v6 = vld [vmem:[#allocation72_spill] sm:$0xff] }
 0x2bb   :  { %v4005_v41 = vadd.f32 %v4004_v36, %v3889_v10  ;;  %v3520_v28 = vmul.f32 %v3403_v56, %v9798_v29  ;;  %v3635_v39 = vadd.f32 %v3634_v45, %v3519_v47  ;;  %v3773_v17 = vmax.f32 %v3402_v42, 0.0  ;;  %v8087_v10 = vpop.permute.xlu0 %1582  ;;  %v9807_v45 = vld [vmem:[#allocation161_spill] sm:$0xff] }
 0x2bc   :  { %v2123_v21 = vmul.f32 %v2006_v14, %v1840_v37  ;;  %v2493_v13 = vmul.f32 %v2376_v30, %v2376_v30  ;;  %v2377_v52 = vmax.f32 %v2007_v60, 0.0  ;;  %v8082_v51 = vmul.f32 %v8019_v59, %v9803_v22  ;;  %v9805_v37 = vld [vmem:[#allocation51_spill] sm:$0xff] }
 0x2bd   :  { %v2608_v36 = vadd.f32 %v2607_v26, %v2492_v7  ;;  %v3407_v34 = vmul.f32 %v8019_v59, %v9804_v2  ;;  %v3521_v9 = vmul.f32 %v3404_v62, %v9800_v5  ;;  %v3636_v31 = vadd.f32 %v3635_v39, %v3520_v28  ;;  %v4313_v26 = vld [vmem:[#allocation2 + $0x290] sm:$0xff]  ;;  %v8109_v28 = vpop.permute.xlu1 %349 }
 0x2be   :  { %v2239_v49 = vadd.f32 %v2238_v23, %v2123_v21  ;;  %v2124_v48 = vmul.f32 %v2007_v60, %v1841_v44  ;;  %v3774_v4 = vmax.f32 %v3403_v56, 0.0  ;;  %v3890_v42 = vmul.f32 %v3773_v17, %v3773_v17 }
 0x2bf   :  { %v3408_v14 = vmul.f32 %v8019_v59, %v9805_v37  ;;  %v8093_v29 = vmul.f32 %v8019_v59, %v9806_v6  ;;  %v3522_v8 = vmul.f32 %v8075_v43, %v9802_v20  ;;  %v3637_v30 = vadd.f32 %v3636_v31, %v3521_v9  ;;  %v9808_v31 = vld [vmem:[#allocation231_spill] sm:$0xff] }
 0x2c0   :  { %v2494_v47 = vmul.f32 %v2377_v52, %v2377_v52  ;;  %v8099_v7 = vmul.f32 %v8019_v59, %v9807_v45  ;;  %v4006_v44 = vadd.f32 %v4005_v41, %v3890_v42  ;;  %v1730_v56 = vsel %vm1642_vm3, %v8015_v11, %v8028_v46 }
 0x2c1   :  { %v2609_v60 = vadd.f32 %v2608_v36, %v2493_v13  ;;  %v3638_v5 = vadd.f32 %v3637_v30, %v3522_v8  ;;  %v1842_v23 = vsub.f32 %v4313_v26, %v1730_v56  ;;  %v1717_v20 = vsel %vm1642_vm3, %v8028_v46, %v8037_v35  ;;  %v4314_v36 = vld [vmem:[#allocation2 + $0x298] sm:$0xff]  ;;  %v4316_v26 = vld [vmem:[#allocation2 + $0x2b0] sm:$0xff] }
 0x2c2   :  { %v2240_v39 = vadd.f32 %v2239_v49, %v2124_v48  ;;  %v3775_v59 = vmax.f32 %v3404_v62, 0.0  ;;  %v3891_v17 = vmul.f32 %v3774_v4, %v3774_v4  ;;  %v1704_v41 = vsel %vm1642_vm3, %v8037_v35, %v8049_v27  ;;  %v8128_v49 = vpop.permute.xlu0 %1608  ;;  %v4315_v48 = vld [vmem:[#allocation2 + $0x2a0] sm:$0xff] }
 0x2c3   :  { %v3523_v11 = vmul.f32 %v8082_v51, %v9803_v22  ;;  %v3524_v21 = vmul.f32 %v3407_v34, %v9804_v2  ;;  %v3525_v13 = vmul.f32 %v3408_v14, %v9805_v37  ;;  %v2008_v52 = vmul.f32 %v9520_v57, %v1842_v23 }
 0x2c4   :  { %v8122_v46 = vmul.f32 %v8093_v29, %v9806_v6  ;;  %v4007_v62 = vadd.f32 %v4006_v44, %v3891_v17  ;;  %v1843_v9 = vsub.f32 %v4314_v36, %v1717_v20  ;;  %v421_v35 = vsel %vm385_vm1, %v9808_v31, %v8078_v1  ;;  %v376_v20 = vpop.permute.xlu1 %375  ;;  %v9813_v17 = vld [vmem:[#allocation133_spill] sm:$0xff] }
 0x2c5   :  { %v3639_v22 = vadd.f32 %v3638_v5, %v3523_v11  ;;  %v3776_v2 = vmax.f32 %v8075_v43, 0.0  ;;  %v1844_v4 = vsub.f32 %v4315_v48, %v1704_v41  ;;  %v1691_v42 = vsel %vm1642_vm3, %v8049_v27, %v8063_v58  ;;  %v4317_v27 = vld [vmem:[#allocation2 + $0x2a8] sm:$0xff] }
 0x2c6   :  { %v8137_v37 = vmul.f32 %v8099_v7, %v9807_v45  ;;  %v3777_v6 = vmax.f32 %v8082_v51, 0.0  ;;  %v3778_v8 = vmax.f32 %v3407_v34, 0.0  ;;  %v3892_v30 = vmul.f32 %v3775_v59, %v3775_v59 }
 0x2c7   :  { %v2610_v44 = vadd.f32 %v2609_v60, %v2494_v47  ;;  %v3779_v56 = vmax.f32 %v3408_v14, 0.0  ;;  %v2378_v5 = vmax.f32 %v2008_v52, 0.0  ;;  %v589_v43 = vsub.f32 %v4316_v26, %v421_v35  ;;  %v9809_v60 = vld [vmem:[#allocation203_spill] sm:$0xff]  ;;  %v8146_v35 = vpop.permute.xlu0 %1634 }
 0x2c8   :  { %v4008_v41 = vadd.f32 %v4007_v62, %v3892_v30  ;;  %v2009_v11 = vmul.f32 %v9532_v25, %v1843_v9  ;;  %v1845_v36 = vsub.f32 %v4317_v27, %v1691_v42  ;;  %v3640_v31 = vadd.f32 %v3639_v22, %v3524_v21  ;;  %v9810_v42 = vld [vmem:[#allocation113_spill] sm:$0xff] }
 0x2c9   :  { %v3893_v48 = vmul.f32 %v3776_v2, %v3776_v2  ;;  %v2010_v51 = vmul.f32 %v9550_v55, %v1844_v4  ;;  %v3894_v34 = vmul.f32 %v3777_v6, %v3777_v6  ;;  %v3895_v47 = vmul.f32 %v3778_v8, %v3778_v8  ;;  %v9811_v6 = vld [vmem:[#allocation229_spill] sm:$0xff] }
 0x2ca   :  { %v2125_v14 = vmul.f32 %v2008_v52, %v1842_v23  ;;  %v985_v59 = vadd.f32 %v8042_v53, %v9809_v60  ;;  %v8148_v24 = vmul.f32 %v3779_v56, %v3779_v56  ;;  %v2495_v62 = vmul.f32 %v2378_v5, %v2378_v5  ;;  %v9812_v60 = vld [vmem:[#allocation235_spill] sm:$0xff]  ;;  %v8158_v56 = vpop.permute.xlu1 %1428 }
 0x2cb   :  { %v755_v30 = vmul.f32 %v9557_v54, %v589_v43  ;;  %v1355_v21 = vadd.f32 %v8052_v38, %v9810_v42  ;;  %v4009_v22 = vadd.f32 %v4008_v41, %v3893_v48  ;;  %v2379_v2 = vmax.f32 %v2009_v11, 0.0 }
 0x2cc   :  { %v2011_v27 = vmul.f32 %v9741_v33, %v1845_v36  ;;  %v986_v8 = vadd.f32 %v985_v59, %v9811_v6  ;;  %v8155_v23 = vadd.f32 %v3640_v31, %v3525_v13  ;;  %v2126_v52 = vmul.f32 %v2009_v11, %v1843_v9  ;;  %v9814_v59 = vld [vmem:[#allocation255_spill] sm:$0xff]  ;;  %v4318_v31 = vld [vmem:[#allocation2 + $0x2b8] sm:$0xff] }
 0x2cd   :  { %v2127_v53 = vmul.f32 %v2010_v51, %v1844_v4  ;;  %v1356_v45 = vadd.f32 %v1355_v21, %v9812_v60  ;;  %v2241_v5 = vadd.f32 %v2240_v39, %v2125_v14  ;;  %v2380_v50 = vmax.f32 %v2010_v51, 0.0 }
 0x2ce   :  { %v987_v54 = vadd.f32 %v986_v8, %v9813_v17  ;;  %v1678_v38 = vsel %vm1642_vm3, %v8063_v58, %v8087_v10  ;;  %v2611_v41 = vadd.f32 %v2610_v44, %v2495_v62  ;;  %v1125_v48 = vmax.f32 %v755_v30, 0.0  ;;  %v8170_v17 = vpop.permute.xlu0 %1454 }
 0x2cf   :  { %v1357_v13 = vadd.f32 %v1356_v45, %v9814_v59  ;;  %v408_v9 = vsel %vm385_vm1, %v8078_v1, %v8109_v28  ;;  %v4010_v4 = vadd.f32 %v4009_v22, %v3894_v34  ;;  %v2496_v11 = vmul.f32 %v2379_v2, %v2379_v2  ;;  %v9815_v45 = vld [vmem:[#allocation67_spill] sm:$0xff] }
 0x2d0   :  { %v872_v39 = vmul.f32 %v755_v30, %v589_v43  ;;  %v590_v51 = vsub.f32 %v4318_v31, %v408_v9  ;;  %v1846_v14 = vsub.f32 %v4316_v26, %v1678_v38  ;;  %v1665_v58 = vsel %vm1642_vm3, %v8087_v10, %v8128_v49  ;;  %v4319_v30 = vld [vmem:[#allocation2 + $0x2c0] sm:$0xff]  ;;  %v4320_v2 = vld [vmem:[#allocation2 + $0x2c8] sm:$0xff]  ;;  %v8183_v10 = vpop.permute.xlu1 %3308 }
 0x2d1   :  { %v395_v44 = vsel %vm385_vm1, %v8109_v28, %v376_v20  ;;  %v499_v1 = vsel %vm385_vm1, %v376_v20, %v9815_v45  ;;  %v2242_v34 = vadd.f32 %v2241_v5, %v2126_v52  ;;  %v2381_v43 = vmax.f32 %v2011_v27, 0.0 }
 0x2d2   :  { %v756_v62 = vmul.f32 %v9743_v0, %v590_v51  ;;  %v591_v42 = vsub.f32 %v4319_v30, %v395_v44  ;;  %v2612_v26 = vadd.f32 %v2611_v41, %v2496_v11  ;;  %v2497_v21 = vmul.f32 %v2380_v50, %v2380_v50  ;;  %v8194_v50 = vld [vmem:[%s8863_s1 + $0x8] ss:$0 sm:$0xff] }
 0x2d3   :  { %v1242_v22 = vmul.f32 %v1125_v48, %v1125_v48  ;;  %v592_v6 = vsub.f32 %v4320_v2, %v499_v1  ;;  %v1847_v28 = vsub.f32 %v4318_v31, %v1665_v58  ;;  %v1652_v20 = vsel %vm1642_vm3, %v8128_v49, %v8146_v35  ;;  %9816 = vst [vmem:[#allocation186_spill] sm:$0xff] %v8194_v50  ;;  %v8197_v31 = vpop.permute.xlu0 %1480 }
 0x2d4   :  { %v873_v8 = vmul.f32 %v756_v62, %v590_v51  ;;  %v1126_v60 = vmax.f32 %v756_v62, 0.0  ;;  %v988_v52 = vadd.f32 %v987_v54, %v872_v39  ;;  %v2012_v5 = vmul.f32 %v9587_v15, %v1846_v14 }
 0x2d5   :  { %v757_v38 = vmul.f32 %v9562_v40, %v591_v42  ;;  %v758_v41 = vmul.f32 %v8194_v50, %v592_v6  ;;  %v4011_v48 = vadd.f32 %v4010_v4, %v3895_v47  ;;  %v2128_v59 = vmul.f32 %v2011_v27, %v1845_v36  ;;  %v8200_v50 = vpop.permute.xlu1 %1506 }
 0x2d6   :  { %v2498_v9 = vmul.f32 %v2381_v43, %v2381_v43  ;;  %v1243_v11 = vmul.f32 %v1126_v60, %v1126_v60  ;;  %v2243_v51 = vadd.f32 %v2242_v34, %v2127_v53  ;;  %v989_v49 = vadd.f32 %v988_v52, %v873_v8  ;;  %v9817_v8 = vld [vmem:[#allocation146_spill] sm:$0xff]  ;;  %v9818_v52 = vld [vmem:[#allocation47_spill] sm:$0xff] }
 0x2d7   :  { %v874_v54 = vmul.f32 %v757_v38, %v591_v42  ;;  %v1848_v39 = vsub.f32 %v4319_v30, %v1652_v20  ;;  %v1358_v58 = vadd.f32 %v1357_v13, %v1242_v22  ;;  %v2013_v44 = vmul.f32 %v9588_v63, %v1847_v28 }
 0x2d8   :  { %v1127_v45 = vmax.f32 %v757_v38, 0.0  ;;  %v1128_v1 = vmax.f32 %v758_v41, 0.0  ;;  %v2613_v62 = vadd.f32 %v2612_v26, %v2497_v21  ;;  %v2382_v15 = vmax.f32 %v2012_v5, 0.0  ;;  %v8212_v21 = vpop.permute.xlu0 %1532 }
 0x2d9   :  { %v875_v40 = vmul.f32 %v758_v41, %v592_v6  ;;  %v990_v0 = vadd.f32 %v989_v49, %v874_v54  ;;  %v4012_v36 = vadd.f32 %v4011_v48, %v8148_v24  ;;  %v1359_v47 = vadd.f32 %v1358_v58, %v1243_v11  ;;  %v9820_v48 = vld [vmem:[#allocation180_spill] sm:$0xff] }
 0x2da   :  { %v1244_v27 = vmul.f32 %v1127_v45, %v1127_v45  ;;  %v1756_v53 = vsel %vm1642_vm3, %v8146_v35, %v8008_v3  ;;  %v2244_v13 = vadd.f32 %v2243_v51, %v2128_v59  ;;  %v2014_v34 = vmul.f32 %v9591_v16, %v1848_v39  ;;  %v9821_v11 = vld [vmem:[#allocation148_spill] sm:$0xff] }
 0x2db   :  { %v991_v4 = vadd.f32 %v990_v0, %v875_v40  ;;  %v1744_v43 = vsel %vm1642_vm3, %v8158_v56, %v8170_v17  ;;  %v2129_v30 = vmul.f32 %v2012_v5, %v1846_v14  ;;  %v2383_v42 = vmax.f32 %v2013_v44, 0.0  ;;  %v4322_v0 = vld [vmem:[#allocation2 + $0x2d0] sm:$0xff] }
 0x2dc   :  { %v1245_v26 = vmul.f32 %v1128_v1, %v1128_v1  ;;  %v1360_v24 = vadd.f32 %v1359_v47, %v1244_v27  ;;  %v2614_v22 = vadd.f32 %v2613_v62, %v2498_v9  ;;  %v2499_v6 = vmul.f32 %v2382_v15, %v2382_v15  ;;  %v8225_v9 = vpop.permute.xlu1 %1558  ;;  %v9823_v1 = vld [vmem:[#allocation111_spill] sm:$0xff] }
 0x2dd   :  { %v992_v60 = vadd.f32 %v991_v4, %v9817_v8  ;;  %v1849_v3 = vsub.f32 %v4320_v2, %v1756_v53  ;;  %v2130_v35 = vmul.f32 %v2013_v44, %v1847_v28  ;;  %v1850_v20 = vsub.f32 %v4322_v0, %v1744_v43 }
 0x2de   :  { %v1361_v40 = vadd.f32 %v1360_v24, %v1245_v26  ;;  %v3411_v38 = vmul.f32 %v8183_v10, %v9818_v52  ;;  %v3642_v14 = vadd.f32 %v8155_v23, %v8122_v46  ;;  %v9819_v5 = vmax.f32 %v8093_v29, 0.0  ;;  %v8231_v46 = vld [vmem:[%s8864_s2 + $0x8] ss:$0 sm:$0xff]  ;;  %v9822_v23 = vld [vmem:[#allocation69_spill] sm:$0xff] }
 0x2df   :  { %v8223_v59 = vadd.f32 %v992_v60, %v9820_v48  ;;  %v2384_v15 = vmax.f32 %v2014_v34, 0.0  ;;  %v2245_v2 = vadd.f32 %v2244_v13, %v2129_v30  ;;  %v2500_v28 = vmul.f32 %v2383_v42, %v2383_v42  ;;  %v9826_v42 = vld [vmem:[#allocation157_spill] sm:$0xff] }
 0x2e0   :  { %v3897_v41 = vmul.f32 %v9819_v5, %v9819_v5  ;;  %v1362_v51 = vadd.f32 %v1361_v40, %v9821_v11  ;;  %v2131_v49 = vmul.f32 %v2014_v34, %v1848_v39  ;;  %v2615_v58 = vadd.f32 %v2614_v22, %v2499_v6  ;;  %v8239_v39 = vpop.permute.xlu0 %325  ;;  %v9824_v34 = vld [vmem:[#allocation80_spill] sm:$0xff]  ;;  %v8259_v0 = vpop.permute.xlu1 %1584  ;;  %v9832_v11 = vld [vmem:[#allocation31_spill] sm:$0xff] }
 0x2e1   :  { %v2015_v29 = vmul.f32 %v8231_v46, %v1849_v3  ;;  %v3412_v44 = vmul.f32 %v8183_v10, %v9822_v23  ;;  %v2246_v45 = vadd.f32 %v2245_v2, %v2130_v35  ;;  %v2016_v47 = vmul.f32 %v9527_v61, %v1850_v20 }
 0x2e2   :  { %v4013_v54 = vadd.f32 %v4012_v36, %v3897_v41  ;;  %v1363_v62 = vadd.f32 %v1362_v51, %v9823_v1  ;;  %v3528_v27 = vmul.f32 %v3411_v38, %v9818_v52  ;;  %v8241_v36 = vld [vmem:[#allocation2 + $0x300] sm:$0xff]  ;;  %v3643_v13 = vadd.f32 %v3642_v14, %v8137_v37 }
 0x2e3   :  { %v8245_v53 = vsub.f32 %v8241_v36, %v7916_v18  ;;  %v2501_v4 = vmul.f32 %v2384_v15, %v2384_v15  ;;  %v3413_v43 = vmul.f32 %v8183_v10, %v9824_v34  ;;  %v9825_v30 = vrot.slane %v8065_v32, 1  ;;  %v9830_v14 = vld [vmem:[#allocation118_spill] sm:$0xff] }
 0x2e4   :  { %v9827_v26 = vrot.slane %v9826_v42, 1  ;;  %v9828_v22 = vmax.f32 %v8099_v7, 0.0  ;;  %v2616_v8 = vadd.f32 %v2615_v58, %v2500_v28  ;;  %v2247_v60 = vadd.f32 %v2246_v45, %v2131_v49  ;;  %v8269_v1 = vpop.permute.xlu0 %351 }
 0x2e5   :  { %v2385_v18 = vmax.f32 %v2015_v29, 0.0  ;;  %v3529_v35 = vmul.f32 %v3412_v44, %v9822_v23  ;;  %v3644_v37 = vadd.f32 %v3643_v13, %v3528_v27  ;;  %v3782_v40 = vmax.f32 %v3411_v38, 0.0  ;;  %v8271_v27 = vld [vmem:[#allocation2 + $0x308] sm:$0xff] }
 0x2e6   :  { %v2988_v24 = vsel %vm2783_vm0, %v9827_v26, %v9825_v30  ;;  %v3898_v6 = vmul.f32 %v9828_v22, %v9828_v22  ;;  %v9829_v52 = vrot.slane %v8070_v19, 1  ;;  %v9831_v5 = vrot.slane %v9830_v14, 1  ;;  %v9833_v30 = vld [vmem:[#allocation96_spill] sm:$0xff]  ;;  %v4328_v14 = vld [vmem:[#allocation2 + $0x2e0] sm:$0xff] }
 0x2e7   :  { %v2132_v15 = vmul.f32 %v2015_v29, %v1849_v3  ;;  %v2386_v7 = vmax.f32 %v2016_v47, 0.0  ;;  %v2617_v2 = vadd.f32 %v2616_v8, %v2501_v4  ;;  %v3414_v28 = vmul.f32 %v8183_v10, %v9832_v11  ;;  %v8276_v3 = vld [vmem:[#allocation2 + $0x310] sm:$0xff]  ;;  %v8292_v8 = vpop.permute.xlu1 %1610  ;;  %v9846_v19 = vld [vmem:[#allocation66_spill] sm:$0xff] }
 0x2e8   :  { %v2990_v41 = vsel %vm2783_vm0, %v9831_v5, %v9829_v52  ;;  %v4014_v48 = vadd.f32 %v4013_v54, %v3898_v6  ;;  %v3530_v51 = vmul.f32 %v3413_v43, %v9824_v34  ;;  %v3645_v49 = vadd.f32 %v3644_v37, %v3529_v35  ;;  %v9834_v37 = vld [vmem:[#allocation112_spill] sm:$0xff] }
 0x2e9   :  { %v2248_v58 = vadd.f32 %v2247_v60, %v2132_v15  ;;  %v2133_v38 = vmul.f32 %v2016_v47, %v1850_v20  ;;  %v3783_v23 = vmax.f32 %v3412_v44, 0.0  ;;  %v3899_v45 = vmul.f32 %v3782_v40, %v3782_v40  ;;  %v9836_v15 = vld [vmem:[#allocation204_spill] sm:$0xff] }
 0x2ea   :  { %v8274_v13 = vsub.f32 %v8271_v27, %v2988_v24  ;;  %v8279_v54 = vsub.f32 %v8276_v3, %v2990_v41  ;;  %v2502_v29 = vmul.f32 %v2385_v18, %v2385_v18  ;;  %v3646_v4 = vadd.f32 %v3645_v49, %v3530_v51  ;;  %v4327_v24 = vld [vmem:[#allocation2 + $0x2d8] sm:$0xff] }
 0x2eb   :  { %v2503_v34 = vmul.f32 %v2386_v7, %v2386_v7  ;;  %v3415_v20 = vmul.f32 %v8183_v10, %v9833_v30  ;;  %v4015_v44 = vadd.f32 %v4014_v48, %v3899_v45  ;;  %v1731_v47 = vsel %vm1642_vm3, %v8170_v17, %v8197_v31  ;;  %v9835_v41 = vld [vmem:[#allocation202_spill] sm:$0xff] }
 0x2ec   :  { %v2618_v42 = vadd.f32 %v2617_v2, %v2502_v29  ;;  %v3531_v26 = vmul.f32 %v3414_v28, %v9832_v11  ;;  %v1851_v22 = vsub.f32 %v4327_v24, %v1731_v47  ;;  %v1718_v6 = vsel %vm1642_vm3, %v8197_v31, %v8200_v50  ;;  %v378_v2 = vpop.permute.xlu0 %377 }
 0x2ed   :  { %v2249_v60 = vadd.f32 %v2248_v58, %v2133_v38  ;;  %v3784_v18 = vmax.f32 %v3413_v43, 0.0  ;;  %v3900_v35 = vmul.f32 %v3783_v23, %v3783_v23  ;;  %v1705_v17 = vsel %vm1642_vm3, %v8200_v50, %v8212_v21  ;;  %v4329_v58 = vld [vmem:[#allocation2 + $0x2e8] sm:$0xff] }
 0x2ee   :  { %v8300_v40 = vmul.f32 %v8183_v10, %v9834_v37  ;;  %v3647_v52 = vadd.f32 %v3646_v4, %v3531_v26  ;;  %v1852_v5 = vsub.f32 %v4328_v14, %v1718_v6  ;;  %v994_v31 = vadd.f32 %v8223_v59, %v9835_v41  ;;  %v9838_v14 = vld [vmem:[#allocation241_spill] sm:$0xff] }
 0x2ef   :  { %v8306_v48 = vmul.f32 %v8183_v10, %v8245_v53  ;;  %v4016_v43 = vadd.f32 %v4015_v44, %v3900_v35  ;;  %v1692_v50 = vsel %vm1642_vm3, %v8212_v21, %v8225_v9  ;;  %v1364_v7 = vadd.f32 %v1363_v62, %v9836_v15  ;;  %v8324_v44 = vpop.permute.xlu1 %1636 }
 0x2f0   :  { %v3532_v11 = vmul.f32 %v3415_v20, %v9833_v30  ;;  %v3785_v51 = vmax.f32 %v3414_v28, 0.0  ;;  %v2017_v49 = vmul.f32 %v9520_v57, %v1851_v22  ;;  %v1853_v59 = vsub.f32 %v4329_v58, %v1705_v17  ;;  %v4330_v30 = vld [vmem:[#allocation2 + $0x2f0] sm:$0xff] }
 0x2f1   :  { %v8317_v38 = vmul.f32 %v8183_v10, %v8274_v13  ;;  %v8321_v23 = vmul.f32 %v8183_v10, %v8279_v54  ;;  %v3786_v45 = vmax.f32 %v3415_v20, 0.0  ;;  %v3901_v21 = vmul.f32 %v3784_v18, %v3784_v18  ;;  %v9837_v17 = vld [vmem:[#allocation240_spill] sm:$0xff] }
 0x2f2   :  { %v2619_v29 = vadd.f32 %v2618_v42, %v2503_v34  ;;  %v3648_v62 = vadd.f32 %v3647_v52, %v3532_v11  ;;  %v2018_v4 = vmul.f32 %v9532_v25, %v1852_v5  ;;  %v1854_v28 = vsub.f32 %v4330_v30, %v1692_v50  ;;  %v9842_v20 = vld [vmem:[#allocation164_spill] sm:$0xff] }
 0x2f3   :  { %v3533_v47 = vmul.f32 %v8300_v40, %v9834_v37  ;;  %v8330_v26 = vmul.f32 %v8306_v48, %v8245_v53  ;;  %v4017_v24 = vadd.f32 %v4016_v43, %v3901_v21  ;;  %v3902_v34 = vmul.f32 %v3785_v51, %v3785_v51  ;;  %v8337_v37 = vpop.permute.xlu0 %1430  ;;  %v9839_v43 = vld [vmem:[#allocation230_spill] sm:$0xff] }
 0x2f4   :  { %v2134_v42 = vmul.f32 %v2017_v49, %v1851_v22  ;;  %v2019_v6 = vmul.f32 %v9550_v55, %v1853_v59  ;;  %v3903_v18 = vmul.f32 %v3786_v45, %v3786_v45  ;;  %v2387_v35 = vmax.f32 %v2017_v49, 0.0  ;;  %v9840_v51 = vld [vmem:[#allocation50_spill] sm:$0xff] }
 0x2f5   :  { %v995_v52 = vadd.f32 %v994_v31, %v9837_v17  ;;  %v1365_v41 = vadd.f32 %v1364_v7, %v9838_v14  ;;  %v8339_v50 = vadd.f32 %v3648_v62, %v3533_v47  ;;  %v2388_v53 = vmax.f32 %v2018_v4, 0.0  ;;  %v9841_v49 = vld [vmem:[#allocation158_spill] sm:$0xff]  ;;  %v8352_v47 = vpop.permute.xlu1 %1456 }
 0x2f6   :  { %v2020_v15 = vmul.f32 %v9741_v33, %v1854_v28  ;;  %v422_v22 = vsel %vm385_vm1, %v9839_v43, %v8239_v39  ;;  %v4018_v11 = vadd.f32 %v4017_v24, %v3902_v34  ;;  %v4331_v31 = vld [vmem:[#allocation2 + $0x2f8] sm:$0xff]  ;;  %v2250_v7 = vadd.f32 %v2249_v60, %v2134_v42 }
 0x2f7   :  { %v996_v58 = vadd.f32 %v995_v52, %v9840_v51  ;;  %v1366_v45 = vadd.f32 %v1365_v41, %v9841_v49  ;;  %v598_v21 = vsub.f32 %v4331_v31, %v422_v22  ;;  %v2135_v30 = vmul.f32 %v2018_v4, %v1852_v5  ;;  %v9843_v4 = vld [vmem:[#allocation76_spill] sm:$0xff]  ;;  %v8370_v41 = vpop.permute.xlu0 %3313 }
 0x2f8   :  { %v2136_v17 = vmul.f32 %v2019_v6, %v1853_v59  ;;  %v409_v62 = vsel %vm385_vm1, %v8239_v39, %v8269_v1  ;;  %v2504_v14 = vmul.f32 %v2387_v35, %v2387_v35  ;;  %v1679_v24 = vsel %vm1642_vm3, %v8225_v9, %v8259_v0  ;;  %9844 = vst [vmem:[#allocation120_spill] sm:$0xff] %v8370_v41 }
 0x2f9   :  { %v764_v43 = vmul.f32 %v9842_v20, %v598_v21  ;;  %v599_v34 = vsub.f32 %v8241_v36, %v409_v62  ;;  %v2505_v60 = vmul.f32 %v2388_v53, %v2388_v53  ;;  %v2389_v5 = vmax.f32 %v2019_v6, 0.0  ;;  %v9845_v6 = vld [vmem:[#allocation168_spill] sm:$0xff] }
 0x2fa   :  { %v396_v59 = vsel %vm385_vm1, %v8269_v1, %v378_v2  ;;  %v500_v39 = vsel %vm385_vm1, %v378_v2, %v9843_v4  ;;  %v2390_v42 = vmax.f32 %v2020_v15, 0.0  ;;  %v1666_v9 = vsel %vm1642_vm3, %v8259_v0, %v8292_v8  ;;  %v8377_v0 = vpop.permute.xlu1 %1482 }
 0x2fb   :  { %v881_v35 = vmul.f32 %v764_v43, %v598_v21  ;;  %v1134_v52 = vmax.f32 %v764_v43, 0.0  ;;  %v1855_v53 = vsub.f32 %v4331_v31, %v1679_v24  ;;  %v765_v22 = vmul.f32 %v9845_v6, %v599_v34  ;;  %v9847_v6 = vld [vmem:[#allocation186_spill] sm:$0xff] }
 0x2fc   :  { %v600_v51 = vsub.f32 %v8271_v27, %v396_v59  ;;  %v601_v1 = vsub.f32 %v8276_v3, %v500_v39  ;;  %v4019_v49 = vadd.f32 %v4018_v11, %v3903_v18  ;;  %v2620_v62 = vadd.f32 %v2619_v29, %v2504_v14  ;;  %v9848_v39 = vld [vmem:[#allocation152_spill] sm:$0xff] }
 0x2fd   :  { %v2251_v2 = vadd.f32 %v2250_v7, %v2135_v30  ;;  %v1251_v4 = vmul.f32 %v1134_v52, %v1134_v52  ;;  %v882_v21 = vmul.f32 %v765_v22, %v599_v34  ;;  %v1135_v43 = vmax.f32 %v765_v22, 0.0  ;;  %v8381_v34 = vpop.permute.xlu0 %1508 }
 0x2fe   :  { %v1856_v10 = vsub.f32 %v8241_v36, %v1666_v9  ;;  %v766_v32 = vmul.f32 %v9846_v19, %v600_v51  ;;  %v2506_v33 = vmul.f32 %v2389_v5, %v2389_v5  ;;  %v2137_v31 = vmul.f32 %v2020_v15, %v1854_v28 }
 0x2ff   :  { %v997_v24 = vadd.f32 %v996_v58, %v881_v35  ;;  %v767_v20 = vmul.f32 %v9847_v6, %v601_v1  ;;  %v2621_v59 = vadd.f32 %v2620_v62, %v2505_v60  ;;  %v2507_v55 = vmul.f32 %v2390_v42, %v2390_v42  ;;  %v8393_v35 = vpop.permute.xlu1 %1534 }
 0x300   :  { %v2021_v18 = vmul.f32 %v9848_v39, %v1855_v53  ;;  %v1252_v29 = vmul.f32 %v1135_v43, %v1135_v43  ;;  %v1367_v11 = vadd.f32 %v1366_v45, %v1251_v4  ;;  %v883_v30 = vmul.f32 %v766_v32, %v600_v51 }
 0x301   :  { %v998_v7 = vadd.f32 %v997_v24, %v882_v21  ;;  %v1136_v14 = vmax.f32 %v766_v32, 0.0  ;;  %v2252_v36 = vadd.f32 %v2251_v2, %v2136_v17  ;;  %v2022_v52 = vmul.f32 %v9588_v63, %v1856_v10  ;;  %v9849_v21 = vld [vmem:[#allocation151_spill] sm:$0xff]  ;;  %v8402_v43 = vpop.permute.xlu0 %1560 }
 0x302   :  { %v884_v9 = vmul.f32 %v767_v20, %v601_v1  ;;  %v1137_v5 = vmax.f32 %v767_v20, 0.0  ;;  %v1368_v28 = vadd.f32 %v1367_v11, %v1252_v29  ;;  %v1653_v60 = vsel %vm1642_vm3, %v8292_v8, %v8324_v44 }
 0x303   :  { %v999_v15 = vadd.f32 %v998_v7, %v883_v30  ;;  %v1253_v58 = vmul.f32 %v1136_v14, %v1136_v14  ;;  %v2138_v42 = vmul.f32 %v2021_v18, %v1855_v53  ;;  %v2391_v45 = vmax.f32 %v2021_v18, 0.0  ;;  %v4332_v7 = vld [vmem:[#allocation2 + $0x318] sm:$0xff] }
 0x304   :  { %v1757_v32 = vsel %vm1642_vm3, %v8324_v44, %v8158_v56  ;;  %v1857_v17 = vsub.f32 %v8271_v27, %v1653_v60  ;;  %v1254_v22 = vmul.f32 %v1137_v5, %v1137_v5  ;;  %v1745_v1 = vsel %vm1642_vm3, %v8337_v37, %v8352_v47 }
 0x305   :  { %v1000_v20 = vadd.f32 %v999_v15, %v884_v9  ;;  %v1369_v51 = vadd.f32 %v1368_v28, %v1253_v58  ;;  %v2622_v8 = vadd.f32 %v2621_v59, %v2506_v33  ;;  %v2253_v53 = vadd.f32 %v2252_v36, %v2137_v31  ;;  %v9851_v31 = vld [vmem:[#allocation178_spill] sm:$0xff]  ;;  %v9852_v59 = vld [vmem:[#allocation156_spill] sm:$0xff]  ;;  %v8414_v15 = vpop.permute.xlu1 %327 }
 0x306   :  { %v2139_v62 = vmul.f32 %v2022_v52, %v1856_v10  ;;  %v2023_v2 = vmul.f32 %v9591_v16, %v1857_v17  ;;  %v2392_v4 = vmax.f32 %v2022_v52, 0.0  ;;  %v1858_v27 = vsub.f32 %v8276_v3, %v1757_v32  ;;  %v9853_v52 = vld [vmem:[#allocation71_spill] sm:$0xff] }
 0x307   :  { %v1001_v56 = vadd.f32 %v1000_v20, %v9849_v21  ;;  %v1370_v44 = vadd.f32 %v1369_v51, %v1254_v22  ;;  %v9850_v24 = vmax.f32 %v8300_v40, 0.0  ;;  %v2254_v29 = vadd.f32 %v2253_v53, %v2138_v42  ;;  %v9855_v42 = vld [vmem:[#allocation179_spill] sm:$0xff] }
 0x308   :  { %v2508_v11 = vmul.f32 %v2391_v45, %v2391_v45  ;;  %v1859_v33 = vsub.f32 %v4332_v7, %v1745_v1  ;;  %v2140_v14 = vmul.f32 %v2023_v2, %v1857_v17  ;;  %v2393_v36 = vmax.f32 %v2023_v2, 0.0  ;;  %v9857_v53 = vld [vmem:[#allocation83_spill] sm:$0xff] }
 0x309   :  { %v3904_v18 = vmul.f32 %v9850_v24, %v9850_v24  ;;  %v1002_v10 = vadd.f32 %v1001_v56, %v9851_v31  ;;  %v1371_v30 = vadd.f32 %v1370_v44, %v9852_v59  ;;  %v9854_v9 = vmax.f32 %v9853_v52, 0.0  ;;  %v8448_v31 = vpop.permute.xlu1 %353 }
 0x30a   :  { %v3650_v5 = vadd.f32 %v8339_v50, %v8330_v26  ;;  %v2623_v28 = vadd.f32 %v2622_v8, %v2507_v55  ;;  %v2255_v58 = vadd.f32 %v2254_v29, %v2139_v62  ;;  %v2509_v60 = vmul.f32 %v2392_v4, %v2392_v4  ;;  %v8428_v8 = vpop.permute.xlu0 %1586 }
 0x30b   :  { %v1268_v3 = vmul.f32 %v9854_v9, %v9854_v9  ;;  %v4020_v40 = vadd.f32 %v4019_v49, %v3904_v18  ;;  %v8417_v45 = vadd.f32 %v1371_v30, %v9855_v42  ;;  %v2024_v32 = vmul.f32 %v8231_v46, %v1858_v27 }
 0x30c   :  { %v3535_v17 = vmul.f32 %v8317_v38, %v8274_v13  ;;  %v3789_v20 = vmax.f32 %v8317_v38, 0.0  ;;  %v3790_v22 = vmax.f32 %v8321_v23, 0.0  ;;  %v9856_v26 = vmax.f32 %v8306_v48, 0.0  ;;  %v9858_v38 = vld [vmem:[#allocation183_spill] sm:$0xff] }
 0x30d   :  { %v2624_v50 = vadd.f32 %v2623_v28, %v2508_v11  ;;  %v2256_v49 = vadd.f32 %v2255_v58, %v2140_v14  ;;  %v2510_v51 = vmul.f32 %v2393_v36, %v2393_v36  ;;  %v2025_v1 = vmul.f32 %v9527_v61, %v1859_v33 }
 0x30e   :  { %v3905_v55 = vmul.f32 %v9856_v26, %v9856_v26  ;;  %v8432_v62 = vsel %vm1010_vm2, %v9857_v53, 0.0  ;;  %v8435_v13 = vsel %vm1010_vm2, %v1268_v3, 0.0  ;;  %v9859_v2 = vmax.f32 %v9858_v38, 0.0  ;;  %v8460_v58 = vpop.permute.xlu0 %1612  ;;  %v9864_v38 = vld [vmem:[#allocation237_spill] sm:$0xff] }
 0x30f   :  { %v3651_v4 = vadd.f32 %v3650_v5, %v3535_v17  ;;  %v2625_v56 = vadd.f32 %v2624_v50, %v2509_v60  ;;  %v2141_v44 = vmul.f32 %v2024_v32, %v1858_v27  ;;  %v2394_v24 = vmax.f32 %v2024_v32, 0.0  ;;  %v4333_v27 = vld [vmem:[#allocation2 + $0x320] sm:$0xff]  ;;  %v4334_v5 = vld [vmem:[#allocation2 + $0x328] sm:$0xff] }
 0x310   :  { %v8440_v48 = vmul.f32 %v9859_v2, %v9859_v2  ;;  %v4021_v21 = vadd.f32 %v4020_v40, %v3905_v55  ;;  %v3536_v18 = vmul.f32 %v8321_v23, %v8279_v54  ;;  %v3906_v29 = vmul.f32 %v3789_v20, %v3789_v20  ;;  %v9860_v60 = vld [vmem:[#allocation48_spill] sm:$0xff]  ;;  %v8472_v50 = vld [vmem:[#allocation2 + $0x340] sm:$0xff] }
 0x311   :  { %v3907_v11 = vmul.f32 %v3790_v22, %v3790_v22  ;;  %v1732_v7 = vsel %vm1642_vm3, %v8352_v47, %v8377_v0  ;;  %v2257_v59 = vadd.f32 %v2256_v49, %v2141_v44  ;;  %v2626_v30 = vadd.f32 %v2625_v56, %v2510_v51  ;;  %9863 = vst [vmem:[#allocation121_spill] sm:$0xff] %v8472_v50  ;;  %v9865_v56 = vld [vmem:[#allocation70_spill] sm:$0xff] }
 0x312   :  { %v2142_v14 = vmul.f32 %v2025_v1, %v1859_v33  ;;  %v2395_v36 = vmax.f32 %v2025_v1, 0.0  ;;  %v8450_v52 = vadd.f32 %v3651_v4, %v3536_v18  ;;  %v1860_v9 = vsub.f32 %v4333_v27, %v1732_v7  ;;  %v4335_v33 = vld [vmem:[#allocation2 + $0x330] sm:$0xff]  ;;  %v380_v4 = vpop.permute.xlu1 %379 }
 0x313   :  { %v1719_v54 = vsel %vm1642_vm3, %v8377_v0, %v8381_v34  ;;  %v1706_v23 = vsel %vm1642_vm3, %v8381_v34, %v8393_v35  ;;  %v4022_v47 = vadd.f32 %v4021_v21, %v3906_v29  ;;  %v2511_v3 = vmul.f32 %v2394_v24, %v2394_v24  ;;  %v9861_v0 = vld [vmem:[#allocation170_spill] sm:$0xff]  ;;  %v9862_v34 = vld [vmem:[#allocation205_spill] sm:$0xff] }
 0x314   :  { %v1861_v40 = vsub.f32 %v4334_v5, %v1719_v54  ;;  %v1862_v28 = vsub.f32 %v4335_v33, %v1706_v23  ;;  %v8464_v42 = vmul.f32 %v8370_v41, %v9860_v60  ;;  %v2026_v32 = vmul.f32 %v9520_v57, %v1860_v9  ;;  %v9867_v29 = vld [vmem:[#allocation82_spill] sm:$0xff]  ;;  %v9869_v27 = vld [vmem:[#allocation97_spill] sm:$0xff] }
 0x315   :  { %v423_v17 = vsel %vm385_vm1, %v9861_v0, %v8414_v15  ;;  %v1003_v20 = vadd.f32 %v1002_v10, %v9862_v34  ;;  %v2627_v22 = vadd.f32 %v2626_v30, %v2511_v3  ;;  %v2258_v26 = vadd.f32 %v2257_v59, %v2142_v14  ;;  %v9866_v10 = vld [vmem:[#allocation153_spill] sm:$0xff]  ;;  %v9868_v59 = vld [vmem:[#allocation32_spill] sm:$0xff] }
 0x316   :  { %v2512_v55 = vmul.f32 %v2395_v36, %v2395_v36  ;;  %v607_v49 = vsub.f32 %v8472_v50, %v423_v17  ;;  %v2143_v51 = vmul.f32 %v2026_v32, %v1860_v9  ;;  %v2396_v1 = vmax.f32 %v2026_v32, 0.0  ;;  %v4337_v33 = vld [vmem:[#allocation2 + $0x338] sm:$0xff] }
 0x317   :  { %v2027_v53 = vmul.f32 %v9532_v25, %v1861_v40  ;;  %v1004_v2 = vadd.f32 %v1003_v20, %v9864_v38  ;;  %v8477_v21 = vadd.f32 %v4022_v47, %v3907_v11  ;;  %v8481_v44 = vmul.f32 %v8370_v41, %v9865_v56  ;;  %v8505_v47 = vpop.permute.xlu0 %1638  ;;  %v9872_v0 = vld [vmem:[#allocation85_spill] sm:$0xff] }
 0x318   :  { %v2028_v24 = vmul.f32 %v9866_v10, %v1862_v28  ;;  %v1693_v18 = vsel %vm1642_vm3, %v8393_v35, %v8402_v43  ;;  %v8490_v7 = vmul.f32 %v8370_v41, %v9867_v29  ;;  %v8494_v30 = vmul.f32 %v8370_v41, %v9868_v59  ;;  %v9871_v35 = vld [vmem:[#allocation164_spill] sm:$0xff] }
 0x319   :  { %v2259_v11 = vadd.f32 %v2258_v26, %v2143_v51  ;;  %v2513_v14 = vmul.f32 %v2396_v1, %v2396_v1  ;;  %v2628_v36 = vadd.f32 %v2627_v22, %v2512_v55  ;;  %v8498_v9 = vmul.f32 %v8370_v41, %v9869_v27  ;;  %v9873_v26 = vld [vmem:[#allocation209_spill] sm:$0xff]  ;;  %v9880_v41 = vld [vmem:[#allocation99_spill] sm:$0xff] }
 0x31a   :  { %v8502_v54 = vmul.f32 %v8464_v42, %v9860_v60  ;;  %v773_v23 = vmul.f32 %v9871_v35, %v607_v49  ;;  %v2144_v3 = vmul.f32 %v2027_v53, %v1861_v40  ;;  %v2397_v5 = vmax.f32 %v2027_v53, 0.0  ;;  %v8522_v53 = vpop.permute.xlu1 %1432 }
 0x31b   :  { %9870 = vst [vmem:[#allocation9_spill] sm:$0xff] %v8498_v9  ;;  %v1863_v32 = vsub.f32 %v4337_v33, %v1693_v18  ;;  %v1005_v17 = vadd.f32 %v1004_v2, %v9872_v0  ;;  %v8510_v34 = vmul.f32 %v8481_v44, %v9865_v56  ;;  %v2145_v20 = vmul.f32 %v2028_v24, %v1862_v28  ;;  %v9874_v2 = vld [vmem:[#allocation238_spill] sm:$0xff]  ;;  %v9877_v0 = vld [vmem:[#allocation168_spill] sm:$0xff] }
 0x31c   :  { %v2398_v22 = vmax.f32 %v2028_v24, 0.0  ;;  %v1373_v60 = vadd.f32 %v8417_v45, %v9873_v26  ;;  %v2629_v55 = vadd.f32 %v2628_v36, %v2513_v14  ;;  %v2260_v51 = vadd.f32 %v2259_v11, %v2144_v3  ;;  %v9875_v18 = vld [vmem:[#allocation154_spill] sm:$0xff]  ;;  %v8529_v14 = vld [vmem:[#allocation2 + $0x348] sm:$0xff] }
 0x31d   :  { %v1680_v40 = vsel %vm1642_vm3, %v8402_v43, %v8428_v8  ;;  %v410_v1 = vsel %vm385_vm1, %v8414_v15, %v8448_v31  ;;  %v890_v38 = vmul.f32 %v773_v23, %v607_v49  ;;  %v1143_v28 = vmax.f32 %v773_v23, 0.0  ;;  %9876 = vst [vmem:[#allocation187_spill] sm:$0xff] %v8529_v14 }
 0x31e   :  { %v1374_v56 = vadd.f32 %v1373_v60, %v9874_v2  ;;  %v1864_v45 = vsub.f32 %v8472_v50, %v1680_v40  ;;  %v2514_v24 = vmul.f32 %v2397_v5, %v2397_v5  ;;  %v8527_v11 = vmul.f32 %v9875_v18, %v1863_v32  ;;  %v1459_v5 = vpop.permute.xlu0 %1458  ;;  %v9878_v60 = vld [vmem:[#allocation75_spill] sm:$0xff] }
 0x31f   :  { %v608_v43 = vsub.f32 %v8529_v14, %v410_v1  ;;  %v1667_v15 = vsel %vm1642_vm3, %v8428_v8, %v8460_v58  ;;  %v2515_v36 = vmul.f32 %v2398_v22, %v2398_v22  ;;  %v397_v3 = vsel %vm385_vm1, %v8448_v31, %v380_v4  ;;  %v9879_v1 = vld [vmem:[#allocation86_spill] sm:$0xff] }
 0x320   :  { %v1375_v49 = vadd.f32 %v1374_v56, %v8440_v48  ;;  %v1865_v23 = vsub.f32 %v8529_v14, %v1667_v15  ;;  %v2630_v33 = vadd.f32 %v2629_v55, %v2514_v24  ;;  %v501_v40 = vsel %vm385_vm1, %v380_v4, %v9878_v60  ;;  %v8551_v24 = vpop.permute.xlu1 %3318 }
 0x321   :  { %v774_v26 = vmul.f32 %v9877_v0, %v608_v43  ;;  %v609_v2 = vsub.f32 %v9879_v1, %v397_v3  ;;  %v2261_v8 = vadd.f32 %v2260_v51, %v2145_v20  ;;  %v1006_v22 = vadd.f32 %v1005_v17, %v890_v38  ;;  %9881 = vst [vmem:[#allocation210_spill] sm:$0xff] %v8551_v24 }
 0x322   :  { %v1260_v27 = vmul.f32 %v1143_v28, %v1143_v28  ;;  %v8547_v48 = vmul.f32 %v9848_v39, %v1864_v45  ;;  %v610_v31 = vsub.f32 %v9880_v41, %v501_v40  ;;  %v8555_v9 = vmul.f32 %v8490_v7, %v9867_v29  ;;  %v1485_v24 = vpop.permute.xlu0 %1484 }
 0x323   :  { %v891_v56 = vmul.f32 %v774_v26, %v608_v43  ;;  %v1144_v15 = vmax.f32 %v774_v26, 0.0  ;;  %v775_v55 = vmul.f32 %v9846_v19, %v609_v2  ;;  %v2146_v4 = vmul.f32 %v8527_v11, %v1863_v32 }
 0x324   :  { %v2399_v17 = vmax.f32 %v8527_v11, 0.0  ;;  %v8560_v20 = vmul.f32 %v9588_v63, %v1865_v23  ;;  %v776_v28 = vmul.f32 %v9847_v6, %v610_v31  ;;  %v2631_v3 = vadd.f32 %v2630_v33, %v2515_v36 }
 0x325   :  { %v1007_v51 = vadd.f32 %v1006_v22, %v891_v56  ;;  %v1261_v38 = vmul.f32 %v1144_v15, %v1144_v15  ;;  %v892_v43 = vmul.f32 %v775_v55, %v609_v2  ;;  %v2262_v26 = vadd.f32 %v2261_v8, %v2146_v4  ;;  %v1511_v2 = vpop.permute.xlu1 %1510 }
 0x326   :  { %v1376_v60 = vadd.f32 %v1375_v49, %v1260_v27  ;;  %v1145_v40 = vmax.f32 %v775_v55, 0.0  ;;  %v2147_v29 = vmul.f32 %v8547_v48, %v1864_v45  ;;  %v893_v14 = vmul.f32 %v776_v28, %v610_v31  ;;  %v9882_v55 = vld [vmem:[#allocation155_spill] sm:$0xff] }
 0x327   :  { %v1008_v59 = vadd.f32 %v1007_v51, %v892_v43  ;;  %v1146_v32 = vmax.f32 %v776_v28, 0.0  ;;  %v1654_v22 = vsel %vm1642_vm3, %v8460_v58, %v8505_v47  ;;  %v1758_v36 = vsel %vm1642_vm3, %v8505_v47, %v8337_v37  ;;  %v4340_v51 = vld [vmem:[#allocation2 + $0x368] sm:$0x7]  ;;  %v1537_v28 = vpop.permute.xlu0 %1536 }
 0x328   :  { %v1377_v50 = vadd.f32 %v1376_v60, %v1261_v38  ;;  %v1262_v11 = vmul.f32 %v1145_v40, %v1145_v40  ;;  %v2148_v27 = vmul.f32 %v8560_v20, %v1865_v23  ;;  %v1866_v45 = vsub.f32 %v9879_v1, %v1654_v22  ;;  %v9883_v60 = vld [vmem:[#allocation182_spill] sm:$0xff] }
 0x329   :  { %v1009_v49 = vadd.f32 %v1008_v59, %v893_v14  ;;  %v1867_v33 = vsub.f32 %v9880_v41, %v1758_v36  ;;  %v1263_v8 = vmul.f32 %v1146_v32, %v1146_v32  ;;  %v1746_v15 = vsel %vm1642_vm3, %v8522_v53, %v1459_v5  ;;  %v4339_v59 = vld [vmem:[#allocation2 + $0x360] sm:$0x7] }
 0x32a   :  { %v1378_v56 = vadd.f32 %v1377_v50, %v1262_v11  ;;  %v1733_v58 = vsel %vm1642_vm3, %v1459_v5, %v1485_v24  ;;  %v2263_v31 = vadd.f32 %v2262_v26, %v2147_v29  ;;  %v2032_v47 = vmul.f32 %v9591_v16, %v1866_v45  ;;  %v9884_v32 = vld [vmem:[#allocation159_spill] sm:$0xff] }
 0x32b   :  { %v1012_v37 = vadd.f32 %v9882_v55, %v1009_v49  ;;  %v1868_v14 = vsub.f32 %v4339_v59, %v1746_v15  ;;  %v2400_v23 = vmax.f32 %v8547_v48, 0.0  ;;  %v1869_v38 = vsub.f32 %v4340_v51, %v1733_v58  ;;  %v1563_v15 = vpop.permute.xlu1 %1562  ;;  %v9887_v59 = vld [vmem:[#allocation8_spill] sm:$0xff] }
 0x32c   :  { %v1379_v4 = vadd.f32 %v1378_v56, %v1263_v8  ;;  %v1720_v50 = vsel %vm1642_vm3, %v1485_v24, %v1511_v2  ;;  %v2264_v43 = vadd.f32 %v2263_v31, %v2148_v27  ;;  %v8587_v5 = vmul.f32 %v8231_v46, %v1867_v33  ;;  %v9885_v24 = vld [vmem:[#allocation208_spill] sm:$0xff] }
 0x32d   :  { %v1014_v40 = vadd.f32 %v9883_v60, %v1012_v37  ;;  %v2149_v26 = vmul.f32 %v2032_v47, %v1866_v45  ;;  %v2516_v29 = vmul.f32 %v2399_v17, %v2399_v17  ;;  %v8591_v22 = vmul.f32 %v9527_v61, %v1868_v14  ;;  %v8598_v8 = vld [vmem:[#allocation2 + $0x370] sm:$0x7] }
 0x32e   :  { %v1381_v11 = vadd.f32 %v9884_v32, %v1379_v4  ;;  %v8594_v48 = vmul.f32 %v9520_v57, %v1869_v38  ;;  %v2401_v36 = vmax.f32 %v8560_v20, 0.0  ;;  %v1870_v56 = vsub.f32 %v8598_v8, %v1720_v50  ;;  %v9886_v61 = vld [vmem:[#allocation185_spill] sm:$0xff]  ;;  %v8633_v32 = vld [vmem:[#allocation2 + $0x380] sm:$0x7] }
 0x32f   :  { %v1016_v49 = vadd.f32 %v9885_v24, %v1014_v40  ;;  %v2265_v27 = vadd.f32 %v2264_v43, %v2149_v26  ;;  %v3653_v17 = vadd.f32 %v8450_v52, %v8502_v54  ;;  %v3791_v45 = vmax.f32 %v8464_v42, 0.0  ;;  %v330_v42 = vpop.permute.xlu0 %329 }
 0x330   :  { %v1383_v58 = vadd.f32 %v9886_v61, %v1381_v11  ;;  %v2151_v57 = vmul.f32 %v8591_v22, %v1868_v14  ;;  %v2632_v31 = vadd.f32 %v2631_v3, %v2516_v29  ;;  %v2517_v55 = vmul.f32 %v2400_v23, %v2400_v23 }
 0x331   :  { %v2150_v20 = vmul.f32 %v8587_v5, %v1867_v33  ;;  %v1707_v37 = vsel %vm1642_vm3, %v1511_v2, %v1537_v28  ;;  %v2402_v51 = vmax.f32 %v2032_v47, 0.0  ;;  %v2152_v50 = vmul.f32 %v8594_v48, %v1869_v38  ;;  %v8623_v47 = vld [vmem:[#allocation2 + $0x378] sm:$0x7] }
 0x332   :  { %v8610_v4 = vadd.f32 %v9887_v59, %v1383_v58  ;;  %v8614_v52 = vmul.f32 %v9532_v25, %v1870_v56  ;;  %v3792_v54 = vmax.f32 %v8481_v44, 0.0  ;;  %v3793_v3 = vmax.f32 %v8490_v7, 0.0  ;;  %v1589_v7 = vpop.permute.xlu1 %1588 }
 0x333   :  { %v2518_v14 = vmul.f32 %v2401_v36, %v2401_v36  ;;  %v2266_v23 = vadd.f32 %v2265_v27, %v2150_v20  ;;  %v8619_v33 = vadd.f32 %v3653_v17, %v8510_v34  ;;  %v2267_v2 = vsel %vm1010_vm2, %v2151_v57, 0.0  ;;  %v9888_v27 = vld [vmem:[#allocation243_spill] sm:$0xff]  ;;  %v356_v57 = vpop.permute.xlu0 %355 }
 0x334   :  { %v2153_v43 = vmul.f32 %v8614_v52, %v1870_v56  ;;  %v1871_v38 = vsub.f32 %v8623_v47, %v1707_v37  ;;  %v3794_v25 = vmax.f32 %v8494_v30, 0.0  ;;  %v3908_v60 = vmul.f32 %v3791_v45, %v3791_v45  ;;  %v9889_v17 = vld [vmem:[#allocation239_spill] sm:$0xff] }
 0x335   :  { %v2633_v40 = vadd.f32 %v2632_v31, %v2517_v55  ;;  %v1694_v44 = vsel %vm1642_vm3, %v1537_v28, %v1563_v15  ;;  %v2519_v26 = vmul.f32 %v2402_v51, %v2402_v51  ;;  %v2269_v34 = vsel %vm1010_vm2, %v2152_v50, 0.0  ;;  %v8647_v20 = vld [vmem:[#allocation2 + $0x388] sm:$0x7] }
 0x336   :  { %v8631_v29 = vmul.f32 %v9866_v10, %v1871_v38  ;;  %v1872_v11 = vsub.f32 %v8633_v32, %v1694_v44  ;;  %v2268_v24 = vadd.f32 %v2267_v2, %v2266_v23  ;;  %v1018_v56 = vadd.f32 %v9888_v27, %v1016_v49  ;;  %v1615_v23 = vpop.permute.xlu1 %1614 }
 0x337   :  { %v2634_v36 = vadd.f32 %v2633_v40, %v2518_v14  ;;  %v424_v45 = vsel %vm385_vm1, %v9889_v17, %v330_v42  ;;  %v2403_v28 = vmax.f32 %v8587_v5, 0.0  ;;  %v2404_v61 = vmax.f32 %v8591_v22, 0.0 }
 0x338   :  { %v2271_v58 = vsel %vm1010_vm2, %v2153_v43, 0.0  ;;  %v8644_v10 = vmul.f32 %v9875_v18, %v1872_v11  ;;  %v2270_v31 = vadd.f32 %v2269_v34, %v2268_v24  ;;  %v1020_v55 = vadd.f32 %v8432_v62, %v1018_v56  ;;  %v382_v34 = vpop.permute.xlu0 %381 }
 0x339   :  { %v616_v49 = vsub.f32 %v8647_v20, %v424_v45  ;;  %v1681_v37 = vsel %vm1642_vm3, %v1563_v15, %v1589_v7  ;;  %v3909_v59 = vmul.f32 %v3792_v54, %v3792_v54  ;;  %v4024_v5 = vadd.f32 %v8477_v21, %v3908_v60  ;;  %v8661_v54 = vld [vmem:[#allocation2 + $0x390] sm:$0x7] }
 0x33a   :  { %v2635_v22 = vadd.f32 %v2634_v36, %v2519_v26  ;;  %v2154_v51 = vmul.f32 %v8631_v29, %v1871_v38  ;;  %v2272_v50 = vadd.f32 %v2271_v58, %v2270_v31  ;;  %v1873_v14 = vsub.f32 %v8647_v20, %v1681_v37 }
 0x33b   :  { %v782_v18 = vmul.f32 %v9871_v35, %v616_v49  ;;  %v411_v62 = vsel %vm385_vm1, %v330_v42, %v356_v57  ;;  %v8658_v2 = vmul.f32 %v3793_v3, %v3793_v3  ;;  %v2521_v43 = vmul.f32 %v2404_v61, %v2404_v61 }
 0x33c   :  { %v2155_v15 = vmul.f32 %v8644_v10, %v1872_v11  ;;  %v617_v21 = vsub.f32 %v8661_v54, %v411_v62  ;;  %v2520_v60 = vmul.f32 %v2403_v28, %v2403_v28  ;;  %v2405_v38 = vmax.f32 %v8594_v48, 0.0 }
 0x33d   :  { %v899_v40 = vmul.f32 %v782_v18, %v616_v49  ;;  %v1152_v35 = vmax.f32 %v782_v18, 0.0  ;;  %v2273_v44 = vsel %vm1010_vm2, %v2154_v51, 0.0  ;;  %v8667_v26 = vmul.f32 %v9848_v39, %v1873_v14  ;;  %v9890_v49 = vld [vmem:[#allocation81_spill] sm:$0xff] }
 0x33e   :  { %v783_v42 = vmul.f32 %v9877_v0, %v617_v21  ;;  %v1668_v3 = vsel %vm1642_vm3, %v1589_v7, %v1615_v23  ;;  %v8672_v11 = vadd.f32 %v4024_v5, %v3909_v59  ;;  %v2636_v36 = vadd.f32 %v2635_v22, %v2520_v60  ;;  %v1641_v59 = vpop.permute.xlu1 %1640 }
 0x33f   :  { %v2274_v24 = vadd.f32 %v2273_v44, %v2272_v50  ;;  %v1874_v27 = vsub.f32 %v8661_v54, %v1668_v3  ;;  %v2637_v48 = vsel %vm1010_vm2, %v2521_v43, 0.0  ;;  %v2275_v56 = vsel %vm1010_vm2, %v2155_v15, 0.0 }
 0x340   :  { %v1021_v17 = vsel %vm1010_vm2, %v899_v40, 0.0  ;;  %v2156_v39 = vmul.f32 %v8667_v26, %v1873_v14  ;;  %v1269_v45 = vmul.f32 %v1152_v35, %v1152_v35  ;;  %v1153_v0 = vmax.f32 %v783_v42, 0.0  ;;  %v8692_v14 = vld [vmem:[#allocation2 + $0x398] sm:$0x7] }
 0x341   :  { %v8680_v28 = vmul.f32 %v9588_v63, %v1874_v27  ;;  %v398_v7 = vsel %vm385_vm1, %v356_v57, %v382_v34  ;;  %v2522_v61 = vmul.f32 %v2405_v38, %v2405_v38  ;;  %v2406_v58 = vmax.f32 %v8614_v52, 0.0  ;;  %v8695_v52 = vld [vmem:[#allocation2 + $0x3a0] sm:$0x7] }
 0x342   :  { %v900_v31 = vmul.f32 %v783_v42, %v617_v21  ;;  %v502_v37 = vsel %vm385_vm1, %v382_v34, %v9890_v49  ;;  %v8688_v5 = vadd.f32 %v2637_v48, %v2636_v36  ;;  %v2276_v22 = vadd.f32 %v2275_v56, %v2274_v24 }
 0x343   :  { %v2277_v51 = vsel %vm1010_vm2, %v2156_v39, 0.0  ;;  %v2157_v63 = vmul.f32 %v8680_v28, %v1874_v27  ;;  %v1022_v50 = vadd.f32 %v1021_v17, %v1020_v55  ;;  %v1270_v18 = vmul.f32 %v1153_v0, %v1153_v0  ;;  %v9891_v55 = vld [vmem:[#allocation246_spill] sm:$0xff] }
 0x344   :  { %v618_v57 = vsub.f32 %v8692_v14, %v398_v7  ;;  %v619_v62 = vsub.f32 %v8695_v52, %v502_v37  ;;  %v1390_v43 = vsel %vm1010_vm2, %v1269_v45, 0.0  ;;  %v1655_v15 = vsel %vm1642_vm3, %v1615_v23, %v1641_v59 }
 0x345   :  { %v1759_v21 = vsel %vm1642_vm3, %v1641_v59, %v8522_v53  ;;  %v1387_v60 = vadd.f32 %v9891_v55, %v8610_v4  ;;  %v2278_v38 = vadd.f32 %v2277_v51, %v2276_v22  ;;  %v1023_v40 = vsel %vm1010_vm2, %v900_v31, 0.0  ;;  %v9892_v51 = vld [vmem:[#allocation84_spill] sm:$0xff] }
 0x346   :  { %v784_v35 = vmul.f32 %v9846_v19, %v618_v57  ;;  %v785_v44 = vmul.f32 %v9847_v6, %v619_v62  ;;  %v2279_v42 = vsel %vm1010_vm2, %v2157_v63, 0.0  ;;  %v1875_v3 = vsub.f32 %v8692_v14, %v1655_v15 }
 0x347   :  { %v1876_v23 = vsub.f32 %v8695_v52, %v1759_v21  ;;  %v1389_v34 = vadd.f32 %v8435_v13, %v1387_v60  ;;  %v1392_v4 = vsel %vm1010_vm2, %v1270_v18, 0.0  ;;  %v3001_v6 = vrot.slane %v8647_v20, 1 }
 0x348   :  { %v901_v12 = vmul.f32 %v784_v35, %v618_v57  ;;  %v1154_v53 = vmax.f32 %v784_v35, 0.0  ;;  %v1155_v36 = vmax.f32 %v785_v44, 0.0  ;;  %v902_v24 = vmul.f32 %v785_v44, %v619_v62 }
 0x349   :  { %v8715_v27 = vmul.f32 %v9591_v16, %v1875_v3  ;;  %v8718_v19 = vmul.f32 %v8231_v46, %v1876_v23  ;;  %v1024_v48 = vadd.f32 %v1023_v40, %v1022_v50  ;;  %v1391_v39 = vadd.f32 %v1390_v43, %v1389_v34 }
 0x34a   :  { %v1025_v56 = vsel %vm1010_vm2, %v901_v12, 0.0  ;;  %v1271_v17 = vmul.f32 %v1154_v53, %v1154_v53  ;;  %v2639_v13 = vsel %vm1010_vm2, %v2522_v61, 0.0  ;;  %v1272_v7 = vmul.f32 %v1155_v36, %v1155_v36 }
 0x34b   :  { %v2158_v45 = vmul.f32 %v8715_v27, %v1875_v3  ;;  %v2159_v0 = vmul.f32 %v8718_v19, %v1876_v23  ;;  %v2280_v31 = vadd.f32 %v2279_v42, %v2278_v38  ;;  %v1026_v16 = vadd.f32 %v1025_v56, %v1024_v48  ;;  %v9894_v38 = vld [vmem:[#allocation21_spill] sm:$0xff]  ;;  %v9900_v48 = vld [vmem:[#allocation32_spill] sm:$0xff] }
 0x34c   :  { %v1393_v49 = vadd.f32 %v1392_v4, %v1391_v39  ;;  %v1394_v46 = vsel %vm1010_vm2, %v1271_v17, 0.0  ;;  %v2523_v37 = vmul.f32 %v2406_v58, %v2406_v58  ;;  %v1027_v22 = vsel %vm1010_vm2, %v902_v24, 0.0  ;;  %v9896_v23 = vld [vmem:[#allocation121_spill] sm:$0xff] }
 0x34d   :  { %v2281_v59 = vsel %vm1010_vm2, %v2158_v45, 0.0  ;;  %v9893_v63 = vrot.slane %v9892_v51, 1  ;;  %v1028_v50 = vadd.f32 %v1027_v22, %v1026_v16  ;;  %v3003_v62 = vrot.slane %v8661_v54, 1  ;;  %v9902_v17 = vld [vmem:[#allocation9_spill] sm:$0xff]  ;;  %v9904_v16 = vld [vmem:[#allocation120_spill] sm:$0xff] }
 0x34e   :  { %v1395_v18 = vadd.f32 %v1394_v46, %v1393_v49  ;;  %v2282_v57 = vadd.f32 %v2281_v59, %v2280_v31  ;;  %v2407_v43 = vmax.f32 %v8631_v29, 0.0  ;;  %v1396_v15 = vsel %vm1010_vm2, %v1272_v7, 0.0  ;;  %v4348_v7 = vld [vmem:[#allocation2 + $0x350] sm:$0xff] }
 0x34f   :  { %v3002_v61 = vsel %vm2783_vm0, %v9893_v63, %v3001_v6  ;;  %v2283_v58 = vsel %vm1010_vm2, %v2159_v0, 0.0  ;;  %v3005_v21 = vrot.slane %v8692_v14, 1  ;;  %1029 = vadd.xlane.f32.xlu0 %v1028_v50  ;;  %v9895_v40 = vrot.slane %v9894_v38, 1  ;;  %v9905_v46 = vld [vmem:[#allocation97_spill] sm:$0xff] }
 0x350   :  { %v1397_v55 = vadd.f32 %v1396_v15, %v1395_v18  ;;  %v2284_v60 = vadd.f32 %v2283_v58, %v2282_v57  ;;  %v3007_v44 = vrot.slane %v8695_v52, 1  ;;  %v3655_v29 = vadd.f32 %v8619_v33, %v8555_v9  ;;  %v9898_v33 = vld [vmem:[#allocation16_spill] sm:$0xff]  ;;  %v9906_v50 = vld [vmem:[#allocation25_spill] sm:$0xff]  ;;  %v9909_v58 = vld [vmem:[#allocation210_spill] sm:$0xff] }
 0x351   :  { %v3004_v35 = vsel %vm2783_vm0, %v9895_v40, %v3003_v62  ;;  %v2641_v42 = vsel %vm1010_vm2, %v2523_v37, 0.0  ;;  %v2408_v3 = vmax.f32 %v8644_v10, 0.0  ;;  %v3230_v34 = vsub.f32 %v9896_v23, %v3002_v61  ;;  %v9908_v15 = vld [vmem:[#allocation49_spill] sm:$0xff] }
 0x352   :  { %v4026_v12 = vadd.f32 %v8672_v11, %v8658_v2  ;;  %v2640_v53 = vadd.f32 %v2639_v13, %v8688_v5  ;;  %v2409_v36 = vmax.f32 %v8667_v26, 0.0  ;;  %1398 = vadd.xlane.f32.xlu1 %v1397_v55  ;;  %v9897_v4 = vrot.slane %v9879_v1, 1  ;;  %v9901_v11 = vld [vmem:[#allocation187_spill] sm:$0xff] }
 0x353   :  { %v9899_v24 = vrot.slane %v9898_v33, 1  ;;  %v3540_v56 = vmul.f32 %v8494_v30, %v9900_v48  ;;  %v2524_v2 = vmul.f32 %v2407_v43, %v2407_v43  ;;  %v3231_v5 = vsub.f32 %v9901_v11, %v3004_v35  ;;  %2285 = vadd.xlane.f32.xlu0 %v2284_v60 }
 0x354   :  { %v3006_v9 = vsel %vm2783_vm0, %v9897_v4, %v3005_v21  ;;  %v3795_v26 = vmax.f32 %v9902_v17, 0.0  ;;  %v3911_v39 = vmul.f32 %v3794_v25, %v3794_v25  ;;  %v2642_v1 = vadd.f32 %v2641_v42, %v2640_v53  ;;  %v9910_v4 = vld [vmem:[#allocation57_spill] sm:$0xff] }
 0x355   :  { %v8761_v10 = vsub.f32 %v8598_v8, %v9899_v24  ;;  %v9903_v13 = vrot.slane %v9880_v41, 1  ;;  %v3656_v45 = vadd.f32 %v3655_v29, %v3540_v56  ;;  %v2525_v0 = vmul.f32 %v2408_v3, %v2408_v3  ;;  %v4349_v41 = vld [vmem:[#allocation2 + $0x358] sm:$0xff] }
 0x356   :  { %v3232_v31 = vsub.f32 %v4348_v7, %v3006_v9  ;;  %v3425_v49 = vmul.f32 %v9904_v16, %v3230_v34  ;;  %v3541_v37 = vmul.f32 %v9902_v17, %v9905_v46  ;;  %v4027_v30 = vadd.f32 %v4026_v12, %v3911_v39  ;;  %v9912_v24 = vld [vmem:[#allocation65_spill] sm:$0xff] }
 0x357   :  { %v3008_v8 = vsel %vm2783_vm0, %v9903_v13, %v3007_v44  ;;  %v2526_v59 = vmul.f32 %v2409_v36, %v2409_v36  ;;  %v2410_v25 = vmax.f32 %v8680_v28, 0.0  ;;  %v2643_v22 = vsel %vm1010_vm2, %v2524_v2, 0.0 }
 0x358   :  { %v2411_v51 = vmax.f32 %v8715_v27, 0.0  ;;  %v3233_v63 = vsub.f32 %v4349_v41, %v3008_v8  ;;  %v3426_v61 = vmul.f32 %v9904_v16, %v3231_v5  ;;  %v9907_v18 = vrot.slane %v9906_v50, 1 }
 0x359   :  { %v3912_v43 = vmul.f32 %v3795_v26, %v3795_v26  ;;  %v8787_v55 = vmul.f32 %v9909_v58, %v9908_v15  ;;  %v2644_v60 = vadd.f32 %v2643_v22, %v2642_v1  ;;  %v2645_v28 = vsel %vm1010_vm2, %v2525_v0, 0.0 }
 0x35a   :  { %v3237_v57 = vsub.f32 %v8623_v47, %v9907_v18  ;;  %v8791_v38 = vmul.f32 %v9904_v16, %v3232_v31  ;;  %v3542_v27 = vmul.f32 %v3425_v49, %v3230_v34  ;;  %v3657_v40 = vadd.f32 %v3656_v45, %v3541_v37 }
 0x35b   :  { %v4028_v35 = vadd.f32 %v4027_v30, %v3912_v43  ;;  %v2647_v29 = vsel %vm1010_vm2, %v2526_v59, 0.0  ;;  %v2527_v42 = vmul.f32 %v2410_v25, %v2410_v25  ;;  %v2412_v3 = vmax.f32 %v8718_v19, 0.0 }
 0x35c   :  { %v2528_v47 = vmul.f32 %v2411_v51, %v2411_v51  ;;  %v3428_v23 = vmul.f32 %v9904_v16, %v3233_v63  ;;  %v3543_v12 = vmul.f32 %v3426_v61, %v3231_v5  ;;  %v3658_v53 = vadd.f32 %v3657_v40, %v3542_v27 }
 0x35d   :  { %v2646_v36 = vadd.f32 %v2645_v28, %v2644_v60  ;;  %v9911_v9 = vrot.slane %v9910_v4, 1  ;;  %v3430_v34 = vmul.f32 %v9909_v58, %v9912_v24  ;;  %v3546_v48 = vmul.f32 %v8787_v55, %v9908_v15 }
 0x35e   :  { %v3239_v19 = vsub.f32 %v8647_v20, %v3001_v6  ;;  %v3544_v56 = vmul.f32 %v8791_v38, %v3232_v31  ;;  %v3659_v2 = vadd.f32 %v3658_v53, %v3543_v12  ;;  %v3431_v11 = vmul.f32 %v9909_v58, %v8761_v10 }
 0x35f   :  { %v3238_v33 = vsub.f32 %v8633_v32, %v9911_v9  ;;  %v8810_v5 = vmul.f32 %v9909_v58, %v3237_v57  ;;  %v2648_v32 = vadd.f32 %v2647_v29, %v2646_v36  ;;  %v2649_v17 = vsel %vm1010_vm2, %v2527_v42, 0.0 }
 0x360   :  { %v3545_v26 = vmul.f32 %v3428_v23, %v3233_v63  ;;  %v3660_v39 = vadd.f32 %v3659_v2, %v3544_v56  ;;  %v2529_v1 = vmul.f32 %v2412_v3, %v2412_v3  ;;  %v2651_v13 = vsel %vm1010_vm2, %v2528_v47, 0.0 }
 0x361   :  { %v3547_v20 = vmul.f32 %v3430_v34, %v9912_v24  ;;  %v3663_v6 = vsel %vm3662_vm4, %v3546_v48, 0.0  ;;  %v3796_v8 = vmax.f32 %v3425_v49, 0.0  ;;  %v2650_v45 = vadd.f32 %v2649_v17, %v2648_v32 }
 0x362   :  { %v3240_v0 = vsub.f32 %v8661_v54, %v3003_v62  ;;  %v3241_v7 = vsub.f32 %v8692_v14, %v3005_v21  ;;  %v3433_v31 = vmul.f32 %v9909_v58, %v3238_v33  ;;  %v3661_v16 = vadd.f32 %v3660_v39, %v3545_v26 }
 0x363   :  { %v8824_v46 = vmul.f32 %v9909_v58, %v3239_v19  ;;  %v3548_v37 = vmul.f32 %v3431_v11, %v8761_v10  ;;  %v3797_v30 = vmax.f32 %v3426_v61, 0.0  ;;  %v2652_v59 = vadd.f32 %v2651_v13, %v2650_v45 }
 0x364   :  { %v3549_v49 = vmul.f32 %v8810_v5, %v3237_v57  ;;  %v3664_v25 = vadd.f32 %v3663_v6, %v3661_v16  ;;  %v2653_v22 = vsel %vm1010_vm2, %v2529_v1, 0.0  ;;  %v3800_v54 = vmax.f32 %v8787_v55, 0.0 }
 0x365   :  { %v3665_v62 = vsel %vm3662_vm4, %v3547_v20, 0.0  ;;  %v3798_v14 = vmax.f32 %v8791_v38, 0.0  ;;  %v3913_v21 = vmul.f32 %v3796_v8, %v3796_v8  ;;  %v2654_v51 = vadd.f32 %v2653_v22, %v2652_v59 }
 0x366   :  { %v3242_v41 = vsub.f32 %v8695_v52, %v3007_v44  ;;  %v3435_v10 = vmul.f32 %v9909_v58, %v3240_v0  ;;  %v3550_v63 = vmul.f32 %v3433_v31, %v3238_v33  ;;  %v3666_v61 = vadd.f32 %v3665_v62, %v3664_v25 }
 0x367   :  { %v3667_v50 = vsel %vm3662_vm4, %v3548_v37, 0.0  ;;  %v3799_v18 = vmax.f32 %v3428_v23, 0.0  ;;  %v3914_v57 = vmul.f32 %v3797_v30, %v3797_v30  ;;  %2655 = vadd.xlane.f32.xlu0 %v2654_v51  ;;  %v4029_v43 = vadd.f32 %v4028_v35, %v3913_v21 }
 0x368   :  { %v3436_v15 = vmul.f32 %v9909_v58, %v3241_v7  ;;  %v3668_v55 = vadd.f32 %v3667_v50, %v3666_v61  ;;  %v3801_v60 = vmax.f32 %v3430_v34, 0.0  ;;  %v3917_v28 = vmul.f32 %v3800_v54, %v3800_v54 }
 0x369   :  { %v3551_v38 = vmul.f32 %v8824_v46, %v3239_v19  ;;  %v3669_v27 = vsel %vm3662_vm4, %v3549_v49, 0.0  ;;  %v3915_v52 = vmul.f32 %v3798_v14, %v3798_v14  ;;  %v4030_v44 = vadd.f32 %v4029_v43, %v3914_v57 }
 0x36a   :  { %v3437_v40 = vmul.f32 %v9909_v58, %v3242_v41  ;;  %v3670_v29 = vadd.f32 %v3669_v27, %v3668_v55  ;;  %v3802_v42 = vmax.f32 %v3431_v11, 0.0  ;;  %v3552_v3 = vmul.f32 %v3435_v10, %v3240_v0 }
 0x36b   :  { %v3671_v47 = vsel %vm3662_vm4, %v3550_v63, 0.0  ;;  %v3916_v23 = vmul.f32 %v3799_v18, %v3799_v18  ;;  %v4031_v35 = vadd.f32 %v4030_v44, %v3915_v52  ;;  %v3803_v53 = vmax.f32 %v8810_v5, 0.0 }
 0x36c   :  { %v3672_v12 = vadd.f32 %v3671_v47, %v3670_v29  ;;  %v3918_v36 = vmul.f32 %v3801_v60, %v3801_v60  ;;  %v4033_v4 = vsel %vm3662_vm4, %v3917_v28, 0.0  ;;  %v3553_v9 = vmul.f32 %v3436_v15, %v3241_v7 }
 0x36d   :  { %v3673_v33 = vsel %vm3662_vm4, %v3551_v38, 0.0  ;;  %v4032_v24 = vadd.f32 %v4031_v35, %v3916_v23  ;;  %v3804_v48 = vmax.f32 %v3433_v31, 0.0  ;;  %v3919_v58 = vmul.f32 %v3802_v42, %v3802_v42 }
 0x36e   :  { %v3674_v34 = vadd.f32 %v3673_v33, %v3672_v12  ;;  %v3554_v19 = vmul.f32 %v3437_v40, %v3242_v41  ;;  %v3675_v56 = vsel %vm3662_vm4, %v3552_v3, 0.0  ;;  %v3805_v32 = vmax.f32 %v8824_v46, 0.0 }
 0x36f   :  { %v4034_v2 = vadd.f32 %v4033_v4, %v4032_v24  ;;  %v3920_v17 = vmul.f32 %v3803_v53, %v3803_v53  ;;  %v4035_v5 = vsel %vm3662_vm4, %v3918_v36, 0.0  ;;  %v3677_v26 = vsel %vm3662_vm4, %v3553_v9, 0.0 }
 0x370   :  { %v3676_v11 = vadd.f32 %v3675_v56, %v3674_v34  ;;  %v3806_v13 = vmax.f32 %v3435_v10, 0.0  ;;  %v3921_v20 = vmul.f32 %v3804_v48, %v3804_v48  ;;  %v4037_v6 = vsel %vm3662_vm4, %v3919_v58, 0.0 }
 0x371   :  { %v4036_v39 = vadd.f32 %v4035_v5, %v4034_v2  ;;  %v3679_v8 = vsel %vm3662_vm4, %v3554_v19, 0.0  ;;  %v3807_v7 = vmax.f32 %v3436_v15, 0.0  ;;  %v3922_v31 = vmul.f32 %v3805_v32, %v3805_v32 }
 0x372   :  { %v3678_v1 = vadd.f32 %v3677_v26, %v3676_v11  ;;  %v4039_v16 = vsel %vm3662_vm4, %v3920_v17, 0.0  ;;  %v3808_v37 = vmax.f32 %v3437_v40, 0.0  ;;  %v3923_v30 = vmul.f32 %v3806_v13, %v3806_v13 }
 0x373   :  { %v4038_v45 = vadd.f32 %v4037_v6, %v4036_v39  ;;  %v4041_v59 = vsel %vm3662_vm4, %v3921_v20, 0.0  ;;  %v3924_v25 = vmul.f32 %v3807_v7, %v3807_v7  ;;  %v4043_v22 = vsel %vm3662_vm4, %v3922_v31, 0.0 }
 0x374   :  { %v3680_v0 = vadd.f32 %v3679_v8, %v3678_v1  ;;  %v3925_v62 = vmul.f32 %v3808_v37, %v3808_v37  ;;  %v4045_v14 = vsel %vm3662_vm4, %v3923_v30, 0.0  ;;  %v4400_v61 = vmov 0.0  }
 0x375   :  { %v4040_v46 = vadd.f32 %v4039_v16, %v4038_v45  ;;  %v4047_v51 = vsel %vm3662_vm4, %v3924_v25, 0.0  ;;  %4067 = vst.msk [vmem:[#allocation5] sm:$0x1] %vm4066_vm5, %v4400_v61 }
 0x376   :  { %3681 = vadd.xlane.f32.xlu1 %v3680_v0  ;;  %v4049_v10 = vsel %vm3662_vm4, %v3925_v62, 0.0 }
 0x377   :  { %v4042_v49 = vadd.f32 %v4041_v59, %v4040_v46 }
 0x379   :  { %v4044_v54 = vadd.f32 %v4043_v22, %v4042_v49 }
 0x37b   :  { %v4046_v21 = vadd.f32 %v4045_v14, %v4044_v54 }
 0x37c   :  { %v4068_v54 = vld [vmem:[#allocation5] sm:$0x1] }
 0x37d   :  { %v4048_v41 = vadd.f32 %v4047_v51, %v4046_v21 }
 0x37f   :  { %v4050_v63 = vadd.f32 %v4049_v10, %v4048_v41 }
 0x381   :  { %4051 = vadd.xlane.f32.xlu0 %v4050_v63 }
 0x3d8   :  { %v1030_v50 = vpop.xlane.xlu0 %1029 }
 0x3d9   :  { %v1031_v18 = vrot.slane %v1030_v50, 4 }
 0x3db   :  { %v1399_v57 = vpop.xlane.xlu1 %1398  ;;  %v1032_v43 = vadd.f32 %v1031_v18, %v1030_v50 }
 0x3dc   :  { %v1400_v15 = vrot.slane %v1399_v57, 4  ;;  %v2286_v55 = vpop.xlane.xlu0 %2285 }
 0x3dd   :  { %v1033_v60 = vrot.slane %v1032_v43, 2  ;;  %v2287_v38 = vrot.slane %v2286_v55, 4 }
 0x3de   :  { %v1401_v28 = vadd.f32 %v1400_v15, %v1399_v57 }
 0x3df   :  { %v2288_v52 = vadd.f32 %v2287_v38, %v2286_v55  ;;  %v1034_v44 = vadd.f32 %v1033_v60, %v1032_v43 }
 0x3e0   :  { %v1402_v27 = vrot.slane %v1401_v28, 2 }
 0x3e1   :  { %v2289_v40 = vrot.slane %v2288_v52, 2  ;;  %v1035_v29 = vrot.slane %v1034_v44, 1 }
 0x3e2   :  { %v1403_v42 = vadd.f32 %v1402_v27, %v1401_v28 }
 0x3e3   :  { %v1036_v3 = vadd.f32 %v1035_v29, %v1034_v44  ;;  %v2290_v23 = vadd.f32 %v2289_v40, %v2288_v52 }
 0x3e4   :  { %v1404_v47 = vrot.slane %v1403_v42, 1 }
 0x3e5   :  { %4093 = vpush %v1036_v3  ;;  %v2291_v12 = vrot.slane %v2290_v23, 1 }
 0x3e6   :  { %v1405_v35 = vadd.f32 %v1404_v47, %v1403_v42 }
 0x3e7   :  { %v2292_v53 = vadd.f32 %v2291_v12, %v2290_v23 }
 0x3e8   :  { %4095 = vpush %v1405_v35 }
 0x3e9   :  { %4097 = vpush %v2292_v53 }
 0x3f0   :  { %v2656_v36 = vpop.xlane.xlu0 %2655 }
 0x3f1   :  { %v2657_v4 = vrot.slane %v2656_v36, 4 }
 0x3f3   :  { %v2658_v9 = vadd.f32 %v2657_v4, %v2656_v36 }
 0x3f5   :  { %v2659_v33 = vrot.slane %v2658_v9, 2 }
 0x3f7   :  { %v2660_v24 = vadd.f32 %v2659_v33, %v2658_v9 }
 0x3f9   :  { %v2661_v34 = vrot.slane %v2660_v24, 1 }
 0x3fb   :  { %v2662_v48 = vadd.f32 %v2661_v34, %v2660_v24 }
 0x3fd   :  { %4099 = vpush %v2662_v48 }
 0x3ff   :  { %v3682_v58 = vpop.xlane.xlu1 %3681 }
 0x400   :  { %v3683_v19 = vrot.slane %v3682_v58, 4 }
 0x402   :  { %v3684_v56 = vadd.f32 %v3683_v19, %v3682_v58 }
 0x404   :  { %v3685_v2 = vrot.slane %v3684_v56, 2 }
 0x406   :  { %v3686_v11 = vadd.f32 %v3685_v2, %v3684_v56 }
 0x408   :  { %v3687_v32 = vrot.slane %v3686_v11, 1 }
 0x40a   :  { %v4052_v17 = vpop.xlane.xlu0 %4051  ;;  %v3688_v5 = vadd.f32 %v3687_v32, %v3686_v11 }
 0x40b   :  { %v4053_v26 = vrot.slane %v4052_v17, 4 }
 0x40c   :  { %4101 = vpush %v3688_v5 }
 0x40d   :  { %v4054_v39 = vadd.f32 %v4053_v26, %v4052_v17 }
 0x40f   :  { %v4055_v1 = vrot.slane %v4054_v39, 2 }
 0x411   :  { %v4056_v13 = vadd.f32 %v4055_v1, %v4054_v39 }
 0x413   :  { %v4057_v20 = vrot.slane %v4056_v13, 1 }
 0x415   :  { %v4058_v6 = vadd.f32 %v4057_v20, %v4056_v13 }
 0x416   :  { %s4094_s2 = spop %4093 }
 0x417   :  { %4103 = vpush %v4058_v6  ;;  %v1038_v45 = vstv %s4094_s2 }
 0x419   :  { %s4096_s14 = spop %4095 }
 0x41a   :  { %s4098_s15 = spop %4097  ;;  %v1407_v16 = vstv %s4096_s14 }
 0x41b   :  { %v2294_v8 = vstv %s4098_s15 }
 0x41c   :  { %v2295_v31 = vadd.f32 %v2294_v8, %v1038_v45 }
 0x42e   :  { %s4100_s16 = spop %4099 }
 0x42f   :  { %v2664_v0 = vstv %s4100_s16 }
 0x430   :  { %v2665_v46 = vadd.f32 %v2664_v0, %v1407_v16 }
 0x43d   :  { %s4102_s17 = spop %4101 }
 0x43e   :  { %v3690_v7 = vstv %s4102_s17 }
 0x43f   :  { %v3691_v37 = vadd.f32 %v3690_v7, %v2295_v31 }
 0x441   :  { %v4069_v49 = vmul.f32 0.0001, %v3691_v37 }
 0x448   :  { %s4104_s18 = spop %4103 }
 0x449   :  { %v4060_v30 = vstv %s4104_s18 }
 0x44a   :  { %v4061_v59 = vadd.f32 %v4060_v30, %v2665_v46 }
 0x44c   :  { %v4070_v25 = vmul.f32 10.0, %v4061_v59 }
 0x44e   :  { %v4071_v22 = vadd.f32 %v4070_v25, %v4069_v49 }
 0x450   :  { %v4072_v62 = vmul.f32 9.56535e-06, %v4071_v22 }
 0x452   :  { %v4073_v14 = vadd.f32 %v4072_v62, %v4068_v54 }
 0x454   :  { %4075 = vst.msk [vmem:[#allocation5] sm:$0x1] %vm4066_vm5, %v4073_v14 }
 0x455   :  { %4381 = shalt.err (!%p4378_p9)
}
 0x456   :  { %4085 = dma.vmem_to_hbm [thread:$0]  %s4083_s20, 16, %s8866_s4, [#allocation4]  }
 0x457   :  { %4392 = dma.done.wait [#allocation4], 16  }
 0x458   :  { %4393 = vsyncadd [#allocation4], 4294967280 }
 0x459   :  { %4089 = vsyncpa [#allocation3], 1 }
 0x45a   :  { %4090 = vsyncpa [#allocation4], 1 }

</bundles_post_ra>
